<compile_context>
chip_gen: v5e
topology: v5e:2x2
jax: 0.10.0
libtpu: 0.0.40
codegen_flags: <defaults>
</compile_context>

<pallas_src>
import functools
import math

import jax
import jax.numpy as jnp
from jax import lax
from jax.experimental import pallas as pl
from jax.experimental.pallas import tpu as pltpu


_VMEM_LIMIT_BYTES = 48 * 1024 * 1024   # fits v5e/v6e (128 MiB) and v7x (64 MiB)


def _cparams(dims):
    return pltpu.CompilerParams(dimension_semantics=dims,
                                vmem_limit_bytes=_VMEM_LIMIT_BYTES)


# ----------------------------------------------------------------------------
# small helpers
# ----------------------------------------------------------------------------
def _bf16(x):
    return x.astype(jnp.bfloat16)


def _round_up(x, m):
    return ((x + m - 1) // m) * m


def _tile_rows(m, target):
    """Row-tile size + padded row count.  Full-dim blocks are always legal."""
    if m <= target:
        return m, m
    return target, _round_up(m, target)


def _pad_rows(x, mp):
    m = x.shape[0]
    if mp == m:
        return x
    pad = [(0, mp - m)] + [(0, 0)] * (x.ndim - 1)
    return jnp.pad(x, pad)


def _pad_axis1(x, np_, value=0.0):
    n = x.shape[1]
    if np_ == n:
        return x
    pad = [(0, 0), (0, np_ - n)] + [(0, 0)] * (x.ndim - 2)
    return jnp.pad(x, pad, constant_values=value)


# ----------------------------------------------------------------------------
# Pallas kernels
# ----------------------------------------------------------------------------
def _sqdist_kernel(a_ref, bt_ref, o_ref):
    a = a_ref[0]                                            # (tn1, 3) f32
    bt = bt_ref[0]                                          # (3, tn2) f32
    an = jnp.sum(a * a, axis=-1, keepdims=True)             # (tn1, 1)  f32
    bn = jnp.sum(bt * bt, axis=0, keepdims=True)            # (1, tn2)  f32
    ab = jnp.dot(a.astype(jnp.bfloat16), bt.astype(jnp.bfloat16),
                 preferred_element_type=jnp.float32)        # bf16 MXU, f32 acc
    o_ref[0] = an + bn - 2.0 * ab


def _mlp2_kernel(x_ref, w1_ref, b1_ref, w2_ref, b2_ref, o_ref):
    """y = relu(x @ w1 + b1) @ w2 + b2 -- hidden never leaves VMEM."""
    h = jnp.dot(x_ref[...], w1_ref[...],
                preferred_element_type=jnp.float32) + b1_ref[...]
    h = jnp.maximum(h, 0.0)
    y = jnp.dot(h.astype(jnp.bfloat16), w2_ref[...],
                preferred_element_type=jnp.float32) + b2_ref[...]
    o_ref[...] = y.astype(o_ref.dtype)


def _mlp1_max_kernel(x_ref, w1_ref, b1_ref, w2_ref, b2_ref, f_ref, fpart_ref,
                     *, n_valid):
    """mlp1 (2 layers) + per-tile partial max (reduced to per-batch max in XLA).

    Emitting partials keeps both grid axes 'parallel' (v7x dual-TC friendly)."""
    n_i = pl.program_id(1)
    x = x_ref[0]                                            # (tn, 3) bf16
    h = jnp.dot(x, w1_ref[...],
                preferred_element_type=jnp.float32) + b1_ref[...]
    h = jnp.maximum(h, 0.0)
    f = jnp.dot(h.astype(jnp.bfloat16), w2_ref[...],
                preferred_element_type=jnp.float32) + b2_ref[...]
    f_ref[0] = f.astype(f_ref.dtype)

    tn = f.shape[0]
    row = n_i * tn + lax.broadcasted_iota(jnp.int32, (tn, 1), 0)
    fpart_ref[0, 0] = jnp.max(jnp.where(row < n_valid, f, -jnp.inf),
                              axis=0, keepdims=True)        # (1, C)


def _mlp2_cat_kernel(f_ref, it_ref, bias_ref, w1f_ref, w1i_ref, w2_ref, b2_ref,
                     o_ref):
    """mlp2 on cat([f, broadcast(fmax), interp]) without the cat: w1 is split
    by rows and the constant fmax contribution is pre-folded into bias_ref."""
    f = f_ref[0]                                            # (tn, C) bf16
    it = it_ref[0]                                          # (tn, C) bf16
    h = (jnp.dot(f, w1f_ref[...], preferred_element_type=jnp.float32)
         + jnp.dot(it, w1i_ref[...], preferred_element_type=jnp.float32)
         + bias_ref[0])                                     # (1, H) per-batch
    h = jnp.maximum(h, 0.0)
    y = jnp.dot(h.astype(jnp.bfloat16), w2_ref[...],
                preferred_element_type=jnp.float32) + b2_ref[...]
    o_ref[0] = y.astype(o_ref.dtype)


def _mlp_res_kernel(a_ref, b_ref, w1_ref, b1_ref, w2_ref, b2_ref,
                    wsc_ref, bsc_ref, o_ref, *, ca):
    """MLP_Res on cat([a, b]) without the HBM concat (row-split weights)."""
    a = a_ref[...]                                          # (tm, Ca) bf16
    b = b_ref[...]                                          # (tm, Cb) bf16
    w1 = w1_ref[...]
    wsc = wsc_ref[...]
    h = (jnp.dot(a, w1[0:ca], preferred_element_type=jnp.float32)
         + jnp.dot(b, w1[ca:], preferred_element_type=jnp.float32)
         + b1_ref[...])
    h = jnp.maximum(h, 0.0)
    y = jnp.dot(h.astype(jnp.bfloat16), w2_ref[...],
                preferred_element_type=jnp.float32) + b2_ref[...]
    sc = (jnp.dot(a, wsc[0:ca], preferred_element_type=jnp.float32)
          + jnp.dot(b, wsc[ca:], preferred_element_type=jnp.float32)
          + bsc_ref[...])
    o_ref[...] = (y + sc).astype(o_ref.dtype)


def _proj4_kernel(xq_ref, xk_ref, xv_ref, xu_ref,
                  wq_ref, bq_ref, wk_ref, bk_ref,
                  wv_ref, bv_ref, wu_ref, bu_ref,
                  q_ref, k_ref, v_ref, u_ref):
    """conv_query/key/value/upfeat fused; four separate lane-contiguous outputs."""
    q_ref[...] = (jnp.dot(xq_ref[...], wq_ref[...],
                          preferred_element_type=jnp.float32)
                  + bq_ref[...]).astype(q_ref.dtype)
    k_ref[...] = (jnp.dot(xk_ref[...], wk_ref[...],
                          preferred_element_type=jnp.float32)
                  + bk_ref[...]).astype(k_ref.dtype)
    v_ref[...] = (jnp.dot(xv_ref[...], wv_ref[...],
                          preferred_element_type=jnp.float32)
                  + bv_ref[...]).astype(v_ref.dtype)
    u_ref[...] = (jnp.dot(xu_ref[...], wu_ref[...],
                          preferred_element_type=jnp.float32)
                  + bu_ref[...]).astype(u_ref.dtype)


def _attn_kernel(posc_ref, q_ref, u_ref, npos_ref, nk_ref, nv_ref, nu_ref,
                 id_ref,
                 wp1_ref, bp1_ref, wp2_ref, bp2_ref,
                 wa1_ref, ba1_ref, wa2_ref, ba2_ref,
                 we_ref, be_ref, o_ref):
    """Fused neighbour attention: pos_mlp + attn_mlp + softmax(K) + weighted
    sum + conv_end + residual.  All K-expanded intermediates stay in VMEM; the
    K-expanded tensors are kept flat (tm*K, .) and folded to (tm, K, .) only
    for the softmax / weighted-sum reductions."""
    tm, K, d = nk_ref.shape

    pos_c = posc_ref[...]                                   # (tm, 3)    f32
    npos = npos_ref[...]                                    # (tm, K, 3) f32
    pos_rel = (pos_c[:, None, :] - npos).reshape(tm * K, 3)

    ph = jnp.dot(pos_rel.astype(jnp.bfloat16), wp1_ref[...],
                 preferred_element_type=jnp.float32) + bp1_ref[...]
    ph = jnp.maximum(ph, 0.0)
    pos_emb = jnp.dot(ph.astype(jnp.bfloat16), wp2_ref[...],
                      preferred_element_type=jnp.float32) + bp2_ref[...]

    q = q_ref[...].astype(jnp.float32)                      # (tm, d)
    u = u_ref[...].astype(jnp.float32)
    k_g = nk_ref[...].astype(jnp.float32)                   # (tm, K, d)
    u_g = nu_ref[...].astype(jnp.float32)
    v_g = nv_ref[...].astype(jnp.float32)

    qk_rel = (q[:, None, :] - k_g).reshape(tm * K, d)
    up_rel = (u[:, None, :] - u_g).reshape(tm * K, d)
    pu_rel = pos_emb + up_rel                               # reused for attn & value

    t = (qk_rel + pu_rel).astype(jnp.bfloat16)
    ah = jnp.dot(t, wa1_ref[...], preferred_element_type=jnp.float32) + ba1_ref[...]
    ah = jnp.maximum(ah, 0.0)
    logits = (jnp.dot(ah.astype(jnp.bfloat16), wa2_ref[...],
                      preferred_element_type=jnp.float32)
              + ba2_ref[...]).reshape(tm, K, d)

    # per-channel softmax over the K neighbours (exact divide)
    m = jnp.max(logits, axis=1, keepdims=True)
    e = jnp.exp(logits - m)
    attn = e / jnp.sum(e, axis=1, keepdims=True)

    vv = v_g + pu_rel.reshape(tm, K, d)
    agg = jnp.sum(attn * vv, axis=1)                        # (tm, d)

    y = jnp.dot(agg.astype(jnp.bfloat16), we_ref[...],
                preferred_element_type=jnp.float32) + be_ref[...]
    o_ref[...] = (y + id_ref[...].astype(jnp.float32)).astype(o_ref.dtype)


# ----------------------------------------------------------------------------
# pallas_call wrappers
# ----------------------------------------------------------------------------
def pairwise_sqdist(a, b, tile_n1=256, tile_n2=512):
    """Squared distances.  a: (B,N1,3), b: (B,N2,3) -> (B,N1,N2) f32."""
    B, N1, D = a.shape
    N2 = b.shape[1]
    tn1, N1p = _tile_rows(N1, tile_n1)
    tn2, N2p = _tile_rows(N2, tile_n2)
    ap = _pad_axis1(a, N1p)
    bp = _pad_axis1(b, N2p, value=1.0e6)                    # padded cols -> huge dist
    bt = jnp.swapaxes(bp, 1, 2)                             # (B, 3, N2p)
    out = pl.pallas_call(
        _sqdist_kernel,
        out_shape=jax.ShapeDtypeStruct((B, N1p, N2p), jnp.float32),
        grid=(B, N1p // tn1, N2p // tn2),
        in_specs=[
            pl.BlockSpec((1, tn1, D), lambda bb, i, j: (bb, i, 0)),
            pl.BlockSpec((1, D, tn2), lambda bb, i, j: (bb, 0, j)),
        ],
        out_specs=pl.BlockSpec((1, tn1, tn2), lambda bb, i, j: (bb, i, j)),
        compiler_params=_cparams(("parallel", "parallel", "parallel")),
    )(ap, bt)
    if N1p != N1 or N2p != N2:
        out = out[:, :N1, :N2]
    return out


def fused_mlp2(p1, p2, x, out_dtype=jnp.bfloat16, tile_m=2048):
    """y = relu(x@w1+b1)@w2+b2 on (M, K) rows, one kernel."""
    M, K = x.shape
    H = p1["w"].shape[1]
    N = p2["w"].shape[1]
    tm, Mp = _tile_rows(M, tile_m)
    xp = _pad_rows(x.astype(jnp.bfloat16), Mp)
    out = pl.pallas_call(
        _mlp2_kernel,
        out_shape=jax.ShapeDtypeStruct((Mp, N), out_dtype),
        grid=(Mp // tm,),
        in_specs=[
            pl.BlockSpec((tm, K), lambda i: (i, 0)),
            pl.BlockSpec((K, H), lambda i: (0, 0)),
            pl.BlockSpec((1, H), lambda i: (0, 0)),
            pl.BlockSpec((H, N), lambda i: (0, 0)),
            pl.BlockSpec((1, N), lambda i: (0, 0)),
        ],
        out_specs=pl.BlockSpec((tm, N), lambda i: (i, 0)),
        compiler_params=_cparams(("parallel",)),
    )(xp, _bf16(p1["w"]), p1["b"].reshape(1, H),
      _bf16(p2["w"]), p2["b"].reshape(1, N))
    return out if Mp == M else out[:M]


def mlp1_with_max(p, xyz, tile_n=2048):
    """mlp1(xyz) + per-batch max over points (per-tile partials + tiny XLA max)."""
    B, N, _ = xyz.shape
    Ch = p[0]["w"].shape[1]
    C = p[1]["w"].shape[1]
    tn, Np = _tile_rows(N, tile_n)
    nt = Np // tn
    xp = _pad_axis1(xyz.astype(jnp.bfloat16), Np)
    f, fpart = pl.pallas_call(
        functools.partial(_mlp1_max_kernel, n_valid=N),
        out_shape=(jax.ShapeDtypeStruct((B, Np, C), jnp.bfloat16),
                   jax.ShapeDtypeStruct((B, nt, 1, C), jnp.float32)),
        grid=(B, nt),
        in_specs=[
            pl.BlockSpec((1, tn, 3), lambda bb, n: (bb, n, 0)),
            pl.BlockSpec((3, Ch), lambda bb, n: (0, 0)),
            pl.BlockSpec((1, Ch), lambda bb, n: (0, 0)),
            pl.BlockSpec((Ch, C), lambda bb, n: (0, 0)),
            pl.BlockSpec((1, C), lambda bb, n: (0, 0)),
        ],
        out_specs=(pl.BlockSpec((1, tn, C), lambda bb, n: (bb, n, 0)),
                   pl.BlockSpec((1, 1, 1, C), lambda bb, n: (bb, n, 0, 0))),
        compiler_params=_cparams(("parallel", "parallel")),
    )(xp, _bf16(p[0]["w"]), p[0]["b"].reshape(1, Ch),
      _bf16(p[1]["w"]), p[1]["b"].reshape(1, C))
    fmax = jnp.max(fpart, axis=1)                           # (B, 1, C) f32
    return (f if Np == N else f[:, :N]), fmax


def mlp2_cat(p, f, fmax, interp, tile_n=2048):
    """mlp2(cat([f, expand(fmax), interp])) without materializing the concat."""
    B, N, C = f.shape
    w1 = p[0]["w"]                                          # (3C, H) f32
    H = w1.shape[1]
    Co = p[1]["w"].shape[1]
    tn, Np = _tile_rows(N, tile_n)
    fp = _pad_axis1(f.astype(jnp.bfloat16), Np)
    ip = _pad_axis1(interp.astype(jnp.bfloat16), Np)
    # constant-over-N global-max contribution hoisted into a per-batch bias
    bias_b = (jnp.einsum("boc,ch->boh", fmax, w1[C:2 * C])
              + p[0]["b"].reshape(1, 1, H)).astype(jnp.float32)   # (B,1,H)
    out = pl.pallas_call(
        _mlp2_cat_kernel,
        out_shape=jax.ShapeDtypeStruct((B, Np, Co), jnp.bfloat16),
        grid=(B, Np // tn),
        in_specs=[
            pl.BlockSpec((1, tn, C), lambda bb, n: (bb, n, 0)),
            pl.BlockSpec((1, tn, C), lambda bb, n: (bb, n, 0)),
            pl.BlockSpec((1, 1, H), lambda bb, n: (bb, 0, 0)),
            pl.BlockSpec((C, H), lambda bb, n: (0, 0)),
            pl.BlockSpec((C, H), lambda bb, n: (0, 0)),
            pl.BlockSpec((H, Co), lambda bb, n: (0, 0)),
            pl.BlockSpec((1, Co), lambda bb, n: (0, 0)),
        ],
        out_specs=pl.BlockSpec((1, tn, Co), lambda bb, n: (bb, n, 0)),
        compiler_params=_cparams(("parallel", "parallel")),
    )(fp, ip, bias_b, _bf16(w1[0:C]), _bf16(w1[2 * C:3 * C]),
      _bf16(p[1]["w"]), p[1]["b"].reshape(1, Co))
    return out if Np == N else out[:, :N]


def fused_mlp_res(p1, p2, psc, a, b, tile_m=2048):
    """MLP_Res(cat([a, b])): conv2(relu(conv1(x))) + shortcut(x)."""
    M, Ca = a.shape
    Cb = b.shape[1]
    H = p1["w"].shape[1]
    Co = p2["w"].shape[1]
    tm, Mp = _tile_rows(M, tile_m)
    ap = _pad_rows(a.astype(jnp.bfloat16), Mp)
    bp = _pad_rows(b.astype(jnp.bfloat16), Mp)
    out = pl.pallas_call(
        functools.partial(_mlp_res_kernel, ca=Ca),
        out_shape=jax.ShapeDtypeStruct((Mp, Co), jnp.bfloat16),
        grid=(Mp // tm,),
        in_specs=[
            pl.BlockSpec((tm, Ca), lambda i: (i, 0)),
            pl.BlockSpec((tm, Cb), lambda i: (i, 0)),
            pl.BlockSpec((Ca + Cb, H), lambda i: (0, 0)),
            pl.BlockSpec((1, H), lambda i: (0, 0)),
            pl.BlockSpec((H, Co), lambda i: (0, 0)),
            pl.BlockSpec((1, Co), lambda i: (0, 0)),
            pl.BlockSpec((Ca + Cb, Co), lambda i: (0, 0)),
            pl.BlockSpec((1, Co), lambda i: (0, 0)),
        ],
        out_specs=pl.BlockSpec((tm, Co), lambda i: (i, 0)),
        compiler_params=_cparams(("parallel",)),
    )(ap, bp, _bf16(p1["w"]), p1["b"].reshape(1, H),
      _bf16(p2["w"]), p2["b"].reshape(1, Co),
      _bf16(psc["w"]), psc["b"].reshape(1, Co))
    return out if Mp == M else out[:M]


def fused_proj4(pq, pk, pv, pu, xq, xk, xv, xu, tile_m=2048):
    """conv_query/key/value/upfeat projections, one call -> 4 x (M, d) bf16."""
    M, Cq = xq.shape
    Ck, Cv, Cu = xk.shape[1], xv.shape[1], xu.shape[1]
    d = pq["w"].shape[1]
    tm, Mp = _tile_rows(M, tile_m)
    xs = [_pad_rows(x.astype(jnp.bfloat16), Mp) for x in (xq, xk, xv, xu)]
    outs = pl.pallas_call(
        _proj4_kernel,
        out_shape=tuple(jax.ShapeDtypeStruct((Mp, d), jnp.bfloat16)
                        for _ in range(4)),
        grid=(Mp // tm,),
        in_specs=[
            pl.BlockSpec((tm, Cq), lambda i: (i, 0)),
            pl.BlockSpec((tm, Ck), lambda i: (i, 0)),
            pl.BlockSpec((tm, Cv), lambda i: (i, 0)),
            pl.BlockSpec((tm, Cu), lambda i: (i, 0)),
            pl.BlockSpec((Cq, d), lambda i: (0, 0)),
            pl.BlockSpec((1, d), lambda i: (0, 0)),
            pl.BlockSpec((Ck, d), lambda i: (0, 0)),
            pl.BlockSpec((1, d), lambda i: (0, 0)),
            pl.BlockSpec((Cv, d), lambda i: (0, 0)),
            pl.BlockSpec((1, d), lambda i: (0, 0)),
            pl.BlockSpec((Cu, d), lambda i: (0, 0)),
            pl.BlockSpec((1, d), lambda i: (0, 0)),
        ],
        out_specs=tuple(pl.BlockSpec((tm, d), lambda i: (i, 0))
                        for _ in range(4)),
        compiler_params=_cparams(("parallel",)),
    )(*xs, _bf16(pq["w"]), pq["b"].reshape(1, d),
      _bf16(pk["w"]), pk["b"].reshape(1, d),
      _bf16(pv["w"]), pv["b"].reshape(1, d),
      _bf16(pu["w"]), pu["b"].reshape(1, d))
    if Mp != M:
        outs = tuple(o[:M] for o in outs)
    return outs


def fused_neighbor_attention(p, pos, q, u, npos, nk, nv, nu, identity,
                             tile_m=128):
    """pos: (M,3) f32; q,u: (M,d) bf16; npos: (M,K,3) f32; nk,nv,nu: (M,K,d)
    bf16; identity: (M,Cid) bf16.  Returns (M, out_dim) bf16."""
    M, d = q.shape
    K = nk.shape[1]
    Cid = identity.shape[1]
    hp = p["pos_mlp"][0]["w"].shape[1]
    ha = p["attn_mlp"][0]["w"].shape[1]
    Co = p["conv_end"]["w"].shape[1]
    tm, Mp = _tile_rows(M, tile_m)
    pos, q, u, npos, nk, nv, nu, identity = (
        _pad_rows(x, Mp) for x in (pos, q, u, npos, nk, nv, nu, identity))
    out = pl.pallas_call(
        _attn_kernel,
        out_shape=jax.ShapeDtypeStruct((Mp, Co), jnp.bfloat16),
        grid=(Mp // tm,),
        in_specs=[
            pl.BlockSpec((tm, 3), lambda i: (i, 0)),
            pl.BlockSpec((tm, d), lambda i: (i, 0)),
            pl.BlockSpec((tm, d), lambda i: (i, 0)),
            pl.BlockSpec((tm, K, 3), lambda i: (i, 0, 0)),
            pl.BlockSpec((tm, K, d), lambda i: (i, 0, 0)),
            pl.BlockSpec((tm, K, d), lambda i: (i, 0, 0)),
            pl.BlockSpec((tm, K, d), lambda i: (i, 0, 0)),
            pl.BlockSpec((tm, Cid), lambda i: (i, 0)),
            pl.BlockSpec((3, hp), lambda i: (0, 0)),
            pl.BlockSpec((1, hp), lambda i: (0, 0)),
            pl.BlockSpec((hp, d), lambda i: (0, 0)),
            pl.BlockSpec((1, d), lambda i: (0, 0)),
            pl.BlockSpec((d, ha), lambda i: (0, 0)),
            pl.BlockSpec((1, ha), lambda i: (0, 0)),
            pl.BlockSpec((ha, d), lambda i: (0, 0)),
            pl.BlockSpec((1, d), lambda i: (0, 0)),
            pl.BlockSpec((d, Co), lambda i: (0, 0)),
            pl.BlockSpec((1, Co), lambda i: (0, 0)),
        ],
        out_specs=pl.BlockSpec((tm, Co), lambda i: (i, 0)),
        compiler_params=_cparams(("parallel",)),
    )(pos, q, u, npos, nk, nv, nu, identity,
      _bf16(p["pos_mlp"][0]["w"]), p["pos_mlp"][0]["b"].reshape(1, hp),
      _bf16(p["pos_mlp"][1]["w"]), p["pos_mlp"][1]["b"].reshape(1, d),
      _bf16(p["attn_mlp"][0]["w"]), p["attn_mlp"][0]["b"].reshape(1, ha),
      _bf16(p["attn_mlp"][1]["w"]), p["attn_mlp"][1]["b"].reshape(1, d),
      _bf16(p["conv_end"]["w"]), p["conv_end"]["b"].reshape(1, Co))
    return out if Mp == M else out[:M]


# ----------------------------------------------------------------------------
# Parameters (deterministic synthetic init, PyTorch-style uniform fan-in)
# ----------------------------------------------------------------------------
def init_linear(key, cin, cout):
    kw, kb = jax.random.split(key)
    bound = 1.0 / math.sqrt(cin)
    return {"w": jax.random.uniform(kw, (cin, cout), jnp.float32, -bound, bound),
            "b": jax.random.uniform(kb, (cout,), jnp.float32, -bound, bound)}


def init_params(key, in_dim, out_dim, attn_dim, pos_hidden=64, attn_mult=4):
    assert in_dim == out_dim, "UpsampleTransformer residual path assumes in_dim == out_dim"
    keys = iter(jax.random.split(key, 32))
    p = {}
    # TODO(synk): BottleneckInterpPointConv internals not provided; modeled as
    # 3-NN inverse-distance interpolation + bottleneck point-wise MLP.
    p["seed_interp"] = [init_linear(next(keys), in_dim, out_dim // 2),
                        init_linear(next(keys), out_dim // 2, out_dim)]
    p["mlp1"] = [init_linear(next(keys), 3, out_dim // 2),
                 init_linear(next(keys), out_dim // 2, out_dim)]
    p["mlp2"] = [init_linear(next(keys), 3 * out_dim, 2 * out_dim),
                 init_linear(next(keys), 2 * out_dim, out_dim)]
    p["normal_mlp"] = [init_linear(next(keys), out_dim, out_dim // 2),
                       init_linear(next(keys), out_dim // 2, 3)]
    a = {}
    a["mlp_v_1"] = init_linear(next(keys), 2 * in_dim, in_dim)
    a["mlp_v_2"] = init_linear(next(keys), in_dim, in_dim)
    a["mlp_v_sc"] = init_linear(next(keys), 2 * in_dim, in_dim)
    a["conv_query"] = init_linear(next(keys), in_dim, attn_dim)
    a["conv_key"] = init_linear(next(keys), in_dim, attn_dim)
    a["conv_value"] = init_linear(next(keys), in_dim, attn_dim)
    a["conv_upfeat"] = init_linear(next(keys), out_dim, attn_dim)
    # NOTE: BatchNorm layers of pos_mlp / attn_mlp are identity at fresh init
    # (eval mode, zero running mean, unit running var) and are therefore omitted.
    a["pos_mlp"] = [init_linear(next(keys), 3, pos_hidden),
                    init_linear(next(keys), pos_hidden, attn_dim)]
    a["attn_mlp"] = [init_linear(next(keys), attn_dim, attn_dim * attn_mult),
                     init_linear(next(keys), attn_dim * attn_mult, attn_dim)]
    a["conv_end"] = init_linear(next(keys), attn_dim, out_dim)
    p["attn"] = a
    return p


# ----------------------------------------------------------------------------
# Module forward (plain-JAX glue around the fused Pallas kernels)
# ----------------------------------------------------------------------------
def gather_neighbors(feat, idx):
    """feat: (B, M, C), idx: (B, N, K) int32 -> (B, N, K, C)."""
    # TODO(synk): XLA gather; an in-kernel DMA gather driven by scalar-prefetched
    # idx (PrefetchScalarGridSpec + pl.ANY source tables) would avoid the KxC
    # HBM blow-up entirely.
    return jax.vmap(lambda f, i: f[i])(feat, idx)


def knn(query_xyz, ref_xyz, k):
    d = pairwise_sqdist(query_xyz, ref_xyz)                 # (B, Nq, Nr) f32
    # TODO(synk): top-k selection stays in XLA; a streaming in-kernel top-k
    # would avoid the O(N^2) distance materialization at large N.
    neg_d, idx = lax.top_k(-d, k)
    return -neg_d, idx


def seed_interpolation(p, seed_xyz, seed_features, xyz):
    """BottleneckInterpPointConv: interpolate seed features onto xyz."""
    B, N, _ = xyz.shape
    d3, idx3 = knn(xyz, seed_xyz, 3)                        # (B, N, 3)
    w = 1.0 / (jnp.maximum(d3, 0.0) + 1e-8)
    w = w / jnp.sum(w, axis=-1, keepdims=True)
    g = gather_neighbors(seed_features, idx3)               # (B, N, 3, C_in)
    interp = jnp.sum(g * w[..., None], axis=2)              # (B, N, C_in)
    out = fused_mlp2(p[0], p[1], interp.reshape(B * N, -1))
    return out.reshape(B, N, -1)                            # (B, N, out_dim) bf16


def upsample_transformer(p, pos, key_feat, query, upfeat, n_knn):
    """UpsampleTransformer with up_factor=None, use_upfeat=True."""
    B, N, _ = pos.shape
    M = B * N
    d = p["conv_query"]["w"].shape[1]

    kf = key_feat.reshape(M, -1).astype(jnp.bfloat16)
    qf = query.reshape(M, -1).astype(jnp.bfloat16)
    uf = upfeat.reshape(M, -1).astype(jnp.bfloat16)

    # value = MLP_Res(cat([key, query]))  -- also the residual identity
    value = fused_mlp_res(p["mlp_v_1"], p["mlp_v_2"], p["mlp_v_sc"], kf, qf)

    # q/k/v/upfeat projections, one fused call -> four (M, d) outputs
    q, k, v, u = fused_proj4(p["conv_query"], p["conv_key"], p["conv_value"],
                             p["conv_upfeat"], qf, kf, value, uf)

    _, idx = knn(pos, pos, n_knn)                           # (B, N, K), self included

    npos = gather_neighbors(pos, idx)                       # (B, N, K, 3) f32
    nk = gather_neighbors(k.reshape(B, N, d), idx)          # (B, N, K, d) bf16
    nv = gather_neighbors(v.reshape(B, N, d), idx)
    nu = gather_neighbors(u.reshape(B, N, d), idx)

    y = fused_neighbor_attention(
        p, pos.reshape(M, 3), q, u,
        npos.reshape(M, n_knn, 3), nk.reshape(M, n_knn, d),
        nv.reshape(M, n_knn, d), nu.reshape(M, n_knn, d), value)
    return y.reshape(B, N, -1)                              # (B, N, out_dim)


def normal_estimator_forward(params, xyz, prev_features, seed_xyz, seed_features, k_knn):
    B, N, _ = xyz.shape
    interp = seed_interpolation(params["seed_interp"], seed_xyz, seed_features, xyz)
    f, fmax = mlp1_with_max(params["mlp1"], xyz)            # fused mlp1 + max partials
    feat = mlp2_cat(params["mlp2"], f, fmax, interp)        # fused concat-mlp2
    key_feat = prev_features if prev_features is not None else feat
    feat = upsample_transformer(params["attn"], xyz, key_feat, feat, interp, k_knn)
    normals = fused_mlp2(params["normal_mlp"][0], params["normal_mlp"][1],
                         feat.reshape(B * N, -1), out_dtype=jnp.float32)
    return normals.reshape(B, N, 3)


# ----------------------------------------------------------------------------
if __name__ == "__main__":
    B, N, N_seed = 2, 16, 8
    in_dim = out_dim = 32
    attn_dim = 16
    k_knn = 8

    root = jax.random.PRNGKey(0)
    k1, k2, k3, k4, kp = jax.random.split(root, 5)
    xyz = jax.random.normal(k1, (B, N, 3), jnp.float32)
    prev_features = jax.random.normal(k2, (B, N, in_dim), jnp.float32)
    seed_xyz = jax.random.normal(k3, (B, N_seed, 3), jnp.float32)
    seed_features = jax.random.normal(k4, (B, N_seed, in_dim), jnp.float32)

    params = init_params(kp, in_dim, out_dim, attn_dim)

    fwd = jax.jit(functools.partial(normal_estimator_forward, k_knn=k_knn))
    normals = fwd(params, xyz, prev_features, seed_xyz, seed_features)
    jax.block_until_ready(normals)
    assert normals.shape == (B, N, 3)
    assert bool(jnp.all(jnp.isfinite(normals)))
    print("KERNEL_OK")
</pallas_src>

<mosaic_0001>
module attributes {stable_mosaic.version = 11 : i64} {
  func.func @_sqdist_kernel(%arg0: i32, %arg1: i32, %arg2: i32, %arg3: memref<1x16x3xf32, #tpu.memory_space<vmem>>, %arg4: memref<1x3x8xf32, #tpu.memory_space<vmem>>, %arg5: memref<1x16x8xf32, #tpu.memory_space<vmem>>) attributes {dimension_semantics = [#tpu.dimension_semantics<parallel>, #tpu.dimension_semantics<parallel>, #tpu.dimension_semantics<parallel>], iteration_bounds = array<i64: 2, 1, 1>, scalar_prefetch = 0 : i64, scratch_operands = 0 : i64, tpu.core_type = #tpu.core_type<tc>, window_params = [{transform_indices = @transform_0, window_bounds = array<i64: 1, 16, 3>}, {transform_indices = @transform_1, window_bounds = array<i64: 1, 3, 8>}, {transform_indices = @transform_2, window_bounds = array<i64: 1, 16, 8>}]} {
    %c0 = arith.constant 0 : index
    %c0_0 = arith.constant 0 : index
    %c0_1 = arith.constant 0 : index
    %0 = vector.load %arg3[%c0, %c0_0, %c0_1] : memref<1x16x3xf32, #tpu.memory_space<vmem>>, vector<1x16x3xf32>
    %1 = vector.shape_cast %0 : vector<1x16x3xf32> to vector<16x3xf32>
    %c0_2 = arith.constant 0 : index
    %c0_3 = arith.constant 0 : index
    %c0_4 = arith.constant 0 : index
    %2 = vector.load %arg4[%c0_2, %c0_3, %c0_4] : memref<1x3x8xf32, #tpu.memory_space<vmem>>, vector<1x3x8xf32>
    %3 = vector.shape_cast %2 : vector<1x3x8xf32> to vector<3x8xf32>
    %4 = arith.mulf %1, %1 : vector<16x3xf32>
    %cst = arith.constant dense<0.000000e+00> : vector<16xf32>
    %5 = vector.multi_reduction <add>, %4, %cst [1] : vector<16x3xf32> to vector<16xf32>
    %6 = vector.shape_cast %5 : vector<16xf32> to vector<16x1xf32>
    %7 = arith.mulf %3, %3 : vector<3x8xf32>
    %cst_5 = arith.constant dense<0.000000e+00> : vector<8xf32>
    %8 = vector.multi_reduction <add>, %7, %cst_5 [0] : vector<3x8xf32> to vector<8xf32>
    %9 = vector.shape_cast %8 : vector<8xf32> to vector<1x8xf32>
    %10 = arith.truncf %1 : vector<16x3xf32> to vector<16x3xbf16>
    %11 = arith.truncf %3 : vector<3x8xf32> to vector<3x8xbf16>
    %cst_6 = arith.constant dense<0.000000e+00> : vector<16x8xf32>
    %12 = tpu.matmul %10, %11, %cst_6 {dimension_numbers = #tpu.dot_dimension_numbers<[1], [0], [0], [1], [0, 0, 1, 1], [], []>} : vector<16x3xbf16>, vector<3x8xbf16>, vector<16x8xf32> -> vector<16x8xf32>
    %13 = vector.broadcast %6 : vector<16x1xf32> to vector<16x8xf32>
    %14 = vector.broadcast %9 : vector<1x8xf32> to vector<16x8xf32>
    %15 = arith.addf %13, %14 : vector<16x8xf32>
    %cst_7 = arith.constant 2.000000e+00 : f32
    %16 = vector.broadcast %cst_7 : f32 to vector<16x8xf32>
    %17 = arith.mulf %16, %12 : vector<16x8xf32>
    %18 = arith.subf %15, %17 : vector<16x8xf32>
    %c0_8 = arith.constant 0 : index
    %c0_9 = arith.constant 0 : index
    %c0_10 = arith.constant 0 : index
    %19 = vector.load %arg5[%c0_8, %c0_9, %c0_10] : memref<1x16x8xf32, #tpu.memory_space<vmem>>, vector<1x16x8xf32>
    %20 = vector.shape_cast %19 : vector<1x16x8xf32> to vector<16x8xf32>
    %21 = vector.shape_cast %18 : vector<16x8xf32> to vector<1x16x8xf32>
    tpu.vector_store %arg5[%c0_8, %c0_9, %c0_10], %21 {strides = array<i32>} : memref<1x16x8xf32, #tpu.memory_space<vmem>>, vector<1x16x8xf32>,
    return
  }
  func.func @transform_0(%arg0: i32, %arg1: i32, %arg2: i32) -> (i32, i32, i32) {
    %c0_i32 = arith.constant 0 : i32
    %c0_i32_0 = arith.constant 0 : i32
    return %arg0, %arg1, %c0_i32 : i32, i32, i32
  }
  func.func @transform_1(%arg0: i32, %arg1: i32, %arg2: i32) -> (i32, i32, i32) {
    %c0_i32 = arith.constant 0 : i32
    %c0_i32_0 = arith.constant 0 : i32
    return %arg0, %c0_i32, %arg2 : i32, i32, i32
  }
  func.func @transform_2(%arg0: i32, %arg1: i32, %arg2: i32) -> (i32, i32, i32) {
    %c0_i32 = arith.constant 0 : i32
    return %arg0, %arg1, %arg2 : i32, i32, i32
  }
}

module attributes {stable_mosaic.version = 11 : i64} {
  func.func @_mlp2_kernel(%arg0: i32, %arg1: memref<32x32xbf16, #tpu.memory_space<vmem>>, %arg2: memref<32x16xbf16, #tpu.memory_space<vmem>>, %arg3: memref<1x16xf32, #tpu.memory_space<vmem>>, %arg4: memref<16x32xbf16, #tpu.memory_space<vmem>>, %arg5: memref<1x32xf32, #tpu.memory_space<vmem>>, %arg6: memref<32x32xbf16, #tpu.memory_space<vmem>>) attributes {dimension_semantics = [#tpu.dimension_semantics<parallel>], iteration_bounds = array<i64: 1>, scalar_prefetch = 0 : i64, scratch_operands = 0 : i64, tpu.core_type = #tpu.core_type<tc>, window_params = [{transform_indices = @transform_0, window_bounds = array<i64: 32, 32>}, {pipeline_mode = #tpu.pipeline_mode<synchronous>, transform_indices = @transform_1, window_bounds = array<i64: 32, 16>}, {pipeline_mode = #tpu.pipeline_mode<synchronous>, transform_indices = @transform_2, window_bounds = array<i64: 1, 16>}, {pipeline_mode = #tpu.pipeline_mode<synchronous>, transform_indices = @transform_3, window_bounds = array<i64: 16, 32>}, {pipeline_mode = #tpu.pipeline_mode<synchronous>, transform_indices = @transform_4, window_bounds = array<i64: 1, 32>}, {transform_indices = @transform_5, window_bounds = array<i64: 32, 32>}]} {
    %c0 = arith.constant 0 : index
    %c0_0 = arith.constant 0 : index
    %0 = vector.load %arg1[%c0, %c0_0] : memref<32x32xbf16, #tpu.memory_space<vmem>>, vector<32x32xbf16>
    %c0_1 = arith.constant 0 : index
    %c0_2 = arith.constant 0 : index
    %1 = vector.load %arg2[%c0_1, %c0_2] : memref<32x16xbf16, #tpu.memory_space<vmem>>, vector<32x16xbf16>
    %cst = arith.constant dense<0.000000e+00> : vector<32x16xf32>
    %2 = tpu.matmul %0, %1, %cst {dimension_numbers = #tpu.dot_dimension_numbers<[1], [0], [0], [1], [0, 0, 1, 1], [], []>} : vector<32x32xbf16>, vector<32x16xbf16>, vector<32x16xf32> -> vector<32x16xf32>
    %c0_3 = arith.constant 0 : index
    %c0_4 = arith.constant 0 : index
    %3 = vector.load %arg3[%c0_3, %c0_4] : memref<1x16xf32, #tpu.memory_space<vmem>>, vector<1x16xf32>
    %4 = vector.broadcast %3 : vector<1x16xf32> to vector<32x16xf32>
    %5 = arith.addf %2, %4 : vector<32x16xf32>
    %cst_5 = arith.constant 0.000000e+00 : f32
    %6 = vector.broadcast %cst_5 : f32 to vector<32x16xf32>
    %7 = arith.maximumf %5, %6 : vector<32x16xf32>
    %8 = arith.truncf %7 : vector<32x16xf32> to vector<32x16xbf16>
    %c0_6 = arith.constant 0 : index
    %c0_7 = arith.constant 0 : index
    %9 = vector.load %arg4[%c0_6, %c0_7] : memref<16x32xbf16, #tpu.memory_space<vmem>>, vector<16x32xbf16>
    %cst_8 = arith.constant dense<0.000000e+00> : vector<32x32xf32>
    %10 = tpu.matmul %8, %9, %cst_8 {dimension_numbers = #tpu.dot_dimension_numbers<[1], [0], [0], [1], [0, 0, 1, 1], [], []>} : vector<32x16xbf16>, vector<16x32xbf16>, vector<32x32xf32> -> vector<32x32xf32>
    %c0_9 = arith.constant 0 : index
    %c0_10 = arith.constant 0 : index
    %11 = vector.load %arg5[%c0_9, %c0_10] : memref<1x32xf32, #tpu.memory_space<vmem>>, vector<1x32xf32>
    %12 = vector.broadcast %11 : vector<1x32xf32> to vector<32x32xf32>
    %13 = arith.addf %10, %12 : vector<32x32xf32>
    %14 = arith.truncf %13 : vector<32x32xf32> to vector<32x32xbf16>
    %c0_11 = arith.constant 0 : index
    %c0_12 = arith.constant 0 : index
    %15 = vector.load %arg6[%c0_11, %c0_12] : memref<32x32xbf16, #tpu.memory_space<vmem>>, vector<32x32xbf16>
    tpu.vector_store %arg6[%c0_11, %c0_12], %14 {strides = array<i32>} : memref<32x32xbf16, #tpu.memory_space<vmem>>, vector<32x32xbf16>,
    return
  }
  func.func @transform_0(%arg0: i32) -> (i32, i32) {
    %c0_i32 = arith.constant 0 : i32
    %c0_i32_0 = arith.constant 0 : i32
    return %arg0, %c0_i32 : i32, i32
  }
  func.func @transform_1(%arg0: i32) -> (i32, i32) {
    %c0_i32 = arith.constant 0 : i32
    %c0_i32_0 = arith.constant 0 : i32
    %c0_i32_1 = arith.constant 0 : i32
    return %c0_i32, %c0_i32_0 : i32, i32
  }
  func.func @transform_2(%arg0: i32) -> (i32, i32) {
    %c0_i32 = arith.constant 0 : i32
    %c0_i32_0 = arith.constant 0 : i32
    %c0_i32_1 = arith.constant 0 : i32
    return %c0_i32, %c0_i32_0 : i32, i32
  }
  func.func @transform_3(%arg0: i32) -> (i32, i32) {
    %c0_i32 = arith.constant 0 : i32
    %c0_i32_0 = arith.constant 0 : i32
    %c0_i32_1 = arith.constant 0 : i32
    return %c0_i32, %c0_i32_0 : i32, i32
  }
  func.func @transform_4(%arg0: i32) -> (i32, i32) {
    %c0_i32 = arith.constant 0 : i32
    %c0_i32_0 = arith.constant 0 : i32
    %c0_i32_1 = arith.constant 0 : i32
    return %c0_i32, %c0_i32_0 : i32, i32
  }
  func.func @transform_5(%arg0: i32) -> (i32, i32) {
    %c0_i32 = arith.constant 0 : i32
    %c0_i32_0 = arith.constant 0 : i32
    return %arg0, %c0_i32 : i32, i32
  }
}

module attributes {stable_mosaic.version = 11 : i64} {
  func.func @_mlp1_max_kernel(%arg0: i32, %arg1: i32, %arg2: memref<1x16x3xbf16, #tpu.memory_space<vmem>>, %arg3: memref<3x16xbf16, #tpu.memory_space<vmem>>, %arg4: memref<1x16xf32, #tpu.memory_space<vmem>>, %arg5: memref<16x32xbf16, #tpu.memory_space<vmem>>, %arg6: memref<1x32xf32, #tpu.memory_space<vmem>>, %arg7: memref<1x16x32xbf16, #tpu.memory_space<vmem>>, %arg8: memref<1x1x1x32xf32, #tpu.memory_space<vmem>>) attributes {dimension_semantics = [#tpu.dimension_semantics<parallel>, #tpu.dimension_semantics<parallel>], iteration_bounds = array<i64: 2, 1>, scalar_prefetch = 0 : i64, scratch_operands = 0 : i64, tpu.core_type = #tpu.core_type<tc>, window_params = [{transform_indices = @transform_0, window_bounds = array<i64: 1, 16, 3>}, {pipeline_mode = #tpu.pipeline_mode<synchronous>, transform_indices = @transform_1, window_bounds = array<i64: 3, 16>}, {pipeline_mode = #tpu.pipeline_mode<synchronous>, transform_indices = @transform_2, window_bounds = array<i64: 1, 16>}, {pipeline_mode = #tpu.pipeline_mode<synchronous>, transform_indices = @transform_3, window_bounds = array<i64: 16, 32>}, {pipeline_mode = #tpu.pipeline_mode<synchronous>, transform_indices = @transform_4, window_bounds = array<i64: 1, 32>}, {transform_indices = @transform_5, window_bounds = array<i64: 1, 16, 32>}, {transform_indices = @transform_6, window_bounds = array<i64: 1, 1, 1, 32>}]} {
    %c0 = arith.constant 0 : index
    %c0_0 = arith.constant 0 : index
    %c0_1 = arith.constant 0 : index
    %0 = vector.load %arg2[%c0, %c0_0, %c0_1] : memref<1x16x3xbf16, #tpu.memory_space<vmem>>, vector<1x16x3xbf16>
    %1 = vector.shape_cast %0 : vector<1x16x3xbf16> to vector<16x3xbf16>
    %c0_2 = arith.constant 0 : index
    %c0_3 = arith.constant 0 : index
    %2 = vector.load %arg3[%c0_2, %c0_3] : memref<3x16xbf16, #tpu.memory_space<vmem>>, vector<3x16xbf16>
    %cst = arith.constant dense<0.000000e+00> : vector<16x16xf32>
    %3 = tpu.matmul %1, %2, %cst {dimension_numbers = #tpu.dot_dimension_numbers<[1], [0], [0], [1], [0, 0, 1, 1], [], []>} : vector<16x3xbf16>, vector<3x16xbf16>, vector<16x16xf32> -> vector<16x16xf32>
    %c0_4 = arith.constant 0 : index
    %c0_5 = arith.constant 0 : index
    %4 = vector.load %arg4[%c0_4, %c0_5] : memref<1x16xf32, #tpu.memory_space<vmem>>, vector<1x16xf32>
    %5 = vector.broadcast %4 : vector<1x16xf32> to vector<16x16xf32>
    %6 = arith.addf %3, %5 : vector<16x16xf32>
    %cst_6 = arith.constant 0.000000e+00 : f32
    %7 = vector.broadcast %cst_6 : f32 to vector<16x16xf32>
    %8 = arith.maximumf %6, %7 : vector<16x16xf32>
    %9 = arith.truncf %8 : vector<16x16xf32> to vector<16x16xbf16>
    %c0_7 = arith.constant 0 : index
    %c0_8 = arith.constant 0 : index
    %10 = vector.load %arg5[%c0_7, %c0_8] : memref<16x32xbf16, #tpu.memory_space<vmem>>, vector<16x32xbf16>
    %cst_9 = arith.constant dense<0.000000e+00> : vector<16x32xf32>
    %11 = tpu.matmul %9, %10, %cst_9 {dimension_numbers = #tpu.dot_dimension_numbers<[1], [0], [0], [1], [0, 0, 1, 1], [], []>} : vector<16x16xbf16>, vector<16x32xbf16>, vector<16x32xf32> -> vector<16x32xf32>
    %c0_10 = arith.constant 0 : index
    %c0_11 = arith.constant 0 : index
    %12 = vector.load %arg6[%c0_10, %c0_11] : memref<1x32xf32, #tpu.memory_space<vmem>>, vector<1x32xf32>
    %13 = vector.broadcast %12 : vector<1x32xf32> to vector<16x32xf32>
    %14 = arith.addf %11, %13 : vector<16x32xf32>
    %15 = arith.truncf %14 : vector<16x32xf32> to vector<16x32xbf16>
    %c0_12 = arith.constant 0 : index
    %c0_13 = arith.constant 0 : index
    %c0_14 = arith.constant 0 : index
    %16 = vector.load %arg7[%c0_12, %c0_13, %c0_14] : memref<1x16x32xbf16, #tpu.memory_space<vmem>>, vector<1x16x32xbf16>
    %17 = vector.shape_cast %16 : vector<1x16x32xbf16> to vector<16x32xbf16>
    %18 = vector.shape_cast %15 : vector<16x32xbf16> to vector<1x16x32xbf16>
    tpu.vector_store %arg7[%c0_12, %c0_13, %c0_14], %18 {strides = array<i32>} : memref<1x16x32xbf16, #tpu.memory_space<vmem>>, vector<1x16x32xbf16>,
    %c16_i32 = arith.constant 16 : i32
    %19 = arith.muli %arg1, %c16_i32 : i32
    %20 = tpu.iota {dimensions = array<i32: 0>} : vector<16x1xi32>
    %21 = vector.broadcast %19 : i32 to vector<16x1xi32>
    %22 = arith.addi %21, %20 : vector<16x1xi32>
    %c16_i32_15 = arith.constant 16 : i32
    %23 = vector.broadcast %c16_i32_15 : i32 to vector<16x1xi32>
    %24 = arith.cmpi slt, %22, %23 : vector<16x1xi32>
    %cst_16 = arith.constant 0xFF800000 : f32
    %25 = vector.shape_cast %24 : vector<16x1xi1> to vector<16x1xi1>
    %26 = vector.broadcast %25 : vector<16x1xi1> to vector<16x32xi1>
    %27 = vector.broadcast %cst_16 : f32 to vector<16x32xf32>
    %28 = arith.select %26, %14, %27 : vector<16x32xi1>, vector<16x32xf32>
    %cst_17 = arith.constant dense<0xFF800000> : vector<32xf32>
    %29 = vector.multi_reduction <maximumf>, %28, %cst_17 [0] : vector<16x32xf32> to vector<32xf32>
    %30 = vector.shape_cast %29 : vector<32xf32> to vector<1x32xf32>
    %c0_18 = arith.constant 0 : index
    %c0_19 = arith.constant 0 : index
    %c0_20 = arith.constant 0 : index
    %c0_21 = arith.constant 0 : index
    %31 = vector.load %arg8[%c0_18, %c0_19, %c0_20, %c0_21] : memref<1x1x1x32xf32, #tpu.memory_space<vmem>>, vector<1x1x1x32xf32>
    %32 = vector.shape_cast %31 : vector<1x1x1x32xf32> to vector<1x32xf32>
    %33 = vector.shape_cast %30 : vector<1x32xf32> to vector<1x1x1x32xf32>
    tpu.vector_store %arg8[%c0_18, %c0_19, %c0_20, %c0_21], %33 {strides = array<i32>} : memref<1x1x1x32xf32, #tpu.memory_space<vmem>>, vector<1x1x1x32xf32>,
    return
  }
  func.func @transform_0(%arg0: i32, %arg1: i32) -> (i32, i32, i32) {
    %c0_i32 = arith.constant 0 : i32
    %c0_i32_0 = arith.constant 0 : i32
    return %arg0, %arg1, %c0_i32 : i32, i32, i32
  }
  func.func @transform_1(%arg0: i32, %arg1: i32) -> (i32, i32) {
    %c0_i32 = arith.constant 0 : i32
    %c0_i32_0 = arith.constant 0 : i32
    %c0_i32_1 = arith.constant 0 : i32
    return %c0_i32, %c0_i32_0 : i32, i32
  }
  func.func @transform_2(%arg0: i32, %arg1: i32) -> (i32, i32) {
    %c0_i32 = arith.constant 0 : i32
    %c0_i32_0 = arith.constant 0 : i32
    %c0_i32_1 = arith.constant 0 : i32
    return %c0_i32, %c0_i32_0 : i32, i32
  }
  func.func @transform_3(%arg0: i32, %arg1: i32) -> (i32, i32) {
    %c0_i32 = arith.constant 0 : i32
    %c0_i32_0 = arith.constant 0 : i32
    %c0_i32_1 = arith.constant 0 : i32
    return %c0_i32, %c0_i32_0 : i32, i32
  }
  func.func @transform_4(%arg0: i32, %arg1: i32) -> (i32, i32) {
    %c0_i32 = arith.constant 0 : i32
    %c0_i32_0 = arith.constant 0 : i32
    %c0_i32_1 = arith.constant 0 : i32
    return %c0_i32, %c0_i32_0 : i32, i32
  }
  func.func @transform_5(%arg0: i32, %arg1: i32) -> (i32, i32, i32) {
    %c0_i32 = arith.constant 0 : i32
    %c0_i32_0 = arith.constant 0 : i32
    return %arg0, %arg1, %c0_i32 : i32, i32, i32
  }
  func.func @transform_6(%arg0: i32, %arg1: i32) -> (i32, i32, i32, i32) {
    %c0_i32 = arith.constant 0 : i32
    %c0_i32_0 = arith.constant 0 : i32
    %c0_i32_1 = arith.constant 0 : i32
    return %arg0, %arg1, %c0_i32, %c0_i32_0 : i32, i32, i32, i32
  }
}

module attributes {stable_mosaic.version = 11 : i64} {
  func.func @_mlp_res_kernel(%arg0: i32, %arg1: memref<32x32xbf16, #tpu.memory_space<vmem>>, %arg2: memref<32x32xbf16, #tpu.memory_space<vmem>>, %arg3: memref<64x32xbf16, #tpu.memory_space<vmem>>, %arg4: memref<1x32xf32, #tpu.memory_space<vmem>>, %arg5: memref<32x32xbf16, #tpu.memory_space<vmem>>, %arg6: memref<1x32xf32, #tpu.memory_space<vmem>>, %arg7: memref<64x32xbf16, #tpu.memory_space<vmem>>, %arg8: memref<1x32xf32, #tpu.memory_space<vmem>>, %arg9: memref<32x32xbf16, #tpu.memory_space<vmem>>) attributes {dimension_semantics = [#tpu.dimension_semantics<parallel>], iteration_bounds = array<i64: 1>, scalar_prefetch = 0 : i64, scratch_operands = 0 : i64, tpu.core_type = #tpu.core_type<tc>, window_params = [{transform_indices = @transform_0, window_bounds = array<i64: 32, 32>}, {transform_indices = @transform_1, window_bounds = array<i64: 32, 32>}, {pipeline_mode = #tpu.pipeline_mode<synchronous>, transform_indices = @transform_2, window_bounds = array<i64: 64, 32>}, {pipeline_mode = #tpu.pipeline_mode<synchronous>, transform_indices = @transform_3, window_bounds = array<i64: 1, 32>}, {pipeline_mode = #tpu.pipeline_mode<synchronous>, transform_indices = @transform_4, window_bounds = array<i64: 32, 32>}, {pipeline_mode = #tpu.pipeline_mode<synchronous>, transform_indices = @transform_5, window_bounds = array<i64: 1, 32>}, {pipeline_mode = #tpu.pipeline_mode<synchronous>, transform_indices = @transform_6, window_bounds = array<i64: 64, 32>}, {pipeline_mode = #tpu.pipeline_mode<synchronous>, transform_indices = @transform_7, window_bounds = array<i64: 1, 32>}, {transform_indices = @transform_8, window_bounds = array<i64: 32, 32>}]} {
    %c0 = arith.constant 0 : index
    %c0_0 = arith.constant 0 : index
    %0 = vector.load %arg1[%c0, %c0_0] : memref<32x32xbf16, #tpu.memory_space<vmem>>, vector<32x32xbf16>
    %c0_1 = arith.constant 0 : index
    %c0_2 = arith.constant 0 : index
    %1 = vector.load %arg2[%c0_1, %c0_2] : memref<32x32xbf16, #tpu.memory_space<vmem>>, vector<32x32xbf16>
    %c0_3 = arith.constant 0 : index
    %c0_4 = arith.constant 0 : index
    %2 = vector.load %arg3[%c0_3, %c0_4] : memref<64x32xbf16, #tpu.memory_space<vmem>>, vector<64x32xbf16>
    %c0_5 = arith.constant 0 : index
    %c0_6 = arith.constant 0 : index
    %3 = vector.load %arg7[%c0_5, %c0_6] : memref<64x32xbf16, #tpu.memory_space<vmem>>, vector<64x32xbf16>
    %4 = vector.extract_strided_slice %2 {offsets = [0, 0], sizes = [32, 32], strides = [1, 1]} : vector<64x32xbf16> to vector<32x32xbf16>
    %cst = arith.constant dense<0.000000e+00> : vector<32x32xf32>
    %5 = tpu.matmul %0, %4, %cst {dimension_numbers = #tpu.dot_dimension_numbers<[1], [0], [0], [1], [0, 0, 1, 1], [], []>} : vector<32x32xbf16>, vector<32x32xbf16>, vector<32x32xf32> -> vector<32x32xf32>
    %6 = vector.extract_strided_slice %2 {offsets = [32, 0], sizes = [32, 32], strides = [1, 1]} : vector<64x32xbf16> to vector<32x32xbf16>
    %cst_7 = arith.constant dense<0.000000e+00> : vector<32x32xf32>
    %7 = tpu.matmul %1, %6, %cst_7 {dimension_numbers = #tpu.dot_dimension_numbers<[1], [0], [0], [1], [0, 0, 1, 1], [], []>} : vector<32x32xbf16>, vector<32x32xbf16>, vector<32x32xf32> -> vector<32x32xf32>
    %8 = arith.addf %5, %7 : vector<32x32xf32>
    %c0_8 = arith.constant 0 : index
    %c0_9 = arith.constant 0 : index
    %9 = vector.load %arg4[%c0_8, %c0_9] : memref<1x32xf32, #tpu.memory_space<vmem>>, vector<1x32xf32>
    %10 = vector.broadcast %9 : vector<1x32xf32> to vector<32x32xf32>
    %11 = arith.addf %8, %10 : vector<32x32xf32>
    %cst_10 = arith.constant 0.000000e+00 : f32
    %12 = vector.broadcast %cst_10 : f32 to vector<32x32xf32>
    %13 = arith.maximumf %11, %12 : vector<32x32xf32>
    %14 = arith.truncf %13 : vector<32x32xf32> to vector<32x32xbf16>
    %c0_11 = arith.constant 0 : index
    %c0_12 = arith.constant 0 : index
    %15 = vector.load %arg5[%c0_11, %c0_12] : memref<32x32xbf16, #tpu.memory_space<vmem>>, vector<32x32xbf16>
    %cst_13 = arith.constant dense<0.000000e+00> : vector<32x32xf32>
    %16 = tpu.matmul %14, %15, %cst_13 {dimension_numbers = #tpu.dot_dimension_numbers<[1], [0], [0], [1], [0, 0, 1, 1], [], []>} : vector<32x32xbf16>, vector<32x32xbf16>, vector<32x32xf32> -> vector<32x32xf32>
    %c0_14 = arith.constant 0 : index
    %c0_15 = arith.constant 0 : index
    %17 = vector.load %arg6[%c0_14, %c0_15] : memref<1x32xf32, #tpu.memory_space<vmem>>, vector<1x32xf32>
    %18 = vector.broadcast %17 : vector<1x32xf32> to vector<32x32xf32>
    %19 = arith.addf %16, %18 : vector<32x32xf32>
    %20 = vector.extract_strided_slice %3 {offsets = [0, 0], sizes = [32, 32], strides = [1, 1]} : vector<64x32xbf16> to vector<32x32xbf16>
    %cst_16 = arith.constant dense<0.000000e+00> : vector<32x32xf32>
    %21 = tpu.matmul %0, %20, %cst_16 {dimension_numbers = #tpu.dot_dimension_numbers<[1], [0], [0], [1], [0, 0, 1, 1], [], []>} : vector<32x32xbf16>, vector<32x32xbf16>, vector<32x32xf32> -> vector<32x32xf32>
    %22 = vector.extract_strided_slice %3 {offsets = [32, 0], sizes = [32, 32], strides = [1, 1]} : vector<64x32xbf16> to vector<32x32xbf16>
    %cst_17 = arith.constant dense<0.000000e+00> : vector<32x32xf32>
    %23 = tpu.matmul %1, %22, %cst_17 {dimension_numbers = #tpu.dot_dimension_numbers<[1], [0], [0], [1], [0, 0, 1, 1], [], []>} : vector<32x32xbf16>, vector<32x32xbf16>, vector<32x32xf32> -> vector<32x32xf32>
    %24 = arith.addf %21, %23 : vector<32x32xf32>
    %c0_18 = arith.constant 0 : index
    %c0_19 = arith.constant 0 : index
    %25 = vector.load %arg8[%c0_18, %c0_19] : memref<1x32xf32, #tpu.memory_space<vmem>>, vector<1x32xf32>
    %26 = vector.broadcast %25 : vector<1x32xf32> to vector<32x32xf32>
    %27 = arith.addf %24, %26 : vector<32x32xf32>
    %28 = arith.addf %19, %27 : vector<32x32xf32>
    %29 = arith.truncf %28 : vector<32x32xf32> to vector<32x32xbf16>
    %c0_20 = arith.constant 0 : index
    %c0_21 = arith.constant 0 : index
    %30 = vector.load %arg9[%c0_20, %c0_21] : memref<32x32xbf16, #tpu.memory_space<vmem>>, vector<32x32xbf16>
    tpu.vector_store %arg9[%c0_20, %c0_21], %29 {strides = array<i32>} : memref<32x32xbf16, #tpu.memory_space<vmem>>, vector<32x32xbf16>,
    return
  }
  func.func @transform_0(%arg0: i32) -> (i32, i32) {
    %c0_i32 = arith.constant 0 : i32
    %c0_i32_0 = arith.constant 0 : i32
    return %arg0, %c0_i32 : i32, i32
  }
  func.func @transform_1(%arg0: i32) -> (i32, i32) {
    %c0_i32 = arith.constant 0 : i32
    %c0_i32_0 = arith.constant 0 : i32
    return %arg0, %c0_i32 : i32, i32
  }
  func.func @transform_2(%arg0: i32) -> (i32, i32) {
    %c0_i32 = arith.constant 0 : i32
    %c0_i32_0 = arith.constant 0 : i32
    %c0_i32_1 = arith.constant 0 : i32
    return %c0_i32, %c0_i32_0 : i32, i32
  }
  func.func @transform_3(%arg0: i32) -> (i32, i32) {
    %c0_i32 = arith.constant 0 : i32
    %c0_i32_0 = arith.constant 0 : i32
    %c0_i32_1 = arith.constant 0 : i32
    return %c0_i32, %c0_i32_0 : i32, i32
  }
  func.func @transform_4(%arg0: i32) -> (i32, i32) {
    %c0_i32 = arith.constant 0 : i32
    %c0_i32_0 = arith.constant 0 : i32
    %c0_i32_1 = arith.constant 0 : i32
    return %c0_i32, %c0_i32_0 : i32, i32
  }
  func.func @transform_5(%arg0: i32) -> (i32, i32) {
    %c0_i32 = arith.constant 0 : i32
    %c0_i32_0 = arith.constant 0 : i32
    %c0_i32_1 = arith.constant 0 : i32
    return %c0_i32, %c0_i32_0 : i32, i32
  }
  func.func @transform_6(%arg0: i32) -> (i32, i32) {
    %c0_i32 = arith.constant 0 : i32
    %c0_i32_0 = arith.constant 0 : i32
    %c0_i32_1 = arith.constant 0 : i32
    return %c0_i32, %c0_i32_0 : i32, i32
  }
  func.func @transform_7(%arg0: i32) -> (i32, i32) {
    %c0_i32 = arith.constant 0 : i32
    %c0_i32_0 = arith.constant 0 : i32
    %c0_i32_1 = arith.constant 0 : i32
    return %c0_i32, %c0_i32_0 : i32, i32
  }
  func.func @transform_8(%arg0: i32) -> (i32, i32) {
    %c0_i32 = arith.constant 0 : i32
    %c0_i32_0 = arith.constant 0 : i32
    return %arg0, %c0_i32 : i32, i32
  }
}

module attributes {stable_mosaic.version = 11 : i64} {
  func.func @_mlp2_cat_kernel(%arg0: i32, %arg1: i32, %arg2: memref<1x16x32xbf16, #tpu.memory_space<vmem>>, %arg3: memref<1x16x32xbf16, #tpu.memory_space<vmem>>, %arg4: memref<1x1x64xf32, #tpu.memory_space<vmem>>, %arg5: memref<32x64xbf16, #tpu.memory_space<vmem>>, %arg6: memref<32x64xbf16, #tpu.memory_space<vmem>>, %arg7: memref<64x32xbf16, #tpu.memory_space<vmem>>, %arg8: memref<1x32xf32, #tpu.memory_space<vmem>>, %arg9: memref<1x16x32xbf16, #tpu.memory_space<vmem>>) attributes {dimension_semantics = [#tpu.dimension_semantics<parallel>, #tpu.dimension_semantics<parallel>], iteration_bounds = array<i64: 2, 1>, scalar_prefetch = 0 : i64, scratch_operands = 0 : i64, tpu.core_type = #tpu.core_type<tc>, window_params = [{transform_indices = @transform_0, window_bounds = array<i64: 1, 16, 32>}, {transform_indices = @transform_1, window_bounds = array<i64: 1, 16, 32>}, {transform_indices = @transform_2, window_bounds = array<i64: 1, 1, 64>}, {pipeline_mode = #tpu.pipeline_mode<synchronous>, transform_indices = @transform_3, window_bounds = array<i64: 32, 64>}, {pipeline_mode = #tpu.pipeline_mode<synchronous>, transform_indices = @transform_4, window_bounds = array<i64: 32, 64>}, {pipeline_mode = #tpu.pipeline_mode<synchronous>, transform_indices = @transform_5, window_bounds = array<i64: 64, 32>}, {pipeline_mode = #tpu.pipeline_mode<synchronous>, transform_indices = @transform_6, window_bounds = array<i64: 1, 32>}, {transform_indices = @transform_7, window_bounds = array<i64: 1, 16, 32>}]} {
    %c0 = arith.constant 0 : index
    %c0_0 = arith.constant 0 : index
    %c0_1 = arith.constant 0 : index
    %0 = vector.load %arg2[%c0, %c0_0, %c0_1] : memref<1x16x32xbf16, #tpu.memory_space<vmem>>, vector<1x16x32xbf16>
    %1 = vector.shape_cast %0 : vector<1x16x32xbf16> to vector<16x32xbf16>
    %c0_2 = arith.constant 0 : index
    %c0_3 = arith.constant 0 : index
    %c0_4 = arith.constant 0 : index
    %2 = vector.load %arg3[%c0_2, %c0_3, %c0_4] : memref<1x16x32xbf16, #tpu.memory_space<vmem>>, vector<1x16x32xbf16>
    %3 = vector.shape_cast %2 : vector<1x16x32xbf16> to vector<16x32xbf16>
    %c0_5 = arith.constant 0 : index
    %c0_6 = arith.constant 0 : index
    %4 = vector.load %arg5[%c0_5, %c0_6] : memref<32x64xbf16, #tpu.memory_space<vmem>>, vector<32x64xbf16>
    %cst = arith.constant dense<0.000000e+00> : vector<16x64xf32>
    %5 = tpu.matmul %1, %4, %cst {dimension_numbers = #tpu.dot_dimension_numbers<[1], [0], [0], [1], [0, 0, 1, 1], [], []>} : vector<16x32xbf16>, vector<32x64xbf16>, vector<16x64xf32> -> vector<16x64xf32>
    %c0_7 = arith.constant 0 : index
    %c0_8 = arith.constant 0 : index
    %6 = vector.load %arg6[%c0_7, %c0_8] : memref<32x64xbf16, #tpu.memory_space<vmem>>, vector<32x64xbf16>
    %cst_9 = arith.constant dense<0.000000e+00> : vector<16x64xf32>
    %7 = tpu.matmul %3, %6, %cst_9 {dimension_numbers = #tpu.dot_dimension_numbers<[1], [0], [0], [1], [0, 0, 1, 1], [], []>} : vector<16x32xbf16>, vector<32x64xbf16>, vector<16x64xf32> -> vector<16x64xf32>
    %8 = arith.addf %5, %7 : vector<16x64xf32>
    %c0_10 = arith.constant 0 : index
    %c0_11 = arith.constant 0 : index
    %c0_12 = arith.constant 0 : index
    %9 = vector.load %arg4[%c0_10, %c0_11, %c0_12] : memref<1x1x64xf32, #tpu.memory_space<vmem>>, vector<1x1x64xf32>
    %10 = vector.shape_cast %9 : vector<1x1x64xf32> to vector<1x64xf32>
    %11 = vector.broadcast %10 : vector<1x64xf32> to vector<16x64xf32>
    %12 = arith.addf %8, %11 : vector<16x64xf32>
    %cst_13 = arith.constant 0.000000e+00 : f32
    %13 = vector.broadcast %cst_13 : f32 to vector<16x64xf32>
    %14 = arith.maximumf %12, %13 : vector<16x64xf32>
    %15 = arith.truncf %14 : vector<16x64xf32> to vector<16x64xbf16>
    %c0_14 = arith.constant 0 : index
    %c0_15 = arith.constant 0 : index
    %16 = vector.load %arg7[%c0_14, %c0_15] : memref<64x32xbf16, #tpu.memory_space<vmem>>, vector<64x32xbf16>
    %cst_16 = arith.constant dense<0.000000e+00> : vector<16x32xf32>
    %17 = tpu.matmul %15, %16, %cst_16 {dimension_numbers = #tpu.dot_dimension_numbers<[1], [0], [0], [1], [0, 0, 1, 1], [], []>} : vector<16x64xbf16>, vector<64x32xbf16>, vector<16x32xf32> -> vector<16x32xf32>
    %c0_17 = arith.constant 0 : index
    %c0_18 = arith.constant 0 : index
    %18 = vector.load %arg8[%c0_17, %c0_18] : memref<1x32xf32, #tpu.memory_space<vmem>>, vector<1x32xf32>
    %19 = vector.broadcast %18 : vector<1x32xf32> to vector<16x32xf32>
    %20 = arith.addf %17, %19 : vector<16x32xf32>
    %21 = arith.truncf %20 : vector<16x32xf32> to vector<16x32xbf16>
    %c0_19 = arith.constant 0 : index
    %c0_20 = arith.constant 0 : index
    %c0_21 = arith.constant 0 : index
    %22 = vector.load %arg9[%c0_19, %c0_20, %c0_21] : memref<1x16x32xbf16, #tpu.memory_space<vmem>>, vector<1x16x32xbf16>
    %23 = vector.shape_cast %22 : vector<1x16x32xbf16> to vector<16x32xbf16>
    %24 = vector.shape_cast %21 : vector<16x32xbf16> to vector<1x16x32xbf16>
    tpu.vector_store %arg9[%c0_19, %c0_20, %c0_21], %24 {strides = array<i32>} : memref<1x16x32xbf16, #tpu.memory_space<vmem>>, vector<1x16x32xbf16>,
    return
  }
  func.func @transform_0(%arg0: i32, %arg1: i32) -> (i32, i32, i32) {
    %c0_i32 = arith.constant 0 : i32
    %c0_i32_0 = arith.constant 0 : i32
    return %arg0, %arg1, %c0_i32 : i32, i32, i32
  }
  func.func @transform_1(%arg0: i32, %arg1: i32) -> (i32, i32, i32) {
    %c0_i32 = arith.constant 0 : i32
    %c0_i32_0 = arith.constant 0 : i32
    return %arg0, %arg1, %c0_i32 : i32, i32, i32
  }
  func.func @transform_2(%arg0: i32, %arg1: i32) -> (i32, i32, i32) {
    %c0_i32 = arith.constant 0 : i32
    %c0_i32_0 = arith.constant 0 : i32
    %c0_i32_1 = arith.constant 0 : i32
    return %arg0, %c0_i32, %c0_i32_0 : i32, i32, i32
  }
  func.func @transform_3(%arg0: i32, %arg1: i32) -> (i32, i32) {
    %c0_i32 = arith.constant 0 : i32
    %c0_i32_0 = arith.constant 0 : i32
    %c0_i32_1 = arith.constant 0 : i32
    return %c0_i32, %c0_i32_0 : i32, i32
  }
  func.func @transform_4(%arg0: i32, %arg1: i32) -> (i32, i32) {
    %c0_i32 = arith.constant 0 : i32
    %c0_i32_0 = arith.constant 0 : i32
    %c0_i32_1 = arith.constant 0 : i32
    return %c0_i32, %c0_i32_0 : i32, i32
  }
  func.func @transform_5(%arg0: i32, %arg1: i32) -> (i32, i32) {
    %c0_i32 = arith.constant 0 : i32
    %c0_i32_0 = arith.constant 0 : i32
    %c0_i32_1 = arith.constant 0 : i32
    return %c0_i32, %c0_i32_0 : i32, i32
  }
  func.func @transform_6(%arg0: i32, %arg1: i32) -> (i32, i32) {
    %c0_i32 = arith.constant 0 : i32
    %c0_i32_0 = arith.constant 0 : i32
    %c0_i32_1 = arith.constant 0 : i32
    return %c0_i32, %c0_i32_0 : i32, i32
  }
  func.func @transform_7(%arg0: i32, %arg1: i32) -> (i32, i32, i32) {
    %c0_i32 = arith.constant 0 : i32
    %c0_i32_0 = arith.constant 0 : i32
    return %arg0, %arg1, %c0_i32 : i32, i32, i32
  }
}

module attributes {stable_mosaic.version = 11 : i64} {
  func.func @_proj4_kernel(%arg0: i32, %arg1: memref<32x32xbf16, #tpu.memory_space<vmem>>, %arg2: memref<32x32xbf16, #tpu.memory_space<vmem>>, %arg3: memref<32x32xbf16, #tpu.memory_space<vmem>>, %arg4: memref<32x32xbf16, #tpu.memory_space<vmem>>, %arg5: memref<32x16xbf16, #tpu.memory_space<vmem>>, %arg6: memref<1x16xf32, #tpu.memory_space<vmem>>, %arg7: memref<32x16xbf16, #tpu.memory_space<vmem>>, %arg8: memref<1x16xf32, #tpu.memory_space<vmem>>, %arg9: memref<32x16xbf16, #tpu.memory_space<vmem>>, %arg10: memref<1x16xf32, #tpu.memory_space<vmem>>, %arg11: memref<32x16xbf16, #tpu.memory_space<vmem>>, %arg12: memref<1x16xf32, #tpu.memory_space<vmem>>, %arg13: memref<32x16xbf16, #tpu.memory_space<vmem>>, %arg14: memref<32x16xbf16, #tpu.memory_space<vmem>>, %arg15: memref<32x16xbf16, #tpu.memory_space<vmem>>, %arg16: memref<32x16xbf16, #tpu.memory_space<vmem>>) attributes {dimension_semantics = [#tpu.dimension_semantics<parallel>], iteration_bounds = array<i64: 1>, scalar_prefetch = 0 : i64, scratch_operands = 0 : i64, tpu.core_type = #tpu.core_type<tc>, window_params = [{transform_indices = @transform_0, window_bounds = array<i64: 32, 32>}, {transform_indices = @transform_1, window_bounds = array<i64: 32, 32>}, {transform_indices = @transform_2, window_bounds = array<i64: 32, 32>}, {transform_indices = @transform_3, window_bounds = array<i64: 32, 32>}, {pipeline_mode = #tpu.pipeline_mode<synchronous>, transform_indices = @transform_4, window_bounds = array<i64: 32, 16>}, {pipeline_mode = #tpu.pipeline_mode<synchronous>, transform_indices = @transform_5, window_bounds = array<i64: 1, 16>}, {pipeline_mode = #tpu.pipeline_mode<synchronous>, transform_indices = @transform_6, window_bounds = array<i64: 32, 16>}, {pipeline_mode = #tpu.pipeline_mode<synchronous>, transform_indices = @transform_7, window_bounds = array<i64: 1, 16>}, {pipeline_mode = #tpu.pipeline_mode<synchronous>, transform_indices = @transform_8, window_bounds = array<i64: 32, 16>}, {pipeline_mode = #tpu.pipeline_mode<synchronous>, transform_indices = @transform_9, window_bounds = array<i64: 1, 16>}, {pipeline_mode = #tpu.pipeline_mode<synchronous>, transform_indices = @transform_10, window_bounds = array<i64: 32, 16>}, {pipeline_mode = #tpu.pipeline_mode<synchronous>, transform_indices = @transform_11, window_bounds = array<i64: 1, 16>}, {transform_indices = @transform_12, window_bounds = array<i64: 32, 16>}, {transform_indices = @transform_13, window_bounds = array<i64: 32, 16>}, {transform_indices = @transform_14, window_bounds = array<i64: 32, 16>}, {transform_indices = @transform_15, window_bounds = array<i64: 32, 16>}]} {
    %c0 = arith.constant 0 : index
    %c0_0 = arith.constant 0 : index
    %0 = vector.load %arg1[%c0, %c0_0] : memref<32x32xbf16, #tpu.memory_space<vmem>>, vector<32x32xbf16>
    %c0_1 = arith.constant 0 : index
    %c0_2 = arith.constant 0 : index
    %1 = vector.load %arg5[%c0_1, %c0_2] : memref<32x16xbf16, #tpu.memory_space<vmem>>, vector<32x16xbf16>
    %cst = arith.constant dense<0.000000e+00> : vector<32x16xf32>
    %2 = tpu.matmul %0, %1, %cst {dimension_numbers = #tpu.dot_dimension_numbers<[1], [0], [0], [1], [0, 0, 1, 1], [], []>} : vector<32x32xbf16>, vector<32x16xbf16>, vector<32x16xf32> -> vector<32x16xf32>
    %c0_3 = arith.constant 0 : index
    %c0_4 = arith.constant 0 : index
    %3 = vector.load %arg6[%c0_3, %c0_4] : memref<1x16xf32, #tpu.memory_space<vmem>>, vector<1x16xf32>
    %4 = vector.broadcast %3 : vector<1x16xf32> to vector<32x16xf32>
    %5 = arith.addf %2, %4 : vector<32x16xf32>
    %6 = arith.truncf %5 : vector<32x16xf32> to vector<32x16xbf16>
    %c0_5 = arith.constant 0 : index
    %c0_6 = arith.constant 0 : index
    %7 = vector.load %arg13[%c0_5, %c0_6] : memref<32x16xbf16, #tpu.memory_space<vmem>>, vector<32x16xbf16>
    tpu.vector_store %arg13[%c0_5, %c0_6], %6 {strides = array<i32>} : memref<32x16xbf16, #tpu.memory_space<vmem>>, vector<32x16xbf16>,
    %c0_7 = arith.constant 0 : index
    %c0_8 = arith.constant 0 : index
    %8 = vector.load %arg2[%c0_7, %c0_8] : memref<32x32xbf16, #tpu.memory_space<vmem>>, vector<32x32xbf16>
    %c0_9 = arith.constant 0 : index
    %c0_10 = arith.constant 0 : index
    %9 = vector.load %arg7[%c0_9, %c0_10] : memref<32x16xbf16, #tpu.memory_space<vmem>>, vector<32x16xbf16>
    %cst_11 = arith.constant dense<0.000000e+00> : vector<32x16xf32>
    %10 = tpu.matmul %8, %9, %cst_11 {dimension_numbers = #tpu.dot_dimension_numbers<[1], [0], [0], [1], [0, 0, 1, 1], [], []>} : vector<32x32xbf16>, vector<32x16xbf16>, vector<32x16xf32> -> vector<32x16xf32>
    %c0_12 = arith.constant 0 : index
    %c0_13 = arith.constant 0 : index
    %11 = vector.load %arg8[%c0_12, %c0_13] : memref<1x16xf32, #tpu.memory_space<vmem>>, vector<1x16xf32>
    %12 = vector.broadcast %11 : vector<1x16xf32> to vector<32x16xf32>
    %13 = arith.addf %10, %12 : vector<32x16xf32>
    %14 = arith.truncf %13 : vector<32x16xf32> to vector<32x16xbf16>
    %c0_14 = arith.constant 0 : index
    %c0_15 = arith.constant 0 : index
    %15 = vector.load %arg14[%c0_14, %c0_15] : memref<32x16xbf16, #tpu.memory_space<vmem>>, vector<32x16xbf16>
    tpu.vector_store %arg14[%c0_14, %c0_15], %14 {strides = array<i32>} : memref<32x16xbf16, #tpu.memory_space<vmem>>, vector<32x16xbf16>,
    %c0_16 = arith.constant 0 : index
    %c0_17 = arith.constant 0 : index
    %16 = vector.load %arg3[%c0_16, %c0_17] : memref<32x32xbf16, #tpu.memory_space<vmem>>, vector<32x32xbf16>
    %c0_18 = arith.constant 0 : index
    %c0_19 = arith.constant 0 : index
    %17 = vector.load %arg9[%c0_18, %c0_19] : memref<32x16xbf16, #tpu.memory_space<vmem>>, vector<32x16xbf16>
    %cst_20 = arith.constant dense<0.000000e+00> : vector<32x16xf32>
    %18 = tpu.matmul %16, %17, %cst_20 {dimension_numbers = #tpu.dot_dimension_numbers<[1], [0], [0], [1], [0, 0, 1, 1], [], []>} : vector<32x32xbf16>, vector<32x16xbf16>, vector<32x16xf32> -> vector<32x16xf32>
    %c0_21 = arith.constant 0 : index
    %c0_22 = arith.constant 0 : index
    %19 = vector.load %arg10[%c0_21, %c0_22] : memref<1x16xf32, #tpu.memory_space<vmem>>, vector<1x16xf32>
    %20 = vector.broadcast %19 : vector<1x16xf32> to vector<32x16xf32>
    %21 = arith.addf %18, %20 : vector<32x16xf32>
    %22 = arith.truncf %21 : vector<32x16xf32> to vector<32x16xbf16>
    %c0_23 = arith.constant 0 : index
    %c0_24 = arith.constant 0 : index
    %23 = vector.load %arg15[%c0_23, %c0_24] : memref<32x16xbf16, #tpu.memory_space<vmem>>, vector<32x16xbf16>
    tpu.vector_store %arg15[%c0_23, %c0_24], %22 {strides = array<i32>} : memref<32x16xbf16, #tpu.memory_space<vmem>>, vector<32x16xbf16>,
    %c0_25 = arith.constant 0 : index
    %c0_26 = arith.constant 0 : index
    %24 = vector.load %arg4[%c0_25, %c0_26] : memref<32x32xbf16, #tpu.memory_space<vmem>>, vector<32x32xbf16>
    %c0_27 = arith.constant 0 : index
    %c0_28 = arith.constant 0 : index
    %25 = vector.load %arg11[%c0_27, %c0_28] : memref<32x16xbf16, #tpu.memory_space<vmem>>, vector<32x16xbf16>
    %cst_29 = arith.constant dense<0.000000e+00> : vector<32x16xf32>
    %26 = tpu.matmul %24, %25, %cst_29 {dimension_numbers = #tpu.dot_dimension_numbers<[1], [0], [0], [1], [0, 0, 1, 1], [], []>} : vector<32x32xbf16>, vector<32x16xbf16>, vector<32x16xf32> -> vector<32x16xf32>
    %c0_30 = arith.constant 0 : index
    %c0_31 = arith.constant 0 : index
    %27 = vector.load %arg12[%c0_30, %c0_31] : memref<1x16xf32, #tpu.memory_space<vmem>>, vector<1x16xf32>
    %28 = vector.broadcast %27 : vector<1x16xf32> to vector<32x16xf32>
    %29 = arith.addf %26, %28 : vector<32x16xf32>
    %30 = arith.truncf %29 : vector<32x16xf32> to vector<32x16xbf16>
    %c0_32 = arith.constant 0 : index
    %c0_33 = arith.constant 0 : index
    %31 = vector.load %arg16[%c0_32, %c0_33] : memref<32x16xbf16, #tpu.memory_space<vmem>>, vector<32x16xbf16>
    tpu.vector_store %arg16[%c0_32, %c0_33], %30 {strides = array<i32>} : memref<32x16xbf16, #tpu.memory_space<vmem>>, vector<32x16xbf16>,
    return
  }
  func.func @transform_0(%arg0: i32) -> (i32, i32) {
    %c0_i32 = arith.constant 0 : i32
    %c0_i32_0 = arith.constant 0 : i32
    return %arg0, %c0_i32 : i32, i32
  }
  func.func @transform_1(%arg0: i32) -> (i32, i32) {
    %c0_i32 = arith.constant 0 : i32
    %c0_i32_0 = arith.constant 0 : i32
    return %arg0, %c0_i32 : i32, i32
  }
  func.func @transform_2(%arg0: i32) -> (i32, i32) {
    %c0_i32 = arith.constant 0 : i32
    %c0_i32_0 = arith.constant 0 : i32
    return %arg0, %c0_i32 : i32, i32
  }
  func.func @transform_3(%arg0: i32) -> (i32, i32) {
    %c0_i32 = arith.constant 0 : i32
    %c0_i32_0 = arith.constant 0 : i32
    return %arg0, %c0_i32 : i32, i32
  }
  func.func @transform_4(%arg0: i32) -> (i32, i32) {
    %c0_i32 = arith.constant 0 : i32
    %c0_i32_0 = arith.constant 0 : i32
    %c0_i32_1 = arith.constant 0 : i32
    return %c0_i32, %c0_i32_0 : i32, i32
  }
  func.func @transform_5(%arg0: i32) -> (i32, i32) {
    %c0_i32 = arith.constant 0 : i32
    %c0_i32_0 = arith.constant 0 : i32
    %c0_i32_1 = arith.constant 0 : i32
    return %c0_i32, %c0_i32_0 : i32, i32
  }
  func.func @transform_6(%arg0: i32) -> (i32, i32) {
    %c0_i32 = arith.constant 0 : i32
    %c0_i32_0 = arith.constant 0 : i32
    %c0_i32_1 = arith.constant 0 : i32
    return %c0_i32, %c0_i32_0 : i32, i32
  }
  func.func @transform_7(%arg0: i32) -> (i32, i32) {
    %c0_i32 = arith.constant 0 : i32
    %c0_i32_0 = arith.constant 0 : i32
    %c0_i32_1 = arith.constant 0 : i32
    return %c0_i32, %c0_i32_0 : i32, i32
  }
  func.func @transform_8(%arg0: i32) -> (i32, i32) {
    %c0_i32 = arith.constant 0 : i32
    %c0_i32_0 = arith.constant 0 : i32
    %c0_i32_1 = arith.constant 0 : i32
    return %c0_i32, %c0_i32_0 : i32, i32
  }
  func.func @transform_9(%arg0: i32) -> (i32, i32) {
    %c0_i32 = arith.constant 0 : i32
    %c0_i32_0 = arith.constant 0 : i32
    %c0_i32_1 = arith.constant 0 : i32
    return %c0_i32, %c0_i32_0 : i32, i32
  }
  func.func @transform_10(%arg0: i32) -> (i32, i32) {
    %c0_i32 = arith.constant 0 : i32
    %c0_i32_0 = arith.constant 0 : i32
    %c0_i32_1 = arith.constant 0 : i32
    return %c0_i32, %c0_i32_0 : i32, i32
  }
  func.func @transform_11(%arg0: i32) -> (i32, i32) {
    %c0_i32 = arith.constant 0 : i32
    %c0_i32_0 = arith.constant 0 : i32
    %c0_i32_1 = arith.constant 0 : i32
    return %c0_i32, %c0_i32_0 : i32, i32
  }
  func.func @transform_12(%arg0: i32) -> (i32, i32) {
    %c0_i32 = arith.constant 0 : i32
    %c0_i32_0 = arith.constant 0 : i32
    return %arg0, %c0_i32 : i32, i32
  }
  func.func @transform_13(%arg0: i32) -> (i32, i32) {
    %c0_i32 = arith.constant 0 : i32
    %c0_i32_0 = arith.constant 0 : i32
    return %arg0, %c0_i32 : i32, i32
  }
  func.func @transform_14(%arg0: i32) -> (i32, i32) {
    %c0_i32 = arith.constant 0 : i32
    %c0_i32_0 = arith.constant 0 : i32
    return %arg0, %c0_i32 : i32, i32
  }
  func.func @transform_15(%arg0: i32) -> (i32, i32) {
    %c0_i32 = arith.constant 0 : i32
    %c0_i32_0 = arith.constant 0 : i32
    return %arg0, %c0_i32 : i32, i32
  }
}

module attributes {stable_mosaic.version = 11 : i64} {
  func.func @_sqdist_kernel(%arg0: i32, %arg1: i32, %arg2: i32, %arg3: memref<1x16x3xf32, #tpu.memory_space<vmem>>, %arg4: memref<1x3x16xf32, #tpu.memory_space<vmem>>, %arg5: memref<1x16x16xf32, #tpu.memory_space<vmem>>) attributes {dimension_semantics = [#tpu.dimension_semantics<parallel>, #tpu.dimension_semantics<parallel>, #tpu.dimension_semantics<parallel>], iteration_bounds = array<i64: 2, 1, 1>, scalar_prefetch = 0 : i64, scratch_operands = 0 : i64, tpu.core_type = #tpu.core_type<tc>, window_params = [{transform_indices = @transform_0, window_bounds = array<i64: 1, 16, 3>}, {transform_indices = @transform_1, window_bounds = array<i64: 1, 3, 16>}, {transform_indices = @transform_2, window_bounds = array<i64: 1, 16, 16>}]} {
    %c0 = arith.constant 0 : index
    %c0_0 = arith.constant 0 : index
    %c0_1 = arith.constant 0 : index
    %0 = vector.load %arg3[%c0, %c0_0, %c0_1] : memref<1x16x3xf32, #tpu.memory_space<vmem>>, vector<1x16x3xf32>
    %1 = vector.shape_cast %0 : vector<1x16x3xf32> to vector<16x3xf32>
    %c0_2 = arith.constant 0 : index
    %c0_3 = arith.constant 0 : index
    %c0_4 = arith.constant 0 : index
    %2 = vector.load %arg4[%c0_2, %c0_3, %c0_4] : memref<1x3x16xf32, #tpu.memory_space<vmem>>, vector<1x3x16xf32>
    %3 = vector.shape_cast %2 : vector<1x3x16xf32> to vector<3x16xf32>
    %4 = arith.mulf %1, %1 : vector<16x3xf32>
    %cst = arith.constant dense<0.000000e+00> : vector<16xf32>
    %5 = vector.multi_reduction <add>, %4, %cst [1] : vector<16x3xf32> to vector<16xf32>
    %6 = vector.shape_cast %5 : vector<16xf32> to vector<16x1xf32>
    %7 = arith.mulf %3, %3 : vector<3x16xf32>
    %cst_5 = arith.constant dense<0.000000e+00> : vector<16xf32>
    %8 = vector.multi_reduction <add>, %7, %cst_5 [0] : vector<3x16xf32> to vector<16xf32>
    %9 = vector.shape_cast %8 : vector<16xf32> to vector<1x16xf32>
    %10 = arith.truncf %1 : vector<16x3xf32> to vector<16x3xbf16>
    %11 = arith.truncf %3 : vector<3x16xf32> to vector<3x16xbf16>
    %cst_6 = arith.constant dense<0.000000e+00> : vector<16x16xf32>
    %12 = tpu.matmul %10, %11, %cst_6 {dimension_numbers = #tpu.dot_dimension_numbers<[1], [0], [0], [1], [0, 0, 1, 1], [], []>} : vector<16x3xbf16>, vector<3x16xbf16>, vector<16x16xf32> -> vector<16x16xf32>
    %13 = vector.broadcast %6 : vector<16x1xf32> to vector<16x16xf32>
    %14 = vector.broadcast %9 : vector<1x16xf32> to vector<16x16xf32>
    %15 = arith.addf %13, %14 : vector<16x16xf32>
    %cst_7 = arith.constant 2.000000e+00 : f32
    %16 = vector.broadcast %cst_7 : f32 to vector<16x16xf32>
    %17 = arith.mulf %16, %12 : vector<16x16xf32>
    %18 = arith.subf %15, %17 : vector<16x16xf32>
    %c0_8 = arith.constant 0 : index
    %c0_9 = arith.constant 0 : index
    %c0_10 = arith.constant 0 : index
    %19 = vector.load %arg5[%c0_8, %c0_9, %c0_10] : memref<1x16x16xf32, #tpu.memory_space<vmem>>, vector<1x16x16xf32>
    %20 = vector.shape_cast %19 : vector<1x16x16xf32> to vector<16x16xf32>
    %21 = vector.shape_cast %18 : vector<16x16xf32> to vector<1x16x16xf32>
    tpu.vector_store %arg5[%c0_8, %c0_9, %c0_10], %21 {strides = array<i32>} : memref<1x16x16xf32, #tpu.memory_space<vmem>>, vector<1x16x16xf32>,
    return
  }
  func.func @transform_0(%arg0: i32, %arg1: i32, %arg2: i32) -> (i32, i32, i32) {
    %c0_i32 = arith.constant 0 : i32
    %c0_i32_0 = arith.constant 0 : i32
    return %arg0, %arg1, %c0_i32 : i32, i32, i32
  }
  func.func @transform_1(%arg0: i32, %arg1: i32, %arg2: i32) -> (i32, i32, i32) {
    %c0_i32 = arith.constant 0 : i32
    %c0_i32_0 = arith.constant 0 : i32
    return %arg0, %c0_i32, %arg2 : i32, i32, i32
  }
  func.func @transform_2(%arg0: i32, %arg1: i32, %arg2: i32) -> (i32, i32, i32) {
    %c0_i32 = arith.constant 0 : i32
    return %arg0, %arg1, %arg2 : i32, i32, i32
  }
}

module attributes {stable_mosaic.version = 11 : i64} {
  func.func @_attn_kernel(%arg0: i32, %arg1: memref<32x3xf32, #tpu.memory_space<vmem>>, %arg2: memref<32x16xbf16, #tpu.memory_space<vmem>>, %arg3: memref<32x16xbf16, #tpu.memory_space<vmem>>, %arg4: memref<32x8x3xf32, #tpu.memory_space<vmem>>, %arg5: memref<32x8x16xbf16, #tpu.memory_space<vmem>>, %arg6: memref<32x8x16xbf16, #tpu.memory_space<vmem>>, %arg7: memref<32x8x16xbf16, #tpu.memory_space<vmem>>, %arg8: memref<32x32xbf16, #tpu.memory_space<vmem>>, %arg9: memref<3x64xbf16, #tpu.memory_space<vmem>>, %arg10: memref<1x64xf32, #tpu.memory_space<vmem>>, %arg11: memref<64x16xbf16, #tpu.memory_space<vmem>>, %arg12: memref<1x16xf32, #tpu.memory_space<vmem>>, %arg13: memref<16x64xbf16, #tpu.memory_space<vmem>>, %arg14: memref<1x64xf32, #tpu.memory_space<vmem>>, %arg15: memref<64x16xbf16, #tpu.memory_space<vmem>>, %arg16: memref<1x16xf32, #tpu.memory_space<vmem>>, %arg17: memref<16x32xbf16, #tpu.memory_space<vmem>>, %arg18: memref<1x32xf32, #tpu.memory_space<vmem>>, %arg19: memref<32x32xbf16, #tpu.memory_space<vmem>>) attributes {dimension_semantics = [#tpu.dimension_semantics<parallel>], iteration_bounds = array<i64: 1>, scalar_prefetch = 0 : i64, scratch_operands = 0 : i64, tpu.core_type = #tpu.core_type<tc>, window_params = [{transform_indices = @transform_0, window_bounds = array<i64: 32, 3>}, {transform_indices = @transform_1, window_bounds = array<i64: 32, 16>}, {transform_indices = @transform_2, window_bounds = array<i64: 32, 16>}, {transform_indices = @transform_3, window_bounds = array<i64: 32, 8, 3>}, {transform_indices = @transform_4, window_bounds = array<i64: 32, 8, 16>}, {transform_indices = @transform_5, window_bounds = array<i64: 32, 8, 16>}, {transform_indices = @transform_6, window_bounds = array<i64: 32, 8, 16>}, {transform_indices = @transform_7, window_bounds = array<i64: 32, 32>}, {pipeline_mode = #tpu.pipeline_mode<synchronous>, transform_indices = @transform_8, window_bounds = array<i64: 3, 64>}, {pipeline_mode = #tpu.pipeline_mode<synchronous>, transform_indices = @transform_9, window_bounds = array<i64: 1, 64>}, {pipeline_mode = #tpu.pipeline_mode<synchronous>, transform_indices = @transform_10, window_bounds = array<i64: 64, 16>}, {pipeline_mode = #tpu.pipeline_mode<synchronous>, transform_indices = @transform_11, window_bounds = array<i64: 1, 16>}, {pipeline_mode = #tpu.pipeline_mode<synchronous>, transform_indices = @transform_12, window_bounds = array<i64: 16, 64>}, {pipeline_mode = #tpu.pipeline_mode<synchronous>, transform_indices = @transform_13, window_bounds = array<i64: 1, 64>}, {pipeline_mode = #tpu.pipeline_mode<synchronous>, transform_indices = @transform_14, window_bounds = array<i64: 64, 16>}, {pipeline_mode = #tpu.pipeline_mode<synchronous>, transform_indices = @transform_15, window_bounds = array<i64: 1, 16>}, {pipeline_mode = #tpu.pipeline_mode<synchronous>, transform_indices = @transform_16, window_bounds = array<i64: 16, 32>}, {pipeline_mode = #tpu.pipeline_mode<synchronous>, transform_indices = @transform_17, window_bounds = array<i64: 1, 32>}, {transform_indices = @transform_18, window_bounds = array<i64: 32, 32>}]} {
    %c0 = arith.constant 0 : index
    %c0_0 = arith.constant 0 : index
    %0 = vector.load %arg1[%c0, %c0_0] : memref<32x3xf32, #tpu.memory_space<vmem>>, vector<32x3xf32>
    %c0_1 = arith.constant 0 : index
    %c0_2 = arith.constant 0 : index
    %c0_3 = arith.constant 0 : index
    %1 = vector.load %arg4[%c0_1, %c0_2, %c0_3] : memref<32x8x3xf32, #tpu.memory_space<vmem>>, vector<32x8x3xf32>
    %2 = vector.shape_cast %0 : vector<32x3xf32> to vector<32x1x3xf32>
    %3 = vector.broadcast %2 : vector<32x1x3xf32> to vector<32x8x3xf32>
    %4 = arith.subf %3, %1 : vector<32x8x3xf32>
    %5 = vector.shape_cast %4 : vector<32x8x3xf32> to vector<256x3xf32>
    %6 = arith.truncf %5 : vector<256x3xf32> to vector<256x3xbf16>
    %c0_4 = arith.constant 0 : index
    %c0_5 = arith.constant 0 : index
    %7 = vector.load %arg9[%c0_4, %c0_5] : memref<3x64xbf16, #tpu.memory_space<vmem>>, vector<3x64xbf16>
    %cst = arith.constant dense<0.000000e+00> : vector<256x64xf32>
    %8 = tpu.matmul %6, %7, %cst {dimension_numbers = #tpu.dot_dimension_numbers<[1], [0], [0], [1], [0, 0, 1, 1], [], []>} : vector<256x3xbf16>, vector<3x64xbf16>, vector<256x64xf32> -> vector<256x64xf32>
    %c0_6 = arith.constant 0 : index
    %c0_7 = arith.constant 0 : index
    %9 = vector.load %arg10[%c0_6, %c0_7] : memref<1x64xf32, #tpu.memory_space<vmem>>, vector<1x64xf32>
    %10 = vector.broadcast %9 : vector<1x64xf32> to vector<256x64xf32>
    %11 = arith.addf %8, %10 : vector<256x64xf32>
    %cst_8 = arith.constant 0.000000e+00 : f32
    %12 = vector.broadcast %cst_8 : f32 to vector<256x64xf32>
    %13 = arith.maximumf %11, %12 : vector<256x64xf32>
    %14 = arith.truncf %13 : vector<256x64xf32> to vector<256x64xbf16>
    %c0_9 = arith.constant 0 : index
    %c0_10 = arith.constant 0 : index
    %15 = vector.load %arg11[%c0_9, %c0_10] : memref<64x16xbf16, #tpu.memory_space<vmem>>, vector<64x16xbf16>
    %cst_11 = arith.constant dense<0.000000e+00> : vector<256x16xf32>
    %16 = tpu.matmul %14, %15, %cst_11 {dimension_numbers = #tpu.dot_dimension_numbers<[1], [0], [0], [1], [0, 0, 1, 1], [], []>} : vector<256x64xbf16>, vector<64x16xbf16>, vector<256x16xf32> -> vector<256x16xf32>
    %c0_12 = arith.constant 0 : index
    %c0_13 = arith.constant 0 : index
    %17 = vector.load %arg12[%c0_12, %c0_13] : memref<1x16xf32, #tpu.memory_space<vmem>>, vector<1x16xf32>
    %18 = vector.broadcast %17 : vector<1x16xf32> to vector<256x16xf32>
    %19 = arith.addf %16, %18 : vector<256x16xf32>
    %c0_14 = arith.constant 0 : index
    %c0_15 = arith.constant 0 : index
    %20 = vector.load %arg2[%c0_14, %c0_15] : memref<32x16xbf16, #tpu.memory_space<vmem>>, vector<32x16xbf16>
    %21 = arith.extf %20 : vector<32x16xbf16> to vector<32x16xf32>
    %c0_16 = arith.constant 0 : index
    %c0_17 = arith.constant 0 : index
    %22 = vector.load %arg3[%c0_16, %c0_17] : memref<32x16xbf16, #tpu.memory_space<vmem>>, vector<32x16xbf16>
    %23 = arith.extf %22 : vector<32x16xbf16> to vector<32x16xf32>
    %c0_18 = arith.constant 0 : index
    %c0_19 = arith.constant 0 : index
    %c0_20 = arith.constant 0 : index
    %24 = vector.load %arg5[%c0_18, %c0_19, %c0_20] : memref<32x8x16xbf16, #tpu.memory_space<vmem>>, vector<32x8x16xbf16>
    %25 = arith.extf %24 : vector<32x8x16xbf16> to vector<32x8x16xf32>
    %c0_21 = arith.constant 0 : index
    %c0_22 = arith.constant 0 : index
    %c0_23 = arith.constant 0 : index
    %26 = vector.load %arg7[%c0_21, %c0_22, %c0_23] : memref<32x8x16xbf16, #tpu.memory_space<vmem>>, vector<32x8x16xbf16>
    %27 = arith.extf %26 : vector<32x8x16xbf16> to vector<32x8x16xf32>
    %c0_24 = arith.constant 0 : index
    %c0_25 = arith.constant 0 : index
    %c0_26 = arith.constant 0 : index
    %28 = vector.load %arg6[%c0_24, %c0_25, %c0_26] : memref<32x8x16xbf16, #tpu.memory_space<vmem>>, vector<32x8x16xbf16>
    %29 = arith.extf %28 : vector<32x8x16xbf16> to vector<32x8x16xf32>
    %30 = vector.shape_cast %21 : vector<32x16xf32> to vector<32x1x16xf32>
    %31 = vector.broadcast %30 : vector<32x1x16xf32> to vector<32x8x16xf32>
    %32 = arith.subf %31, %25 : vector<32x8x16xf32>
    %33 = vector.shape_cast %32 : vector<32x8x16xf32> to vector<256x16xf32>
    %34 = vector.shape_cast %23 : vector<32x16xf32> to vector<32x1x16xf32>
    %35 = vector.broadcast %34 : vector<32x1x16xf32> to vector<32x8x16xf32>
    %36 = arith.subf %35, %27 : vector<32x8x16xf32>
    %37 = vector.shape_cast %36 : vector<32x8x16xf32> to vector<256x16xf32>
    %38 = arith.addf %19, %37 : vector<256x16xf32>
    %39 = arith.addf %33, %38 : vector<256x16xf32>
    %40 = arith.truncf %39 : vector<256x16xf32> to vector<256x16xbf16>
    %c0_27 = arith.constant 0 : index
    %c0_28 = arith.constant 0 : index
    %41 = vector.load %arg13[%c0_27, %c0_28] : memref<16x64xbf16, #tpu.memory_space<vmem>>, vector<16x64xbf16>
    %cst_29 = arith.constant dense<0.000000e+00> : vector<256x64xf32>
    %42 = tpu.matmul %40, %41, %cst_29 {dimension_numbers = #tpu.dot_dimension_numbers<[1], [0], [0], [1], [0, 0, 1, 1], [], []>} : vector<256x16xbf16>, vector<16x64xbf16>, vector<256x64xf32> -> vector<256x64xf32>
    %c0_30 = arith.constant 0 : index
    %c0_31 = arith.constant 0 : index
    %43 = vector.load %arg14[%c0_30, %c0_31] : memref<1x64xf32, #tpu.memory_space<vmem>>, vector<1x64xf32>
    %44 = vector.broadcast %43 : vector<1x64xf32> to vector<256x64xf32>
    %45 = arith.addf %42, %44 : vector<256x64xf32>
    %cst_32 = arith.constant 0.000000e+00 : f32
    %46 = vector.broadcast %cst_32 : f32 to vector<256x64xf32>
    %47 = arith.maximumf %45, %46 : vector<256x64xf32>
    %48 = arith.truncf %47 : vector<256x64xf32> to vector<256x64xbf16>
    %c0_33 = arith.constant 0 : index
    %c0_34 = arith.constant 0 : index
    %49 = vector.load %arg15[%c0_33, %c0_34] : memref<64x16xbf16, #tpu.memory_space<vmem>>, vector<64x16xbf16>
    %cst_35 = arith.constant dense<0.000000e+00> : vector<256x16xf32>
    %50 = tpu.matmul %48, %49, %cst_35 {dimension_numbers = #tpu.dot_dimension_numbers<[1], [0], [0], [1], [0, 0, 1, 1], [], []>} : vector<256x64xbf16>, vector<64x16xbf16>, vector<256x16xf32> -> vector<256x16xf32>
    %c0_36 = arith.constant 0 : index
    %c0_37 = arith.constant 0 : index
    %51 = vector.load %arg16[%c0_36, %c0_37] : memref<1x16xf32, #tpu.memory_space<vmem>>, vector<1x16xf32>
    %52 = vector.broadcast %51 : vector<1x16xf32> to vector<256x16xf32>
    %53 = arith.addf %50, %52 : vector<256x16xf32>
    %54 = vector.shape_cast %53 : vector<256x16xf32> to vector<32x8x16xf32>
    %cst_38 = arith.constant dense<0xFF800000> : vector<32x16xf32>
    %55 = vector.multi_reduction <maximumf>, %54, %cst_38 [1] : vector<32x8x16xf32> to vector<32x16xf32>
    %56 = vector.shape_cast %55 : vector<32x16xf32> to vector<32x1x16xf32>
    %57 = vector.broadcast %56 : vector<32x1x16xf32> to vector<32x8x16xf32>
    %58 = arith.subf %54, %57 : vector<32x8x16xf32>
    %59 = math.exp %58 : vector<32x8x16xf32>
    %cst_39 = arith.constant dense<0.000000e+00> : vector<32x16xf32>
    %60 = vector.multi_reduction <add>, %59, %cst_39 [1] : vector<32x8x16xf32> to vector<32x16xf32>
    %61 = vector.shape_cast %60 : vector<32x16xf32> to vector<32x1x16xf32>
    %62 = vector.broadcast %61 : vector<32x1x16xf32> to vector<32x8x16xf32>
    %63 = arith.divf %59, %62 : vector<32x8x16xf32>
    %64 = vector.shape_cast %38 : vector<256x16xf32> to vector<32x8x16xf32>
    %65 = arith.addf %29, %64 : vector<32x8x16xf32>
    %66 = arith.mulf %63, %65 : vector<32x8x16xf32>
    %cst_40 = arith.constant dense<0.000000e+00> : vector<32x16xf32>
    %67 = vector.multi_reduction <add>, %66, %cst_40 [1] : vector<32x8x16xf32> to vector<32x16xf32>
    %68 = arith.truncf %67 : vector<32x16xf32> to vector<32x16xbf16>
    %c0_41 = arith.constant 0 : index
    %c0_42 = arith.constant 0 : index
    %69 = vector.load %arg17[%c0_41, %c0_42] : memref<16x32xbf16, #tpu.memory_space<vmem>>, vector<16x32xbf16>
    %cst_43 = arith.constant dense<0.000000e+00> : vector<32x32xf32>
    %70 = tpu.matmul %68, %69, %cst_43 {dimension_numbers = #tpu.dot_dimension_numbers<[1], [0], [0], [1], [0, 0, 1, 1], [], []>} : vector<32x16xbf16>, vector<16x32xbf16>, vector<32x32xf32> -> vector<32x32xf32>
    %c0_44 = arith.constant 0 : index
    %c0_45 = arith.constant 0 : index
    %71 = vector.load %arg18[%c0_44, %c0_45] : memref<1x32xf32, #tpu.memory_space<vmem>>, vector<1x32xf32>
    %72 = vector.broadcast %71 : vector<1x32xf32> to vector<32x32xf32>
    %73 = arith.addf %70, %72 : vector<32x32xf32>
    %c0_46 = arith.constant 0 : index
    %c0_47 = arith.constant 0 : index
    %74 = vector.load %arg8[%c0_46, %c0_47] : memref<32x32xbf16, #tpu.memory_space<vmem>>, vector<32x32xbf16>
    %75 = arith.extf %74 : vector<32x32xbf16> to vector<32x32xf32>
    %76 = arith.addf %73, %75 : vector<32x32xf32>
    %77 = arith.truncf %76 : vector<32x32xf32> to vector<32x32xbf16>
    %c0_48 = arith.constant 0 : index
    %c0_49 = arith.constant 0 : index
    %78 = vector.load %arg19[%c0_48, %c0_49] : memref<32x32xbf16, #tpu.memory_space<vmem>>, vector<32x32xbf16>
    tpu.vector_store %arg19[%c0_48, %c0_49], %77 {strides = array<i32>} : memref<32x32xbf16, #tpu.memory_space<vmem>>, vector<32x32xbf16>,
    return
  }
  func.func @transform_0(%arg0: i32) -> (i32, i32) {
    %c0_i32 = arith.constant 0 : i32
    %c0_i32_0 = arith.constant 0 : i32
    return %arg0, %c0_i32 : i32, i32
  }
  func.func @transform_1(%arg0: i32) -> (i32, i32) {
    %c0_i32 = arith.constant 0 : i32
    %c0_i32_0 = arith.constant 0 : i32
    return %arg0, %c0_i32 : i32, i32
  }
  func.func @transform_2(%arg0: i32) -> (i32, i32) {
    %c0_i32 = arith.constant 0 : i32
    %c0_i32_0 = arith.constant 0 : i32
    return %arg0, %c0_i32 : i32, i32
  }
  func.func @transform_3(%arg0: i32) -> (i32, i32, i32) {
    %c0_i32 = arith.constant 0 : i32
    %c0_i32_0 = arith.constant 0 : i32
    %c0_i32_1 = arith.constant 0 : i32
    return %arg0, %c0_i32, %c0_i32_0 : i32, i32, i32
  }
  func.func @transform_4(%arg0: i32) -> (i32, i32, i32) {
    %c0_i32 = arith.constant 0 : i32
    %c0_i32_0 = arith.constant 0 : i32
    %c0_i32_1 = arith.constant 0 : i32
    return %arg0, %c0_i32, %c0_i32_0 : i32, i32, i32
  }
  func.func @transform_5(%arg0: i32) -> (i32, i32, i32) {
    %c0_i32 = arith.constant 0 : i32
    %c0_i32_0 = arith.constant 0 : i32
    %c0_i32_1 = arith.constant 0 : i32
    return %arg0, %c0_i32, %c0_i32_0 : i32, i32, i32
  }
  func.func @transform_6(%arg0: i32) -> (i32, i32, i32) {
    %c0_i32 = arith.constant 0 : i32
    %c0_i32_0 = arith.constant 0 : i32
    %c0_i32_1 = arith.constant 0 : i32
    return %arg0, %c0_i32, %c0_i32_0 : i32, i32, i32
  }
  func.func @transform_7(%arg0: i32) -> (i32, i32) {
    %c0_i32 = arith.constant 0 : i32
    %c0_i32_0 = arith.constant 0 : i32
    return %arg0, %c0_i32 : i32, i32
  }
  func.func @transform_8(%arg0: i32) -> (i32, i32) {
    %c0_i32 = arith.constant 0 : i32
    %c0_i32_0 = arith.constant 0 : i32
    %c0_i32_1 = arith.constant 0 : i32
    return %c0_i32, %c0_i32_0 : i32, i32
  }
  func.func @transform_9(%arg0: i32) -> (i32, i32) {
    %c0_i32 = arith.constant 0 : i32
    %c0_i32_0 = arith.constant 0 : i32
    %c0_i32_1 = arith.constant 0 : i32
    return %c0_i32, %c0_i32_0 : i32, i32
  }
  func.func @transform_10(%arg0: i32) -> (i32, i32) {
    %c0_i32 = arith.constant 0 : i32
    %c0_i32_0 = arith.constant 0 : i32
    %c0_i32_1 = arith.constant 0 : i32
    return %c0_i32, %c0_i32_0 : i32, i32
  }
  func.func @transform_11(%arg0: i32) -> (i32, i32) {
    %c0_i32 = arith.constant 0 : i32
    %c0_i32_0 = arith.constant 0 : i32
    %c0_i32_1 = arith.constant 0 : i32
    return %c0_i32, %c0_i32_0 : i32, i32
  }
  func.func @transform_12(%arg0: i32) -> (i32, i32) {
    %c0_i32 = arith.constant 0 : i32
    %c0_i32_0 = arith.constant 0 : i32
    %c0_i32_1 = arith.constant 0 : i32
    return %c0_i32, %c0_i32_0 : i32, i32
  }
  func.func @transform_13(%arg0: i32) -> (i32, i32) {
    %c0_i32 = arith.constant 0 : i32
    %c0_i32_0 = arith.constant 0 : i32
    %c0_i32_1 = arith.constant 0 : i32
    return %c0_i32, %c0_i32_0 : i32, i32
  }
  func.func @transform_14(%arg0: i32) -> (i32, i32) {
    %c0_i32 = arith.constant 0 : i32
    %c0_i32_0 = arith.constant 0 : i32
    %c0_i32_1 = arith.constant 0 : i32
    return %c0_i32, %c0_i32_0 : i32, i32
  }
  func.func @transform_15(%arg0: i32) -> (i32, i32) {
    %c0_i32 = arith.constant 0 : i32
    %c0_i32_0 = arith.constant 0 : i32
    %c0_i32_1 = arith.constant 0 : i32
    return %c0_i32, %c0_i32_0 : i32, i32
  }
  func.func @transform_16(%arg0: i32) -> (i32, i32) {
    %c0_i32 = arith.constant 0 : i32
    %c0_i32_0 = arith.constant 0 : i32
    %c0_i32_1 = arith.constant 0 : i32
    return %c0_i32, %c0_i32_0 : i32, i32
  }
  func.func @transform_17(%arg0: i32) -> (i32, i32) {
    %c0_i32 = arith.constant 0 : i32
    %c0_i32_0 = arith.constant 0 : i32
    %c0_i32_1 = arith.constant 0 : i32
    return %c0_i32, %c0_i32_0 : i32, i32
  }
  func.func @transform_18(%arg0: i32) -> (i32, i32) {
    %c0_i32 = arith.constant 0 : i32
    %c0_i32_0 = arith.constant 0 : i32
    return %arg0, %c0_i32 : i32, i32
  }
}

module attributes {stable_mosaic.version = 11 : i64} {
  func.func @_mlp2_kernel(%arg0: i32, %arg1: memref<32x32xbf16, #tpu.memory_space<vmem>>, %arg2: memref<32x16xbf16, #tpu.memory_space<vmem>>, %arg3: memref<1x16xf32, #tpu.memory_space<vmem>>, %arg4: memref<16x3xbf16, #tpu.memory_space<vmem>>, %arg5: memref<1x3xf32, #tpu.memory_space<vmem>>, %arg6: memref<32x3xf32, #tpu.memory_space<vmem>>) attributes {dimension_semantics = [#tpu.dimension_semantics<parallel>], iteration_bounds = array<i64: 1>, scalar_prefetch = 0 : i64, scratch_operands = 0 : i64, tpu.core_type = #tpu.core_type<tc>, window_params = [{transform_indices = @transform_0, window_bounds = array<i64: 32, 32>}, {pipeline_mode = #tpu.pipeline_mode<synchronous>, transform_indices = @transform_1, window_bounds = array<i64: 32, 16>}, {pipeline_mode = #tpu.pipeline_mode<synchronous>, transform_indices = @transform_2, window_bounds = array<i64: 1, 16>}, {pipeline_mode = #tpu.pipeline_mode<synchronous>, transform_indices = @transform_3, window_bounds = array<i64: 16, 3>}, {pipeline_mode = #tpu.pipeline_mode<synchronous>, transform_indices = @transform_4, window_bounds = array<i64: 1, 3>}, {transform_indices = @transform_5, window_bounds = array<i64: 32, 3>}]} {
    %c0 = arith.constant 0 : index
    %c0_0 = arith.constant 0 : index
    %0 = vector.load %arg1[%c0, %c0_0] : memref<32x32xbf16, #tpu.memory_space<vmem>>, vector<32x32xbf16>
    %c0_1 = arith.constant 0 : index
    %c0_2 = arith.constant 0 : index
    %1 = vector.load %arg2[%c0_1, %c0_2] : memref<32x16xbf16, #tpu.memory_space<vmem>>, vector<32x16xbf16>
    %cst = arith.constant dense<0.000000e+00> : vector<32x16xf32>
    %2 = tpu.matmul %0, %1, %cst {dimension_numbers = #tpu.dot_dimension_numbers<[1], [0], [0], [1], [0, 0, 1, 1], [], []>} : vector<32x32xbf16>, vector<32x16xbf16>, vector<32x16xf32> -> vector<32x16xf32>
    %c0_3 = arith.constant 0 : index
    %c0_4 = arith.constant 0 : index
    %3 = vector.load %arg3[%c0_3, %c0_4] : memref<1x16xf32, #tpu.memory_space<vmem>>, vector<1x16xf32>
    %4 = vector.broadcast %3 : vector<1x16xf32> to vector<32x16xf32>
    %5 = arith.addf %2, %4 : vector<32x16xf32>
    %cst_5 = arith.constant 0.000000e+00 : f32
    %6 = vector.broadcast %cst_5 : f32 to vector<32x16xf32>
    %7 = arith.maximumf %5, %6 : vector<32x16xf32>
    %8 = arith.truncf %7 : vector<32x16xf32> to vector<32x16xbf16>
    %c0_6 = arith.constant 0 : index
    %c0_7 = arith.constant 0 : index
    %9 = vector.load %arg4[%c0_6, %c0_7] : memref<16x3xbf16, #tpu.memory_space<vmem>>, vector<16x3xbf16>
    %cst_8 = arith.constant dense<0.000000e+00> : vector<32x3xf32>
    %10 = tpu.matmul %8, %9, %cst_8 {dimension_numbers = #tpu.dot_dimension_numbers<[1], [0], [0], [1], [0, 0, 1, 1], [], []>} : vector<32x16xbf16>, vector<16x3xbf16>, vector<32x3xf32> -> vector<32x3xf32>
    %c0_9 = arith.constant 0 : index
    %c0_10 = arith.constant 0 : index
    %11 = vector.load %arg5[%c0_9, %c0_10] : memref<1x3xf32, #tpu.memory_space<vmem>>, vector<1x3xf32>
    %12 = vector.broadcast %11 : vector<1x3xf32> to vector<32x3xf32>
    %13 = arith.addf %10, %12 : vector<32x3xf32>
    %c0_11 = arith.constant 0 : index
    %c0_12 = arith.constant 0 : index
    %14 = vector.load %arg6[%c0_11, %c0_12] : memref<32x3xf32, #tpu.memory_space<vmem>>, vector<32x3xf32>
    tpu.vector_store %arg6[%c0_11, %c0_12], %13 {strides = array<i32>} : memref<32x3xf32, #tpu.memory_space<vmem>>, vector<32x3xf32>,
    return
  }
  func.func @transform_0(%arg0: i32) -> (i32, i32) {
    %c0_i32 = arith.constant 0 : i32
    %c0_i32_0 = arith.constant 0 : i32
    return %arg0, %c0_i32 : i32, i32
  }
  func.func @transform_1(%arg0: i32) -> (i32, i32) {
    %c0_i32 = arith.constant 0 : i32
    %c0_i32_0 = arith.constant 0 : i32
    %c0_i32_1 = arith.constant 0 : i32
    return %c0_i32, %c0_i32_0 : i32, i32
  }
  func.func @transform_2(%arg0: i32) -> (i32, i32) {
    %c0_i32 = arith.constant 0 : i32
    %c0_i32_0 = arith.constant 0 : i32
    %c0_i32_1 = arith.constant 0 : i32
    return %c0_i32, %c0_i32_0 : i32, i32
  }
  func.func @transform_3(%arg0: i32) -> (i32, i32) {
    %c0_i32 = arith.constant 0 : i32
    %c0_i32_0 = arith.constant 0 : i32
    %c0_i32_1 = arith.constant 0 : i32
    return %c0_i32, %c0_i32_0 : i32, i32
  }
  func.func @transform_4(%arg0: i32) -> (i32, i32) {
    %c0_i32 = arith.constant 0 : i32
    %c0_i32_0 = arith.constant 0 : i32
    %c0_i32_1 = arith.constant 0 : i32
    return %c0_i32, %c0_i32_0 : i32, i32
  }
  func.func @transform_5(%arg0: i32) -> (i32, i32) {
    %c0_i32 = arith.constant 0 : i32
    %c0_i32_0 = arith.constant 0 : i32
    return %arg0, %c0_i32 : i32, i32
  }
}

</mosaic_0001>

<bundles_post_ra>
// kernel: neg.3
= control target key start
LH: loop header
LB: loop body
LE: loop exit
PB: predicated region body
PF: predicated region fallthrough
CT: control target
= control target key end

     0   :  { %s72_s0 = inlined_call_operand.vmem [shape: f32[2,16,8], index: 0, kind: input, shape index: {}]   ;;  %s73_s1 = inlined_call_operand.vmem [shape: f32[2,16,8], index: 1, kind: output, shape index: {}]  }
   0x1   :  { %v2_v0 = vld [vmem:[%s72_s0] sm:$0xff]  ;;  %v32_v1 = vld [vmem:[%s72_s0 + $0x10] sm:$0xff]  ;;  %v34_v2 = vld [vmem:[%s72_s0 + $0x8] sm:$0xff] }
   0x2   :  { %v5_v3 = vxor.u32 2147483648, %v2_v0  ;;  %v12_v4 = vxor.u32 2147483648, %v32_v1  ;;  %v20_v5 = vxor.u32 2147483648, %v34_v2  ;;  %v36_v6 = vld [vmem:[%s72_s0 + $0x18] sm:$0xff] }
   0x3   :  { %v28_v7 = vxor.u32 2147483648, %v36_v6 }
   0x4   :  { %7 = vst [vmem:[%s73_s1] sm:$0xff] %v5_v3 }
   0x5   :  { %33 = vst [vmem:[%s73_s1 + $0x10] sm:$0xff] %v12_v4 }
   0x6   :  { %35 = vst [vmem:[%s73_s1 + $0x8] sm:$0xff] %v20_v5 }
   0x7   :  { %37 = vst [vmem:[%s73_s1 + $0x18] sm:$0xff] %v28_v7 }

// kernel: normal_estimator_forward.9
= control target key start
LH: loop header
LB: loop body
LE: loop exit
PB: predicated region body
PF: predicated region fallthrough
CT: control target
= control target key end

     0   :  { %s478_s9 = smov 0   ;;  %s480_s10 = smov 0   ;;  %s522_s0 = inlined_call_operand.vmem [shape: f32[2,16,3], index: 0, kind: input, shape index: {}]   ;;  %s523_s1 = inlined_call_operand.vmem [shape: f32[2,3,8], index: 1, kind: input, shape index: {}]   ;;  %s524_s2 = inlined_call_operand.vmem [shape: f32[2,16,8], index: 2, kind: output, shape index: {}]  }
   0x1   :  { %s482_s11 = smov 0  }
   0x2 LB: > { %s31_s12 = sadd.s32 1, %s456_s10  ;;  %p402_p0 = scmp.ge.s32.totalorder %s460_s11, 1  ;;  %s460_s11 = sphi %s482_s11, %s12_s11   ;;  %s456_s10 = sphi %s480_s10, %s526_s10   ;;  %s452_s9 = sphi %s478_s9, %s525_s9  }
   0x3   : > { %p33_p1 = scmp.ge.s32.totalorder %s31_s12, 2  ;;  %p156_p2 = scmp.lt.s32.totalorder %s460_s11, 3 }
   0x5   : > { %s528_s12 = smov (%p33_p1, %s31_s12), 0  ;;  %p157_p3 = pnand %p402_p0, %p156_p2 }
   0x6   : > { %p197_p4 = scmp.lt.s32.totalorder (!%p157_p3), %s452_s9, 1 }
   0x7   : > { %160 = sbr.rel (%p157_p3) target bundleno = 162 (0xa2), region = 28 }
   0xc   : > { %vm253_vm0 = vcmask 1040384   ;;  %s530_s9 = smov (!%p197_p4, %s452_s9), 1  ;;  %vm254_vm1 = vcmask 1041408   ;;  %v462_v0 = vmov 65535   ;;  %vm232_vm2 = vcmask 23552  }
   0xd   : > { %v255_v1 = vsel %vm253_vm0, 4294967295, %v462_v0  ;;  %s405_s13 = sshll.u32 %s530_s9, 2  ;;  %s411_s14 = sshll.u32 %s530_s9, 4  ;;  %vm240_vm3 = vcmask 59392   ;;  %vm280_vm4 = vcmask 64512  }
   0xe   : > { %s212_s17 = scalar_lea.vmem %s523_s1, %s405_s13  ;;  %s204_s20 = scalar_lea.vmem %s522_s0, %s411_s14  ;;  %v256_v3 = vsel %vm254_vm1, %v255_v1, 0 }
   0xf   : > { %v229_v2 = vld [vmem:[%s212_s17] sm:$0x7]  ;;  %v228_v6 = vld [vmem:[%s204_s20 + $0x8] sm:$0xff]  ;;  %s224_s23 = scalar_lea.vmem %s524_s2, %s411_s14 }
  0x10   : > { %v227_v4 = vld [vmem:[%s204_s20] sm:$0xff]  ;;  %v249_v5 = vpack.c.bf16 %v229_v2, %v229_v2  ;;  %v231_v11 = vmul.f32 %v228_v6, %v228_v6  ;;  %v239_v13 = vmul.f32 %v229_v2, %v229_v2 }
  0x11   : > { %v230_v7 = vmul.f32 %v227_v4, %v227_v4  ;;  %v248_v10 = vpack.c.bf16 %v228_v6, %v227_v4 }
  0x12   : > { %v258_v8 = vand.u32 %v256_v3, %v249_v5  ;;  %v236_v12 = vsel %vm232_vm2, %v231_v11, 0.0  ;;  %v241_v14 = vsel %vm240_vm3, %v239_v13, 0.0 }
  0x13   : > { %v233_v9 = vsel %vm232_vm2, %v230_v7, 0.0  ;;  %v242_v15 = vrot.slane %v241_v14, 4 }
  0x14   : > { %234 = vadd.xlane.f32.xlu0 %v233_v9  ;;  %267 = vmatpush.bf16.msra.mxu0 %v258_v8 }
  0x15   : > { %v243_v16 = vadd.f32 %v242_v15, %v241_v14 }
  0x17   : > { %408 = vmatmul.msk.bf16.vlgmr.msra.gmra.mxu0 %vm232_vm2, %v248_v10  ;;  %v244_v17 = vrot.slane %v243_v16, 2 }
  0x19   : > { %v245_v18 = vadd.f32 %v244_v17, %v243_v16 }
  0x1b   : > { %v246_v19 = vrot.slane %v245_v18, 1 }
  0x1c   : > { %237 = vadd.xlane.f32.xlu0 %v236_v12 }
  0x1d   : > { %v247_v21 = vadd.f32 %v246_v19, %v245_v18 }
  0x87   : > { %v235_v20 = vpop.xlane.xlu0 %234 }
  0x88   : > { %v274_v22 = vadd.f32 %v247_v21, %v235_v20 }
  0x8f   : > { %v238_v26 = vpop.xlane.xlu0 %237 }
  0x90   : > { %v275_v27 = vadd.f32 %v247_v21, %v238_v26 }
  0x94   : > { %v269_v23 = vpop.f32.mrf.mxu0 }
  0x95   : > { %v276_v24 = vmul.f32 2.0, %v269_v23 }
  0x97   : > { %v278_v25 = vsub.f32 %v274_v22, %v276_v24 }
  0x99   : > { %281 = vst.msk [vmem:[%s224_s23] sm:$0xff] %vm280_vm4, %v278_v25 }
  0x9c   : > { %v271_v28 = vpop.f32.mrf.mxu0 }
  0x9d   : > { %v277_v29 = vmul.f32 2.0, %v271_v28 }
  0x9f   : > { %v279_v30 = vsub.f32 %v275_v27, %v277_v29 }
  0xa1   : > { %282 = vst.msk [vmem:[%s224_s23 + $0x8] sm:$0xff] %vm280_vm4, %v279_v30 }
  0xa2 PF: > { %s12_s11 = sadd.s32 1, %s460_s11   ;;  %s525_s9 = smov %s456_s10 }
  0xa3   : > { %p9_p5 = scmp.ge.s32.totalorder %s12_s11, 4   ;;  %s526_s10 = smov %s528_s12 }
  0xa5   :  { %11 = sbr.rel (!%p9_p5) target bundleno = 2 (0x2), region = 61 }

// kernel: normal_estimator_forward.10
= control target key start
LH: loop header
LB: loop body
LE: loop exit
PB: predicated region body
PF: predicated region fallthrough
CT: control target
= control target key end

     0   :  { %vm55_vm0 = vcmask 261120   ;;  %vm99_vm1 = vcmask 130048   ;;  %vm129_vm2 = vcmask 257024   ;;  %s235_s1 = inlined_call_operand.vmem [shape: bf16[32,16], index: 1, kind: input, shape index: {}]   ;;  %s236_s2 = inlined_call_operand.vmem [shape: f32[1,16], index: 2, kind: input, shape index: {}]   ;;  %s237_s0 = inlined_call_operand.vmem [shape: bf16[32,32], index: 0, kind: input, shape index: {}]   ;;  %s238_s4 = inlined_call_operand.vmem [shape: f32[1,32], index: 4, kind: input, shape index: {}]   ;;  %s239_s3 = inlined_call_operand.vmem [shape: bf16[16,32], index: 3, kind: input, shape index: {}]   ;;  %s240_s5 = inlined_call_operand.vmem [shape: bf16[32,32], index: 5, kind: output, shape index: {}]  }
   0x1   :  { %v165_v0 = vld [vmem:[%s235_s1 + $0x8] sm:$0xff]  ;;  %v164_v1 = vld [vmem:[%s235_s1] sm:$0xff] }
   0x2   :  { %68 = vmatpush.bf16.msra.mxu0 %v165_v0  ;;  %167 = vmatpush.bf16.msra.mxu2 %v165_v0  ;;  %v162_v2 = vld [vmem:[%s237_s0] sm:$0xff]  ;;  %v163_v3 = vld [vmem:[%s237_s0 + $0x8] sm:$0xff] }
   0x3   :  { %v166_v4 = vld [vmem:[%s239_s3] sm:$0xff] }
   0x4   :  { %113 = vmatpush.bf16.msra.mxu1 %v166_v4  ;;  %169 = vmatpush.bf16.msra.mxu3 %v166_v4  ;;  %v170_v6 = vld [vmem:[%s236_s2] ss:$0 sm:$0xff] }
   0x5   :  { %v171_v20 = vld [vmem:[%s238_s4] ss:$0 sm:$0xff] }
   0x6   :  { %69 = vmatpush.bf16.msra.mxu0 %v164_v1  ;;  %168 = vmatpush.bf16.msra.mxu2 %v164_v1 }
   0x9   :  { %154 = vmatmul.msk.bf16.vlgmr.msra.gmra.mxu0 %vm55_vm0, %v162_v2  ;;  %155 = vmatmul.msk.bf16.vlgmr.msra.gmra.mxu2 %vm55_vm0, %v163_v3 }
  0x86   :  { %v71_v5 = vpop.f32.mrf.mxu0 }
  0x87   :  { %v72_v7 = vadd.f32 %v170_v6, %v71_v5 }
  0x89   :  { %v81_v10 = vmax.f32 %v72_v7, 0.0 }
  0x8c   :  { %v76_v8 = vpop.f32.mrf.mxu2 }
  0x8d   :  { %v77_v13 = vadd.f32 %v170_v6, %v76_v8 }
  0x8e   :  { %v73_v9 = vpop.f32.mrf.mxu0 }
  0x8f   :  { %v74_v11 = vadd.f32 %v170_v6, %v73_v9  ;;  %v83_v17 = vmax.f32 %v77_v13, 0.0 }
  0x91   :  { %v82_v12 = vmax.f32 %v74_v11, 0.0 }
  0x93   :  { %v85_v14 = vpack.c.bf16 %v82_v12, %v81_v10 }
  0x94   :  { %v78_v15 = vpop.f32.mrf.mxu2 }
  0x95   :  { %v79_v16 = vadd.f32 %v170_v6, %v78_v15  ;;  %160 = vmatmul.msk.bf16.vlgmr.msra.gmra.mxu1 %vm99_vm1, %v85_v14 }
  0x97   :  { %v84_v18 = vmax.f32 %v79_v16, 0.0 }
  0x99   :  { %v86_v19 = vpack.c.bf16 %v84_v18, %v83_v17 }
  0x9b   :  { %161 = vmatmul.msk.bf16.vlgmr.msra.gmra.mxu3 %vm99_vm1, %v86_v19 }
 0x112   :  { %v115_v21 = vpop.f32.mrf.mxu1 }
 0x113   :  { %v116_v22 = vadd.f32 %v171_v20, %v115_v21 }
 0x115   :  { %v125_v23 = vpack.c.bf16 %v116_v22, %v116_v22 }
 0x117   :  { %130 = vst.msk [vmem:[%s240_s5] sm:$0xf] %vm129_vm2, %v125_v23 }
 0x11a   :  { %v117_v24 = vpop.f32.mrf.mxu1 }
 0x11b   :  { %v118_v25 = vadd.f32 %v171_v20, %v117_v24 }
 0x11d   :  { %v126_v26 = vpack.c.bf16 %v118_v25, %v118_v25 }
 0x11e   :  { %v120_v27 = vpop.f32.mrf.mxu3 }
 0x11f   :  { %131 = vst.msk [vmem:[%s240_s5 + $0x4] sm:$0xf] %vm129_vm2, %v126_v26  ;;  %v121_v28 = vadd.f32 %v171_v20, %v120_v27 }
 0x121   :  { %v127_v29 = vpack.c.bf16 %v121_v28, %v121_v28 }
 0x123   :  { %132 = vst.msk [vmem:[%s240_s5 + $0x8] sm:$0xf] %vm129_vm2, %v127_v29 }
 0x126   :  { %v122_v30 = vpop.f32.mrf.mxu3 }
 0x127   :  { %v123_v31 = vadd.f32 %v171_v20, %v122_v30 }
 0x129   :  { %v128_v32 = vpack.c.bf16 %v123_v31, %v123_v31 }
 0x12b   :  { %133 = vst.msk [vmem:[%s240_s5 + $0xc] sm:$0xf] %vm129_vm2, %v128_v32 }

// kernel: normal_estimator_forward.11
= control target key start
LH: loop header
LB: loop body
LE: loop exit
PB: predicated region body
PF: predicated region fallthrough
CT: control target
= control target key end

     0   :  { %s645_s21 = smov 0   ;;  %s647_s22 = smov 0   ;;  %s697_s0 = inlined_call_operand.vmem [shape: bf16[2,16,3], index: 0, kind: input, shape index: {}]   ;;  %s698_s1 = inlined_call_operand.vmem [shape: bf16[3,16], index: 1, kind: input, shape index: {}]   ;;  %s699_s2 = inlined_call_operand.vmem [shape: f32[1,16], index: 2, kind: input, shape index: {}]   ;;  %s700_s3 = inlined_call_operand.vmem [shape: bf16[16,32], index: 3, kind: input, shape index: {}]   ;;  %s701_s4 = inlined_call_operand.vmem [shape: f32[1,32], index: 4, kind: input, shape index: {}]   ;;  %s702_s5 = inlined_call_operand.vmem [shape: bf16[2,16,32], index: 5, kind: output, shape index: {0}]   ;;  %s703_s6 = inlined_call_operand.vmem [shape: f32[2,1,1,32], index: 6, kind: output, shape index: {1}]  }
   0x1   :  { %s649_s23 = smov 0  }
   0x2 LB: > { %s29_s24 = sadd.s32 1, %s603_s22  ;;  %p537_p0 = scmp.ge.s32.totalorder %s607_s23, 1  ;;  %s607_s23 = sphi %s649_s23, %s17_s23   ;;  %s603_s22 = sphi %s647_s22, %s705_s22   ;;  %s599_s21 = sphi %s645_s21, %s704_s21  }
   0x3   : > { %p31_p1 = scmp.ge.s32.totalorder %s29_s24, 2  ;;  %p238_p2 = scmp.lt.s32.totalorder %s607_s23, 3 }
   0x5   : > { %s707_s24 = smov (%p31_p1, %s29_s24), 0  ;;  %p239_p3 = pnand %p537_p0, %p238_p2 }
   0x6   : > { %p283_p4 = scmp.lt.s32.totalorder (!%p239_p3), %s599_s21, 1 }
   0x7   : > { %242 = sbr.rel (%p239_p3) target bundleno = 312 (0x138), region = 40 }
   0xc   : > { %v311_v0 = vld [vmem:[%s698_s1] sm:$0x3]  ;;  %vm325_vm0 = vcmask 1040384   ;;  %vm326_vm1 = vcmask 1041408   ;;  %v609_v1 = vmov 65535   ;;  %s709_s21 = smov (!%p283_p4, %s599_s21), 1 }
   0xd   : > { %v327_v2 = vsel %vm325_vm0, 4294967295, %v609_v1  ;;  %s554_s27 = sshll.u32 %s709_s21, 3  ;;  %vm321_vm2 = vcmask 23552   ;;  %v557_v6 = vld [vmem:[%s700_s3] sm:$0xff]  ;;  %vm361_vm3 = vcmask 130048   ;;  %vm381_vm4 = vcmask 257024   ;;  %s307_s18 = scalar_lea.vmem %s703_s6, %s709_s21 }
   0xe   : > { %v328_v3 = vsel %vm326_vm1, %v327_v2, 0  ;;  %s290_s30 = scalar_lea.vmem %s697_s0, %s554_s27  ;;  %372 = vmatpush.bf16.msra.mxu1 %v557_v6  ;;  %v583_v8 = vld [vmem:[%s699_s2] ss:$0 sm:$0xff]  ;;  %s300_s15 = scalar_lea.vmem %s702_s5, %s554_s27  ;;  %vm399_vm5 = vcmask 261120   ;;  %vm409_vm6 = vcmask 253952  }
   0xf   : > { %v330_v4 = vand.u32 %v328_v3, %v311_v0  ;;  %v556_v5 = vld [vmem:[%s290_s30] sm:$0xff] }
  0x10   : > { %v584_v15 = vld [vmem:[%s701_s4] ss:$0 sm:$0xff] }
  0x11   : > { %339 = vmatpush.bf16.msra.mxu0 %v330_v4 }
  0x14   : > { %546 = vmatmul.msk.bf16.vlgmr.msra.gmra.mxu0 %vm321_vm2, %v556_v5 }
  0x91   : > { %v341_v7 = vpop.f32.mrf.mxu0 }
  0x92   : > { %v342_v9 = vadd.f32 %v583_v8, %v341_v7 }
  0x94   : > { %v346_v12 = vmax.f32 %v342_v9, 0.0 }
  0x99   : > { %v343_v10 = vpop.f32.mrf.mxu0 }
  0x9a   : > { %v344_v11 = vadd.f32 %v583_v8, %v343_v10 }
  0x9c   : > { %v347_v13 = vmax.f32 %v344_v11, 0.0 }
  0x9e   : > { %v348_v14 = vpack.c.bf16 %v347_v13, %v346_v12 }
  0xa0   : > { %551 = vmatmul.msk.bf16.vlgmr.msra.gmra.mxu1 %vm361_vm3, %v348_v14 }
 0x11d   : > { %v374_v16 = vpop.f32.mrf.mxu1 }
 0x11e   : > { %v375_v17 = vadd.f32 %v584_v15, %v374_v16 }
 0x120   : > { %v379_v18 = vpack.c.bf16 %v375_v17, %v375_v17  ;;  %v400_v21 = vsel %vm399_vm5, %v375_v17, -inf }
 0x122   : > { %382 = vst.msk [vmem:[%s300_s15] sm:$0xf] %vm381_vm4, %v379_v18 }
 0x125   : > { %v376_v19 = vpop.f32.mrf.mxu1 }
 0x126   : > { %v377_v20 = vadd.f32 %v584_v15, %v376_v19 }
 0x128   : > { %v380_v22 = vpack.c.bf16 %v377_v20, %v377_v20  ;;  %v401_v23 = vsel %vm399_vm5, %v377_v20, -inf }
 0x129   : > { %v402_v24 = vmax.f32 %v400_v21, %v401_v23 }
 0x12a   : > { %383 = vst.msk [vmem:[%s300_s15 + $0x4] sm:$0xf] %vm381_vm4, %v380_v22 }
 0x12b   : > { %v403_v25 = vrot.slane %v402_v24, 4 }
 0x12d   : > { %v404_v26 = vmax.f32 %v402_v24, %v403_v25 }
 0x12f   : > { %v405_v27 = vrot.slane %v404_v26, 2 }
 0x131   : > { %v406_v28 = vmax.f32 %v404_v26, %v405_v27 }
 0x133   : > { %v407_v29 = vrot.slane %v406_v28, 1 }
 0x135   : > { %v408_v30 = vmax.f32 %v406_v28, %v407_v29 }
 0x137   : > { %410 = vst.msk [vmem:[%s307_s18] sm:$0x1] %vm409_vm6, %v408_v30 }
 0x138 PF: > { %s17_s23 = sadd.s32 1, %s607_s23   ;;  %s704_s21 = smov %s603_s22 }
 0x139   : > { %p14_p5 = scmp.ge.s32.totalorder %s17_s23, 4   ;;  %s705_s22 = smov %s707_s24 }
 0x13b   :  { %16 = sbr.rel (!%p14_p5) target bundleno = 2 (0x2), region = 82 }

// kernel: normal_estimator_forward.12
= control target key start
LH: loop header
LB: loop body
LE: loop exit
PB: predicated region body
PF: predicated region fallthrough
CT: control target
= control target key end

     0   :  { %s791_s24 = smov 0   ;;  %s793_s25 = smov 0   ;;  %s862_s0 = inlined_call_operand.vmem [shape: bf16[2,16,32], index: 0, kind: input, shape index: {}]   ;;  %s863_s1 = inlined_call_operand.vmem [shape: bf16[2,16,32], index: 1, kind: input, shape index: {}]   ;;  %s864_s2 = inlined_call_operand.vmem [shape: f32[2,1,64], index: 2, kind: input, shape index: {}]   ;;  %s865_s3 = inlined_call_operand.vmem [shape: bf16[32,64], index: 3, kind: input, shape index: {}]   ;;  %s866_s4 = inlined_call_operand.vmem [shape: bf16[32,64], index: 4, kind: input, shape index: {}]   ;;  %s867_s5 = inlined_call_operand.vmem [shape: bf16[64,32], index: 5, kind: input, shape index: {}]   ;;  %s868_s6 = inlined_call_operand.vmem [shape: f32[1,32], index: 6, kind: input, shape index: {}]   ;;  %s869_s7 = inlined_call_operand.vmem [shape: bf16[2,16,32], index: 7, kind: output, shape index: {}]  }
   0x1   :  { %s795_s26 = smov 0  }
   0x2 LB: > { %s29_s27 = sadd.s32 1, %s745_s25  ;;  %p636_p0 = scmp.ge.s32.totalorder %s749_s26, 1  ;;  %s749_s26 = sphi %s795_s26, %s17_s26   ;;  %s745_s25 = sphi %s793_s25, %s871_s25   ;;  %s741_s24 = sphi %s791_s24, %s870_s24  }
   0x3   : > { %p31_p1 = scmp.ge.s32.totalorder %s29_s27, 2  ;;  %p283_p2 = scmp.lt.s32.totalorder %s749_s26, 3 }
   0x5   : > { %s873_s27 = smov (%p31_p1, %s29_s27), 0  ;;  %p284_p3 = pnand %p636_p0, %p283_p2 }
   0x6   : > { %p336_p4 = scmp.lt.s32.totalorder (!%p284_p3), %s741_s24, 1 }
   0x7   : > { %287 = sbr.rel (%p284_p3) target bundleno = 308 (0x134), region = 48 }
   0xc   : > { %v696_v0 = vld [vmem:[%s866_s4 + $0x8] sm:$0xff]  ;;  %v695_v2 = vld [vmem:[%s866_s4] sm:$0xff]  ;;  %s875_s24 = smov (!%p336_p4, %s741_s24), 1  ;;  %vm398_vm0 = vcmask 261120   ;;  %v700_v6 = vld [vmem:[%s867_s5 + $0x18] sm:$0xff]  ;;  %vm495_vm1 = vcmask 523264  }
   0xd   : > { %v694_v1 = vld [vmem:[%s865_s3 + $0x8] sm:$0xff]  ;;  %408 = vmatpush.bf16.msra.mxu0 %v696_v0  ;;  %v693_v3 = vld [vmem:[%s865_s3] sm:$0xff]  ;;  %s821_s13 = sshll.u32 %s875_s24, 3  ;;  %s357_s22 = scalar_lea.vmem %s864_s2, %s875_s24  ;;  %503 = vmatpush.bf16.msra.mxu2 %v700_v6  ;;  %v699_v7 = vld [vmem:[%s867_s5 + $0x10] sm:$0xff]  ;;  %vm515_vm2 = vcmask 257024  }
   0xe   : > { %442 = vmatpush.bf16.msra.mxu1 %v694_v1  ;;  %s353_s16 = scalar_lea.vmem %s863_s1, %s821_s13  ;;  %s343_s19 = scalar_lea.vmem %s862_s0, %s821_s13  ;;  %v698_v8 = vld [vmem:[%s867_s5 + $0x8] sm:$0xff]  ;;  %v697_v9 = vld [vmem:[%s867_s5] sm:$0xff] }
   0xf   : > { %v692_v4 = vld [vmem:[%s353_s16] sm:$0xff]  ;;  %s366_s16 = scalar_lea.vmem %s869_s7, %s821_s13 }
  0x10   : > { %v691_v5 = vld [vmem:[%s343_s19] sm:$0xff] }
  0x11   : > { %409 = vmatpush.bf16.msra.mxu0 %v695_v2  ;;  %504 = vmatpush.bf16.msra.mxu2 %v699_v7  ;;  %v725_v13 = vld [vmem:[%s357_s22] ss:$0 sm:$0xff] }
  0x12   : > { %443 = vmatpush.bf16.msra.mxu1 %v693_v3  ;;  %v726_v22 = vld [vmem:[%s868_s6] ss:$0 sm:$0xff] }
  0x14   : > { %655 = vmatmul.msk.bf16.vlgmr.msra.gmra.mxu0 %vm398_vm0, %v692_v4 }
  0x15   : > { %668 = vmatmul.msk.bf16.vlgmr.msra.gmra.mxu1 %vm398_vm0, %v691_v5  ;;  %505 = vmatpush.bf16.msra.mxu2 %v698_v8 }
  0x19   : > { %506 = vmatpush.bf16.msra.mxu2 %v697_v9 }
  0x91   : > { %v411_v10 = vpop.f32.mrf.mxu0 }
  0x92   : > { %v445_v11 = vpop.f32.mrf.mxu1 }
  0x93   : > { %v446_v12 = vadd.f32 %v445_v11, %v411_v10 }
  0x95   : > { %v454_v16 = vadd.f32 %v725_v13, %v446_v12 }
  0x97   : > { %v456_v19 = vmax.f32 %v454_v16, 0.0 }
  0x99   : > { %v413_v14 = vpop.f32.mrf.mxu0 }
  0x9a   : > { %v447_v15 = vpop.f32.mrf.mxu1 }
  0x9b   : > { %v448_v17 = vadd.f32 %v447_v15, %v413_v14 }
  0x9d   : > { %v455_v18 = vadd.f32 %v725_v13, %v448_v17 }
  0x9f   : > { %v457_v20 = vmax.f32 %v455_v18, 0.0 }
  0xa1   : > { %v458_v21 = vpack.c.bf16 %v457_v20, %v456_v19 }
  0xa3   : > { %685 = vmatmul.msk.bf16.vlgmr.msra.gmra.mxu2 %vm495_vm1, %v458_v21 }
 0x126   : > { %v508_v23 = vpop.f32.mrf.mxu2 }
 0x127   : > { %v509_v24 = vadd.f32 %v726_v22, %v508_v23 }
 0x129   : > { %v513_v25 = vpack.c.bf16 %v509_v24, %v509_v24 }
 0x12b   : > { %516 = vst.msk [vmem:[%s366_s16] sm:$0xf] %vm515_vm2, %v513_v25 }
 0x12e   : > { %v510_v26 = vpop.f32.mrf.mxu2 }
 0x12f   : > { %v511_v27 = vadd.f32 %v726_v22, %v510_v26 }
 0x131   : > { %v514_v28 = vpack.c.bf16 %v511_v27, %v511_v27 }
 0x133   : > { %517 = vst.msk [vmem:[%s366_s16 + $0x4] sm:$0xf] %vm515_vm2, %v514_v28 }
 0x134 PF: > { %s17_s26 = sadd.s32 1, %s749_s26   ;;  %s870_s24 = smov %s745_s25 }
 0x135   : > { %p14_p5 = scmp.ge.s32.totalorder %s17_s26, 4   ;;  %s871_s25 = smov %s873_s27 }
 0x137   :  { %16 = sbr.rel (!%p14_p5) target bundleno = 2 (0x2), region = 84 }

// kernel: normal_estimator_forward.13
= control target key start
LH: loop header
LB: loop body
LE: loop exit
PB: predicated region body
PF: predicated region fallthrough
CT: control target
= control target key end

     0   :  { %vm76_vm0 = vcmask 261120   ;;  %vm286_vm1 = vcmask 257024   ;;  %s502_s2 = inlined_call_operand.vmem [shape: bf16[64,32], index: 2, kind: input, shape index: {}]   ;;  %s503_s1 = inlined_call_operand.vmem [shape: bf16[32,32], index: 1, kind: input, shape index: {}]   ;;  %s504_s3 = inlined_call_operand.vmem [shape: f32[1,32], index: 3, kind: input, shape index: {}]   ;;  %s505_s0 = inlined_call_operand.vmem [shape: bf16[32,32], index: 0, kind: input, shape index: {}]   ;;  %s506_s6 = inlined_call_operand.vmem [shape: bf16[64,32], index: 6, kind: input, shape index: {}]   ;;  %s507_s4 = inlined_call_operand.vmem [shape: bf16[32,32], index: 4, kind: input, shape index: {}]   ;;  %s508_s7 = inlined_call_operand.vmem [shape: f32[1,32], index: 7, kind: input, shape index: {}]   ;;  %s509_s5 = inlined_call_operand.vmem [shape: f32[1,32], index: 5, kind: input, shape index: {}]   ;;  %s510_s8 = inlined_call_operand.vmem [shape: bf16[32,32], index: 8, kind: output, shape index: {}]  }
   0x1   :  { %v368_v0 = vld [vmem:[%s502_s2 + $0x18] sm:$0xff]  ;;  %v367_v1 = vld [vmem:[%s502_s2 + $0x10] sm:$0xff]  ;;  %v366_v2 = vld [vmem:[%s502_s2 + $0x8] sm:$0xff] }
   0x2   :  { %375 = vmatpush.bf16.msra.mxu1 %v368_v0  ;;  %89 = vmatpush.bf16.msra.mxu0 %v368_v0  ;;  %v364_v3 = vld [vmem:[%s503_s1 + $0x8] sm:$0xff]  ;;  %v363_v4 = vld [vmem:[%s503_s1] sm:$0xff]  ;;  %v372_v8 = vld [vmem:[%s506_s6 + $0x18] sm:$0xff] }
   0x3   :  { %v365_v5 = vld [vmem:[%s502_s2] sm:$0xff]  ;;  %v362_v7 = vld [vmem:[%s505_s0 + $0x8] sm:$0xff]  ;;  %226 = vmatpush.bf16.msra.mxu3 %v372_v8  ;;  %v371_v9 = vld [vmem:[%s506_s6 + $0x10] sm:$0xff] }
   0x4   :  { %v361_v6 = vld [vmem:[%s505_s0] sm:$0xff]  ;;  %v370_v10 = vld [vmem:[%s506_s6 + $0x8] sm:$0xff] }
   0x5   :  { %v374_v11 = vld [vmem:[%s507_s4 + $0x8] sm:$0xff]  ;;  %v369_v12 = vld [vmem:[%s506_s6] sm:$0xff] }
   0x6   :  { %376 = vmatpush.bf16.msra.mxu1 %v367_v1  ;;  %90 = vmatpush.bf16.msra.mxu0 %v367_v1  ;;  %v373_v13 = vld [vmem:[%s507_s4] sm:$0xff] }
   0x7   :  { %227 = vmatpush.bf16.msra.mxu3 %v371_v9  ;;  %195 = vmatpush.bf16.msra.mxu2 %v374_v11  ;;  %v377_v19 = vld [vmem:[%s504_s3] ss:$0 sm:$0xff] }
   0x8   :  { %v378_v40 = vld [vmem:[%s508_s7] ss:$0 sm:$0xff] }
   0x9   :  { %312 = vmatmul.msk.bf16.vlgmr.msra.gmra.mxu1 %vm76_vm0, %v364_v3  ;;  %311 = vmatmul.msk.bf16.vlgmr.msra.gmra.mxu0 %vm76_vm0, %v363_v4  ;;  %v379_v42 = vld [vmem:[%s509_s5] ss:$0 sm:$0xff] }
   0xa   :  { %136 = vmatpush.bf16.msrb.mxu1 %v366_v2  ;;  %257 = vmatpush.bf16.msrb.mxu0 %v370_v10 }
   0xb   :  { %349 = vmatmul.msk.bf16.vlgmr.msra.gmra.mxu3 %vm76_vm0, %v363_v4  ;;  %196 = vmatpush.bf16.msra.mxu2 %v373_v13 }
   0xe   :  { %137 = vmatpush.bf16.msrb.mxu1 %v365_v5  ;;  %258 = vmatpush.bf16.msrb.mxu0 %v369_v12 }
  0x19   :  { %329 = vmatmul.msk.bf16.vlgmr.msrb.gmra.mxu1 %vm76_vm0, %v361_v6  ;;  %359 = vmatmul.msk.bf16.vlgmr.msrb.gmra.mxu0 %vm76_vm0, %v361_v6 }
  0x1b   :  { %350 = vmatmul.msk.bf16.gmra.mxu3 %vm76_vm0, %v364_v3 }
  0x29   :  { %330 = vmatmul.msk.bf16.gmra.mxu1 %vm76_vm0, %v362_v7  ;;  %360 = vmatmul.msk.bf16.gmra.mxu0 %vm76_vm0, %v362_v7 }
  0x86   :  { %v97_v14 = vpop.f32.mrf.mxu1  ;;  %v92_v16 = vpop.f32.mrf.mxu0 }
  0x8e   :  { %v99_v15 = vpop.f32.mrf.mxu1  ;;  %v94_v20 = vpop.f32.mrf.mxu0 }
  0x8f   :  { %v229_v37 = vpop.f32.mrf.mxu3 }
  0x96   :  { %v139_v17 = vpop.f32.mrf.mxu1  ;;  %v260_v38 = vpop.f32.mrf.mxu0 }
  0x97   :  { %v140_v18 = vadd.f32 %v139_v17, %v92_v16  ;;  %v261_v39 = vadd.f32 %v260_v38, %v229_v37  ;;  %v231_v41 = vpop.f32.mrf.mxu3 }
  0x99   :  { %v153_v22 = vadd.f32 %v377_v19, %v140_v18  ;;  %v274_v44 = vadd.f32 %v378_v40, %v261_v39 }
  0x9b   :  { %v157_v25 = vmax.f32 %v153_v22, 0.0 }
  0x9e   :  { %v141_v21 = vpop.f32.mrf.mxu1  ;;  %v262_v43 = vpop.f32.mrf.mxu0 }
  0x9f   :  { %v142_v23 = vadd.f32 %v141_v21, %v94_v20  ;;  %v263_v48 = vadd.f32 %v262_v43, %v231_v41  ;;  %v234_v50 = vpop.f32.mrf.mxu3 }
  0xa1   :  { %v154_v24 = vadd.f32 %v377_v19, %v142_v23  ;;  %v275_v53 = vadd.f32 %v378_v40, %v263_v48 }
  0xa3   :  { %v158_v26 = vmax.f32 %v154_v24, 0.0 }
  0xa5   :  { %v161_v27 = vpack.c.bf16 %v158_v26, %v157_v25 }
  0xa6   :  { %v144_v28 = vpop.f32.mrf.mxu1  ;;  %v265_v51 = vpop.f32.mrf.mxu0 }
  0xa7   :  { %339 = vmatmul.msk.bf16.vlgmr.msra.gmra.mxu2 %vm76_vm0, %v161_v27  ;;  %v145_v29 = vadd.f32 %v144_v28, %v97_v14  ;;  %v266_v55 = vadd.f32 %v265_v51, %v234_v50  ;;  %v236_v61 = vpop.f32.mrf.mxu3 }
  0xa9   :  { %v155_v31 = vadd.f32 %v377_v19, %v145_v29  ;;  %v276_v58 = vadd.f32 %v378_v40, %v266_v55 }
  0xab   :  { %v159_v34 = vmax.f32 %v155_v31, 0.0 }
  0xae   :  { %v146_v30 = vpop.f32.mrf.mxu1  ;;  %v267_v62 = vpop.f32.mrf.mxu0 }
  0xaf   :  { %v147_v32 = vadd.f32 %v146_v30, %v99_v15  ;;  %v268_v0 = vadd.f32 %v267_v62, %v236_v61 }
  0xb1   :  { %v156_v33 = vadd.f32 %v377_v19, %v147_v32  ;;  %v277_v3 = vadd.f32 %v378_v40, %v268_v0 }
  0xb3   :  { %v160_v35 = vmax.f32 %v156_v33, 0.0 }
  0xb5   :  { %v162_v36 = vpack.c.bf16 %v160_v35, %v159_v34 }
  0xb7   :  { %340 = vmatmul.msk.bf16.gmra.mxu2 %vm76_vm0, %v162_v36 }
 0x12a   :  { %v198_v45 = vpop.f32.mrf.mxu2 }
 0x12b   :  { %v199_v46 = vadd.f32 %v379_v42, %v198_v45 }
 0x12d   :  { %v278_v47 = vadd.f32 %v274_v44, %v199_v46 }
 0x12f   :  { %v282_v49 = vpack.c.bf16 %v278_v47, %v278_v47 }
 0x131   :  { %287 = vst.msk [vmem:[%s510_s8] sm:$0xf] %vm286_vm1, %v282_v49 }
 0x132   :  { %v200_v52 = vpop.f32.mrf.mxu2 }
 0x133   :  { %v201_v54 = vadd.f32 %v379_v42, %v200_v52 }
 0x135   :  { %v279_v56 = vadd.f32 %v275_v53, %v201_v54 }
 0x137   :  { %v283_v57 = vpack.c.bf16 %v279_v56, %v279_v56 }
 0x139   :  { %288 = vst.msk [vmem:[%s510_s8 + $0x4] sm:$0xf] %vm286_vm1, %v283_v57 }
 0x13a   :  { %v203_v59 = vpop.f32.mrf.mxu2 }
 0x13b   :  { %v204_v60 = vadd.f32 %v379_v42, %v203_v59 }
 0x13d   :  { %v280_v63 = vadd.f32 %v276_v58, %v204_v60 }
 0x13f   :  { %v284_v1 = vpack.c.bf16 %v280_v63, %v280_v63 }
 0x141   :  { %289 = vst.msk [vmem:[%s510_s8 + $0x8] sm:$0xf] %vm286_vm1, %v284_v1 }
 0x142   :  { %v205_v2 = vpop.f32.mrf.mxu2 }
 0x143   :  { %v206_v4 = vadd.f32 %v379_v42, %v205_v2 }
 0x145   :  { %v281_v5 = vadd.f32 %v277_v3, %v206_v4 }
 0x147   :  { %v285_v6 = vpack.c.bf16 %v281_v5, %v281_v5 }
 0x149   :  { %290 = vst.msk [vmem:[%s510_s8 + $0xc] sm:$0xf] %vm286_vm1, %v285_v6 }

// kernel: neg.5
= control target key start
LH: loop header
LB: loop body
LE: loop exit
PB: predicated region body
PF: predicated region fallthrough
CT: control target
= control target key end

     0   :  { %s72_s0 = inlined_call_operand.vmem [shape: f32[2,16,16], index: 0, kind: input, shape index: {}]   ;;  %s73_s1 = inlined_call_operand.vmem [shape: f32[2,16,16], index: 1, kind: output, shape index: {}]  }
   0x1   :  { %v2_v0 = vld [vmem:[%s72_s0] sm:$0xff]  ;;  %v32_v1 = vld [vmem:[%s72_s0 + $0x10] sm:$0xff]  ;;  %v34_v2 = vld [vmem:[%s72_s0 + $0x8] sm:$0xff] }
   0x2   :  { %v5_v3 = vxor.u32 2147483648, %v2_v0  ;;  %v12_v4 = vxor.u32 2147483648, %v32_v1  ;;  %v20_v5 = vxor.u32 2147483648, %v34_v2  ;;  %v36_v6 = vld [vmem:[%s72_s0 + $0x18] sm:$0xff] }
   0x3   :  { %v28_v7 = vxor.u32 2147483648, %v36_v6 }
   0x4   :  { %7 = vst [vmem:[%s73_s1] sm:$0xff] %v5_v3 }
   0x5   :  { %33 = vst [vmem:[%s73_s1 + $0x10] sm:$0xff] %v12_v4 }
   0x6   :  { %35 = vst [vmem:[%s73_s1 + $0x8] sm:$0xff] %v20_v5 }
   0x7   :  { %37 = vst [vmem:[%s73_s1 + $0x18] sm:$0xff] %v28_v7 }

// kernel: normal_estimator_forward.14
= control target key start
LH: loop header
LB: loop body
LE: loop exit
PB: predicated region body
PF: predicated region fallthrough
CT: control target
= control target key end

     0   :  { %vm80_vm0 = vcmask 261120   ;;  %vm110_vm1 = vcmask 125952   ;;  %s636_s4 = inlined_call_operand.vmem [shape: bf16[32,16], index: 4, kind: input, shape index: {}]   ;;  %s637_s6 = inlined_call_operand.vmem [shape: bf16[32,16], index: 6, kind: input, shape index: {}]   ;;  %s638_s8 = inlined_call_operand.vmem [shape: bf16[32,16], index: 8, kind: input, shape index: {}]   ;;  %s639_s10 = inlined_call_operand.vmem [shape: bf16[32,16], index: 10, kind: input, shape index: {}]   ;;  %s640_s0 = inlined_call_operand.vmem [shape: bf16[32,32], index: 0, kind: input, shape index: {}]   ;;  %s641_s1 = inlined_call_operand.vmem [shape: bf16[32,32], index: 1, kind: input, shape index: {}]   ;;  %s642_s2 = inlined_call_operand.vmem [shape: bf16[32,32], index: 2, kind: input, shape index: {}]   ;;  %s643_s3 = inlined_call_operand.vmem [shape: bf16[32,32], index: 3, kind: input, shape index: {}]   ;;  %s644_s5 = inlined_call_operand.vmem [shape: f32[1,16], index: 5, kind: input, shape index: {}]   ;;  %s645_s7 = inlined_call_operand.vmem [shape: f32[1,16], index: 7, kind: input, shape index: {}]   ;;  %s646_s9 = inlined_call_operand.vmem [shape: f32[1,16], index: 9, kind: input, shape index: {}]   ;;  %s647_s11 = inlined_call_operand.vmem [shape: f32[1,16], index: 11, kind: input, shape index: {}]   ;;  %s648_s12 = inlined_call_operand.vmem [shape: bf16[32,16], index: 12, kind: output, shape index: {0}]   ;;  %s649_s13 = inlined_call_operand.vmem [shape: bf16[32,16], index: 13, kind: output, shape index: {1}]   ;;  %s650_s14 = inlined_call_operand.vmem [shape: bf16[32,16], index: 14, kind: output, shape index: {2}]   ;;  %s651_s15 = inlined_call_operand.vmem [shape: bf16[32,16], index: 15, kind: output, shape index: {3}]  }
   0x1   :  { %v407_v0 = vld [vmem:[%s636_s4 + $0x8] sm:$0xff]  ;;  %v406_v4 = vld [vmem:[%s636_s4] sm:$0xff] }
   0x2   :  { %v411_v1 = vld [vmem:[%s637_s6 + $0x8] sm:$0xff]  ;;  %93 = vmatpush.bf16.msra.mxu0 %v407_v0  ;;  %v410_v5 = vld [vmem:[%s637_s6] sm:$0xff] }
   0x3   :  { %v415_v2 = vld [vmem:[%s638_s8 + $0x8] sm:$0xff]  ;;  %161 = vmatpush.bf16.msra.mxu1 %v411_v1  ;;  %v414_v6 = vld [vmem:[%s638_s8] sm:$0xff] }
   0x4   :  { %v419_v3 = vld [vmem:[%s639_s10 + $0x8] sm:$0xff]  ;;  %228 = vmatpush.bf16.msra.mxu2 %v415_v2  ;;  %v418_v7 = vld [vmem:[%s639_s10] sm:$0xff] }
   0x5   :  { %295 = vmatpush.bf16.msra.mxu3 %v419_v3  ;;  %v404_v8 = vld [vmem:[%s640_s0] sm:$0xff]  ;;  %v405_v12 = vld [vmem:[%s640_s0 + $0x8] sm:$0xff] }
   0x6   :  { %v408_v9 = vld [vmem:[%s641_s1] sm:$0xff]  ;;  %94 = vmatpush.bf16.msra.mxu0 %v406_v4  ;;  %v409_v13 = vld [vmem:[%s641_s1 + $0x8] sm:$0xff] }
   0x7   :  { %162 = vmatpush.bf16.msra.mxu1 %v410_v5  ;;  %v412_v10 = vld [vmem:[%s642_s2] sm:$0xff]  ;;  %v413_v14 = vld [vmem:[%s642_s2 + $0x8] sm:$0xff] }
   0x8   :  { %v416_v11 = vld [vmem:[%s643_s3] sm:$0xff]  ;;  %229 = vmatpush.bf16.msra.mxu2 %v414_v6  ;;  %v417_v15 = vld [vmem:[%s643_s3 + $0x8] sm:$0xff] }
   0x9   :  { %296 = vmatpush.bf16.msra.mxu3 %v418_v7  ;;  %348 = vmatmul.msk.bf16.vlgmr.msra.gmra.mxu0 %vm80_vm0, %v404_v8  ;;  %v420_v16 = vld [vmem:[%s644_s5] ss:$0 sm:$0xff] }
   0xa   :  { %366 = vmatmul.msk.bf16.vlgmr.msra.gmra.mxu1 %vm80_vm0, %v408_v9  ;;  %v421_v17 = vld [vmem:[%s645_s7] ss:$0 sm:$0xff] }
   0xb   :  { %384 = vmatmul.msk.bf16.vlgmr.msra.gmra.mxu2 %vm80_vm0, %v412_v10  ;;  %v422_v24 = vld [vmem:[%s646_s9] ss:$0 sm:$0xff] }
   0xc   :  { %402 = vmatmul.msk.bf16.vlgmr.msra.gmra.mxu3 %vm80_vm0, %v416_v11  ;;  %v423_v25 = vld [vmem:[%s647_s11] ss:$0 sm:$0xff] }
  0x19   :  { %349 = vmatmul.msk.bf16.gmra.mxu0 %vm80_vm0, %v405_v12 }
  0x1a   :  { %367 = vmatmul.msk.bf16.gmra.mxu1 %vm80_vm0, %v409_v13 }
  0x1b   :  { %385 = vmatmul.msk.bf16.gmra.mxu2 %vm80_vm0, %v413_v14 }
  0x1c   :  { %403 = vmatmul.msk.bf16.gmra.mxu3 %vm80_vm0, %v417_v15 }
  0x86   :  { %v96_v18 = vpop.f32.mrf.mxu0 }
  0x87   :  { %v164_v19 = vpop.f32.mrf.mxu1  ;;  %v97_v20 = vadd.f32 %v420_v16, %v96_v18 }
  0x88   :  { %v165_v21 = vadd.f32 %v421_v17, %v164_v19 }
  0x89   :  { %v106_v22 = vpack.c.bf16 %v97_v20, %v97_v20 }
  0x8a   :  { %v174_v23 = vpack.c.bf16 %v165_v21, %v165_v21 }
  0x8b   :  { %111 = vst.msk [vmem:[%s648_s12] sm:$0xf] %vm110_vm1, %v106_v22 }
  0x8c   :  { %178 = vst.msk [vmem:[%s649_s13] sm:$0xf] %vm110_vm1, %v174_v23 }
  0x8e   :  { %v231_v26 = vpop.f32.mrf.mxu2  ;;  %v98_v30 = vpop.f32.mrf.mxu0 }
  0x8f   :  { %v298_v27 = vpop.f32.mrf.mxu3  ;;  %v232_v28 = vadd.f32 %v422_v24, %v231_v26  ;;  %v166_v31 = vpop.f32.mrf.mxu1  ;;  %v99_v32 = vadd.f32 %v420_v16, %v98_v30 }
  0x90   :  { %v299_v29 = vadd.f32 %v423_v25, %v298_v27  ;;  %v167_v33 = vadd.f32 %v421_v17, %v166_v31 }
  0x91   :  { %v241_v34 = vpack.c.bf16 %v232_v28, %v232_v28  ;;  %v107_v36 = vpack.c.bf16 %v99_v32, %v99_v32 }
  0x92   :  { %v308_v35 = vpack.c.bf16 %v299_v29, %v299_v29  ;;  %v175_v37 = vpack.c.bf16 %v167_v33, %v167_v33 }
  0x93   :  { %245 = vst.msk [vmem:[%s650_s14] sm:$0xf] %vm110_vm1, %v241_v34 }
  0x94   :  { %312 = vst.msk [vmem:[%s651_s15] sm:$0xf] %vm110_vm1, %v308_v35 }
  0x95   :  { %112 = vst.msk [vmem:[%s648_s12 + $0x4] sm:$0xf] %vm110_vm1, %v107_v36 }
  0x96   :  { %179 = vst.msk [vmem:[%s649_s13 + $0x4] sm:$0xf] %vm110_vm1, %v175_v37  ;;  %v233_v38 = vpop.f32.mrf.mxu2  ;;  %v101_v42 = vpop.f32.mrf.mxu0 }
  0x97   :  { %v300_v39 = vpop.f32.mrf.mxu3  ;;  %v234_v40 = vadd.f32 %v422_v24, %v233_v38  ;;  %v169_v43 = vpop.f32.mrf.mxu1  ;;  %v102_v44 = vadd.f32 %v420_v16, %v101_v42 }
  0x98   :  { %v301_v41 = vadd.f32 %v423_v25, %v300_v39  ;;  %v170_v45 = vadd.f32 %v421_v17, %v169_v43 }
  0x99   :  { %v242_v46 = vpack.c.bf16 %v234_v40, %v234_v40  ;;  %v108_v48 = vpack.c.bf16 %v102_v44, %v102_v44 }
  0x9a   :  { %v309_v47 = vpack.c.bf16 %v301_v41, %v301_v41  ;;  %v176_v49 = vpack.c.bf16 %v170_v45, %v170_v45 }
  0x9b   :  { %246 = vst.msk [vmem:[%s650_s14 + $0x4] sm:$0xf] %vm110_vm1, %v242_v46 }
  0x9c   :  { %313 = vst.msk [vmem:[%s651_s15 + $0x4] sm:$0xf] %vm110_vm1, %v309_v47 }
  0x9d   :  { %113 = vst.msk [vmem:[%s648_s12 + $0x8] sm:$0xf] %vm110_vm1, %v108_v48 }
  0x9e   :  { %180 = vst.msk [vmem:[%s649_s13 + $0x8] sm:$0xf] %vm110_vm1, %v176_v49  ;;  %v236_v50 = vpop.f32.mrf.mxu2  ;;  %v103_v54 = vpop.f32.mrf.mxu0 }
  0x9f   :  { %v303_v51 = vpop.f32.mrf.mxu3  ;;  %v237_v52 = vadd.f32 %v422_v24, %v236_v50  ;;  %v171_v55 = vpop.f32.mrf.mxu1  ;;  %v104_v56 = vadd.f32 %v420_v16, %v103_v54 }
  0xa0   :  { %v304_v53 = vadd.f32 %v423_v25, %v303_v51  ;;  %v172_v57 = vadd.f32 %v421_v17, %v171_v55 }
  0xa1   :  { %v243_v58 = vpack.c.bf16 %v237_v52, %v237_v52  ;;  %v109_v60 = vpack.c.bf16 %v104_v56, %v104_v56 }
  0xa2   :  { %v310_v59 = vpack.c.bf16 %v304_v53, %v304_v53  ;;  %v177_v61 = vpack.c.bf16 %v172_v57, %v172_v57 }
  0xa3   :  { %247 = vst.msk [vmem:[%s650_s14 + $0x8] sm:$0xf] %vm110_vm1, %v243_v58 }
  0xa4   :  { %314 = vst.msk [vmem:[%s651_s15 + $0x8] sm:$0xf] %vm110_vm1, %v310_v59 }
  0xa5   :  { %114 = vst.msk [vmem:[%s648_s12 + $0xc] sm:$0xf] %vm110_vm1, %v109_v60 }
  0xa6   :  { %181 = vst.msk [vmem:[%s649_s13 + $0xc] sm:$0xf] %vm110_vm1, %v177_v61  ;;  %v238_v62 = vpop.f32.mrf.mxu2 }
  0xa7   :  { %v305_v63 = vpop.f32.mrf.mxu3  ;;  %v239_v0 = vadd.f32 %v422_v24, %v238_v62 }
  0xa8   :  { %v306_v1 = vadd.f32 %v423_v25, %v305_v63 }
  0xa9   :  { %v244_v2 = vpack.c.bf16 %v239_v0, %v239_v0 }
  0xaa   :  { %v311_v3 = vpack.c.bf16 %v306_v1, %v306_v1 }
  0xab   :  { %248 = vst.msk [vmem:[%s650_s14 + $0xc] sm:$0xf] %vm110_vm1, %v244_v2 }
  0xac   :  { %315 = vst.msk [vmem:[%s651_s15 + $0xc] sm:$0xf] %vm110_vm1, %v311_v3 }

// kernel: normal_estimator_forward.15
= control target key start
LH: loop header
LB: loop body
LE: loop exit
PB: predicated region body
PF: predicated region fallthrough
CT: control target
= control target key end

     0   :  { %s478_s9 = smov 0   ;;  %s480_s10 = smov 0   ;;  %s522_s0 = inlined_call_operand.vmem [shape: f32[2,16,3], index: 0, kind: input, shape index: {}]   ;;  %s523_s1 = inlined_call_operand.vmem [shape: f32[2,3,16], index: 1, kind: input, shape index: {}]   ;;  %s524_s2 = inlined_call_operand.vmem [shape: f32[2,16,16], index: 2, kind: output, shape index: {}]  }
   0x1   :  { %s482_s11 = smov 0  }
   0x2 LB: > { %s31_s12 = sadd.s32 1, %s456_s10  ;;  %p402_p0 = scmp.ge.s32.totalorder %s460_s11, 1  ;;  %s460_s11 = sphi %s482_s11, %s12_s11   ;;  %s456_s10 = sphi %s480_s10, %s526_s10   ;;  %s452_s9 = sphi %s478_s9, %s525_s9  }
   0x3   : > { %p33_p1 = scmp.ge.s32.totalorder %s31_s12, 2  ;;  %p156_p2 = scmp.lt.s32.totalorder %s460_s11, 3 }
   0x5   : > { %s528_s12 = smov (%p33_p1, %s31_s12), 0  ;;  %p157_p3 = pnand %p402_p0, %p156_p2 }
   0x6   : > { %p197_p4 = scmp.lt.s32.totalorder (!%p157_p3), %s452_s9, 1 }
   0x7   : > { %160 = sbr.rel (%p157_p3) target bundleno = 162 (0xa2), region = 28 }
   0xc   : > { %vm253_vm0 = vcmask 1040384   ;;  %s530_s9 = smov (!%p197_p4, %s452_s9), 1  ;;  %vm254_vm1 = vcmask 1041408   ;;  %v462_v0 = vmov 65535   ;;  %vm232_vm2 = vcmask 23552  }
   0xd   : > { %v255_v1 = vsel %vm253_vm0, 4294967295, %v462_v0  ;;  %s405_s13 = sshll.u32 %s530_s9, 2  ;;  %s411_s14 = sshll.u32 %s530_s9, 4  ;;  %vm240_vm3 = vcmask 124928   ;;  %vm280_vm4 = vcmask 130048  }
   0xe   : > { %s212_s17 = scalar_lea.vmem %s523_s1, %s405_s13  ;;  %s204_s20 = scalar_lea.vmem %s522_s0, %s411_s14  ;;  %v256_v3 = vsel %vm254_vm1, %v255_v1, 0 }
   0xf   : > { %v229_v2 = vld [vmem:[%s212_s17] sm:$0x7]  ;;  %v228_v6 = vld [vmem:[%s204_s20 + $0x8] sm:$0xff]  ;;  %s224_s23 = scalar_lea.vmem %s524_s2, %s411_s14 }
  0x10   : > { %v227_v4 = vld [vmem:[%s204_s20] sm:$0xff]  ;;  %v249_v5 = vpack.c.bf16 %v229_v2, %v229_v2  ;;  %v231_v11 = vmul.f32 %v228_v6, %v228_v6  ;;  %v239_v13 = vmul.f32 %v229_v2, %v229_v2 }
  0x11   : > { %v230_v7 = vmul.f32 %v227_v4, %v227_v4  ;;  %v248_v10 = vpack.c.bf16 %v228_v6, %v227_v4 }
  0x12   : > { %v258_v8 = vand.u32 %v256_v3, %v249_v5  ;;  %v236_v12 = vsel %vm232_vm2, %v231_v11, 0.0  ;;  %v241_v14 = vsel %vm240_vm3, %v239_v13, 0.0 }
  0x13   : > { %v233_v9 = vsel %vm232_vm2, %v230_v7, 0.0  ;;  %v242_v15 = vrot.slane %v241_v14, 4 }
  0x14   : > { %234 = vadd.xlane.f32.xlu0 %v233_v9  ;;  %267 = vmatpush.bf16.msra.mxu0 %v258_v8 }
  0x15   : > { %v243_v16 = vadd.f32 %v242_v15, %v241_v14 }
  0x17   : > { %408 = vmatmul.msk.bf16.vlgmr.msra.gmra.mxu0 %vm232_vm2, %v248_v10  ;;  %v244_v17 = vrot.slane %v243_v16, 2 }
  0x19   : > { %v245_v18 = vadd.f32 %v244_v17, %v243_v16 }
  0x1b   : > { %v246_v19 = vrot.slane %v245_v18, 1 }
  0x1c   : > { %237 = vadd.xlane.f32.xlu0 %v236_v12 }
  0x1d   : > { %v247_v21 = vadd.f32 %v246_v19, %v245_v18 }
  0x87   : > { %v235_v20 = vpop.xlane.xlu0 %234 }
  0x88   : > { %v274_v22 = vadd.f32 %v247_v21, %v235_v20 }
  0x8f   : > { %v238_v26 = vpop.xlane.xlu0 %237 }
  0x90   : > { %v275_v27 = vadd.f32 %v247_v21, %v238_v26 }
  0x94   : > { %v269_v23 = vpop.f32.mrf.mxu0 }
  0x95   : > { %v276_v24 = vmul.f32 2.0, %v269_v23 }
  0x97   : > { %v278_v25 = vsub.f32 %v274_v22, %v276_v24 }
  0x99   : > { %281 = vst.msk [vmem:[%s224_s23] sm:$0xff] %vm280_vm4, %v278_v25 }
  0x9c   : > { %v271_v28 = vpop.f32.mrf.mxu0 }
  0x9d   : > { %v277_v29 = vmul.f32 2.0, %v271_v28 }
  0x9f   : > { %v279_v30 = vsub.f32 %v275_v27, %v277_v29 }
  0xa1   : > { %282 = vst.msk [vmem:[%s224_s23 + $0x8] sm:$0xff] %vm280_vm4, %v279_v30 }
  0xa2 PF: > { %s12_s11 = sadd.s32 1, %s460_s11   ;;  %s525_s9 = smov %s456_s10 }
  0xa3   : > { %p9_p5 = scmp.ge.s32.totalorder %s12_s11, 4   ;;  %s526_s10 = smov %s528_s12 }
  0xa5   :  { %11 = sbr.rel (!%p9_p5) target bundleno = 2 (0x2), region = 61 }

// kernel: normal_estimator_forward.17
= control target key start
LH: loop header
LB: loop body
LE: loop exit
PB: predicated region body
PF: predicated region fallthrough
CT: control target
= control target key end

     0   :  { %vm55_vm0 = vcmask 261120   ;;  %vm99_vm1 = vcmask 130048   ;;  %vm125_vm2 = vcmask 23552   ;;  %s231_s1 = inlined_call_operand.vmem [shape: bf16[32,16], index: 1, kind: input, shape index: {}]   ;;  %s232_s2 = inlined_call_operand.vmem [shape: f32[1,16], index: 2, kind: input, shape index: {}]   ;;  %s233_s0 = inlined_call_operand.vmem [shape: bf16[32,32], index: 0, kind: input, shape index: {}]   ;;  %s234_s4 = inlined_call_operand.vmem [shape: f32[1,3], index: 4, kind: input, shape index: {}]   ;;  %s235_s3 = inlined_call_operand.vmem [shape: bf16[16,3], index: 3, kind: input, shape index: {}]   ;;  %s236_s5 = inlined_call_operand.vmem [shape: f32[32,3], index: 5, kind: output, shape index: {}]  }
   0x1   :  { %v161_v0 = vld [vmem:[%s231_s1 + $0x8] sm:$0xff]  ;;  %v160_v1 = vld [vmem:[%s231_s1] sm:$0xff] }
   0x2   :  { %68 = vmatpush.bf16.msra.mxu0 %v161_v0  ;;  %163 = vmatpush.bf16.msra.mxu2 %v161_v0  ;;  %v158_v2 = vld [vmem:[%s233_s0] sm:$0xff]  ;;  %v159_v3 = vld [vmem:[%s233_s0 + $0x8] sm:$0xff] }
   0x3   :  { %v162_v4 = vld [vmem:[%s235_s3] sm:$0xff] }
   0x4   :  { %113 = vmatpush.bf16.msra.mxu1 %v162_v4  ;;  %165 = vmatpush.bf16.msra.mxu3 %v162_v4  ;;  %v166_v6 = vld [vmem:[%s232_s2] ss:$0 sm:$0xff] }
   0x5   :  { %v167_v20 = vld [vmem:[%s234_s4] ss:$0 sm:$0xff] }
   0x6   :  { %69 = vmatpush.bf16.msra.mxu0 %v160_v1  ;;  %164 = vmatpush.bf16.msra.mxu2 %v160_v1 }
   0x9   :  { %150 = vmatmul.msk.bf16.vlgmr.msra.gmra.mxu0 %vm55_vm0, %v158_v2  ;;  %151 = vmatmul.msk.bf16.vlgmr.msra.gmra.mxu2 %vm55_vm0, %v159_v3 }
  0x86   :  { %v71_v5 = vpop.f32.mrf.mxu0 }
  0x87   :  { %v72_v7 = vadd.f32 %v166_v6, %v71_v5 }
  0x89   :  { %v81_v10 = vmax.f32 %v72_v7, 0.0 }
  0x8c   :  { %v76_v8 = vpop.f32.mrf.mxu2 }
  0x8d   :  { %v77_v13 = vadd.f32 %v166_v6, %v76_v8 }
  0x8e   :  { %v73_v9 = vpop.f32.mrf.mxu0 }
  0x8f   :  { %v74_v11 = vadd.f32 %v166_v6, %v73_v9  ;;  %v83_v17 = vmax.f32 %v77_v13, 0.0 }
  0x91   :  { %v82_v12 = vmax.f32 %v74_v11, 0.0 }
  0x93   :  { %v85_v14 = vpack.c.bf16 %v82_v12, %v81_v10 }
  0x94   :  { %v78_v15 = vpop.f32.mrf.mxu2 }
  0x95   :  { %v79_v16 = vadd.f32 %v166_v6, %v78_v15  ;;  %156 = vmatmul.msk.bf16.vlgmr.msra.gmra.mxu1 %vm99_vm1, %v85_v14 }
  0x97   :  { %v84_v18 = vmax.f32 %v79_v16, 0.0 }
  0x99   :  { %v86_v19 = vpack.c.bf16 %v84_v18, %v83_v17 }
  0x9b   :  { %157 = vmatmul.msk.bf16.vlgmr.msra.gmra.mxu3 %vm99_vm1, %v86_v19 }
 0x112   :  { %v115_v21 = vpop.f32.mrf.mxu1 }
 0x113   :  { %v116_v22 = vadd.f32 %v167_v20, %v115_v21 }
 0x115   :  { %126 = vst.msk [vmem:[%s236_s5] sm:$0xff] %vm125_vm2, %v116_v22 }
 0x11a   :  { %v117_v23 = vpop.f32.mrf.mxu1 }
 0x11b   :  { %v118_v24 = vadd.f32 %v167_v20, %v117_v23 }
 0x11d   :  { %127 = vst.msk [vmem:[%s236_s5 + $0x8] sm:$0xff] %vm125_vm2, %v118_v24 }
 0x11e   :  { %v120_v25 = vpop.f32.mrf.mxu3 }
 0x11f   :  { %v121_v26 = vadd.f32 %v167_v20, %v120_v25 }
 0x121   :  { %128 = vst.msk [vmem:[%s236_s5 + $0x10] sm:$0xff] %vm125_vm2, %v121_v26 }
 0x126   :  { %v122_v27 = vpop.f32.mrf.mxu3 }
 0x127   :  { %v123_v28 = vadd.f32 %v167_v20, %v122_v27 }
 0x129   :  { %129 = vst.msk [vmem:[%s236_s5 + $0x18] sm:$0xff] %vm125_vm2, %v123_v28 }

// kernel: normal_estimator_forward.16
= control target key start
LH: loop header
LB: loop body
LE: loop exit
PB: predicated region body
PF: predicated region fallthrough
CT: control target
= control target key end

     0   :  { %vm294_vm0 = vcmask 1040384   ;;  %vm295_vm1 = vcmask 1041408   ;;  %v3554_v1 = vmov 65535   ;;  %vm245_vm2 = vcmask 23552   ;;  %s5487_s8 = inlined_call_operand.vmem [shape: bf16[3,64], index: 8, kind: input, shape index: {}]   ;;  %s5488_s0 = inlined_call_operand.vmem [shape: f32[32,3], index: 0, kind: input, shape index: {}]   ;;  %s5489_s3 = inlined_call_operand.vmem [shape: f32[32,8,3], index: 3, kind: input, shape index: {}]   ;;  %s5490_s9 = inlined_call_operand.vmem [shape: f32[1,64], index: 9, kind: input, shape index: {}]   ;;  %s5491_s10 = inlined_call_operand.vmem [shape: bf16[64,16], index: 10, kind: input, shape index: {}]   ;;  %s5492_s11 = inlined_call_operand.vmem [shape: f32[1,16], index: 11, kind: input, shape index: {}]   ;;  %s5493_s12 = inlined_call_operand.vmem [shape: bf16[16,64], index: 12, kind: input, shape index: {}]   ;;  %s5494_s2 = inlined_call_operand.vmem [shape: bf16[32,16], index: 2, kind: input, shape index: {}]   ;;  %s5495_s1 = inlined_call_operand.vmem [shape: bf16[32,16], index: 1, kind: input, shape index: {}]   ;;  %s5496_s6 = inlined_call_operand.vmem [shape: bf16[32,8,16], index: 6, kind: input, shape index: {}]   ;;  %s5497_s4 = inlined_call_operand.vmem [shape: bf16[32,8,16], index: 4, kind: input, shape index: {}]   ;;  %s5498_s13 = inlined_call_operand.vmem [shape: f32[1,64], index: 13, kind: input, shape index: {}]   ;;  %s5499_s14 = inlined_call_operand.vmem [shape: bf16[64,16], index: 14, kind: input, shape index: {}]   ;;  %s5500_s15 = inlined_call_operand.vmem [shape: f32[1,16], index: 15, kind: input, shape index: {}]   ;;  %s5501_s5 = inlined_call_operand.vmem [shape: bf16[32,8,16], index: 5, kind: input, shape index: {}]   ;;  %s5502_s16 = inlined_call_operand.vmem [shape: bf16[16,32], index: 16, kind: input, shape index: {}]   ;;  %s5503_s17 = inlined_call_operand.vmem [shape: f32[1,32], index: 17, kind: input, shape index: {}]   ;;  %s5504_s7 = inlined_call_operand.vmem [shape: bf16[32,32], index: 7, kind: input, shape index: {}]   ;;  %s5505_s18 = inlined_call_operand.vmem [shape: bf16[32,32], index: 18, kind: output, shape index: {}]  }
   0x1   :  { %5517 = sst [smem:[#allocation16_spill]] %s5487_s8  ;;  %v296_v2 = vsel %vm294_vm0, 4294967295, %v3554_v1  ;;  %vm474_vm3 = vcmask 523264   ;;  %vm1168_vm4 = vcmask 130048  }
   0x2   :  { %5518 = sst [smem:[#allocation17_spill]] %s5488_s0  ;;  %v297_v5 = vsel %vm295_vm1, %v296_v2, 0  ;;  %vm2941_vm1 = vcmask 1041409  }
   0x3   :  { %5519 = sst [smem:[#allocation18_spill]] %s5489_s3 }
   0x4   :  { %s5520_s29 = sld [smem:[#allocation16_spill]] }
   0x5   :  { %s5521_s19 = sld [smem:[#allocation17_spill]] }
   0x6   :  { %s5522_s21 = sld [smem:[#allocation18_spill]] }
   0xa   :  { %v240_v0 = vld [vmem:[%s5520_s29] sm:$0x3] }
   0xb   :  { %v60_v3 = vld [vmem:[%s5521_s19] sm:$0xff]  ;;  %v299_v8 = vand.u32 %v297_v5, %v240_v0  ;;  %v61_v41 = vld [vmem:[%s5521_s19 + $0x8] sm:$0xff]  ;;  %v3142_v5 = vld [vmem:[%s5491_s10 + $0x10] sm:$0xff] }
   0xc   :  { %v64_v4 = vld [vmem:[%s5522_s21] sm:$0xff]  ;;  %v100_v6 = vrot.slane %v60_v3, 1  ;;  %v128_v7 = vperm.slane %v60_v3, 0  ;;  %v65_v9 = vld [vmem:[%s5522_s21 + $0x8] sm:$0xff]  ;;  %v101_v14 = vrot.slane %v60_v3, 2  ;;  %v102_v15 = vrot.slane %v60_v3, 3 }
   0xd   :  { %308 = vmatpush.bf16.msra.mxu0 %v299_v8  ;;  %3414 = vmatpush.bf16.msra.mxu2 %v299_v8  ;;  %v66_v18 = vld [vmem:[%s5522_s21 + $0x10] sm:$0xff]  ;;  %v67_v19 = vld [vmem:[%s5522_s21 + $0x18] sm:$0xff]  ;;  %v103_v23 = vrot.slane %v60_v3, 4  ;;  %v104_v24 = vrot.slane %v60_v3, 5  ;;  %v68_v27 = vld [vmem:[%s5522_s21 + $0x20] sm:$0xff]  ;;  %v105_v32 = vrot.slane %v60_v3, 6 }
   0xe   :  { %v129_v10 = vperm.slane %v100_v6, 0  ;;  %v192_v11 = vsub.f32 %v128_v7, %v64_v4  ;;  %v130_v16 = vperm.slane %v101_v14, 0  ;;  %v131_v17 = vperm.slane %v102_v15, 0  ;;  %v69_v28 = vld [vmem:[%s5522_s21 + $0x28] sm:$0xff]  ;;  %v70_v36 = vld [vmem:[%s5522_s21 + $0x30] sm:$0xff]  ;;  %v71_v37 = vld [vmem:[%s5522_s21 + $0x38] sm:$0xff] }
   0xf   :  { %v132_v25 = vperm.slane %v103_v23, 0  ;;  %v133_v26 = vperm.slane %v104_v24, 0  ;;  %v106_v33 = vrot.slane %v60_v3, 7  ;;  %v134_v34 = vperm.slane %v105_v32, 0  ;;  %v72_v45 = vld [vmem:[%s5522_s21 + $0x40] sm:$0xff]  ;;  %v73_v46 = vld [vmem:[%s5522_s21 + $0x48] sm:$0xff] }
  0x10   :  { %v193_v12 = vsub.f32 %v129_v10, %v65_v9  ;;  %v194_v20 = vsub.f32 %v130_v16, %v66_v18  ;;  %v195_v21 = vsub.f32 %v131_v17, %v67_v19  ;;  %v107_v42 = vrot.slane %v61_v41, 1  ;;  %v74_v54 = vld [vmem:[%s5522_s21 + $0x50] sm:$0xff]  ;;  %v75_v55 = vld [vmem:[%s5522_s21 + $0x58] sm:$0xff]  ;;  %v76_v63 = vld [vmem:[%s5522_s21 + $0x60] sm:$0xff] }
  0x11   :  { %v196_v29 = vsub.f32 %v132_v25, %v68_v27  ;;  %v197_v30 = vsub.f32 %v133_v26, %v69_v28  ;;  %v135_v35 = vperm.slane %v106_v33, 0  ;;  %v198_v38 = vsub.f32 %v134_v34, %v70_v36  ;;  %v77_v0 = vld [vmem:[%s5522_s21 + $0x68] sm:$0xff]  ;;  %v3143_v3 = vld [vmem:[%s5491_s10 + $0x18] sm:$0xff]  ;;  %v62_v17 = vld [vmem:[%s5521_s19 + $0x10] sm:$0xff] }
  0x12   :  { %v224_v13 = vpack.c.bf16 %v193_v12, %v192_v11  ;;  %v225_v22 = vpack.c.bf16 %v195_v21, %v194_v20  ;;  %v136_v43 = vperm.slane %v61_v41, 0  ;;  %v137_v44 = vperm.slane %v107_v42, 0  ;;  %527 = vmatpush.bf16.msra.mxu1 %v3143_v3  ;;  %v3141_v8 = vld [vmem:[%s5491_s10 + $0x8] sm:$0xff]  ;;  %v78_v11 = vld [vmem:[%s5522_s21 + $0x70] sm:$0xff]  ;;  %v79_v12 = vld [vmem:[%s5522_s21 + $0x78] sm:$0xff] }
  0x13   :  { %v226_v31 = vpack.c.bf16 %v197_v30, %v196_v29  ;;  %v199_v39 = vsub.f32 %v135_v35, %v71_v37  ;;  %v108_v50 = vrot.slane %v61_v41, 2  ;;  %v109_v51 = vrot.slane %v61_v41, 3  ;;  %v80_v21 = vld [vmem:[%s5522_s21 + $0x80] sm:$0xff]  ;;  %v82_v34 = vld [vmem:[%s5522_s21 + $0x90] sm:$0xff]  ;;  %v83_v35 = vld [vmem:[%s5522_s21 + $0x98] sm:$0xff] }
  0x14   :  { %3034 = vmatmul.msk.bf16.vlgmr.msra.gmra.mxu0 %vm245_vm2, %v224_v13  ;;  %v200_v47 = vsub.f32 %v136_v43, %v72_v45  ;;  %v201_v48 = vsub.f32 %v137_v44, %v73_v46  ;;  %v110_v59 = vrot.slane %v61_v41, 4  ;;  %v111_v60 = vrot.slane %v61_v41, 5  ;;  %v3140_v13 = vld [vmem:[%s5491_s10] sm:$0xff]  ;;  %v87_v3 = vld [vmem:[%s5522_s21 + $0xb8] sm:$0xff] }
  0x15   :  { %v227_v40 = vpack.c.bf16 %v199_v39, %v198_v38  ;;  %v138_v52 = vperm.slane %v108_v50, 0  ;;  %v139_v53 = vperm.slane %v109_v51, 0  ;;  %v112_v6 = vrot.slane %v61_v41, 6  ;;  %v3739_v27 = vld [vmem:[%s5490_s9] ss:$0 sm:$0xff]  ;;  %v85_v51 = vld [vmem:[%s5522_s21 + $0xa8] sm:$0xff] }
  0x16   :  { %v228_v49 = vpack.c.bf16 %v201_v48, %v200_v47  ;;  %v140_v61 = vperm.slane %v110_v59, 0  ;;  %v141_v62 = vperm.slane %v111_v60, 0  ;;  %v113_v7 = vrot.slane %v61_v41, 7  ;;  %528 = vmatpush.bf16.msra.mxu1 %v3142_v5  ;;  %v84_v50 = vld [vmem:[%s5522_s21 + $0xa0] sm:$0xff] }
  0x17   :  { %v202_v56 = vsub.f32 %v138_v52, %v74_v54  ;;  %v203_v57 = vsub.f32 %v139_v53, %v75_v55  ;;  %v142_v9 = vperm.slane %v112_v6, 0  ;;  %v114_v18 = vrot.slane %v62_v17, 1 }
  0x18   :  { %v204_v1 = vsub.f32 %v140_v61, %v76_v63  ;;  %v205_v2 = vsub.f32 %v141_v62, %v77_v0  ;;  %v143_v10 = vperm.slane %v113_v7, 0  ;;  %v144_v19 = vperm.slane %v62_v17, 0 }
  0x19   :  { %v229_v58 = vpack.c.bf16 %v203_v57, %v202_v56  ;;  %v206_v14 = vsub.f32 %v142_v9, %v78_v11  ;;  %v145_v20 = vperm.slane %v114_v18, 0  ;;  %v115_v28 = vrot.slane %v62_v17, 2  ;;  %v88_v18 = vld [vmem:[%s5522_s21 + $0xc0] sm:$0xff] }
  0x1a   :  { %v230_v4 = vpack.c.bf16 %v205_v2, %v204_v1  ;;  %529 = vmatpush.bf16.msra.mxu1 %v3141_v8  ;;  %v207_v15 = vsub.f32 %v143_v10, %v79_v12  ;;  %v208_v23 = vsub.f32 %v144_v19, %v80_v21  ;;  %v116_v29 = vrot.slane %v62_v17, 3  ;;  %v86_v2 = vld [vmem:[%s5522_s21 + $0xb0] sm:$0xff]  ;;  %v63_v12 = vld [vmem:[%s5521_s19 + $0x18] sm:$0xff]  ;;  %v89_v19 = vld [vmem:[%s5522_s21 + $0xc8] sm:$0xff] }
  0x1b   :  { %v117_v44 = vrot.slane %v62_v17, 4  ;;  %v118_v45 = vrot.slane %v62_v17, 5  ;;  %v119_v60 = vrot.slane %v62_v17, 6  ;;  %v120_v61 = vrot.slane %v62_v17, 7 }
  0x1c   :  { %v231_v16 = vpack.c.bf16 %v207_v15, %v206_v14  ;;  %v147_v32 = vperm.slane %v116_v29, 0  ;;  %v152_v15 = vperm.slane %v63_v12, 0 }
  0x1d   :  { %v148_v47 = vperm.slane %v117_v44, 0  ;;  %v149_v48 = vperm.slane %v118_v45, 0  ;;  %v150_v63 = vperm.slane %v119_v60, 0  ;;  %v151_v0 = vperm.slane %v120_v61, 0  ;;  %v90_v44 = vld [vmem:[%s5522_s21 + $0xd0] sm:$0xff]  ;;  %v91_v45 = vld [vmem:[%s5522_s21 + $0xd8] sm:$0xff] }
  0x1e   :  { %530 = vmatpush.bf16.msra.mxu1 %v3140_v13  ;;  %v121_v13 = vrot.slane %v63_v12, 1  ;;  %v92_v60 = vld [vmem:[%s5522_s21 + $0xe0] sm:$0xff]  ;;  %v93_v61 = vld [vmem:[%s5522_s21 + $0xe8] sm:$0xff] }
  0x1f   :  { %v212_v55 = vsub.f32 %v148_v47, %v84_v50  ;;  %v213_v56 = vsub.f32 %v149_v48, %v85_v51  ;;  %v214_v7 = vsub.f32 %v150_v63, %v86_v2  ;;  %v215_v8 = vsub.f32 %v151_v0, %v87_v3 }
  0x21   :  { %v235_v10 = vpack.c.bf16 %v215_v8, %v214_v7 }
  0x24   :  { %3035 = vmatmul.msk.bf16.gmra.mxu0 %vm245_vm2, %v225_v22  ;;  %v81_v22 = vld [vmem:[%s5522_s21 + $0x88] sm:$0xff] }
  0x25   :  { %v209_v24 = vsub.f32 %v145_v20, %v81_v22 }
  0x27   :  { %v232_v25 = vpack.c.bf16 %v209_v24, %v208_v23  ;;  %v216_v23 = vsub.f32 %v152_v15, %v88_v18 }
  0x34   :  { %3036 = vmatmul.msk.bf16.gmra.mxu0 %vm245_vm2, %v226_v31  ;;  %v146_v31 = vperm.slane %v115_v28, 0  ;;  %v127_v28 = vrot.slane %v63_v12, 7 }
  0x36   :  { %v210_v39 = vsub.f32 %v146_v31, %v82_v34  ;;  %v159_v34 = vperm.slane %v127_v28, 0  ;;  %v3231_v28 = vld [vmem:[%s5496_s6] sm:$0xff]  }
  0x44   :  { %3037 = vmatmul.msk.bf16.gmra.mxu0 %vm245_vm2, %v227_v40  ;;  %v211_v40 = vsub.f32 %v147_v32, %v83_v35  ;;  %v94_v32 = vld [vmem:[%s5522_s21 + $0xf0] sm:$0xff] }
  0x46   :  { %v233_v42 = vpack.c.bf16 %v211_v40, %v210_v39 }
  0x54   :  { %3038 = vmatmul.msk.bf16.gmra.mxu0 %vm245_vm2, %v228_v49 }
  0x64   :  { %3039 = vmatmul.msk.bf16.gmra.mxu0 %vm245_vm2, %v229_v58  ;;  %v234_v58 = vpack.c.bf16 %v213_v56, %v212_v55  ;;  %v125_v55 = vrot.slane %v63_v12, 5 }
  0x74   :  { %3040 = vmatmul.msk.bf16.gmra.mxu0 %vm245_vm2, %v230_v4 }
  0x84   :  { %3041 = vmatmul.msk.bf16.gmra.mxu0 %vm245_vm2, %v231_v16  ;;  %v153_v16 = vperm.slane %v121_v13, 0  ;;  %v3144_v13 = vld [vmem:[%s5493_s12] sm:$0xff] }
  0x85   :  { %1224 = vmatpush.bf16.msrb.mxu2 %v3144_v13 }
  0x86   :  { %v217_v24 = vsub.f32 %v153_v16, %v89_v19 }
  0x88   :  { %v236_v29 = vpack.c.bf16 %v217_v24, %v216_v23  ;;  %v3830_v24 = vld [vmem:[%s5495_s1] sm:$0xff]  }
  0x91   :  { %v310_v26 = vpop.f32.mrf.mxu0 }
  0x92   :  { %v311_v30 = vadd.f32 %v3739_v27, %v310_v26  ;;  %v126_v26 = vrot.slane %v63_v12, 6 }
  0x94   :  { %3042 = vmatmul.msk.bf16.gmra.mxu0 %vm245_vm2, %v232_v25  ;;  %v390_v37 = vmax.f32 %v311_v30, 0.0  ;;  %v158_v30 = vperm.slane %v126_v26, 0 }
  0x96   :  { %v222_v35 = vsub.f32 %v158_v30, %v94_v32 }
  0x99   :  { %v312_v33 = vpop.f32.mrf.mxu0 }
  0x9a   :  { %v313_v36 = vadd.f32 %v3739_v27, %v312_v33  ;;  %v95_v33 = vld [vmem:[%s5522_s21 + $0xf8] sm:$0xff] }
  0x9c   :  { %v391_v38 = vmax.f32 %v313_v36, 0.0  ;;  %v223_v36 = vsub.f32 %v159_v34, %v95_v33 }
  0x9e   :  { %v422_v41 = vpack.c.bf16 %v391_v38, %v390_v37  ;;  %v122_v37 = vrot.slane %v63_v12, 2  ;;  %v123_v38 = vrot.slane %v63_v12, 3  ;;  %v239_v39 = vpack.c.bf16 %v223_v36, %v222_v35  ;;  %v3846_v35 = vld [vmem:[%s5492_s11] ss:$0 sm:$0xff] }
  0x9f   :  { %v3167_v36 = vld [vmem:[%s5497_s4] sm:$0xff]  }
  0xa0   :  { %3066 = vmatmul.msk.bf16.vlgmr.msra.gmra.mxu1 %vm474_vm3, %v422_v41  ;;  %3049 = vmatmul.msk.bf16.vlgmr.msra.gmra.mxu2 %vm245_vm2, %v239_v39  ;;  %v154_v41 = vperm.slane %v122_v37, 0  ;;  %v3232_v37 = vunpack.c.l.bf16 %v3231_v28 }
  0xa1   :  { %v315_v43 = vpop.f32.mrf.mxu0 }
  0xa2   :  { %v316_v46 = vadd.f32 %v3739_v27, %v315_v43 }
  0xa4   :  { %3043 = vmatmul.msk.bf16.gmra.mxu0 %vm245_vm2, %v233_v42  ;;  %v392_v53 = vmax.f32 %v316_v46, 0.0  ;;  %v155_v42 = vperm.slane %v123_v38, 0 }
  0xa6   :  { %v219_v50 = vsub.f32 %v155_v42, %v91_v45  ;;  %v3168_v42 = vunpack.c.l.bf16 %v3167_v36 }
  0xa9   :  { %v317_v49 = vpop.f32.mrf.mxu0 }
  0xaa   :  { %v318_v52 = vadd.f32 %v3739_v27, %v317_v49  ;;  %v218_v49 = vsub.f32 %v154_v41, %v90_v44 }
  0xac   :  { %v393_v54 = vmax.f32 %v318_v52, 0.0  ;;  %v237_v52 = vpack.c.bf16 %v219_v50, %v218_v49 }
  0xae   :  { %v423_v57 = vpack.c.bf16 %v393_v54, %v392_v53  ;;  %v124_v54 = vrot.slane %v63_v12, 4 }
  0xb0   :  { %3067 = vmatmul.msk.bf16.gmra.mxu1 %vm474_vm3, %v423_v57  ;;  %v156_v57 = vperm.slane %v124_v54, 0 }
  0xb1   :  { %v320_v59 = vpop.f32.mrf.mxu0 }
  0xb2   :  { %v321_v62 = vadd.f32 %v3739_v27, %v320_v59 }
  0xb4   :  { %3044 = vmatmul.msk.bf16.gmra.mxu0 %vm245_vm2, %v234_v58  ;;  %v394_v5 = vmax.f32 %v321_v62, 0.0  ;;  %v157_v58 = vperm.slane %v125_v55, 0 }
  0xb6   :  { %v221_v2 = vsub.f32 %v157_v58, %v93_v61 }
  0xb9   :  { %v322_v1 = vpop.f32.mrf.mxu0 }
  0xba   :  { %v323_v4 = vadd.f32 %v3739_v27, %v322_v1  ;;  %v220_v1 = vsub.f32 %v156_v57, %v92_v60 }
  0xbc   :  { %v395_v6 = vmax.f32 %v323_v4, 0.0  ;;  %v238_v4 = vpack.c.bf16 %v221_v2, %v220_v1 }
  0xbe   :  { %v424_v9 = vpack.c.bf16 %v395_v6, %v394_v5 }
  0xc0   :  { %3068 = vmatmul.msk.bf16.gmra.mxu1 %vm474_vm3, %v424_v9 }
  0xc1   :  { %v325_v11 = vpop.f32.mrf.mxu0 }
  0xc2   :  { %v326_v14 = vadd.f32 %v3739_v27, %v325_v11 }
  0xc4   :  { %3045 = vmatmul.msk.bf16.gmra.mxu0 %vm245_vm2, %v235_v10  ;;  %v396_v21 = vmax.f32 %v326_v14, 0.0 }
  0xc9   :  { %v327_v17 = vpop.f32.mrf.mxu0 }
  0xca   :  { %v328_v20 = vadd.f32 %v3739_v27, %v327_v17 }
  0xcc   :  { %v397_v22 = vmax.f32 %v328_v20, 0.0 }
  0xce   :  { %v425_v25 = vpack.c.bf16 %v397_v22, %v396_v21  ;;  %v3824_v21 = vld [vmem:[%s5494_s2] sm:$0xff]  }
  0xcf   :  { %v3834_v26 = vunpack.c.l.bf16 %v3824_v21 }
  0xd0   :  { %3069 = vmatmul.msk.bf16.gmra.mxu1 %vm474_vm3, %v425_v25 }
  0xd1   :  { %v330_v31 = vpop.f32.mrf.mxu0  ;;  %v952_v32 = vrot.slane %v3834_v26, 1  ;;  %v980_v38 = vperm.slane %v3834_v26, 0  ;;  %v953_v61 = vrot.slane %v3834_v26, 2  ;;  %v954_v2 = vrot.slane %v3834_v26, 3 }
  0xd2   :  { %v331_v40 = vadd.f32 %v3739_v27, %v330_v31  ;;  %v3840_v31 = vunpack.c.l.bf16 %v3830_v24 }
  0xd3   :  { %v981_v41 = vperm.slane %v952_v32, 0 }
  0xd4   :  { %3046 = vmatmul.msk.bf16.gmra.mxu0 %vm245_vm2, %v236_v29  ;;  %v398_v47 = vmax.f32 %v331_v40, 0.0  ;;  %v824_v39 = vrot.slane %v3840_v31, 1  ;;  %v3233_v40 = vunpack.c.h.bf16 %v3231_v28 }
  0xd6   :  { %v1045_v49 = vsub.f32 %v981_v41, %v3233_v40 }
  0xd9   :  { %v332_v43 = vpop.f32.mrf.mxu0 }
  0xda   :  { %v333_v46 = vadd.f32 %v3739_v27, %v332_v43  ;;  %v852_v43 = vperm.slane %v3840_v31, 0 }
  0xdc   :  { %v399_v48 = vmax.f32 %v333_v46, 0.0  ;;  %v1044_v46 = vsub.f32 %v980_v38, %v3232_v37  ;;  %v955_v37 = vrot.slane %v3834_v26, 4  ;;  %v3384_v38 = vld [vmem:[%s5496_s6 + $0x10] sm:$0xff]  }
  0xde   :  { %v426_v51 = vpack.c.bf16 %v399_v48, %v398_v47  ;;  %v3169_v47 = vunpack.c.h.bf16 %v3167_v36  ;;  %v853_v48 = vperm.slane %v824_v39, 0 }
  0xe0   :  { %3070 = vmatmul.msk.bf16.gmra.mxu1 %vm474_vm3, %v426_v51  ;;  %v916_v51 = vsub.f32 %v852_v43, %v3168_v42  ;;  %v917_v54 = vsub.f32 %v853_v48, %v3169_v47  ;;  %v956_v42 = vrot.slane %v3834_v26, 5  ;;  %v3240_v47 = vunpack.c.l.bf16 %v3384_v38 }
  0xe1   :  { %v335_v53 = vpop.f32.mrf.mxu0  ;;  %v984_v48 = vperm.slane %v955_v37, 0 }
  0xe2   :  { %v336_v56 = vadd.f32 %v3739_v27, %v335_v53 }
  0xe4   :  { %3047 = vmatmul.msk.bf16.gmra.mxu0 %vm245_vm2, %v237_v52  ;;  %v400_v63 = vmax.f32 %v336_v56, 0.0 }
  0xe9   :  { %v337_v59 = vpop.f32.mrf.mxu0 }
  0xea   :  { %v338_v62 = vadd.f32 %v3739_v27, %v337_v59 }
  0xec   :  { %v401_v0 = vmax.f32 %v338_v62, 0.0  ;;  %v3383_v62 = vld [vmem:[%s5496_s6 + $0x8] sm:$0xff]  }
  0xee   :  { %v427_v3 = vpack.c.bf16 %v401_v0, %v400_v63 }
  0xf0   :  { %3071 = vmatmul.msk.bf16.gmra.mxu1 %vm474_vm3, %v427_v3 }
  0xf1   :  { %v340_v5 = vpop.f32.mrf.mxu0 }
  0xf2   :  { %v341_v6 = vadd.f32 %v3739_v27, %v340_v5 }
  0xf4   :  { %3048 = vmatmul.msk.bf16.gmra.mxu0 %vm245_vm2, %v238_v4  ;;  %v402_v9 = vmax.f32 %v341_v6, 0.0  ;;  %v825_v4 = vrot.slane %v3840_v31, 2  ;;  %v3368_v6 = vld [vmem:[%s5497_s4 + $0x8] sm:$0xff]  }
  0xf6   :  { %v854_v13 = vperm.slane %v825_v4, 0 }
  0xf9   :  { %v342_v7 = vpop.f32.mrf.mxu0 }
  0xfa   :  { %v343_v8 = vadd.f32 %v3739_v27, %v342_v7  ;;  %v3236_v7 = vunpack.c.l.bf16 %v3383_v62 }
  0xfc   :  { %v403_v10 = vmax.f32 %v343_v8, 0.0  ;;  %v982_v8 = vperm.slane %v953_v61, 0 }
  0xfe   :  { %v428_v11 = vpack.c.bf16 %v403_v10, %v402_v9  ;;  %v826_v9 = vrot.slane %v3840_v31, 3  ;;  %v3237_v10 = vunpack.c.h.bf16 %v3383_v62 }
 0x100   :  { %3072 = vmatmul.msk.bf16.gmra.mxu1 %vm474_vm3, %v428_v11  ;;  %v983_v11 = vperm.slane %v954_v2, 0 }
 0x101   :  { %v345_v12 = vpop.f32.mrf.mxu0 }
 0x102   :  { %v346_v14 = vadd.f32 %v3739_v27, %v345_v12  ;;  %v3172_v12 = vunpack.c.l.bf16 %v3368_v6 }
 0x104   :  { %v404_v17 = vmax.f32 %v346_v14, 0.0 }
 0x109   :  { %v347_v15 = vpop.f32.mrf.mxu0 }
 0x10a   :  { %v348_v16 = vadd.f32 %v3739_v27, %v347_v15 }
 0x10c   :  { %v405_v18 = vmax.f32 %v348_v16, 0.0  ;;  %v1046_v16 = vsub.f32 %v982_v8, %v3236_v7 }
 0x10e   :  { %v429_v19 = vpack.c.bf16 %v405_v18, %v404_v17  ;;  %v3173_v17 = vunpack.c.h.bf16 %v3368_v6  ;;  %v855_v18 = vperm.slane %v826_v9, 0  ;;  %v957_v9 = vrot.slane %v3834_v26, 6 }
 0x110   :  { %3073 = vmatmul.msk.bf16.gmra.mxu1 %vm474_vm3, %v429_v19  ;;  %v1047_v19 = vsub.f32 %v983_v11, %v3237_v10  ;;  %v919_v28 = vsub.f32 %v855_v18, %v3173_v17  ;;  %v3385_v10 = vld [vmem:[%s5496_s6 + $0x18] sm:$0xff]  }
 0x111   :  { %v350_v20 = vpop.f32.mrf.mxu0  ;;  %v3370_v18 = vld [vmem:[%s5497_s4 + $0x18] sm:$0xff]  }
 0x112   :  { %v351_v22 = vadd.f32 %v3739_v27, %v350_v20 }
 0x114   :  { %v406_v29 = vmax.f32 %v351_v22, 0.0  ;;  %v918_v22 = vsub.f32 %v854_v13, %v3172_v12 }
 0x119   :  { %v352_v23 = vpop.f32.mrf.mxu0 }
 0x11a   :  { %v353_v25 = vadd.f32 %v3739_v27, %v352_v23 }
 0x11c   :  { %v407_v30 = vmax.f32 %v353_v25, 0.0 }
 0x11d   :  { %v532_v33 = vpop.f32.mrf.mxu1 }
 0x11e   :  { %v430_v34 = vpack.c.bf16 %v407_v30, %v406_v29  ;;  %v533_v45 = vadd.f32 %v3846_v35, %v532_v33 }
 0x120   :  { %3074 = vmatmul.msk.bf16.gmra.mxu1 %vm474_vm3, %v430_v34  ;;  %v3856_v52 = vadd.f32 %v1044_v46, %v533_v45  ;;  %v3369_v46 = vld [vmem:[%s5497_s4 + $0x10] sm:$0xff]  }
 0x121   :  { %v355_v44 = vpop.f32.mrf.mxu0 }
 0x122   :  { %v356_v55 = vadd.f32 %v3739_v27, %v355_v44  ;;  %v1108_v58 = vadd.f32 %v3856_v52, %v916_v51  ;;  %v827_v44 = vrot.slane %v3840_v31, 4  ;;  %v985_v51 = vperm.slane %v956_v42, 0 }
 0x124   :  { %v408_v63 = vmax.f32 %v356_v55, 0.0 }
 0x125   :  { %v534_v50 = vpop.f32.mrf.mxu1 }
 0x126   :  { %v535_v53 = vadd.f32 %v3846_v35, %v534_v50  ;;  %v3241_v50 = vunpack.c.h.bf16 %v3384_v38  ;;  %v3923_v38 = vunpack.c.h.bf16 %v3824_v21  ;;  %v3371_v21 = vld [vmem:[%s5497_s4 + $0x20] sm:$0xff]  }
 0x128   :  { %v3860_v56 = vadd.f32 %v1045_v49, %v535_v53  ;;  %v828_v49 = vrot.slane %v3840_v31, 5  ;;  %v3176_v53 = vunpack.c.l.bf16 %v3369_v46  ;;  %v1049_v61 = vsub.f32 %v985_v51, %v3241_v50 }
 0x129   :  { %v357_v57 = vpop.f32.mrf.mxu0  ;;  %v3184_v51 = vunpack.c.l.bf16 %v3371_v21 }
 0x12a   :  { %v1109_v59 = vadd.f32 %v3860_v56, %v917_v54  ;;  %v358_v60 = vadd.f32 %v3739_v27, %v357_v57  ;;  %v856_v54 = vperm.slane %v827_v44, 0 }
 0x12c   :  { %v409_v0 = vmax.f32 %v358_v60, 0.0  ;;  %v1140_v1 = vpack.c.bf16 %v1109_v59, %v1108_v58  ;;  %v1048_v58 = vsub.f32 %v984_v48, %v3240_v47  ;;  %v3177_v59 = vunpack.c.h.bf16 %v3369_v46 }
 0x12d   :  { %v537_v3 = vpop.f32.mrf.mxu1  ;;  %v857_v60 = vperm.slane %v828_v49, 0  ;;  %v988_v47 = vperm.slane %v3923_v38, 0 }
 0x12e   :  { %v431_v5 = vpack.c.bf16 %v409_v0, %v408_v63  ;;  %3086 = vmatmul.msk.bf16.vlgmr.msrb.gmra.mxu2 %vm1168_vm4, %v1140_v1  ;;  %v538_v15 = vadd.f32 %v3846_v35, %v537_v3  ;;  %v920_v63 = vsub.f32 %v856_v54, %v3176_v53 }
 0x12f   :  { %v921_v2 = vsub.f32 %v857_v60, %v3177_v59 }
 0x130   :  { %3075 = vmatmul.msk.bf16.gmra.mxu1 %vm474_vm3, %v431_v5  ;;  %v3878_v23 = vadd.f32 %v1046_v16, %v538_v15  ;;  %v829_v16 = vrot.slane %v3840_v31, 6 }
 0x131   :  { %v360_v14 = vpop.f32.mrf.mxu0 }
 0x132   :  { %v361_v29 = vadd.f32 %v3739_v27, %v360_v14  ;;  %v1110_v33 = vadd.f32 %v3878_v23, %v918_v22  ;;  %v958_v14 = vrot.slane %v3834_v26, 7  ;;  %v830_v22 = vrot.slane %v3840_v31, 7  ;;  %v3386_v31 = vld [vmem:[%s5496_s6 + $0x20] sm:$0xff]  }
 0x133   :  { %v858_v26 = vperm.slane %v829_v16, 0  ;;  %v3248_v46 = vunpack.c.l.bf16 %v3386_v31 }
 0x134   :  { %v410_v39 = vmax.f32 %v361_v29, 0.0  ;;  %v3180_v29 = vunpack.c.l.bf16 %v3370_v18  ;;  %v859_v37 = vperm.slane %v830_v22, 0 }
 0x135   :  { %v539_v20 = vpop.f32.mrf.mxu1 }
 0x136   :  { %v540_v25 = vadd.f32 %v3846_v35, %v539_v20  ;;  %v986_v20 = vperm.slane %v957_v9, 0 }
 0x138   :  { %v3882_v30 = vadd.f32 %v1047_v19, %v540_v25  ;;  %v3244_v19 = vunpack.c.l.bf16 %v3385_v10  ;;  %v3245_v25 = vunpack.c.h.bf16 %v3385_v10  ;;  %v3185_v10 = vunpack.c.h.bf16 %v3371_v21 }
 0x139   :  { %v362_v32 = vpop.f32.mrf.mxu0 }
 0x13a   :  { %v1111_v34 = vadd.f32 %v3882_v30, %v919_v28  ;;  %v363_v36 = vadd.f32 %v3739_v27, %v362_v32  ;;  %v987_v28 = vperm.slane %v958_v14, 0  ;;  %v3387_v14 = vld [vmem:[%s5496_s6 + $0x28] sm:$0xff]  }
 0x13c   :  { %v411_v40 = vmax.f32 %v363_v36, 0.0  ;;  %v1141_v41 = vpack.c.bf16 %v1111_v34, %v1110_v33  ;;  %v1050_v34 = vsub.f32 %v986_v20, %v3244_v19  ;;  %v3181_v36 = vunpack.c.h.bf16 %v3370_v18  ;;  %v3372_v19 = vld [vmem:[%s5497_s4 + $0x28] sm:$0xff]  }
 0x13d   :  { %v542_v43 = vpop.f32.mrf.mxu1  ;;  %v3252_v20 = vunpack.c.l.bf16 %v3387_v14 }
 0x13e   :  { %v432_v45 = vpack.c.bf16 %v411_v40, %v410_v39  ;;  %3087 = vmatmul.msk.bf16.gmra.mxu2 %vm1168_vm4, %v1141_v41  ;;  %v543_v57 = vadd.f32 %v3846_v35, %v542_v43  ;;  %v1051_v39 = vsub.f32 %v987_v28, %v3245_v25  ;;  %v922_v40 = vsub.f32 %v858_v26, %v3180_v29 }
 0x13f   :  { %v923_v44 = vsub.f32 %v859_v37, %v3181_v36 }
 0x140   :  { %3076 = vmatmul.msk.bf16.gmra.mxu1 %vm474_vm3, %v432_v45  ;;  %v3900_v0 = vadd.f32 %v1048_v58, %v543_v57  ;;  %v3932_v45 = vunpack.c.h.bf16 %v3830_v24  ;;  %v1052_v57 = vsub.f32 %v988_v47, %v3248_v46 }
 0x141   :  { %v365_v55 = vpop.f32.mrf.mxu0 }
 0x142   :  { %v366_v3 = vadd.f32 %v3739_v27, %v365_v55  ;;  %v1112_v6 = vadd.f32 %v3900_v0, %v920_v63  ;;  %v860_v55 = vperm.slane %v3932_v45, 0  ;;  %v832_v18 = vrot.slane %v3932_v45, 2 }
 0x143   :  { %v833_v46 = vrot.slane %v3932_v45, 3 }
 0x144   :  { %v412_v11 = vmax.f32 %v366_v3, 0.0  ;;  %v831_v3 = vrot.slane %v3932_v45, 1 }
 0x145   :  { %v544_v62 = vpop.f32.mrf.mxu1 }
 0x146   :  { %v545_v1 = vadd.f32 %v3846_v35, %v544_v62 }
 0x148   :  { %v3904_v4 = vadd.f32 %v1049_v61, %v545_v1  ;;  %v959_v61 = vrot.slane %v3923_v38, 1 }
 0x149   :  { %v367_v5 = vpop.f32.mrf.mxu0 }
 0x14a   :  { %v1113_v7 = vadd.f32 %v3904_v4, %v921_v2  ;;  %v368_v8 = vadd.f32 %v3739_v27, %v367_v5  ;;  %v924_v2 = vsub.f32 %v860_v55, %v3184_v51  ;;  %v962_v55 = vrot.slane %v3923_v38, 4 }
 0x14c   :  { %v413_v12 = vmax.f32 %v368_v8, 0.0  ;;  %v1142_v13 = vpack.c.bf16 %v1113_v7, %v1112_v6  ;;  %v3249_v6 = vunpack.c.h.bf16 %v3386_v31  ;;  %v989_v7 = vperm.slane %v959_v61, 0 }
 0x14d   :  { %v547_v15 = vpop.f32.mrf.mxu1 }
 0x14e   :  { %v433_v17 = vpack.c.bf16 %v413_v12, %v412_v11  ;;  %3088 = vmatmul.msk.bf16.gmra.mxu2 %vm1168_vm4, %v1142_v13  ;;  %v548_v33 = vadd.f32 %v3846_v35, %v547_v15  ;;  %v861_v11 = vperm.slane %v831_v3, 0  ;;  %v960_v12 = vrot.slane %v3923_v38, 2 }
 0x14f   :  { %v1053_v13 = vsub.f32 %v989_v7, %v3249_v6 }
 0x150   :  { %3077 = vmatmul.msk.bf16.gmra.mxu1 %vm474_vm3, %v433_v17  ;;  %v3928_v42 = vadd.f32 %v1050_v34, %v548_v33  ;;  %v925_v17 = vsub.f32 %v861_v11, %v3185_v10  ;;  %v990_v22 = vperm.slane %v960_v12, 0  ;;  %v3188_v33 = vunpack.c.l.bf16 %v3372_v19 }
 0x151   :  { %v370_v32 = vpop.f32.mrf.mxu0  ;;  %v862_v34 = vperm.slane %v832_v18, 0 }
 0x152   :  { %v371_v48 = vadd.f32 %v3739_v27, %v370_v32  ;;  %v1114_v53 = vadd.f32 %v3928_v42, %v922_v40  ;;  %v1054_v36 = vsub.f32 %v990_v22, %v3252_v20  ;;  %v961_v40 = vrot.slane %v3923_v38, 3 }
 0x153   :  { %v926_v21 = vsub.f32 %v862_v34, %v3188_v33 }
 0x154   :  { %v414_v58 = vmax.f32 %v371_v48, 0.0  ;;  %v3253_v48 = vunpack.c.h.bf16 %v3387_v14 }
 0x155   :  { %v549_v41 = vpop.f32.mrf.mxu1 }
 0x156   :  { %v550_v43 = vadd.f32 %v3846_v35, %v549_v41 }
 0x158   :  { %v3939_v49 = vadd.f32 %v1051_v39, %v550_v43 }
 0x159   :  { %v372_v50 = vpop.f32.mrf.mxu0 }
 0x15a   :  { %v1115_v54 = vadd.f32 %v3939_v49, %v923_v44  ;;  %v373_v24 = vadd.f32 %v3739_v27, %v372_v50  ;;  %v991_v50 = vperm.slane %v961_v40, 0 }
 0x15c   :  { %v415_v59 = vmax.f32 %v373_v24, 0.0  ;;  %v1143_v60 = vpack.c.bf16 %v1115_v54, %v1114_v53  ;;  %v3189_v54 = vunpack.c.h.bf16 %v3372_v19  ;;  %v863_v24 = vperm.slane %v833_v46, 0 }
 0x15d   :  { %v552_v62 = vpop.f32.mrf.mxu1 }
 0x15e   :  { %v434_v63 = vpack.c.bf16 %v415_v59, %v414_v58  ;;  %v553_v1 = vadd.f32 %v3846_v35, %v552_v62  ;;  %3089 = vmatmul.msk.bf16.gmra.mxu2 %vm1168_vm4, %v1143_v60  ;;  %v3388_v58 = vld [vmem:[%s5496_s6 + $0x30] sm:$0xff]   ;;  %v927_v61 = vsub.f32 %v863_v24, %v3189_v54  ;;  %v834_v62 = vrot.slane %v3932_v45, 4 }
 0x160   :  { %v3949_v5 = vadd.f32 %v1052_v57, %v553_v1  ;;  %3078 = vmatmul.msk.bf16.gmra.mxu1 %vm474_vm3, %v434_v63  ;;  %v1055_v57 = vsub.f32 %v991_v50, %v3253_v48  ;;  %v3373_v63 = vld [vmem:[%s5497_s4 + $0x30] sm:$0xff]   ;;  %v3256_v1 = vunpack.c.l.bf16 %v3388_v58  ;;  %v864_v12 = vperm.slane %v834_v62, 0  ;;  %v3374_v50 = vld [vmem:[%s5497_s4 + $0x38] sm:$0xff]  }
 0x161   :  { %v375_v8 = vpop.f32.mrf.mxu0  ;;  %v3192_v11 = vunpack.c.l.bf16 %v3373_v63  ;;  %v3193_v34 = vunpack.c.h.bf16 %v3373_v63  ;;  %v836_v48 = vrot.slane %v3932_v45, 6 }
 0x162   :  { %v1116_v9 = vadd.f32 %v3949_v5, %v924_v2  ;;  %v376_v25 = vadd.f32 %v3739_v27, %v375_v8  ;;  %v992_v2 = vperm.slane %v962_v55, 0  ;;  %v385_v8 = vpop.f32.mrf.mxu2 }
 0x163   :  { %v928_v22 = vsub.f32 %v864_v12, %v3192_v11  ;;  %v386_v40 = vadd.f32 %v3739_v27, %v385_v8  ;;  %v3197_v11 = vunpack.c.h.bf16 %v3374_v50 }
 0x164   :  { %v416_v37 = vmax.f32 %v376_v25, 0.0  ;;  %v835_v25 = vrot.slane %v3932_v45, 5 }
 0x165   :  { %v554_v15 = vpop.f32.mrf.mxu1  ;;  %v420_v24 = vmax.f32 %v386_v40, 0.0 }
 0x166   :  { %v555_v16 = vadd.f32 %v3846_v35, %v554_v15 }
 0x168   :  { %v3963_v28 = vadd.f32 %v1053_v13, %v555_v16  ;;  %v1056_v13 = vsub.f32 %v992_v2, %v3256_v1 }
 0x169   :  { %v377_v29 = vpop.f32.mrf.mxu0 }
 0x16a   :  { %v1117_v26 = vadd.f32 %v3963_v28, %v925_v17  ;;  %v378_v32 = vadd.f32 %v3739_v27, %v377_v29  ;;  %v963_v17 = vrot.slane %v3923_v38, 5 }
 0x16c   :  { %v417_v39 = vmax.f32 %v378_v32, 0.0  ;;  %v1144_v31 = vpack.c.bf16 %v1117_v26, %v1116_v9  ;;  %v3257_v26 = vunpack.c.h.bf16 %v3388_v58  ;;  %v993_v32 = vperm.slane %v963_v17, 0  ;;  %v4029_v17 = vld [vmem:[%s5494_s2 + $0x8] sm:$0xff]  }
 0x16d   :  { %v557_v41 = vpop.f32.mrf.mxu1  ;;  %v3196_v58 = vunpack.c.l.bf16 %v3374_v50 }
 0x16e   :  { %v435_v43 = vpack.c.bf16 %v417_v39, %v416_v37  ;;  %v558_v44 = vadd.f32 %v3846_v35, %v557_v41  ;;  %3090 = vmatmul.msk.bf16.gmra.mxu2 %vm1168_vm4, %v1144_v31  ;;  %v387_v37 = vpop.f32.mrf.mxu2  ;;  %v1057_v39 = vsub.f32 %v993_v32, %v3257_v26  ;;  %v964_v31 = vrot.slane %v3923_v38, 6  ;;  %v3390_v26 = vld [vmem:[%s5496_s6 + $0x40] sm:$0xff]  }
 0x16f   :  { %v3145_v32 = vld [vmem:[%s5499_s14] sm:$0xff] }
 0x170   :  { %v3971_v47 = vadd.f32 %v1054_v36, %v558_v44  ;;  %3079 = vmatmul.msk.bf16.gmra.mxu1 %vm474_vm3, %v435_v43  ;;  %v865_v36 = vperm.slane %v835_v25, 0  ;;  %v3389_v43 = vld [vmem:[%s5496_s6 + $0x38] sm:$0xff]   ;;  %v388_v44 = vadd.f32 %v3739_v27, %v387_v37  ;;  %v994_v54 = vperm.slane %v964_v31, 0 }
 0x171   :  { %v380_v51 = vpop.f32.mrf.mxu0  ;;  %v4043_v25 = vunpack.c.l.bf16 %v4029_v17  ;;  %v3264_v31 = vunpack.c.l.bf16 %v3390_v26 }
 0x172   :  { %v1118_v53 = vadd.f32 %v3971_v47, %v926_v21  ;;  %v381_v3 = vadd.f32 %v3739_v27, %v380_v51  ;;  %v929_v46 = vsub.f32 %v865_v36, %v3193_v34  ;;  %v421_v55 = vmax.f32 %v388_v44, 0.0 }
 0x173   :  { %v966_v36 = vrot.slane %v4043_v25, 1  ;;  %v996_v40 = vperm.slane %v4043_v25, 0 }
 0x174   :  { %v418_v14 = vmax.f32 %v381_v3, 0.0  ;;  %v437_v63 = vpack.c.bf16 %v421_v55, %v420_v24  ;;  %v837_v3 = vrot.slane %v3932_v45, 7 }
 0x175   :  { %v559_v59 = vpop.f32.mrf.mxu1  ;;  %v997_v44 = vperm.slane %v966_v36, 0  ;;  %v1060_v50 = vsub.f32 %v996_v40, %v3264_v31 }
 0x176   :  { %v560_v60 = vadd.f32 %v3846_v35, %v559_v59  ;;  %v866_v59 = vperm.slane %v836_v48, 0  ;;  %v867_v12 = vperm.slane %v837_v3, 0  ;;  %v968_v3 = vrot.slane %v4043_v25, 3 }
 0x178   :  { %v3985_v6 = vadd.f32 %v1055_v57, %v560_v60  ;;  %v930_v2 = vsub.f32 %v866_v59, %v3196_v58 }
 0x179   :  { %v382_v7 = vpop.f32.mrf.mxu0 }
 0x17a   :  { %v1119_v9 = vadd.f32 %v3985_v6, %v927_v61  ;;  %v383_v10 = vadd.f32 %v3739_v27, %v382_v7  ;;  %v965_v61 = vrot.slane %v3923_v38, 7  ;;  %v3148_v7 = vld [vmem:[%s5499_s14 + $0x18] sm:$0xff] }
 0x17b   :  { %1442 = vmatpush.bf16.msra.mxu3 %v3148_v7 }
 0x17c   :  { %v419_v15 = vmax.f32 %v383_v10, 0.0  ;;  %v1145_v16 = vpack.c.bf16 %v1119_v9, %v1118_v53  ;;  %v3260_v53 = vunpack.c.l.bf16 %v3389_v43  ;;  %v3261_v9 = vunpack.c.h.bf16 %v3389_v43 }
 0x17d   :  { %v562_v18 = vpop.f32.mrf.mxu1  ;;  %v995_v10 = vperm.slane %v965_v61, 0  ;;  %v3265_v43 = vunpack.c.h.bf16 %v3390_v26 }
 0x17e   :  { %v436_v19 = vpack.c.bf16 %v419_v15, %v418_v14  ;;  %v563_v20 = vadd.f32 %v3846_v35, %v562_v18  ;;  %3091 = vmatmul.msk.bf16.gmra.mxu2 %vm1168_vm4, %v1145_v16  ;;  %v1058_v27 = vsub.f32 %v994_v54, %v3260_v53  ;;  %v931_v16 = vsub.f32 %v867_v12, %v3197_v11  ;;  %v3146_v18 = vld [vmem:[%s5499_s14 + $0x8] sm:$0xff] }
 0x17f   :  { %v1059_v45 = vsub.f32 %v995_v10, %v3261_v9  ;;  %v1061_v24 = vsub.f32 %v997_v44, %v3265_v43  ;;  %v3376_v10 = vld [vmem:[%s5497_s4 + $0x48] sm:$0xff]  }
 0x180   :  { %v3993_v29 = vadd.f32 %v1056_v13, %v563_v20  ;;  %3080 = vmatmul.msk.bf16.gmra.mxu1 %vm474_vm3, %v436_v19  ;;  %v3147_v13 = vld [vmem:[%s5499_s14 + $0x10] sm:$0xff]  ;;  %v4039_v20 = vld [vmem:[%s5495_s1 + $0x8] sm:$0xff]   ;;  %v3205_v26 = vunpack.c.h.bf16 %v3376_v10 }
 0x181   :  { %1443 = vmatpush.bf16.msra.mxu3 %v3147_v13 }
 0x182   :  { %v1120_v33 = vadd.f32 %v3993_v29, %v928_v22 }
 0x185   :  { %v564_v41 = vpop.f32.mrf.mxu1  ;;  %1444 = vmatpush.bf16.msra.mxu3 %v3146_v18 }
 0x186   :  { %v565_v21 = vadd.f32 %v3846_v35, %v564_v41 }
 0x188   :  { %v4008_v51 = vadd.f32 %v1057_v39, %v565_v21  ;;  %v3375_v39 = vld [vmem:[%s5497_s4 + $0x40] sm:$0xff]  }
 0x189   :  { %1445 = vmatpush.bf16.msra.mxu3 %v3145_v32  ;;  %v3200_v21 = vunpack.c.l.bf16 %v3375_v39  ;;  %v3201_v53 = vunpack.c.h.bf16 %v3375_v39 }
 0x18a   :  { %v1121_v57 = vadd.f32 %v4008_v51, %v929_v46 }
 0x18c   :  { %v1146_v60 = vpack.c.bf16 %v1121_v57, %v1120_v33  ;;  %v4052_v33 = vunpack.c.l.bf16 %v4039_v20 }
 0x18d   :  { %v567_v62 = vpop.f32.mrf.mxu1 }
 0x18e   :  { %v568_v1 = vadd.f32 %v3846_v35, %v567_v62  ;;  %3092 = vmatmul.msk.bf16.gmra.mxu2 %vm1168_vm4, %v1146_v60  ;;  %v838_v41 = vrot.slane %v4052_v33, 1  ;;  %v868_v46 = vperm.slane %v4052_v33, 0  ;;  %v839_v9 = vrot.slane %v4052_v33, 2 }
 0x18f   :  { %v840_v12 = vrot.slane %v4052_v33, 3 }
 0x190   :  { %v4018_v8 = vadd.f32 %v1058_v27, %v568_v1  ;;  %3081 = vmatmul.msk.bf16.gmra.mxu1 %vm474_vm3, %v437_v63  ;;  %v869_v54 = vperm.slane %v838_v41, 0  ;;  %v932_v57 = vsub.f32 %v868_v46, %v3200_v21  ;;  %v967_v63 = vrot.slane %v4043_v25, 2  ;;  %v3391_v1 = vld [vmem:[%s5496_s6 + $0x48] sm:$0xff]  }
 0x191   :  { %v3269_v13 = vunpack.c.h.bf16 %v3391_v1  ;;  %v871_v32 = vperm.slane %v840_v12, 0 }
 0x192   :  { %v1122_v38 = vadd.f32 %v4018_v8, %v930_v2  ;;  %v933_v27 = vsub.f32 %v869_v54, %v3201_v53  ;;  %v998_v11 = vperm.slane %v967_v63, 0  ;;  %v969_v53 = vrot.slane %v4043_v25, 4  ;;  %v3392_v54 = vld [vmem:[%s5496_s6 + $0x50] sm:$0xff]  }
 0x193   :  { %v935_v41 = vsub.f32 %v871_v32, %v3205_v26  ;;  %v3272_v63 = vunpack.c.l.bf16 %v3392_v54 }
 0x195   :  { %v569_v14 = vpop.f32.mrf.mxu1 }
 0x196   :  { %v570_v15 = vadd.f32 %v3846_v35, %v569_v14  ;;  %v3204_v14 = vunpack.c.l.bf16 %v3376_v10 }
 0x198   :  { %v4034_v19 = vadd.f32 %v1059_v45, %v570_v15  ;;  %v999_v45 = vperm.slane %v968_v3, 0  ;;  %v870_v15 = vperm.slane %v839_v9, 0  ;;  %v842_v3 = vrot.slane %v4052_v33, 5 }
 0x19a   :  { %v1123_v22 = vadd.f32 %v4034_v19, %v931_v16  ;;  %v1063_v36 = vsub.f32 %v999_v45, %v3269_v13  ;;  %v934_v39 = vsub.f32 %v870_v15, %v3204_v14  ;;  %v873_v14 = vperm.slane %v842_v3, 0 }
 0x19c   :  { %v1147_v34 = vpack.c.bf16 %v1123_v22, %v1122_v38  ;;  %v3268_v38 = vunpack.c.l.bf16 %v3391_v1  ;;  %v1000_v1 = vperm.slane %v969_v53, 0 }
 0x19d   :  { %v572_v37 = vpop.f32.mrf.mxu1 }
 0x19e   :  { %3093 = vmatmul.msk.bf16.gmra.mxu2 %vm1168_vm4, %v1147_v34  ;;  %v573_v48 = vadd.f32 %v3846_v35, %v572_v37  ;;  %v1062_v22 = vsub.f32 %v998_v11, %v3268_v38  ;;  %v4085_v34 = vld [vmem:[%s5498_s13] ss:$0 sm:$0xff]  ;;  %v1064_v13 = vsub.f32 %v1000_v1, %v3272_v63 }
 0x1a0   :  { %v4063_v58 = vadd.f32 %v1060_v50, %v573_v48 }
 0x1a2   :  { %v1124_v61 = vadd.f32 %v4063_v58, %v932_v57 }
 0x1a5   :  { %v574_v55 = vpop.f32.mrf.mxu1 }
 0x1a6   :  { %v575_v59 = vadd.f32 %v3846_v35, %v574_v55 }
 0x1a8   :  { %v4066_v60 = vadd.f32 %v1061_v24, %v575_v59  ;;  %v970_v59 = vrot.slane %v4043_v25, 5 }
 0x1aa   :  { %v1125_v62 = vadd.f32 %v4066_v60, %v933_v27  ;;  %v1001_v9 = vperm.slane %v970_v59, 0 }
 0x1ac   :  { %v1148_v2 = vpack.c.bf16 %v1125_v62, %v1124_v61  ;;  %v841_v61 = vrot.slane %v4052_v33, 4  ;;  %v3377_v62 = vld [vmem:[%s5497_s4 + $0x50] sm:$0xff]  }
 0x1ad   :  { %v577_v7 = vpop.f32.mrf.mxu1  ;;  %v3208_v10 = vunpack.c.l.bf16 %v3377_v62  ;;  %v3209_v45 = vunpack.c.h.bf16 %v3377_v62  ;;  %v844_v62 = vrot.slane %v4052_v33, 7 }
 0x1ae   :  { %3094 = vmatmul.msk.bf16.gmra.mxu2 %vm1168_vm4, %v1148_v2  ;;  %v578_v18 = vadd.f32 %v3846_v35, %v577_v7  ;;  %v3273_v7 = vunpack.c.h.bf16 %v3392_v54  ;;  %v872_v38 = vperm.slane %v841_v61, 0  ;;  %v972_v54 = vrot.slane %v4043_v25, 7 }
 0x1af   :  { %v937_v32 = vsub.f32 %v873_v14, %v3209_v45 }
 0x1b0   :  { %v4087_v31 = vadd.f32 %v1062_v22, %v578_v18  ;;  %v1065_v15 = vsub.f32 %v1001_v9, %v3273_v7  ;;  %v936_v18 = vsub.f32 %v872_v38, %v3208_v10  ;;  %v1003_v1 = vperm.slane %v972_v54, 0 }
 0x1b1   :  { %v1226_v16 = vpop.f32.mrf.mxu2  ;;  %v875_v38 = vperm.slane %v844_v62, 0 }
 0x1b2   :  { %v1227_v43 = vadd.f32 %v4085_v34, %v1226_v16  ;;  %v1126_v46 = vadd.f32 %v4087_v31, %v934_v39 }
 0x1b4   :  { %v1306_v24 = vmax.f32 %v1227_v43, 0.0 }
 0x1b5   :  { %v579_v37 = vpop.f32.mrf.mxu1 }
 0x1b6   :  { %v580_v40 = vadd.f32 %v3846_v35, %v579_v37 }
 0x1b8   :  { %v4091_v44 = vadd.f32 %v1063_v36, %v580_v40 }
 0x1b9   :  { %v1228_v21 = vpop.f32.mrf.mxu2 }
 0x1ba   :  { %v1127_v48 = vadd.f32 %v4091_v44, %v935_v41  ;;  %v1229_v50 = vadd.f32 %v4085_v34, %v1228_v21  ;;  %v971_v21 = vrot.slane %v4043_v25, 6 }
 0x1bc   :  { %v1307_v55 = vmax.f32 %v1229_v50, 0.0  ;;  %v1149_v57 = vpack.c.bf16 %v1127_v48, %v1126_v46  ;;  %v3393_v46 = vld [vmem:[%s5496_s6 + $0x58] sm:$0xff]  }
 0x1bd   :  { %v582_v27 = vpop.f32.mrf.mxu1  ;;  %v3276_v59 = vunpack.c.l.bf16 %v3393_v46  ;;  %v3277_v63 = vunpack.c.h.bf16 %v3393_v46 }
 0x1be   :  { %3095 = vmatmul.msk.bf16.gmra.mxu2 %vm1168_vm4, %v1149_v57  ;;  %v1338_v2 = vpack.c.bf16 %v1307_v55, %v1306_v24  ;;  %v583_v12 = vadd.f32 %v3846_v35, %v582_v27  ;;  %v843_v55 = vrot.slane %v4052_v33, 6  ;;  %v3378_v57 = vld [vmem:[%s5497_s4 + $0x58] sm:$0xff]   ;;  %v1002_v27 = vperm.slane %v971_v21, 0  ;;  %v3394_v33 = vld [vmem:[%s5496_s6 + $0x60] sm:$0xff]  }
 0x1bf   :  { %v3213_v10 = vunpack.c.h.bf16 %v3378_v57 }
 0x1c0   :  { %3118 = vmatmul.msk.bf16.vlgmr.msra.gmra.mxu3 %vm474_vm3, %v1338_v2  ;;  %v4109_v22 = vadd.f32 %v1064_v13, %v583_v12  ;;  %v3212_v2 = vunpack.c.l.bf16 %v3378_v57  ;;  %v874_v25 = vperm.slane %v843_v55, 0  ;;  %v1066_v9 = vsub.f32 %v1002_v27, %v3276_v59 }
 0x1c1   :  { %v1231_v11 = vpop.f32.mrf.mxu2  ;;  %v1067_v12 = vsub.f32 %v1003_v1, %v3277_v63  ;;  %v3281_v63 = vunpack.c.h.bf16 %v3394_v33 }
 0x1c2   :  { %v1232_v36 = vadd.f32 %v4085_v34, %v1231_v11  ;;  %v1128_v40 = vadd.f32 %v4109_v22, %v936_v18  ;;  %v4132_v11 = vunpack.c.h.bf16 %v4029_v17  ;;  %v938_v13 = vsub.f32 %v874_v25, %v3212_v2  ;;  %v3379_v17 = vld [vmem:[%s5497_s4 + $0x60] sm:$0xff]  }
 0x1c3   :  { %v4141_v18 = vunpack.c.h.bf16 %v4039_v20 }
 0x1c4   :  { %v1308_v48 = vmax.f32 %v1232_v36, 0.0 }
 0x1c5   :  { %v584_v16 = vpop.f32.mrf.mxu1  ;;  %v876_v46 = vperm.slane %v4141_v18, 0 }
 0x1c6   :  { %v585_v26 = vadd.f32 %v3846_v35, %v584_v16  ;;  %v939_v16 = vsub.f32 %v875_v38, %v3213_v10  ;;  %v3395_v38 = vld [vmem:[%s5496_s6 + $0x68] sm:$0xff]  }
 0x1c8   :  { %v4113_v37 = vadd.f32 %v1065_v15, %v585_v26  ;;  %v3280_v26 = vunpack.c.l.bf16 %v3394_v33  ;;  %v3380_v33 = vld [vmem:[%s5497_s4 + $0x68] sm:$0xff]  }
 0x1c9   :  { %v1233_v39 = vpop.f32.mrf.mxu2 }
 0x1ca   :  { %v1129_v41 = vadd.f32 %v4113_v37, %v937_v32  ;;  %v1234_v43 = vadd.f32 %v4085_v34, %v1233_v39  ;;  %v1004_v32 = vperm.slane %v4132_v11, 0 }
 0x1cc   :  { %v1309_v50 = vmax.f32 %v1234_v43, 0.0  ;;  %v1150_v53 = vpack.c.bf16 %v1129_v41, %v1128_v40  ;;  %v3216_v41 = vunpack.c.l.bf16 %v3379_v17 }
 0x1cd   :  { %v587_v24 = vpop.f32.mrf.mxu1 }
 0x1ce   :  { %3096 = vmatmul.msk.bf16.gmra.mxu2 %vm1168_vm4, %v1150_v53  ;;  %v1339_v61 = vpack.c.bf16 %v1309_v50, %v1308_v48  ;;  %v588_v7 = vadd.f32 %v3846_v35, %v587_v24  ;;  %v1068_v48 = vsub.f32 %v1004_v32, %v3280_v26  ;;  %v973_v24 = vrot.slane %v4132_v11, 1 }
 0x1cf   :  { %v940_v59 = vsub.f32 %v876_v46, %v3216_v41 }
 0x1d0   :  { %3119 = vmatmul.msk.bf16.gmra.mxu3 %vm474_vm3, %v1339_v61  ;;  %v4137_v14 = vadd.f32 %v1066_v9, %v588_v7  ;;  %v845_v61 = vrot.slane %v4141_v18, 1  ;;  %v1005_v1 = vperm.slane %v973_v24, 0  ;;  %v974_v9 = vrot.slane %v4132_v11, 2 }
 0x1d1   :  { %v1236_v3 = vpop.f32.mrf.mxu2 }
 0x1d2   :  { %v1237_v36 = vadd.f32 %v4085_v34, %v1236_v3  ;;  %v1130_v43 = vadd.f32 %v4137_v14, %v938_v13  ;;  %v3217_v3 = vunpack.c.h.bf16 %v3379_v17  ;;  %v877_v7 = vperm.slane %v845_v61, 0 }
 0x1d3   :  { %v1069_v10 = vsub.f32 %v1005_v1, %v3281_v63  ;;  %v1006_v17 = vperm.slane %v974_v9, 0  ;;  %v3285_v61 = vunpack.c.h.bf16 %v3395_v38 }
 0x1d4   :  { %v1310_v50 = vmax.f32 %v1237_v36, 0.0 }
 0x1d5   :  { %v589_v45 = vpop.f32.mrf.mxu1 }
 0x1d6   :  { %v590_v15 = vadd.f32 %v3846_v35, %v589_v45  ;;  %v941_v45 = vsub.f32 %v877_v7, %v3217_v3  ;;  %v976_v7 = vrot.slane %v4132_v11, 4 }
 0x1d8   :  { %v4148_v39 = vadd.f32 %v1067_v12, %v590_v15  ;;  %v846_v15 = vrot.slane %v4141_v18, 2 }
 0x1d9   :  { %v1238_v40 = vpop.f32.mrf.mxu2 }
 0x1da   :  { %5523 = vst [vmem:[#allocation2_spill] sm:$0xff] %v4148_v39  ;;  %v1131_v21 = vadd.f32 %v4148_v39, %v939_v16  ;;  %v1239_v20 = vadd.f32 %v4085_v34, %v1238_v40  ;;  %v3284_v16 = vunpack.c.l.bf16 %v3395_v38  ;;  %v3381_v38 = vld [vmem:[%s5497_s4 + $0x70] sm:$0xff]  }
 0x1dc   :  { %v1151_v53 = vpack.c.bf16 %v1131_v21, %v1130_v43  ;;  %v1311_v54 = vmax.f32 %v1239_v20, 0.0  ;;  %v3220_v43 = vunpack.c.l.bf16 %v3380_v33  ;;  %v878_v21 = vperm.slane %v846_v15, 0 }
 0x1dd   :  { %v592_v55 = vpop.f32.mrf.mxu1  ;;  %v1070_v20 = vsub.f32 %v1006_v17, %v3284_v16  ;;  %v848_v15 = vrot.slane %v4141_v18, 4 }
 0x1de   :  { %v593_v57 = vadd.f32 %v3846_v35, %v592_v55  ;;  %3097 = vmatmul.msk.bf16.gmra.mxu2 %vm1168_vm4, %v1151_v53  ;;  %v1340_v27 = vpack.c.bf16 %v1311_v54, %v1310_v50  ;;  %v975_v53 = vrot.slane %v4132_v11, 3  ;;  %v942_v55 = vsub.f32 %v878_v21, %v3220_v43 }
 0x1df   :  { %v3224_v43 = vunpack.c.l.bf16 %v3381_v38  ;;  %v880_v21 = vperm.slane %v848_v15, 0 }
 0x1e0   :  { %v4158_v62 = vadd.f32 %v1068_v48, %v593_v57  ;;  %3120 = vmatmul.msk.bf16.gmra.mxu3 %vm474_vm3, %v1340_v27  ;;  %v1007_v63 = vperm.slane %v975_v53, 0  ;;  %v977_v53 = vrot.slane %v4132_v11, 5 }
 0x1e1   :  { %v1241_v2 = vpop.f32.mrf.mxu2 }
 0x1e2   :  { %5524 = vst [vmem:[#allocation3_spill] sm:$0xff] %v4158_v62  ;;  %v1132_v25 = vadd.f32 %v4158_v62, %v940_v59  ;;  %v1242_v26 = vadd.f32 %v4085_v34, %v1241_v2  ;;  %v847_v59 = vrot.slane %v4141_v18, 3  ;;  %v1071_v9 = vsub.f32 %v1007_v63, %v3285_v61 }
 0x1e4   :  { %v1312_v46 = vmax.f32 %v1242_v26, 0.0  ;;  %v879_v3 = vperm.slane %v847_v59, 0  ;;  %v849_v59 = vrot.slane %v4141_v18, 5 }
 0x1e5   :  { %v594_v12 = vpop.f32.mrf.mxu1 }
 0x1e6   :  { %v595_v13 = vadd.f32 %v3846_v35, %v594_v12 }
 0x1e8   :  { %v4172_v32 = vadd.f32 %v1069_v10, %v595_v13  ;;  %v3396_v10 = vld [vmem:[%s5496_s6 + $0x70] sm:$0xff]  }
 0x1e9   :  { %v1243_v36 = vpop.f32.mrf.mxu2  ;;  %v3288_v16 = vunpack.c.l.bf16 %v3396_v10  ;;  %v3289_v63 = vunpack.c.h.bf16 %v3396_v10 }
 0x1ea   :  { %5525 = vst [vmem:[#allocation4_spill] sm:$0xff] %v4172_v32  ;;  %v1133_v40 = vadd.f32 %v4172_v32, %v941_v45  ;;  %v1244_v41 = vadd.f32 %v4085_v34, %v1243_v36 }
 0x1ec   :  { %v1152_v48 = vpack.c.bf16 %v1133_v40, %v1132_v25  ;;  %v1313_v50 = vmax.f32 %v1244_v41, 0.0  ;;  %v3221_v25 = vunpack.c.h.bf16 %v3380_v33  ;;  %v1008_v33 = vperm.slane %v976_v7, 0 }
 0x1ed   :  { %v597_v54 = vpop.f32.mrf.mxu1  ;;  %v881_v7 = vperm.slane %v849_v59, 0 }
 0x1ee   :  { %v598_v24 = vadd.f32 %v3846_v35, %v597_v54  ;;  %3098 = vmatmul.msk.bf16.gmra.mxu2 %vm1168_vm4, %v1152_v48  ;;  %v1341_v57 = vpack.c.bf16 %v1313_v50, %v1312_v46  ;;  %v943_v45 = vsub.f32 %v879_v3, %v3221_v25  ;;  %v3225_v3 = vunpack.c.h.bf16 %v3381_v38  ;;  %v3382_v38 = vld [vmem:[%s5497_s4 + $0x78] sm:$0xff]  }
 0x1f0   :  { %v4180_v27 = vadd.f32 %v1070_v20, %v598_v24  ;;  %3121 = vmatmul.msk.bf16.gmra.mxu3 %vm474_vm3, %v1341_v57  ;;  %v1072_v20 = vsub.f32 %v1008_v33, %v3288_v16  ;;  %v944_v57 = vsub.f32 %v880_v21, %v3224_v43  ;;  %v945_v10 = vsub.f32 %v881_v7, %v3225_v3 }
 0x1f1   :  { %v1246_v1 = vpop.f32.mrf.mxu2  ;;  %v850_v16 = vrot.slane %v4141_v18, 6 }
 0x1f2   :  { %5526 = vst [vmem:[#allocation5_spill] sm:$0xff] %v4180_v27  ;;  %v1134_v2 = vadd.f32 %v4180_v27, %v942_v55  ;;  %v1247_v17 = vadd.f32 %v4085_v34, %v1246_v1  ;;  %v1009_v1 = vperm.slane %v977_v53, 0 }
 0x1f4   :  { %v1314_v46 = vmax.f32 %v1247_v17, 0.0 }
 0x1f5   :  { %v599_v12 = vpop.f32.mrf.mxu1 }
 0x1f6   :  { %v600_v13 = vadd.f32 %v3846_v35, %v599_v12  ;;  %v1073_v12 = vsub.f32 %v1009_v1, %v3289_v63  ;;  %v851_v1 = vrot.slane %v4141_v18, 7 }
 0x1f8   :  { %v4194_v26 = vadd.f32 %v1071_v9, %v600_v13  ;;  %v978_v9 = vrot.slane %v4132_v11, 6 }
 0x1f9   :  { %v1248_v36 = vpop.f32.mrf.mxu2 }
 0x1fa   :  { %5527 = vst [vmem:[#allocation6_spill] sm:$0xff] %v4194_v26  ;;  %v1135_v40 = vadd.f32 %v4194_v26, %v943_v45  ;;  %v1249_v41 = vadd.f32 %v4085_v34, %v1248_v36  ;;  %v3549_v45 = vld [vmem:[%s5492_s11] ss:$0 sm:$0xff]  ;;  %v1010_v17 = vperm.slane %v978_v9, 0 }
 0x1fc   :  { %v1153_v48 = vpack.c.bf16 %v1135_v40, %v1134_v2  ;;  %v1315_v50 = vmax.f32 %v1249_v41, 0.0 }
 0x1fd   :  { %v602_v54 = vpop.f32.mrf.mxu1 }
 0x1fe   :  { %v1342_v24 = vpack.c.bf16 %v1315_v50, %v1314_v46  ;;  %v603_v55 = vadd.f32 %v3846_v35, %v602_v54  ;;  %3099 = vmatmul.msk.bf16.gmra.mxu2 %vm1168_vm4, %v1153_v48  ;;  %v3397_v35 = vld [vmem:[%s5496_s6 + $0x78] sm:$0xff]   ;;  %v882_v46 = vperm.slane %v850_v16, 0 }
 0x1ff   :  { %v3292_v33 = vunpack.c.l.bf16 %v3397_v35  ;;  %v3293_v3 = vunpack.c.h.bf16 %v3397_v35 }
 0x200   :  { %v4202_v61 = vadd.f32 %v1072_v20, %v603_v55  ;;  %3122 = vmatmul.msk.bf16.gmra.mxu3 %vm474_vm3, %v1342_v24  ;;  %v3228_v20 = vunpack.c.l.bf16 %v3382_v38  ;;  %v979_v24 = vrot.slane %v4132_v11, 7 }
 0x201   :  { %v1251_v25 = vpop.f32.mrf.mxu2  ;;  %v1074_v48 = vsub.f32 %v1010_v17, %v3292_v33 }
 0x202   :  { %5528 = vst [vmem:[#allocation7_spill] sm:$0xff] %v4202_v61  ;;  %v1136_v2 = vadd.f32 %v4202_v61, %v944_v57  ;;  %v1252_v36 = vadd.f32 %v4085_v34, %v1251_v25  ;;  %v946_v63 = vsub.f32 %v882_v46, %v3228_v20  ;;  %v1011_v7 = vperm.slane %v979_v24, 0 }
 0x204   :  { %v1316_v50 = vmax.f32 %v1252_v36, 0.0  ;;  %v1075_v11 = vsub.f32 %v1011_v7, %v3293_v3  ;;  %v4245_v7 = vld [vmem:[%s5500_s15] ss:$0 sm:$0xff] }
 0x205   :  { %v604_v13 = vpop.f32.mrf.mxu1 }
 0x206   :  { %v605_v15 = vadd.f32 %v3549_v45, %v604_v13  ;;  %v883_v13 = vperm.slane %v851_v1, 0 }
 0x208   :  { %v4218_v40 = vadd.f32 %v1073_v12, %v605_v15  ;;  %v3229_v12 = vunpack.c.h.bf16 %v3382_v38 }
 0x209   :  { %v1253_v41 = vpop.f32.mrf.mxu2 }
 0x20a   :  { %5529 = vst [vmem:[#allocation8_spill] sm:$0xff] %v4218_v40  ;;  %v1137_v43 = vadd.f32 %v4218_v40, %v945_v10  ;;  %v1254_v21 = vadd.f32 %v4085_v34, %v1253_v41  ;;  %v947_v16 = vsub.f32 %v883_v13, %v3229_v12 }
 0x20c   :  { %v1154_v53 = vpack.c.bf16 %v1137_v43, %v1136_v2  ;;  %v1317_v54 = vmax.f32 %v1254_v21, 0.0 }
 0x20d   :  { %v607_v55 = vpop.f32.mrf.mxu1 }
 0x20e   :  { %v1343_v57 = vpack.c.bf16 %v1317_v54, %v1316_v50  ;;  %v608_v59 = vadd.f32 %v3549_v45, %v607_v55  ;;  %3100 = vmatmul.msk.bf16.gmra.mxu2 %vm1168_vm4, %v1154_v53 }
 0x210   :  { %v4225_v25 = vadd.f32 %v1074_v48, %v608_v59  ;;  %3123 = vmatmul.msk.bf16.gmra.mxu3 %vm474_vm3, %v1343_v57 }
 0x211   :  { %v1256_v9 = vpop.f32.mrf.mxu2 }
 0x212   :  { %5530 = vst [vmem:[#allocation9_spill] sm:$0xff] %v4225_v25  ;;  %v1138_v2 = vadd.f32 %v4225_v25, %v946_v63  ;;  %v1257_v33 = vadd.f32 %v4085_v34, %v1256_v9 }
 0x214   :  { %v1318_v35 = vmax.f32 %v1257_v33, 0.0 }
 0x215   :  { %v609_v15 = vpop.f32.mrf.mxu1 }
 0x216   :  { %v610_v10 = vadd.f32 %v3549_v45, %v609_v15 }
 0x218   :  { %v4230_v17 = vadd.f32 %v1075_v11, %v610_v10 }
 0x219   :  { %v1258_v18 = vpop.f32.mrf.mxu2 }
 0x21a   :  { %5531 = vst [vmem:[#allocation10_spill] sm:$0xff] %v4230_v17  ;;  %v1139_v36 = vadd.f32 %v4230_v17, %v947_v16  ;;  %v1259_v41 = vadd.f32 %v4085_v34, %v1258_v18 }
 0x21c   :  { %v1155_v43 = vpack.c.bf16 %v1139_v36, %v1138_v2  ;;  %v1319_v21 = vmax.f32 %v1259_v41, 0.0 }
 0x21e   :  { %v1344_v20 = vpack.c.bf16 %v1319_v21, %v1318_v35  ;;  %3101 = vmatmul.msk.bf16.gmra.mxu2 %vm1168_vm4, %v1155_v43 }
 0x220   :  { %3124 = vmatmul.msk.bf16.gmra.mxu3 %vm474_vm3, %v1344_v20 }
 0x221   :  { %v1261_v38 = vpop.f32.mrf.mxu2 }
 0x222   :  { %v1262_v45 = vadd.f32 %v4085_v34, %v1261_v38 }
 0x224   :  { %v1320_v50 = vmax.f32 %v1262_v45, 0.0 }
 0x229   :  { %v1263_v46 = vpop.f32.mrf.mxu2 }
 0x22a   :  { %v1264_v48 = vadd.f32 %v4085_v34, %v1263_v46 }
 0x22c   :  { %v1321_v53 = vmax.f32 %v1264_v48, 0.0 }
 0x22e   :  { %v1345_v54 = vpack.c.bf16 %v1321_v53, %v1320_v50 }
 0x230   :  { %3125 = vmatmul.msk.bf16.gmra.mxu3 %vm474_vm3, %v1345_v54 }
 0x231   :  { %v1266_v24 = vpop.f32.mrf.mxu2 }
 0x232   :  { %v1267_v55 = vadd.f32 %v4085_v34, %v1266_v24 }
 0x234   :  { %v1322_v63 = vmax.f32 %v1267_v55, 0.0 }
 0x239   :  { %v1268_v57 = vpop.f32.mrf.mxu2 }
 0x23a   :  { %v1269_v59 = vadd.f32 %v4085_v34, %v1268_v57 }
 0x23c   :  { %v1323_v1 = vmax.f32 %v1269_v59, 0.0 }
 0x23e   :  { %v1346_v3 = vpack.c.bf16 %v1323_v1, %v1322_v63 }
 0x240   :  { %3126 = vmatmul.msk.bf16.gmra.mxu3 %vm474_vm3, %v1346_v3 }
 0x241   :  { %v1271_v9 = vpop.f32.mrf.mxu2 }
 0x242   :  { %v1272_v15 = vadd.f32 %v4085_v34, %v1271_v9 }
 0x243   :  { %v1447_v2 = vpop.f32.mrf.mxu3 }
 0x244   :  { %v1448_v12 = vadd.f32 %v4245_v7, %v1447_v2  ;;  %v1324_v41 = vmax.f32 %v1272_v15, 0.0 }
 0x246   :  { %v1527_v13 = vsel %vm1168_vm4, %v1448_v12, -inf }
 0x247   :  { %v1528_v11 = vrot.slane %v1527_v13, 4 }
 0x249   :  { %v1529_v10 = vmax.f32 %v1527_v13, %v1528_v11  ;;  %v1273_v16 = vpop.f32.mrf.mxu2 }
 0x24a   :  { %v1274_v33 = vadd.f32 %v4085_v34, %v1273_v16 }
 0x24b   :  { %v1530_v18 = vrot.slane %v1529_v10, 2  ;;  %v1449_v36 = vpop.f32.mrf.mxu3 }
 0x24c   :  { %v1325_v35 = vmax.f32 %v1274_v33, 0.0  ;;  %v1450_v43 = vadd.f32 %v4245_v7, %v1449_v36 }
 0x24d   :  { %v1531_v21 = vmax.f32 %v1529_v10, %v1530_v18 }
 0x24e   :  { %v1347_v20 = vpack.c.bf16 %v1325_v35, %v1324_v41  ;;  %v1534_v38 = vsel %vm1168_vm4, %v1450_v43, -inf }
 0x24f   :  { %v1532_v45 = vrot.slane %v1531_v21, 1  ;;  %v1535_v46 = vrot.slane %v1534_v38, 4 }
 0x250   :  { %3127 = vmatmul.msk.bf16.gmra.mxu3 %vm474_vm3, %v1347_v20 }
 0x251   :  { %v1533_v48 = vmax.f32 %v1531_v21, %v1532_v45  ;;  %v1536_v50 = vmax.f32 %v1534_v38, %v1535_v46  ;;  %v1276_v53 = vpop.f32.mrf.mxu2 }
 0x252   :  { %v1277_v2 = vadd.f32 %v4085_v34, %v1276_v53 }
 0x253   :  { %v1751_v54 = vsub.f32 %v1448_v12, %v1533_v48  ;;  %v1537_v24 = vrot.slane %v1536_v50, 2  ;;  %v1452_v55 = vpop.f32.mrf.mxu3 }
 0x254   :  { %v1453_v57 = vadd.f32 %v4245_v7, %v1452_v55  ;;  %v1326_v18 = vmax.f32 %v1277_v2, 0.0 }
 0x255   :  { %v1783_v59 = vmul.f32 1.442695, %v1751_v54  ;;  %v1538_v63 = vmax.f32 %v1536_v50, %v1537_v24 }
 0x256   :  { %v1541_v1 = vsel %vm1168_vm4, %v1453_v57, -inf }
 0x257   :  { %3421 = vpow2.f32 %v1783_v59  ;;  %v1539_v3 = vrot.slane %v1538_v63, 1  ;;  %v1542_v9 = vrot.slane %v1541_v1, 4 }
 0x259   :  { %v1540_v13 = vmax.f32 %v1538_v63, %v1539_v3  ;;  %v1543_v11 = vmax.f32 %v1541_v1, %v1542_v9  ;;  %v1278_v15 = vpop.f32.mrf.mxu2 }
 0x25a   :  { %v1279_v10 = vadd.f32 %v4085_v34, %v1278_v15 }
 0x25b   :  { %v1752_v16 = vsub.f32 %v1450_v43, %v1540_v13  ;;  %v1544_v12 = vrot.slane %v1543_v11, 2  ;;  %v1454_v33 = vpop.f32.mrf.mxu3 }
 0x25c   :  { %v1327_v36 = vmax.f32 %v1279_v10, 0.0  ;;  %v4259_v41 = vadd.f32 %v4245_v7, %v1454_v33 }
 0x25d   :  { %v4261_v35 = vpop.eup %3421  ;;  %v1785_v21 = vmul.f32 1.442695, %v1752_v16  ;;  %v1545_v20 = vmax.f32 %v1543_v11, %v1544_v12 }
 0x25e   :  { %v1847_v38 = vsel %vm1168_vm4, %v4261_v35, 0.0  ;;  %v1348_v45 = vpack.c.bf16 %v1327_v36, %v1326_v18  ;;  %v1548_v46 = vsel %vm1168_vm4, %v4259_v41, -inf }
 0x25f   :  { %v1848_v48 = vrot.slane %v1847_v38, 4  ;;  %3423 = vpow2.f32 %v1785_v21  ;;  %v1546_v43 = vrot.slane %v1545_v20, 1  ;;  %v1549_v50 = vrot.slane %v1548_v46, 4 }
 0x260   :  { %3128 = vmatmul.msk.bf16.gmra.mxu3 %vm474_vm3, %v1348_v45 }
 0x261   :  { %v1849_v53 = vadd.f32 %v1848_v48, %v1847_v38  ;;  %v1547_v54 = vmax.f32 %v1545_v20, %v1546_v43  ;;  %v1281_v24 = vpop.f32.mrf.mxu2  ;;  %v1550_v1 = vmax.f32 %v1548_v46, %v1549_v50 }
 0x262   :  { %v1282_v36 = vadd.f32 %v4085_v34, %v1281_v24 }
 0x263   :  { %v1850_v55 = vrot.slane %v1849_v53, 2  ;;  %v1753_v59 = vsub.f32 %v1453_v57, %v1547_v54  ;;  %v1457_v63 = vpop.f32.mrf.mxu3  ;;  %v1551_v12 = vrot.slane %v1550_v1, 2 }
 0x264   :  { %v1458_v3 = vadd.f32 %v4245_v7, %v1457_v63  ;;  %v1328_v54 = vmax.f32 %v1282_v36, 0.0 }
 0x265   :  { %v4269_v9 = vpop.eup %3423  ;;  %v1851_v2 = vadd.f32 %v1850_v55, %v1849_v53  ;;  %v1787_v13 = vmul.f32 1.442695, %v1753_v59  ;;  %v1552_v48 = vmax.f32 %v1550_v1, %v1551_v12 }
 0x266   :  { %v1854_v11 = vsel %vm1168_vm4, %v4269_v9, 0.0  ;;  %v1555_v15 = vsel %vm1168_vm4, %v1458_v3, -inf }
 0x267   :  { %v1852_v10 = vrot.slane %v1851_v2, 1  ;;  %v1855_v16 = vrot.slane %v1854_v11, 4  ;;  %3425 = vpow2.f32 %v1787_v13  ;;  %v1556_v33 = vrot.slane %v1555_v15, 4 }
 0x268   :  { %v1553_v1 = vrot.slane %v1552_v48, 1 }
 0x269   :  { %v4274_v18 = vadd.f32 %v1852_v10, %v1851_v2  ;;  %v1856_v57 = vadd.f32 %v1855_v16, %v1854_v11  ;;  %v1283_v21 = vpop.f32.mrf.mxu2  ;;  %v1557_v20 = vmax.f32 %v1555_v15, %v1556_v33 }
 0x26a   :  { %v1284_v38 = vadd.f32 %v4085_v34, %v1283_v21 }
 0x26b   :  { %3427 = vrcp.f32 %v4274_v18  ;;  %v1459_v45 = vpop.f32.mrf.mxu3  ;;  %v1857_v46 = vrot.slane %v1856_v57, 2  ;;  %v1558_v43 = vrot.slane %v1557_v20, 2  ;;  %vm2076_vm6 = vweird.f32 %v4274_v18 }
 0x26c   :  { %v1329_v50 = vmax.f32 %v1284_v38, 0.0  ;;  %v4282_v55 = vadd.f32 %v4245_v7, %v1459_v45 }
 0x26d   :  { %v4279_v53 = vpop.eup %3425  ;;  %v1858_v59 = vadd.f32 %v1857_v46, %v1856_v57  ;;  %v1559_v63 = vmax.f32 %v1557_v20, %v1558_v43  ;;  %v3295_v46 = vld [vmem:[%s5501_s5] sm:$0xff]  }
 0x26e   :  { %v1861_v24 = vsel %vm1168_vm4, %v4279_v53, 0.0  ;;  %v1349_v13 = vpack.c.bf16 %v1329_v50, %v1328_v54  ;;  %v1562_v11 = vsel %vm1168_vm4, %v4282_v55, -inf  ;;  %v1554_v50 = vmax.f32 %v1552_v48, %v1553_v1  ;;  %v4306_v1 = vld [vmem:[%s5501_s5 + $0x8] sm:$0xff]  }
 0x26f   :  { %v1862_v2 = vrot.slane %v1861_v24, 4  ;;  %v1859_v15 = vrot.slane %v1858_v59, 1  ;;  %v1560_v10 = vrot.slane %v1559_v63, 1  ;;  %v1563_v21 = vrot.slane %v1562_v11, 4 }
 0x270   :  { %3129 = vmatmul.msk.bf16.gmra.mxu3 %vm474_vm3, %v1349_v13  ;;  %v2080_v54 = vand.u32 2147483647, %v4274_v18  ;;  %v3297_v40 = vunpack.c.h.bf16 %v3295_v46  ;;  %v1754_v48 = vsub.f32 %v4259_v41, %v1554_v50 }
 0x271   :  { %v3428_v16 = vpop.eup %3427  ;;  %v1863_v12 = vadd.f32 %v1862_v2, %v1861_v24  ;;  %v4290_v36 = vadd.f32 %v1859_v15, %v1858_v59  ;;  %v1561_v57 = vmax.f32 %v1559_v63, %v1560_v10  ;;  %v1286_v38 = vpop.f32.mrf.mxu2  ;;  %v2082_v24 = vand.u32 2147483648, %v4274_v18 }
 0x272   :  { %v2072_v33 = vmul.f32 %v3428_v16, %v4274_v18  ;;  %vm2077_vm5 = vweird.f32 %v3428_v16  ;;  %v1564_v63 = vmax.f32 %v1562_v11, %v1563_v21  ;;  %v3296_v10 = vunpack.c.l.bf16 %v3295_v46 }
 0x273   :  { %v1864_v20 = vrot.slane %v1863_v12, 2  ;;  %v1462_v45 = vpop.f32.mrf.mxu3  ;;  %3429 = vrcp.f32 %v4290_v36  ;;  %v1755_v59 = vsub.f32 %v1458_v3, %v1561_v57  ;;  %vm2078_vm7 = vmor %vm2076_vm6, %vm2077_vm5  ;;  %v2083_v3 = vor.u32 1.1754944e-38, %v2082_v24 }
 0x274   :  { %v2073_v43 = vsub.f32 1.0, %v2072_v33  ;;  %v4299_v15 = vadd.f32 %v4245_v7, %v1462_v45  ;;  %vm2081_vm8 = vcmp.eq.f32.partialorder %v2080_v54, 8.507059e+37  ;;  %v2551_v46 = vadd.f32 %v3296_v10, %v3856_v52 }
 0x275   :  { %v1865_v2 = vadd.f32 %v1864_v20, %v1863_v12  ;;  %v1791_v25 = vmul.f32 1.442695, %v1755_v59  ;;  %v1565_v20 = vrot.slane %v1564_v63, 2  ;;  %v2552_v24 = vadd.f32 %v3297_v40, %v3860_v56 }
 0x276   :  { %v2074_v13 = vmul.f32 %v3428_v16, %v2073_v43  ;;  %v1569_v12 = vsel %vm1168_vm4, %v4299_v15, -inf  ;;  %vm2091_vm10 = vweird.f32 %v4290_v36  ;;  %v1287_v40 = vadd.f32 %v4085_v34, %v1286_v38 }
 0x277   :  { %v1866_v17 = vrot.slane %v1865_v2, 1  ;;  %3431 = vpow2.f32 %v1791_v25  ;;  %v1570_v18 = vrot.slane %v1569_v12, 4 }
 0x278   :  { %v2075_v33 = vadd.f32 %v3428_v16, %v2074_v13  ;;  %v2097_v13 = vand.u32 2147483648, %v4290_v36  ;;  %v1330_v26 = vmax.f32 %v1287_v40, 0.0 }
 0x279   :  { %v4308_v11 = vadd.f32 %v1866_v17, %v1865_v2  ;;  %v3430_v57 = vpop.eup %3429  ;;  %v1288_v25 = vpop.f32.mrf.mxu2  ;;  %v1571_v54 = vmax.f32 %v1569_v12, %v1570_v18 }
 0x27a   :  { %v2079_v21 = vsel %vm2078_vm7, %v3428_v16, %v2075_v33  ;;  %v2087_v41 = vmul.f32 %v3430_v57, %v4290_v36  ;;  %v2095_v16 = vand.u32 2147483647, %v4290_v36  ;;  %v1789_v33 = vmul.f32 1.442695, %v1754_v48 }
 0x27b   :  { %v2084_v45 = vsel %vm2081_vm8, %v2083_v3, %v2079_v21  ;;  %3433 = vrcp.f32 %v4308_v11  ;;  %v1464_v50 = vpop.f32.mrf.mxu3  ;;  %v1566_v3 = vmax.f32 %v1564_v63, %v1565_v20  ;;  %vm2092_vm9 = vweird.f32 %v3430_v57 }
 0x27c   :  { %v2085_v17 = vmul.f32 %v4261_v35, %v2084_v45  ;;  %v2088_v2 = vsub.f32 1.0, %v2087_v41  ;;  %v1572_v10 = vrot.slane %v1571_v54, 2  ;;  %v1289_v35 = vadd.f32 %v4085_v34, %v1288_v25  ;;  %vm2093_vm12 = vmor %vm2091_vm10, %vm2092_vm9 }
 0x27d   :  { %v4320_v21 = vpop.eup %3431  ;;  %vm2096_vm11 = vcmp.eq.f32.partialorder %v2095_v16, 8.507059e+37  ;;  %v2098_v20 = vor.u32 1.1754944e-38, %v2097_v13  ;;  %vm2106_vm13 = vweird.f32 %v4308_v11  ;;  %v2112_v16 = vand.u32 2147483648, %v4308_v11 }
 0x27e   :  { %v2583_v59 = vmul.f32 %v2551_v46, %v2085_v17  ;;  %v2089_v52 = vmul.f32 %v3430_v57, %v2088_v2  ;;  %v1875_v56 = vsel %vm1168_vm4, %v4320_v21, 0.0  ;;  %v1567_v46 = vrot.slane %v1566_v3, 1 }
 0x27f   :  { %v1876_v63 = vrot.slane %v1875_v56, 4  ;;  %v1573_v17 = vmax.f32 %v1571_v54, %v1572_v10  ;;  %v1331_v36 = vmax.f32 %v1289_v35, 0.0  ;;  %3435 = vpow2.f32 %v1789_v33 }
 0x280   :  { %v2615_v45 = vsel %vm1168_vm4, %v2583_v59, 0.0  ;;  %v2090_v48 = vadd.f32 %v3430_v57, %v2089_v52  ;;  %v2110_v52 = vand.u32 2147483647, %v4308_v11 }
 0x281   :  { %v3434_v12 = vpop.eup %3433  ;;  %v2616_v18 = vrot.slane %v2615_v45, 4  ;;  %v1877_v59 = vadd.f32 %v1876_v63, %v1875_v56  ;;  %v1574_v27 = vrot.slane %v1573_v17, 1  ;;  %v1350_v56 = vpack.c.bf16 %v1331_v36, %v1330_v26 }
 0x282   :  { %v2102_v41 = vmul.f32 %v3434_v12, %v4308_v11  ;;  %v2094_v2 = vsel %vm2093_vm12, %v3430_v57, %v2090_v48  ;;  %vm2107_vm14 = vweird.f32 %v3434_v12  ;;  %vm2111_vm0 = vcmp.eq.f32.partialorder %v2110_v52, 8.507059e+37 }
 0x283   :  { %v2617_v25 = vadd.f32 %v2616_v18, %v2615_v45  ;;  %v2099_v43 = vsel %vm2096_vm11, %v2098_v20, %v2094_v2  ;;  %v1878_v54 = vrot.slane %v1877_v59, 2  ;;  %v1467_v10 = vpop.f32.mrf.mxu3  ;;  %v1568_v45 = vmax.f32 %v1566_v3, %v1567_v46  ;;  %v4333_v18 = vpop.f32.mrf.mxu2  ;;  %vm2108_vm15 = vmor %vm2106_vm13, %vm2107_vm14  ;;  %3130 = vmatmul.msk.bf16.gmra.mxu3 %vm474_vm3, %v1350_v56 }
 0x284   :  { %v2103_v61 = vsub.f32 1.0, %v2102_v41  ;;  %v2100_v38 = vmul.f32 %v4269_v9, %v2099_v43  ;;  %v1575_v35 = vmax.f32 %v1573_v17, %v1574_v27  ;;  %v4336_v9 = vadd.f32 %v4245_v7, %v1464_v50 }
 0x285   :  { %v2618_v34 = vrot.slane %v2617_v25, 2  ;;  %v1879_v63 = vadd.f32 %v1878_v54, %v1877_v59  ;;  %v5532_v20 = vunpack.c.l.bf16 %v4306_v1  ;;  %v1756_v46 = vsub.f32 %v4282_v55, %v1568_v45  ;;  %v4352_v36 = vpop.eup %3435  ;;  %v4361_v45 = vld [vmem:[%s5501_s5 + $0x10] sm:$0xff]  }
 0x286   :  { %v2104_v13 = vmul.f32 %v3434_v12, %v2103_v61  ;;  %v2584_v57 = vmul.f32 %v2552_v24, %v2100_v38  ;;  %v2113_v61 = vor.u32 1.1754944e-38, %v2112_v16  ;;  %v1757_v24 = vsub.f32 %v4299_v15, %v1575_v35 }
 0x287   :  { %v2619_v40 = vadd.f32 %v2618_v34, %v2617_v25  ;;  %v1880_v3 = vrot.slane %v1879_v63, 1  ;;  %v2553_v50 = vadd.f32 %v5532_v20, %v3878_v23  ;;  %v1576_v15 = vsel %vm1168_vm4, %v4336_v9, -inf }
 0x288   :  { %v2105_v48 = vadd.f32 %v3434_v12, %v2104_v13  ;;  %v2622_v43 = vsel %vm1168_vm4, %v2584_v57, 0.0  ;;  %v1795_v17 = vmul.f32 1.442695, %v1757_v24  ;;  %v1793_v23 = vmul.f32 1.442695, %v1756_v46 }
 0x289   :  { %v2623_v27 = vrot.slane %v2622_v43, 4  ;;  %v2620_v11 = vrot.slane %v2619_v40, 1  ;;  %v1881_v2 = vadd.f32 %v1880_v3, %v1879_v63  ;;  %v1577_v34 = vrot.slane %v1576_v15, 4 }
 0x28a   :  { %v2109_v26 = vsel %vm2108_vm15, %v3434_v12, %v2105_v48  ;;  %3437 = vpow2.f32 %v1795_v17  ;;  %v4366_v48 = vadd.f32 %v4245_v7, %v1467_v10 }
 0x28b   :  { %v2114_v41 = vsel %vm2111_vm0, %v2113_v61, %v2109_v26  ;;  %v2624_v25 = vadd.f32 %v2623_v27, %v2622_v43  ;;  %3439 = vrcp.f32 %v1881_v2  ;;  %v2621_v38 = vadd.f32 %v2620_v11, %v2619_v40  ;;  %v1469_v16 = vpop.f32.mrf.mxu3  ;;  %v1293_v13 = vpop.f32.mrf.mxu2 }
 0x28c   :  { %v2115_v33 = vmul.f32 %v4279_v53, %v2114_v41  ;;  %v1868_v53 = vsel %vm1168_vm4, %v4352_v36, 0.0  ;;  %3441 = vpow2.f32 %v1793_v23  ;;  %v1578_v57 = vmax.f32 %v1576_v15, %v1577_v34 }
 0x28d   :  { %v2625_v12 = vrot.slane %v2624_v25, 2  ;;  %v2839_v35 = vpack.c.bf16 %v2621_v38, %v2621_v38  ;;  %v1869_v43 = vrot.slane %v1868_v53, 4  ;;  %v3304_v26 = vunpack.c.l.bf16 %v4361_v45 }
 0x28e   :  { %v4350_v59 = vmul.f32 %v2553_v50, %v2115_v33  ;;  %v1579_v20 = vrot.slane %v1578_v57, 2  ;;  %v1583_v17 = vsel %vm1168_vm4, %v4366_v48, -inf  ;;  %v2142_v33 = vand.u32 2147483648, %v1881_v2 }
 0x28f   :  { %v2626_v55 = vadd.f32 %v2625_v12, %v2624_v25  ;;  %v2909_v50 = vunpack.c.l.b16 %v2839_v35  ;;  %v1870_v10 = vadd.f32 %v1869_v43, %v1868_v53  ;;  %v2140_v25 = vand.u32 2147483647, %v1881_v2 }
 0x290   :  { %v4356_v54 = vpop.eup %3437  ;;  %v1584_v34 = vrot.slane %v1583_v17, 4  ;;  %vm2136_vm5 = vweird.f32 %v1881_v2  ;;  %v2555_v53 = vadd.f32 %v3304_v26, %v3900_v0  ;;  %v2143_v43 = vor.u32 1.1754944e-38, %v2142_v33 }
 0x291   :  { %v2627_v52 = vrot.slane %v2626_v55, 1  ;;  %v1889_v40 = vsel %vm1168_vm4, %v4356_v54, 0.0  ;;  %v3440_v63 = vpop.eup %3439  ;;  %vm2141_vm7 = vcmp.eq.f32.partialorder %v2140_v25, 8.507059e+37  ;;  %v4393_v33 = vadd.f32 %v4245_v7, %v1469_v16 }
 0x292   :  { %v1890_v61 = vrot.slane %v1889_v40, 4  ;;  %v2132_v27 = vmul.f32 %v3440_v63, %v1881_v2  ;;  %v4371_v11 = vpop.eup %3441  ;;  %vm2137_vm2 = vweird.f32 %v3440_v63  ;;  %v4384_v2 = vld [vmem:[%s5498_s13] ss:$0 sm:$0xff] }
 0x293   :  { %v2628_v56 = vadd.f32 %v2627_v52, %v2626_v55  ;;  %v1472_v38 = vpop.f32.mrf.mxu3  ;;  %v1580_v55 = vmax.f32 %v1578_v57, %v1579_v20  ;;  %v4376_v52 = vpop.f32.mrf.mxu2  ;;  %vm2138_vm6 = vmor %vm2136_vm5, %vm2137_vm2 }
 0x294   :  { %v1891_v3 = vadd.f32 %v1890_v61, %v1889_v40  ;;  %v2133_v46 = vsub.f32 1.0, %v2132_v27  ;;  %v1585_v61 = vmax.f32 %v1583_v17, %v1584_v34  ;;  %v1294_v17 = vadd.f32 %v4384_v2, %v1293_v13 }
 0x295   :  { %v2840_v24 = vpack.c.bf16 %v2628_v56, %v2628_v56  ;;  %v1882_v56 = vsel %vm1168_vm4, %v4371_v11, 0.0  ;;  %v1581_v57 = vrot.slane %v1580_v55, 1  ;;  %v1590_v13 = vsel %vm1168_vm4, %v4393_v33, -inf }
 0x296   :  { %v1892_v15 = vrot.slane %v1891_v3, 2  ;;  %v2134_v23 = vmul.f32 %v3440_v63, %v2133_v46  ;;  %v1883_v46 = vrot.slane %v1882_v56, 4  ;;  %v1586_v20 = vrot.slane %v1585_v61, 2 }
 0x297   :  { %v2910_v41 = vunpack.c.l.b16 %v2840_v24  ;;  %v1871_v24 = vrot.slane %v1870_v10, 2 }
 0x298   :  { %v2135_v35 = vadd.f32 %v3440_v63, %v2134_v23  ;;  %v1893_v40 = vadd.f32 %v1892_v15, %v1891_v3  ;;  %v1292_v3 = vadd.f32 %v4384_v2, %v4333_v18  ;;  %v1884_v15 = vadd.f32 %v1883_v46, %v1882_v56 }
 0x299   :  { %v4374_v12 = vsel %vm2941_vm1, %v2910_v41, %v2909_v50  ;;  %v1582_v23 = vmax.f32 %v1580_v55, %v1581_v57  ;;  %v4400_v55 = vadd.f32 %v4245_v7, %v1472_v38 }
 0x29a   :  { %5533 = vst [vmem:[#allocation11_spill] sm:$0xff] %v4374_v12  ;;  %v2139_v27 = vsel %vm2138_vm6, %v3440_v63, %v2135_v35  ;;  %v1894_v50 = vrot.slane %v1893_v40, 1  ;;  %v1872_v63 = vadd.f32 %v1871_v24, %v1870_v10  ;;  %v1332_v34 = vmax.f32 %v1292_v3, 0.0 }
 0x29b   :  { %v2144_v41 = vsel %vm2141_vm7, %v2143_v43, %v2139_v27  ;;  %v1587_v35 = vmax.f32 %v1585_v61, %v1586_v20  ;;  %v1333_v43 = vmax.f32 %v1294_v17, 0.0  ;;  %v1474_v27 = vpop.f32.mrf.mxu3  ;;  %v1298_v18 = vpop.f32.mrf.mxu2  ;;  %v1885_v10 = vrot.slane %v1884_v15, 2 }
 0x29c   :  { %v2145_v0 = vmul.f32 %v4320_v21, %v2144_v41  ;;  %v1895_v26 = vadd.f32 %v1894_v50, %v1893_v40  ;;  %v1873_v32 = vrot.slane %v1872_v63, 1  ;;  %v1591_v24 = vrot.slane %v1590_v13, 4 }
 0x29d   :  { %v1588_v21 = vrot.slane %v1587_v35, 1  ;;  %v1351_v40 = vpack.c.bf16 %v1333_v43, %v1332_v34  ;;  %v3301_v61 = vunpack.c.h.bf16 %v4306_v1  ;;  %v1886_v3 = vadd.f32 %v1885_v10, %v1884_v15 }
 0x29e   :  { %v4390_v25 = vmul.f32 %v2555_v53, %v2145_v0  ;;  %3443 = vrcp.f32 %v1895_v26  ;;  %v1758_v53 = vsub.f32 %v4336_v9, %v1582_v23  ;;  %v4403_v41 = vadd.f32 %v1873_v32, %v1872_v63  ;;  %v3400_v9 = vld [vmem:[%s5501_s5 + $0x18] sm:$0xff]  }
 0x29f   :  { %v1589_v16 = vmax.f32 %v1587_v35, %v1588_v21  ;;  %3131 = vmatmul.msk.bf16.gmra.mxu3 %vm474_vm3, %v1351_v40  ;;  %v1592_v57 = vmax.f32 %v1590_v13, %v1591_v24  ;;  %v1597_v17 = vsel %vm1168_vm4, %v4400_v55, -inf  ;;  %v2170_v38 = vand.u32 2147483647, %v1895_v26 }
 0x2a0   :  { %v1797_v20 = vmul.f32 1.442695, %v1758_v53  ;;  %v2172_v23 = vand.u32 2147483648, %v1895_v26  ;;  %v1598_v32 = vrot.slane %v1597_v17, 4  ;;  %v3308_v63 = vunpack.c.l.bf16 %v3400_v9 }
 0x2a1   :  { %v1759_v46 = vsub.f32 %v4366_v48, %v1589_v16  ;;  %v1593_v35 = vrot.slane %v1592_v57, 2  ;;  %v1299_v48 = vadd.f32 %v4384_v2, %v1298_v18  ;;  %v1297_v15 = vadd.f32 %v4384_v2, %v4376_v52 }
 0x2a2   :  { %vm2166_vm9 = vweird.f32 %v1895_v26  ;;  %v1599_v13 = vmax.f32 %v1597_v17, %v1598_v32  ;;  %v2173_v53 = vor.u32 1.1754944e-38, %v2172_v23  ;;  %v1887_v18 = vrot.slane %v1886_v3, 1  ;;  %v3401_v17 = vld [vmem:[%s5501_s5 + $0x20] sm:$0xff]  }
 0x2a3   :  { %v1799_v34 = vmul.f32 1.442695, %v1759_v46  ;;  %v1594_v43 = vmax.f32 %v1592_v57, %v1593_v35  ;;  %v1477_v21 = vpop.f32.mrf.mxu3  ;;  %v4414_v10 = vpop.f32.mrf.mxu2  ;;  %v1335_v16 = vmax.f32 %v1299_v48, 0.0  ;;  %vm2171_vm11 = vcmp.eq.f32.partialorder %v2170_v38, 8.507059e+37 }
 0x2a4   :  { %v3444_v50 = vpop.eup %3443  ;;  %v1600_v46 = vrot.slane %v1599_v13, 2  ;;  %v1334_v52 = vmax.f32 %v1297_v15, 0.0  ;;  %v3309_v38 = vunpack.c.h.bf16 %v3400_v9  ;;  %v3312_v9 = vunpack.c.l.bf16 %v3401_v17 }
 0x2a5   :  { %v2162_v56 = vmul.f32 %v3444_v50, %v1895_v26  ;;  %vm2167_vm8 = vweird.f32 %v3444_v50  ;;  %3445 = vpow2.f32 %v1799_v34  ;;  %v1595_v24 = vrot.slane %v1594_v43, 1 }
 0x2a6   :  { %3447 = vpow2.f32 %v1797_v20  ;;  %vm2168_vm10 = vmor %vm2166_vm9, %vm2167_vm8  ;;  %v4418_v34 = vadd.f32 %v4245_v7, %v1474_v27  ;;  %v3305_v26 = vunpack.c.h.bf16 %v4361_v45  ;;  %v2557_v20 = vadd.f32 %v3308_v63, %v3928_v42  ;;  %v3402_v42 = vld [vmem:[%s5501_s5 + $0x28] sm:$0xff]  }
 0x2a7   :  { %v2163_v0 = vsub.f32 1.0, %v2162_v56  ;;  %3449 = vrcp.f32 %v4403_v41  ;;  %v1601_v35 = vmax.f32 %v1599_v13, %v1600_v46  ;;  %v1352_v32 = vpack.c.bf16 %v1335_v16, %v1334_v52 }
 0x2a8   :  { %v4432_v27 = vadd.f32 %v3301_v61, %v3882_v30  ;;  %v4448_v30 = vadd.f32 %v1887_v18, %v1886_v3  ;;  %v1604_v61 = vsel %vm1168_vm4, %v4418_v34, -inf  ;;  %v4453_v15 = vadd.f32 %v3305_v26, %v3904_v4 }
 0x2a9   :  { %v2164_v1 = vmul.f32 %v3444_v50, %v2163_v0  ;;  %v1596_v0 = vmax.f32 %v1594_v43, %v1595_v24  ;;  %v3313_v43 = vunpack.c.h.bf16 %v3401_v17  ;;  %v4456_v24 = vadd.f32 %v3309_v38, %v3939_v49  ;;  %v4468_v49 = vld [vmem:[%s5501_s5 + $0x38] sm:$0xff]  }
 0x2aa   :  { %v3316_v16 = vunpack.c.l.bf16 %v3402_v42  ;;  %v1605_v4 = vrot.slane %v1604_v61, 4  ;;  %v4463_v52 = vadd.f32 %v3312_v9, %v3949_v5  ;;  %v2125_v12 = vand.u32 2147483647, %v4403_v41 }
 0x2ab   :  { %v2165_v40 = vadd.f32 %v3444_v50, %v2164_v1  ;;  %v1760_v1 = vsub.f32 %v4393_v33, %v1596_v0  ;;  %v4446_v33 = vld [vmem:[%s5501_s5 + $0x30] sm:$0xff]   ;;  %v1479_v3 = vpop.f32.mrf.mxu3  ;;  %v1303_v0 = vpop.f32.mrf.mxu2  ;;  %v4477_v5 = vadd.f32 %v3313_v43, %v3963_v28  ;;  %v4491_v28 = vld [vmem:[%s5501_s5 + $0x40] sm:$0xff]   ;;  %vm2121_vm13 = vweird.f32 %v4403_v41 }
 0x2ac   :  { %v3320_v18 = vunpack.c.l.bf16 %v4446_v33  ;;  %v4484_v9 = vadd.f32 %v3316_v16, %v3971_v47  ;;  %vm4550_vm15 = vcmp.eq.f32.partialorder %v2125_v12, 8.507059e+37  ;;  %v4563_v12 = vld [vmem:[%s5501_s5 + $0x50] sm:$0xff]   ;;  %vm2151_vm7 = vweird.f32 %v4448_v30 }
 0x2ad   :  { %v2169_v56 = vsel %vm2168_vm10, %v3444_v50, %v2165_v40  ;;  %v4426_v50 = vpop.eup %3445  ;;  %v1801_v13 = vmul.f32 1.442695, %v1760_v1  ;;  %v1606_v1 = vmax.f32 %v1604_v61, %v1605_v4 }
 0x2ae   :  { %v2174_v57 = vsel %vm2171_vm11, %v2173_v53, %v2169_v56  ;;  %v4429_v48 = vpop.eup %3447  ;;  %v1602_v53 = vrot.slane %v1601_v35, 1  ;;  %v3317_v56 = vunpack.c.h.bf16 %v3402_v42 }
 0x2af   :  { %v2175_v23 = vmul.f32 %v4356_v54, %v2174_v57  ;;  %v1903_v54 = vsel %vm1168_vm4, %v4426_v50, 0.0  ;;  %v4441_v63 = vpop.eup %3449  ;;  %v1896_v46 = vsel %vm1168_vm4, %v4429_v48, 0.0  ;;  %3132 = vmatmul.msk.bf16.gmra.mxu3 %vm474_vm3, %v1352_v32  ;;  %3451 = vpow2.f32 %v1801_v13 }
 0x2b0   :  { %v1904_v40 = vrot.slane %v1903_v54, 4  ;;  %v2117_v26 = vmul.f32 %v4441_v63, %v4403_v41  ;;  %3453 = vrcp.f32 %v4448_v30  ;;  %v1897_v17 = vrot.slane %v1896_v46, 4 }
 0x2b1   :  { %v4437_v45 = vmul.f32 %v2557_v20, %v2175_v23  ;;  %v4474_v20 = vadd.f32 %v4245_v7, %v1477_v21  ;;  %v1603_v38 = vmax.f32 %v1601_v35, %v1602_v53  ;;  %v3321_v32 = vunpack.c.h.bf16 %v4446_v33 }
 0x2b2   :  { %v1905_v57 = vadd.f32 %v1904_v40, %v1903_v54  ;;  %v1304_v54 = vadd.f32 %v4384_v2, %v1303_v0  ;;  %v3324_v21 = vunpack.c.l.bf16 %v4468_v49  ;;  %v3325_v40 = vunpack.c.h.bf16 %v4468_v49 }
 0x2b3   :  { %v1611_v42 = vsel %vm1168_vm4, %v4474_v20, -inf  ;;  %v2118_v35 = vsub.f32 1.0, %v2117_v26  ;;  %v1607_v43 = vrot.slane %v1606_v1, 2  ;;  %v1302_v33 = vadd.f32 %v4384_v2, %v4414_v10 }
 0x2b4   :  { %v1906_v23 = vrot.slane %v1905_v57, 2  ;;  %v1612_v61 = vrot.slane %v1611_v42, 4  ;;  %v4498_v47 = vadd.f32 %v3317_v56, %v3985_v6  ;;  %v1898_v16 = vadd.f32 %v1897_v17, %v1896_v46 }
 0x2b5   :  { %v4495_v53 = vpop.eup %3451  ;;  %v1608_v26 = vmax.f32 %v1606_v1, %v1607_v43  ;;  %v1337_v62 = vmax.f32 %v1304_v54, 0.0  ;;  %v4506_v2 = vadd.f32 %v3320_v18, %v3993_v29  ;;  %v2119_v56 = vmul.f32 %v4441_v63, %v2118_v35  ;;  %v1482_v1 = vpop.f32.mrf.mxu3 }
 0x2b6   :  { %v1907_v13 = vadd.f32 %v1906_v23, %v1905_v57  ;;  %v1761_v57 = vsub.f32 %v4400_v55, %v1603_v38  ;;  %v4501_v0 = vpop.eup %3453  ;;  %v1910_v49 = vsel %vm1168_vm4, %v4495_v53, 0.0  ;;  %v1613_v23 = vmax.f32 %v1611_v42, %v1612_v61  ;;  %v4514_v55 = vld [vmem:[%s5501_s5 + $0x48] sm:$0xff]  }
 0x2b7   :  { %5534 = vst [vmem:[#allocation12_spill] sm:$0xff] %v4506_v2  ;;  %v1911_v6 = vrot.slane %v1910_v49, 4  ;;  %v1609_v46 = vrot.slane %v1608_v26, 1  ;;  %v1336_v17 = vmax.f32 %v1302_v33, 0.0  ;;  %v2147_v29 = vmul.f32 %v4501_v0, %v4448_v30 }
 0x2b8   :  { %v1908_v4 = vrot.slane %v1907_v13, 1  ;;  %v1614_v38 = vrot.slane %v1613_v23, 2  ;;  %v1803_v18 = vmul.f32 1.442695, %v1761_v57  ;;  %v4521_v42 = vadd.f32 %v4245_v7, %v1479_v3 }
 0x2b9   :  { %v1899_v54 = vrot.slane %v1898_v16, 2  ;;  %v1610_v43 = vmax.f32 %v1608_v26, %v1609_v46  ;;  %v1353_v61 = vpack.c.bf16 %v1337_v62, %v1336_v17  ;;  %v3329_v35 = vunpack.c.h.bf16 %v4491_v28 }
 0x2ba   :  { %v4509_v39 = vadd.f32 %v1908_v4, %v1907_v13  ;;  %v1912_v13 = vadd.f32 %v1911_v6, %v1910_v49  ;;  %v4524_v4 = vadd.f32 %v3321_v32, %v4008_v51  ;;  %v3332_v33 = vunpack.c.l.bf16 %v4514_v55 }
 0x2bb   :  { %v1615_v10 = vmax.f32 %v1613_v23, %v1614_v38  ;;  %vm2122_vm12 = vweird.f32 %v4441_v63  ;;  %v2127_v57 = vand.u32 2147483648, %v4403_v41  ;;  %v2120_v2 = vadd.f32 %v4441_v63, %v2119_v56 }
 0x2bc   :  { %3455 = vrcp.f32 %v4509_v39  ;;  %v1913_v3 = vrot.slane %v1912_v13, 2  ;;  %v1762_v62 = vsub.f32 %v4418_v34, %v1610_v43  ;;  %v1618_v51 = vsel %vm1168_vm4, %v4521_v42, -inf  ;;  %vm4546_vm14 = vmor %vm2121_vm13, %vm2122_vm12 }
 0x2bd   :  { %3457 = vpow2.f32 %v1803_v18  ;;  %v4536_v32 = vadd.f32 %v3324_v21, %v4018_v8  ;;  %v2148_v49 = vsub.f32 1.0, %v2147_v29  ;;  %v1900_v26 = vadd.f32 %v1899_v54, %v1898_v16 }
 0x2be   :  { %v1914_v23 = vadd.f32 %v1913_v3, %v1912_v13  ;;  %v4540_v46 = vadd.f32 %v3325_v40, %v4034_v19  ;;  %v1616_v34 = vrot.slane %v1615_v10, 1  ;;  %v1619_v19 = vrot.slane %v1618_v51, 4 }
 0x2bf   :  { %3133 = vmatmul.msk.bf16.gmra.mxu3 %vm474_vm3, %v1353_v61  ;;  %v2629_v40 = vsel %vm1168_vm4, %v4350_v59, 0.0  ;;  %v2124_v41 = vsel %vm4546_vm14, %v4441_v63, %v2120_v2  ;;  %v2128_v38 = vor.u32 1.1754944e-38, %v2127_v57  ;;  %v1805_v29 = vmul.f32 1.442695, %v1762_v62  ;;  %v1484_v61 = vpop.f32.mrf.mxu3 }
 0x2c0   :  { %v1915_v16 = vrot.slane %v1914_v23, 1  ;;  %v2149_v18 = vmul.f32 %v4501_v0, %v2148_v49  ;;  %v1901_v54 = vrot.slane %v1900_v26, 1  ;;  %v2200_v59 = vand.u32 2147483647, %v4509_v39 }
 0x2c1   :  { %v2202_v63 = vand.u32 2147483648, %v4509_v39  ;;  %v1617_v2 = vmax.f32 %v1615_v10, %v1616_v34  ;;  %v4573_v57 = vadd.f32 %v4245_v7, %v1482_v1  ;;  %v1620_v49 = vmax.f32 %v1618_v51, %v1619_v19 }
 0x2c2   :  { %v3456_v6 = vpop.eup %3455  ;;  %v4566_v43 = vadd.f32 %v1915_v16, %v1914_v23  ;;  %v2630_v23 = vrot.slane %v2629_v40, 4  ;;  %v4579_v16 = vadd.f32 %v1901_v54, %v1900_v26  ;;  %vm2196_vm0 = vweird.f32 %v4509_v39 }
 0x2c3   :  { %v2192_v21 = vmul.f32 %v3456_v6, %v4509_v39  ;;  %v4568_v3 = vpop.eup %3457  ;;  %vm2197_vm3 = vweird.f32 %v3456_v6  ;;  %vm2152_vm2 = vweird.f32 %v4501_v0  ;;  %v2203_v1 = vor.u32 1.1754944e-38, %v2202_v63 }
 0x2c4   :  { %3459 = vrcp.f32 %v4566_v43  ;;  %v1917_v10 = vsel %vm1168_vm4, %v4568_v3, 0.0  ;;  %vm2198_vm5 = vmor %vm2196_vm0, %vm2197_vm3  ;;  %v1763_v51 = vsub.f32 %v4474_v20, %v1617_v2  ;;  %v1625_v34 = vsel %vm1168_vm4, %v4573_v57, -inf }
 0x2c5   :  { %v2193_v13 = vsub.f32 1.0, %v2192_v21  ;;  %v2129_v21 = vsel %vm4550_vm15, %v2128_v38, %v2124_v41  ;;  %3461 = vpow2.f32 %v1805_v29  ;;  %v2150_v8 = vadd.f32 %v4501_v0, %v2149_v18  ;;  %vm4605_vm8 = vmor %vm2151_vm7, %vm2152_vm2 }
 0x2c6   :  { %vm2201_vm6 = vcmp.eq.f32.partialorder %v2200_v59, 8.507059e+37  ;;  %v1621_v26 = vrot.slane %v1620_v49, 2  ;;  %v4589_v41 = vadd.f32 %v2630_v23, %v2629_v40  ;;  %v1918_v38 = vrot.slane %v1917_v10, 4 }
 0x2c7   :  { %v2194_v62 = vmul.f32 %v3456_v6, %v2193_v13  ;;  %v4592_v29 = vadd.f32 %v4245_v7, %v1484_v61  ;;  %3463 = vrcp.f32 %v4579_v16  ;;  %v2130_v40 = vmul.f32 %v4352_v36, %v2129_v21 }
 0x2c8   :  { %v2155_v13 = vand.u32 2147483647, %v4448_v30  ;;  %v2154_v59 = vsel %vm4605_vm8, %v4501_v0, %v2150_v8  ;;  %v2157_v63 = vand.u32 2147483648, %v4448_v30  ;;  %v1622_v36 = vmax.f32 %v1620_v49, %v1621_v26 }
 0x2c9   :  { %v2195_v56 = vadd.f32 %v3456_v6, %v2194_v62  ;;  %v1487_v62 = vpop.f32.mrf.mxu3  ;;  %v2215_v21 = vand.u32 2147483647, %v4566_v43  ;;  %v2586_v26 = vmul.f32 %v4432_v27, %v2130_v40  ;;  %vm2211_vm11 = vweird.f32 %v4566_v43 }
 0x2ca   :  { %v3460_v54 = vpop.eup %3459  ;;  %vm2156_vm10 = vcmp.eq.f32.partialorder %v2155_v13, 8.507059e+37  ;;  %v2632_v27 = vrot.slane %v4589_v41, 2  ;;  %vm2181_vm15 = vweird.f32 %v4579_v16 }
 0x2cb   :  { %v2199_v19 = vsel %vm2198_vm5, %v3456_v6, %v2195_v56  ;;  %v3149_v6 = vld [vmem:[%s5502_s16] sm:$0xff]  ;;  %v1626_v56 = vrot.slane %v1625_v34, 4  ;;  %v4600_v18 = vpop.eup %3461  ;;  %v2207_v61 = vmul.f32 %v3460_v54, %v4566_v43  ;;  %vm2212_vm9 = vweird.f32 %v3460_v54 }
 0x2cc   :  { %v2204_v39 = vsel %vm2201_vm6, %v2203_v1, %v2199_v19  ;;  %2997 = vmatpush.bf16.msrb.mxu0 %v3149_v6  ;;  %v1919_v1 = vadd.f32 %v1918_v38, %v1917_v10  ;;  %v1632_v19 = vsel %vm1168_vm4, %v4592_v29, -inf  ;;  %v1924_v0 = vsel %vm1168_vm4, %v4600_v18, 0.0  ;;  %vm2213_vm12 = vmor %vm2211_vm11, %vm2212_vm9 }
 0x2cd   :  { %v2205_v20 = vmul.f32 %v4426_v50, %v2204_v39  ;;  %v1807_v50 = vmul.f32 1.442695, %v1763_v51  ;;  %v2208_v23 = vsub.f32 1.0, %v2207_v61  ;;  %v2217_v39 = vand.u32 2147483648, %v4566_v43  ;;  %v4623_v49 = vpop.eup %3463 }
 0x2ce   :  { %v1627_v30 = vmax.f32 %v1625_v34, %v1626_v56  ;;  %v2158_v10 = vor.u32 1.1754944e-38, %v2157_v63  ;;  %v1623_v38 = vrot.slane %v1622_v36, 1  ;;  %v1925_v7 = vrot.slane %v1924_v0, 4 }
 0x2cf   :  { %v2591_v2 = vmul.f32 %v4463_v52, %v2205_v20  ;;  %v2209_v52 = vmul.f32 %v3460_v54, %v2208_v23  ;;  %3465 = vpow2.f32 %v1807_v50  ;;  %v1633_v56 = vrot.slane %v1632_v19, 4 }
 0x2d0   :  { %v2159_v61 = vsel %vm2156_vm10, %v2158_v10, %v2154_v59  ;;  %v1628_v34 = vrot.slane %v1627_v30, 2  ;;  %v2177_v50 = vmul.f32 %v4623_v49, %v4579_v16  ;;  %vm2216_vm13 = vcmp.eq.f32.partialorder %v2215_v21, 8.507059e+37 }
 0x2d1   :  { %v2671_v51 = vsel %vm1168_vm4, %v2591_v2, 0.0  ;;  %v2210_v6 = vadd.f32 %v3460_v54, %v2209_v52  ;;  %v2218_v2 = vor.u32 1.1754944e-38, %v2217_v39  ;;  %v1920_v17 = vrot.slane %v1919_v1, 2 }
 0x2d2   :  { %v2672_v8 = vrot.slane %v2671_v51, 4  ;;  %v1624_v63 = vmax.f32 %v1622_v36, %v1623_v38  ;;  %v5541_v43 = vunpack.c.l.bf16 %v4491_v28  ;;  %v3337_v39 = vunpack.c.h.bf16 %v4563_v12 }
 0x2d3   :  { %v2214_v23 = vsel %vm2213_vm12, %v3460_v54, %v2210_v6  ;;  %v1926_v52 = vadd.f32 %v1925_v7, %v1924_v0  ;;  %v2636_v54 = vsel %vm1168_vm4, %v2586_v26, 0.0  ;;  %v2160_v21 = vmul.f32 %v4371_v11, %v2159_v61 }
 0x2d4   :  { %v2673_v20 = vadd.f32 %v2672_v8, %v2671_v51  ;;  %v2219_v13 = vsel %vm2216_vm13, %v2218_v2, %v2214_v23  ;;  %v4635_v59 = vadd.f32 %v5541_v43, %v4063_v58  ;;  %v1629_v10 = vmax.f32 %v1627_v30, %v1628_v34  ;;  %v1489_v2 = vpop.f32.mrf.mxu3 }
 0x2d5   :  { %v4630_v51 = vpop.eup %3465  ;;  %v2220_v8 = vmul.f32 %v4495_v53, %v2219_v13  ;;  %v1634_v6 = vmax.f32 %v1632_v19, %v1633_v56  ;;  %v4644_v36 = vadd.f32 %v3329_v35, %v4066_v60  ;;  %v2178_v38 = vsub.f32 1.0, %v2177_v50  ;;  %v4650_v53 = vld [vmem:[%s5501_s5 + $0x58] sm:$0xff]  }
 0x2d6   :  { %v2674_v40 = vrot.slane %v2673_v20, 2  ;;  %v1921_v23 = vadd.f32 %v1920_v17, %v1919_v1  ;;  %v4653_v0 = vadd.f32 %v2632_v27, %v4589_v41  ;;  %v1931_v19 = vsel %vm1168_vm4, %v4630_v51, 0.0 }
 0x2d7   :  { %v2592_v58 = vmul.f32 %v4477_v5, %v2220_v8  ;;  %v1764_v28 = vsub.f32 %v4521_v42, %v1624_v63  ;;  %v2637_v60 = vrot.slane %v2636_v54, 4  ;;  %v1927_v30 = vrot.slane %v1926_v52, 2  ;;  %v4662_v5 = vld [vmem:[%s5500_s15] ss:$0 sm:$0xff] }
 0x2d8   :  { %v2675_v11 = vadd.f32 %v2674_v40, %v2673_v20  ;;  %v4665_v17 = vadd.f32 %v4662_v5, %v1487_v62  ;;  %v2588_v41 = vmul.f32 %v4453_v15, %v2160_v21  ;;  %v1630_v26 = vrot.slane %v1629_v10, 1 }
 0x2d9   :  { %v2678_v35 = vsel %vm1168_vm4, %v2592_v58, 0.0  ;;  %v1635_v20 = vrot.slane %v1634_v6, 2  ;;  %v2179_v42 = vmul.f32 %v4623_v49, %v2178_v38  ;;  %v1922_v61 = vrot.slane %v1921_v23, 1 }
 0x2da   :  { %v2679_v1 = vrot.slane %v2678_v35, 4  ;;  %v1932_v34 = vrot.slane %v1931_v19, 4  ;;  %v2634_v56 = vrot.slane %v4653_v0, 1  ;;  %v2676_v50 = vrot.slane %v2675_v11, 1 }
 0x2db   :  { %v1809_v40 = vmul.f32 1.442695, %v1764_v28  ;;  %v4671_v13 = vadd.f32 %v2637_v60, %v2636_v54  ;;  %v2643_v62 = vsel %vm1168_vm4, %v4390_v25, 0.0  ;;  %v1928_v15 = vadd.f32 %v1927_v30, %v1926_v52 }
 0x2dc   :  { %v2680_v27 = vadd.f32 %v2679_v1, %v2678_v35  ;;  %v1639_v63 = vsel %vm1168_vm4, %v4665_v17, -inf  ;;  %v2650_v43 = vsel %vm1168_vm4, %v2588_v41, 0.0  ;;  %v1631_v21 = vmax.f32 %v1629_v10, %v1630_v26  ;;  %v4682_v52 = vpop.f32.mrf.mxu3 }
 0x2dd   :  { %v1636_v38 = vmax.f32 %v1634_v6, %v1635_v20  ;;  %v2180_v58 = vadd.f32 %v4623_v49, %v2179_v42  ;;  %vm2182_vm14 = vweird.f32 %v4623_v49  ;;  %v4680_v35 = vadd.f32 %v1922_v61, %v1921_v23 }
 0x2de   :  { %v2681_v8 = vrot.slane %v2680_v27, 2  ;;  %v1933_v54 = vadd.f32 %v1932_v34, %v1931_v19  ;;  %v2677_v28 = vadd.f32 %v2676_v50, %v2675_v11  ;;  %3467 = vpow2.f32 %v1809_v40  ;;  %vm4687_vm3 = vmor %vm2181_vm15, %vm2182_vm14 }
 0x2df   :  { %v1640_v25 = vrot.slane %v1639_v63, 4  ;;  %v2185_v30 = vand.u32 2147483647, %v4579_v16  ;;  %v2187_v10 = vand.u32 2147483648, %v4579_v16  ;;  %v1929_v6 = vrot.slane %v1928_v15, 1 }
 0x2e0   :  { %v2682_v60 = vadd.f32 %v2681_v8, %v2680_v27  ;;  %v1765_v19 = vsub.f32 %v4573_v57, %v1631_v21  ;;  %v1637_v11 = vrot.slane %v1636_v38, 1  ;;  %v4693_v1 = vadd.f32 %v4662_v5, %v1489_v2 }
 0x2e1   :  { %v2644_v26 = vrot.slane %v2643_v62, 4  ;;  %v2651_v20 = vrot.slane %v2650_v43, 4  ;;  %v2184_v42 = vsel %vm4687_vm3, %v4623_v49, %v2180_v58  ;;  %3469 = vrcp.f32 %v4680_v35 }
 0x2e2   :  { %v2683_v23 = vrot.slane %v2682_v60, 1  ;;  %v2847_v16 = vpack.c.bf16 %v2677_v28, %v2677_v28  ;;  %v1934_v34 = vrot.slane %v1933_v54, 2  ;;  %v1641_v50 = vmax.f32 %v1639_v63, %v1640_v25 }
 0x2e3   :  { %v2657_v27 = vsel %vm1168_vm4, %v4437_v45, 0.0  ;;  %vm2186_vm0 = vcmp.eq.f32.partialorder %v2185_v30, 8.507059e+37  ;;  %v2188_v57 = vor.u32 1.1754944e-38, %v2187_v10  ;;  %v4701_v40 = vadd.f32 %v1929_v6, %v1928_v15 }
 0x2e4   :  { %v2684_v61 = vadd.f32 %v2683_v23, %v2682_v60  ;;  %v4703_v2 = vpop.eup %3467  ;;  %v1811_v21 = vmul.f32 1.442695, %v1765_v19  ;;  %v1638_v7 = vmax.f32 %v1636_v38, %v1637_v11  ;;  %v1646_v49 = vsel %vm1168_vm4, %v4693_v1, -inf }
 0x2e5   :  { %v2639_v58 = vrot.slane %v4671_v13, 2  ;;  %v2645_v28 = vadd.f32 %v2644_v26, %v2643_v62  ;;  %v2652_v60 = vadd.f32 %v2651_v20, %v2650_v43  ;;  %v2189_v63 = vsel %vm2186_vm0, %v2188_v57, %v2184_v42  ;;  %v4718_v43 = vpop.f32.mrf.mxu3 }
 0x2e6   :  { %v2848_v8 = vpack.c.bf16 %v2684_v61, %v2684_v61  ;;  %v2917_v25 = vunpack.c.l.b16 %v2847_v16  ;;  %v1935_v45 = vadd.f32 %v1934_v34, %v1933_v54  ;;  %v1642_v30 = vrot.slane %v1641_v50, 2 }
 0x2e7   :  { %v4708_v10 = vpop.eup %3469  ;;  %v2658_v15 = vrot.slane %v2657_v27, 4  ;;  %3471 = vrcp.f32 %v4701_v40  ;;  %v1938_v38 = vsel %vm1168_vm4, %v4703_v2, 0.0  ;;  %v1647_v6 = vrot.slane %v1646_v49, 4 }
 0x2e8   :  { %v2918_v41 = vunpack.c.l.b16 %v2848_v8  ;;  %v2190_v23 = vmul.f32 %v4429_v48, %v2189_v63  ;;  %3473 = vpow2.f32 %v1811_v21  ;;  %v1766_v62 = vsub.f32 %v4592_v29, %v1638_v7 }
 0x2e9   :  { %v4723_v54 = vadd.f32 %v3332_v33, %v4087_v31  ;;  %v5545_v11 = vunpack.c.h.bf16 %v4514_v55  ;;  %v2646_v20 = vrot.slane %v2645_v28, 2  ;;  %v2653_v48 = vrot.slane %v2652_v60, 2 }
 0x2ea   :  { %v4715_v19 = vsel %vm2941_vm1, %v2918_v41, %v2917_v25  ;;  %v2222_v42 = vmul.f32 %v4708_v10, %v4680_v35  ;;  %v1936_v16 = vrot.slane %v1935_v45, 1  ;;  %v1939_v61 = vrot.slane %v1938_v38, 4 }
 0x2eb   :  { %5544 = vst [vmem:[#allocation13_spill] sm:$0xff] %v4715_v19  ;;  %v4728_v26 = vadd.f32 %v5545_v11, %v4091_v44  ;;  %v1643_v29 = vmax.f32 %v1641_v50, %v1642_v30  ;;  %v5546_v7 = vunpack.c.l.bf16 %v4563_v12  ;;  %v4740_v31 = vadd.f32 %v2634_v56, %v4653_v0 }
 0x2ec   :  { %v2659_v44 = vadd.f32 %v2658_v15, %v2657_v27  ;;  %v1648_v55 = vmax.f32 %v1646_v49, %v1647_v6  ;;  %v2640_v33 = vadd.f32 %v2639_v58, %v4671_v13  ;;  %v2590_v57 = vmul.f32 %v4456_v24, %v2190_v23 }
 0x2ed   :  { %v4735_v34 = vadd.f32 %v5546_v7, %v4109_v22  ;;  %v1813_v8 = vmul.f32 1.442695, %v1766_v62  ;;  %v1644_v21 = vrot.slane %v1643_v29, 1  ;;  %v4744_v63 = vpop.eup %3471  ;;  %v4749_v22 = vadd.f32 %v3337_v39, %v4113_v37  ;;  %v1497_v23 = vpop.f32.mrf.mxu3 }
 0x2ee   :  { %v5548_v50 = vunpack.c.l.bf16 %v4650_v53  ;;  %v2647_v56 = vadd.f32 %v2646_v20, %v2645_v28  ;;  %v2654_v27 = vadd.f32 %v2653_v48, %v2652_v60  ;;  %v4756_v49 = vpop.eup %3473  ;;  %v2223_v13 = vsub.f32 1.0, %v2222_v42 }
 0x2ef   :  { %5547 = vst [vmem:[#allocation14_spill] sm:$0xff] %v4749_v22  ;;  %v4758_v24 = vadd.f32 %v1936_v16, %v1935_v45  ;;  %v1940_v58 = vadd.f32 %v1939_v61, %v1938_v38  ;;  %v1645_v25 = vmax.f32 %v1643_v29, %v1644_v21  ;;  %v2660_v12 = vrot.slane %v2659_v44, 2 }
 0x2f0   :  { %v4754_v0 = vadd.f32 %v5548_v50, %v4137_v14  ;;  %v1649_v37 = vrot.slane %v1648_v55, 2  ;;  %v4764_v39 = vadd.f32 %v4662_v5, %v4682_v52  ;;  %v2641_v14 = vrot.slane %v2640_v33, 1 }
 0x2f1   :  { %v2664_v53 = vsel %vm1168_vm4, %v2590_v57, 0.0  ;;  %3475 = vpow2.f32 %v1813_v8  ;;  %v1767_v28 = vsub.f32 %v4665_v17, %v1645_v25  ;;  %v2648_v60 = vrot.slane %v2647_v56, 1 }
 0x2f2   :  { %5549 = vst [vmem:[#allocation15_spill] sm:$0xff] %v4754_v0  ;;  %v2237_v45 = vmul.f32 %v4744_v63, %v4701_v40  ;;  %v1945_v30 = vsel %vm1168_vm4, %v4756_v49, 0.0  ;;  %v1650_v15 = vmax.f32 %v1648_v55, %v1649_v37  ;;  %v2655_v38 = vrot.slane %v2654_v27, 1 }
 0x2f3   :  { %v2224_v6 = vmul.f32 %v4708_v10, %v2223_v13  ;;  %3477 = vrcp.f32 %v4758_v24  ;;  %v1941_v52 = vrot.slane %v1940_v58, 2  ;;  %v4774_v62 = vadd.f32 %v2660_v12, %v2659_v44 }
 0x2f4   :  { %v2665_v11 = vrot.slane %v2664_v53, 4  ;;  %v2230_v17 = vand.u32 2147483647, %v4680_v35  ;;  %v1653_v20 = vsel %vm1168_vm4, %v4764_v39, -inf  ;;  %v2232_v48 = vand.u32 2147483648, %v4680_v35 }
 0x2f5   :  { %v1946_v42 = vrot.slane %v1945_v30, 4  ;;  %v1815_v16 = vmul.f32 1.442695, %v1767_v28  ;;  %v1651_v61 = vrot.slane %v1650_v15, 1  ;;  %v4780_v29 = vadd.f32 %v2641_v14, %v2640_v33 }
 0x2f6   :  { %v4782_v7 = vadd.f32 %v2648_v60, %v2647_v56  ;;  %vm2227_vm2 = vweird.f32 %v4708_v10  ;;  %v2238_v55 = vsub.f32 1.0, %v2237_v45  ;;  %v2225_v57 = vadd.f32 %v4708_v10, %v2224_v6 }
 0x2f7   :  { %v4785_v44 = vpop.eup %3475  ;;  %v1942_v8 = vadd.f32 %v1941_v52, %v1940_v58  ;;  %3479 = vpow2.f32 %v1815_v16  ;;  %v1654_v21 = vrot.slane %v1653_v20, 4  ;;  %v4788_v50 = vadd.f32 %v2655_v38, %v2654_v27 }
 0x2f8   :  { %v4791_v25 = vadd.f32 %v2665_v11, %v2664_v53  ;;  %vm2226_vm5 = vweird.f32 %v4680_v35  ;;  %vm4796_vm6 = vcmp.eq.f32.partialorder %v2230_v17, 8.507059e+37  ;;  %v2233_v12 = vor.u32 1.1754944e-38, %v2232_v48 }
 0x2f9   :  { %v4794_v33 = vpop.eup %3477  ;;  %v1947_v37 = vadd.f32 %v1946_v42, %v1945_v30  ;;  %v1652_v14 = vmax.f32 %v1650_v15, %v1651_v61  ;;  %vm4802_vm7 = vmor %vm2226_vm5, %vm2227_vm2  ;;  %v2239_v58 = vmul.f32 %v4744_v63, %v2238_v55  ;;  %vm2241_vm8 = vweird.f32 %v4701_v40 }
 0x2fa   :  { %v2245_v35 = vand.u32 2147483647, %v4701_v40  ;;  %v1952_v53 = vsel %vm1168_vm4, %v4785_v44, 0.0  ;;  %v2229_v28 = vsel %vm4802_vm7, %v4708_v10, %v2225_v57  ;;  %v1943_v60 = vrot.slane %v1942_v8, 1 }
 0x2fb   :  { %v1768_v45 = vsub.f32 %v4693_v1, %v1652_v14  ;;  %v1655_v30 = vmax.f32 %v1653_v20, %v1654_v21  ;;  %vm2242_vm9 = vweird.f32 %v4744_v63  ;;  %v2252_v15 = vmul.f32 %v4794_v33, %v4758_v24  ;;  %v1499_v1 = vpop.f32.mrf.mxu3 }
 0x2fc   :  { %v4820_v38 = vadd.f32 %v4662_v5, %v4718_v43  ;;  %v4823_v6 = vadd.f32 %v4662_v5, %v1497_v23  ;;  %v1948_v11 = vrot.slane %v1947_v37, 2  ;;  %v1953_v10 = vrot.slane %v1952_v53, 4  ;;  %vm4843_vm10 = vmor %vm2241_vm8, %vm2242_vm9 }
 0x2fd   :  { %v4825_v52 = vpop.eup %3479  ;;  %v1817_v17 = vmul.f32 1.442695, %v1768_v45  ;;  %v1656_v48 = vrot.slane %v1655_v30, 2  ;;  %v2240_v20 = vadd.f32 %v4744_v63, %v2239_v58  ;;  %v2234_v23 = vsel %vm4796_vm6, %v2233_v12, %v2229_v28 }
 0x2fe   :  { %v1959_v42 = vsel %vm1168_vm4, %v4825_v52, 0.0  ;;  %v1660_v16 = vsel %vm1168_vm4, %v4820_v38, -inf  ;;  %v1667_v43 = vsel %vm1168_vm4, %v4823_v6, -inf  ;;  %v2247_v61 = vand.u32 2147483648, %v4701_v40 }
 0x2ff   :  { %v4837_v55 = vadd.f32 %v1943_v60, %v1942_v8  ;;  %v1960_v57 = vrot.slane %v1959_v42, 4  ;;  %v2253_v21 = vsub.f32 1.0, %v2252_v15  ;;  %3481 = vpow2.f32 %v1817_v17 }
 0x300   :  { %v1657_v14 = vmax.f32 %v1655_v30, %v1656_v48  ;;  %v1661_v27 = vrot.slane %v1660_v16, 4  ;;  %v1949_v45 = vadd.f32 %v1948_v11, %v1947_v37  ;;  %v1954_v56 = vadd.f32 %v1953_v10, %v1952_v53 }
 0x301   :  { %v1961_v12 = vadd.f32 %v1960_v57, %v1959_v42  ;;  %v1668_v28 = vrot.slane %v1667_v43, 4  ;;  %v2244_v8 = vsel %vm4843_vm10, %v4744_v63, %v2240_v20  ;;  %vm2246_vm11 = vcmp.eq.f32.partialorder %v2245_v35, 8.507059e+37 }
 0x302   :  { %v1658_v60 = vrot.slane %v1657_v14, 1  ;;  %v1662_v30 = vmax.f32 %v1660_v16, %v1661_v27  ;;  %v2235_v15 = vmul.f32 %v4568_v3, %v2234_v23  ;;  %v2248_v17 = vor.u32 1.1754944e-38, %v2247_v61 }
 0x303   :  { %3483 = vrcp.f32 %v4837_v55  ;;  %v1962_v40 = vrot.slane %v1961_v12, 2  ;;  %v2254_v48 = vmul.f32 %v4794_v33, %v2253_v21  ;;  %v1669_v53 = vmax.f32 %v1667_v43, %v1668_v28  ;;  %v1502_v21 = vpop.f32.mrf.mxu3 }
 0x304   :  { %v1659_v13 = vmax.f32 %v1657_v14, %v1658_v60  ;;  %v1663_v37 = vrot.slane %v1662_v30, 2  ;;  %v2249_v11 = vsel %vm2246_vm11, %v2248_v17, %v2244_v8  ;;  %v1950_v10 = vrot.slane %v1949_v45, 1 }
 0x305   :  { %v1955_v42 = vrot.slane %v1954_v56, 2  ;;  %v1963_v57 = vadd.f32 %v1962_v40, %v1961_v12  ;;  %v4853_v58 = vpop.eup %3481  ;;  %v2260_v63 = vand.u32 2147483647, %v4758_v24  ;;  %v1670_v20 = vrot.slane %v1669_v53, 2 }
 0x306   :  { %v1769_v35 = vsub.f32 %v4764_v39, %v1659_v13  ;;  %v1664_v3 = vmax.f32 %v1662_v30, %v1663_v37  ;;  %v2593_v16 = vmul.f32 %v4484_v9, %v2235_v15  ;;  %v2262_v23 = vand.u32 2147483648, %v4758_v24 }
 0x307   :  { %v1964_v61 = vrot.slane %v1963_v57, 1  ;;  %v1966_v43 = vsel %vm1168_vm4, %v4853_v58, 0.0  ;;  %v2250_v14 = vmul.f32 %v4600_v18, %v2249_v11  ;;  %vm2257_vm12 = vweird.f32 %v4794_v33 }
 0x308   :  { %v1967_v27 = vrot.slane %v1966_v43, 4  ;;  %v1819_v12 = vmul.f32 1.442695, %v1769_v35  ;;  %v2255_v39 = vadd.f32 %v4794_v33, %v2254_v48  ;;  %v4866_v13 = vadd.f32 %v1950_v10, %v1949_v45 }
 0x309   :  { %v4863_v28 = vpop.eup %3483  ;;  %v1956_v9 = vadd.f32 %v1955_v42, %v1954_v56  ;;  %v4868_v8 = vadd.f32 %v1964_v61, %v1963_v57  ;;  %v1665_v30 = vrot.slane %v1664_v3, 1  ;;  %v1671_v15 = vmax.f32 %v1669_v53, %v1670_v20 }
 0x30a   :  { %v1968_v60 = vadd.f32 %v1967_v27, %v1966_v43  ;;  %3485 = vpow2.f32 %v1819_v12  ;;  %v4871_v17 = vsel %vm1168_vm4, %v2593_v16, 0.0  ;;  %vm2256_vm13 = vweird.f32 %v4758_v24 }
 0x30b   :  { %3487 = vrcp.f32 %v4868_v8  ;;  %v4876_v18 = vadd.f32 %v4662_v5, %v1499_v1  ;;  %vm4880_vm14 = vmor %vm2256_vm13, %vm2257_vm12  ;;  %vm4884_vm15 = vcmp.eq.f32.partialorder %v2260_v63, 8.507059e+37  ;;  %v2263_v40 = vor.u32 1.1754944e-38, %v2262_v23 }
 0x30c   :  { %v2267_v48 = vmul.f32 %v4863_v28, %v4837_v55  ;;  %v1969_v24 = vrot.slane %v1968_v60, 2  ;;  %v2259_v1 = vsel %vm4880_vm14, %v4794_v33, %v2255_v39  ;;  %v1957_v37 = vrot.slane %v1956_v9, 1  ;;  %v1504_v39 = vpop.f32.mrf.mxu3 }
 0x30d   :  { %v1666_v53 = vmax.f32 %v1664_v3, %v1665_v30  ;;  %v1672_v11 = vrot.slane %v1671_v15, 1  ;;  %v2594_v42 = vmul.f32 %v4498_v47, %v2250_v14  ;;  %3489 = vrcp.f32 %v4866_v13 }
 0x30e   :  { %v1970_v57 = vadd.f32 %v1969_v24, %v1968_v60  ;;  %v1674_v16 = vsel %vm1168_vm4, %v4876_v18, -inf  ;;  %v4904_v33 = vsel %vm4884_vm15, %v2263_v40, %v2259_v1  ;;  %v2268_v3 = vsub.f32 1.0, %v2267_v48 }
 0x30f   :  { %v1770_v35 = vsub.f32 %v4820_v38, %v1666_v53  ;;  %v1673_v20 = vmax.f32 %v1671_v15, %v1672_v11  ;;  %v4907_v14 = vadd.f32 %v1957_v37, %v1956_v9  ;;  %v4913_v60 = vsel %vm1168_vm4, %v2594_v42, 0.0 }
 0x310   :  { %v4900_v23 = vpop.eup %3485  ;;  %v1971_v61 = vrot.slane %v1970_v57, 1  ;;  %v1675_v45 = vrot.slane %v1674_v16, 4  ;;  %v4919_v9 = vadd.f32 %v4662_v5, %v1502_v21  ;;  %v2269_v24 = vmul.f32 %v4863_v28, %v2268_v3 }
 0x311   :  { %v3488_v43 = vpop.eup %3487  ;;  %v1973_v38 = vsel %vm1168_vm4, %v4900_v23, 0.0  ;;  %v1821_v27 = vmul.f32 1.442695, %v1770_v35  ;;  %v1771_v12 = vsub.f32 %v4823_v6, %v1673_v20  ;;  %v4926_v1 = vadd.f32 %v4662_v5, %v1504_v39 }
 0x312   :  { %v2312_v30 = vmul.f32 %v3488_v43, %v4868_v8  ;;  %v4916_v15 = vadd.f32 %v1971_v61, %v1970_v57  ;;  %v1974_v56 = vrot.slane %v1973_v38, 4  ;;  %v2320_v37 = vand.u32 2147483647, %v4868_v8 }
 0x313   :  { %3491 = vpow2.f32 %v1821_v27  ;;  %v1823_v40 = vmul.f32 1.442695, %v1771_v12  ;;  %v4921_v48 = vpop.eup %3489  ;;  %v2322_v53 = vand.u32 2147483648, %v4868_v8  ;;  %vm2317_vm3 = vweird.f32 %v3488_v43 }
 0x314   :  { %v2313_v6 = vsub.f32 1.0, %v2312_v30  ;;  %3493 = vrcp.f32 %v4916_v15  ;;  %v1975_v11 = vadd.f32 %v1974_v56, %v1973_v38  ;;  %v1676_v21 = vmax.f32 %v1674_v16, %v1675_v45 }
 0x315   :  { %3495 = vrcp.f32 %v4907_v14  ;;  %v4933_v57 = vmul.f32 %v4921_v48, %v4866_v13  ;;  %vm2316_vm0 = vweird.f32 %v4868_v8  ;;  %v1681_v20 = vsel %vm1168_vm4, %v4919_v9, -inf }
 0x316   :  { %v2314_v42 = vmul.f32 %v3488_v43, %v2313_v6  ;;  %3497 = vpow2.f32 %v1823_v40  ;;  %v1976_v35 = vrot.slane %v1975_v11, 2  ;;  %v1677_v61 = vrot.slane %v1676_v21, 2  ;;  %vm2318_vm2 = vmor %vm2316_vm0, %vm2317_vm3 }
 0x317   :  { %v1682_v27 = vrot.slane %v1681_v20, 4  ;;  %v1688_v38 = vsel %vm1168_vm4, %v4926_v1, -inf  ;;  %vm2321_vm5 = vcmp.eq.f32.partialorder %v2320_v37, 8.507059e+37  ;;  %v2323_v16 = vor.u32 1.1754944e-38, %v2322_v53 }
 0x318   :  { %v2315_v3 = vadd.f32 %v3488_v43, %v2314_v42  ;;  %v2335_v39 = vand.u32 2147483647, %v4916_v15  ;;  %v1977_v30 = vadd.f32 %v1976_v35, %v1975_v11  ;;  %v1678_v40 = vmax.f32 %v1676_v21, %v1677_v61 }
 0x319   :  { %v4940_v12 = vpop.eup %3491  ;;  %v1683_v6 = vmax.f32 %v1681_v20, %v1682_v27  ;;  %v1689_v63 = vrot.slane %v1688_v38, 4  ;;  %v2337_v53 = vand.u32 2147483648, %v4916_v15  ;;  %vm2271_vm6 = vweird.f32 %v4837_v55 }
 0x31a   :  { %v3494_v45 = vpop.eup %3493  ;;  %v2319_v8 = vsel %vm2318_vm2, %v3488_v43, %v2315_v3  ;;  %v1980_v56 = vsel %vm1168_vm4, %v4940_v12, 0.0  ;;  %v1978_v47 = vrot.slane %v1977_v30, 1  ;;  %v1679_v43 = vrot.slane %v1678_v40, 1 }
 0x31b   :  { %v4945_v42 = vpop.eup %3495  ;;  %v2324_v41 = vsel %vm2321_vm5, %v2323_v16, %v2319_v8  ;;  %v2327_v10 = vmul.f32 %v3494_v45, %v4916_v15  ;;  %v1981_v11 = vrot.slane %v1980_v56, 4  ;;  %v1684_v3 = vrot.slane %v1683_v6, 2 }
 0x31c   :  { %v4948_v19 = vpop.eup %3497  ;;  %v2325_v37 = vmul.f32 %v4825_v52, %v2324_v41  ;;  %v4953_v21 = vadd.f32 %v1978_v47, %v1977_v30  ;;  %v1680_v8 = vmax.f32 %v1678_v40, %v1679_v43  ;;  %vm2332_vm7 = vweird.f32 %v3494_v45 }
 0x31d   :  { %v2328_v35 = vsub.f32 1.0, %v2327_v10  ;;  %v1987_v20 = vsel %vm1168_vm4, %v4948_v19, 0.0  ;;  %v1982_v27 = vadd.f32 %v1981_v11, %v1980_v56  ;;  %v1690_v52 = vmax.f32 %v1688_v38, %v1689_v63 }
 0x31e   :  { %v4958_v61 = vmul.f32 %v4635_v59, %v2325_v37  ;;  %v1988_v16 = vrot.slane %v1987_v20, 4  ;;  %3499 = vrcp.f32 %v4953_v21  ;;  %v2270_v0 = vadd.f32 %v4863_v28, %v2269_v24 }
 0x31f   :  { %v2329_v41 = vmul.f32 %v3494_v45, %v2328_v35  ;;  %vm2272_vm8 = vweird.f32 %v4863_v28  ;;  %v1983_v10 = vrot.slane %v1982_v27, 2  ;;  %v2283_v30 = vsub.f32 1.0, %v4933_v57 }
 0x320   :  { %v1989_v47 = vadd.f32 %v1988_v16, %v1987_v20  ;;  %vm2331_vm9 = vweird.f32 %v4916_v15  ;;  %v1772_v59 = vsub.f32 %v4876_v18, %v1680_v8  ;;  %v5560_v56 = vand.u32 2147483647, %v4837_v55  ;;  %vm4981_vm13 = vmor %vm2271_vm6, %vm2272_vm8 }
 0x321   :  { %v2330_v22 = vadd.f32 %v3494_v45, %v2329_v41  ;;  %vm2333_vm11 = vmor %vm2331_vm9, %vm2332_vm7  ;;  %v2338_v63 = vor.u32 1.1754944e-38, %v2337_v53  ;;  %v1984_v24 = vadd.f32 %v1983_v10, %v1982_v27  ;;  %v1685_v37 = vmax.f32 %v1683_v6, %v1684_v3 }
 0x322   :  { %vm4968_vm10 = vcmp.eq.f32.partialorder %v5560_v56, 8.507059e+37  ;;  %v1990_v38 = vrot.slane %v1989_v47, 2  ;;  %vm2336_vm12 = vcmp.eq.f32.partialorder %v2335_v39, 8.507059e+37  ;;  %v1825_v43 = vmul.f32 1.442695, %v1772_v59 }
 0x323   :  { %v2334_v11 = vsel %vm2333_vm11, %v3494_v45, %v2330_v22  ;;  %v1691_v57 = vrot.slane %v1690_v52, 2  ;;  %v1985_v20 = vrot.slane %v1984_v24, 1  ;;  %v1686_v16 = vrot.slane %v1685_v37, 1 }
 0x324   :  { %v2339_v35 = vsel %vm2336_vm12, %v2338_v63, %v2334_v11  ;;  %v1991_v15 = vadd.f32 %v1990_v38, %v1989_v47  ;;  %v3500_v18 = vpop.eup %3499  ;;  %v4974_v8 = vmul.f32 %v4630_v51, %v4904_v33  ;;  %3501 = vpow2.f32 %v1825_v43 }
 0x325   :  { %v2340_v41 = vmul.f32 %v4853_v58, %v2339_v35  ;;  %v1692_v53 = vmax.f32 %v1690_v52, %v1691_v57  ;;  %v5565_v39 = vand.u32 2147483648, %v4837_v55  ;;  %v2342_v6 = vmul.f32 %v3500_v18, %v4953_v21 }
 0x326   :  { %v4988_v3 = vadd.f32 %v1985_v20, %v1984_v24  ;;  %v1992_v51 = vrot.slane %v1991_v15, 1  ;;  %v2274_v58 = vsel %vm4981_vm13, %v4863_v28, %v2270_v0  ;;  %vm2286_vm14 = vweird.f32 %v4866_v13 }
 0x327   :  { %v2278_v45 = vor.u32 1.1754944e-38, %v5565_v39  ;;  %v2290_v33 = vand.u32 2147483647, %v4866_v13  ;;  %v4996_v27 = vmul.f32 %v4644_v36, %v2340_v41  ;;  %v1687_v52 = vmax.f32 %v1685_v37, %v1686_v16 }
 0x328   :  { %v2284_v55 = vmul.f32 %v4921_v48, %v2283_v30  ;;  %v2297_v10 = vmul.f32 %v4945_v42, %v4907_v14  ;;  %v2343_v47 = vsub.f32 1.0, %v2342_v6  ;;  %3503 = vrcp.f32 %v4988_v3 }
 0x329   :  { %v2292_v59 = vand.u32 2147483648, %v4866_v13  ;;  %v2352_v0 = vand.u32 2147483648, %v4953_v21  ;;  %v5004_v28 = vadd.f32 %v1992_v51, %v1991_v15  ;;  %v1693_v56 = vrot.slane %v1692_v53, 1 }
 0x32a   :  { %v2344_v63 = vmul.f32 %v3500_v18, %v2343_v47  ;;  %vm2347_vm15 = vweird.f32 %v3500_v18  ;;  %v2350_v36 = vand.u32 2147483647, %v4953_v21  ;;  %v1773_v24 = vsub.f32 %v4919_v9, %v1687_v52  ;;  %v5008_v30 = vpop.eup %3501 }
 0x32b   :  { %v2279_v38 = vsel %vm4968_vm10, %v2278_v45, %v2274_v58  ;;  %vm2287_vm3 = vweird.f32 %v4921_v48  ;;  %vm5013_vm0 = vcmp.eq.f32.partialorder %v2290_v33, 8.507059e+37  ;;  %3505 = vrcp.f32 %v5004_v28 }
 0x32c   :  { %v2285_v11 = vadd.f32 %v4921_v48, %v2284_v55  ;;  %v2298_v43 = vsub.f32 1.0, %v2297_v10  ;;  %v2345_v57 = vadd.f32 %v3500_v18, %v2344_v63  ;;  %vm2346_vm2 = vweird.f32 %v4953_v21  ;;  %vm5033_vm8 = vmor %vm2286_vm14, %vm2287_vm3 }
 0x32d   :  { %vm2348_vm5 = vmor %vm2346_vm2, %vm2347_vm15  ;;  %v2353_v9 = vor.u32 1.1754944e-38, %v2352_v0  ;;  %v1994_v40 = vsel %vm1168_vm4, %v5008_v30, 0.0  ;;  %v1827_v35 = vmul.f32 1.442695, %v1773_v24  ;;  %v1694_v20 = vmax.f32 %v1692_v53, %v1693_v56 }
 0x32e   :  { %v3504_v15 = vpop.eup %3503  ;;  %v5023_v16 = vmul.f32 %v4703_v2, %v2279_v38  ;;  %v2293_v41 = vor.u32 1.1754944e-38, %v2292_v59  ;;  %v2349_v22 = vsel %vm2348_vm5, %v3500_v18, %v2345_v57  ;;  %vm2351_vm6 = vcmp.eq.f32.partialorder %v2350_v36, 8.507059e+37  ;;  %v5575_v59 = vld [vmem:[#allocation12_spill] sm:$0xff] }
 0x32f   :  { %vm2301_vm7 = vweird.f32 %v4907_v14  ;;  %v2305_v39 = vand.u32 2147483647, %v4907_v14  ;;  %v2307_v21 = vand.u32 2147483648, %v4907_v14  ;;  %v2354_v45 = vsel %vm2351_vm6, %v2353_v9, %v2349_v22 }
 0x330   :  { %v2357_v6 = vmul.f32 %v3504_v15, %v4988_v3  ;;  %v2299_v2 = vmul.f32 %v4945_v42, %v2298_v43  ;;  %v2355_v18 = vmul.f32 %v4900_v23, %v2354_v45  ;;  %v1995_v51 = vrot.slane %v1994_v40, 4 }
 0x331   :  { %3507 = vpow2.f32 %v1827_v35  ;;  %v3506_v58 = vpop.eup %3505  ;;  %v2289_v33 = vsel %vm5033_vm8, %v4921_v48, %v2285_v11  ;;  %vm2302_vm9 = vweird.f32 %v4945_v42  ;;  %v1774_v13 = vsub.f32 %v4926_v1, %v1694_v20 }
 0x332   :  { %v2358_v52 = vsub.f32 1.0, %v2357_v6  ;;  %v5045_v55 = vmul.f32 %v4723_v54, %v2355_v18  ;;  %v2365_v10 = vand.u32 2147483647, %v4988_v3  ;;  %v2367_v47 = vand.u32 2147483648, %v4988_v3  ;;  %vm5068_vm3 = vmor %vm2301_vm7, %vm2302_vm9 }
 0x333   :  { %v2372_v23 = vmul.f32 %v3506_v58, %v5004_v28  ;;  %vm5050_vm10 = vcmp.eq.f32.partialorder %v2305_v39, 8.507059e+37  ;;  %vm2362_vm11 = vweird.f32 %v3504_v15  ;;  %v1996_v48 = vadd.f32 %v1995_v51, %v1994_v40 }
 0x334   :  { %v2359_v0 = vmul.f32 %v3504_v15, %v2358_v52  ;;  %v1829_v56 = vmul.f32 1.442695, %v1774_v13  ;;  %v2294_v1 = vsel %vm5013_vm0, %v2293_v41, %v2289_v33  ;;  %v2300_v54 = vadd.f32 %v4945_v42, %v2299_v2 }
 0x335   :  { %vm2361_vm12 = vweird.f32 %v4988_v3  ;;  %v2373_v63 = vsub.f32 1.0, %v2372_v23  ;;  %v2382_v24 = vand.u32 2147483648, %v5004_v28  ;;  %v1997_v38 = vrot.slane %v1996_v48, 2 }
 0x336   :  { %v2360_v36 = vadd.f32 %v3504_v15, %v2359_v0  ;;  %3509 = vpow2.f32 %v1829_v56  ;;  %vm2363_vm13 = vmor %vm2361_vm12, %vm2362_vm11  ;;  %v2368_v43 = vor.u32 1.1754944e-38, %v2367_v47  ;;  %vm2377_vm14 = vweird.f32 %v3506_v58 }
 0x337   :  { %v5059_v11 = vpop.eup %3507  ;;  %v2374_v57 = vmul.f32 %v3506_v58, %v2373_v63  ;;  %v2380_v9 = vand.u32 2147483647, %v5004_v28  ;;  %vm2366_vm15 = vcmp.eq.f32.partialorder %v2365_v10, 8.507059e+37  ;;  %v1998_v40 = vadd.f32 %v1997_v38, %v1996_v48 }
 0x338   :  { %v2364_v37 = vsel %vm2363_vm13, %v3504_v15, %v2360_v36  ;;  %v2001_v3 = vsel %vm1168_vm4, %v5059_v11, 0.0  ;;  %vm2376_vm0 = vweird.f32 %v5004_v28  ;;  %v2304_v15 = vsel %vm5068_vm3, %v4945_v42, %v2300_v54 }
 0x339   :  { %v2369_v20 = vsel %vm2366_vm15, %v2368_v43, %v2364_v37  ;;  %v2375_v41 = vadd.f32 %v3506_v58, %v2374_v57  ;;  %v2002_v22 = vrot.slane %v2001_v3, 4  ;;  %vm2378_vm2 = vmor %vm2376_vm0, %vm2377_vm14  ;;  %v2383_v45 = vor.u32 1.1754944e-38, %v2382_v24 }
 0x33a   :  { %v2370_v39 = vmul.f32 %v4940_v12, %v2369_v20  ;;  %v1999_v6 = vrot.slane %v1998_v40, 1  ;;  %v2308_v53 = vor.u32 1.1754944e-38, %v2307_v21  ;;  %vm2381_vm5 = vcmp.eq.f32.partialorder %v2380_v9, 8.507059e+37 }
 0x33b   :  { %v2379_v14 = vsel %vm2378_vm2, %v3506_v58, %v2375_v41  ;;  %v2003_v2 = vadd.f32 %v2002_v22, %v2001_v3  ;;  %v2295_v51 = vmul.f32 %v4756_v49, %v2294_v1  ;;  %v1507_v58 = vpop.f32.mrf.mxu3  ;;  %v2842_v10 = vpack.c.bf16 %v4780_v29, %v4780_v29 }
 0x33c   :  { %v5077_v18 = vpop.eup %3509  ;;  %v5081_v28 = vmul.f32 %v4728_v26, %v2370_v39  ;;  %v2384_v33 = vsel %vm2381_vm5, %v2383_v45, %v2379_v14  ;;  %v5083_v52 = vadd.f32 %v1999_v6, %v1998_v40  ;;  %v2309_v12 = vsel %vm5050_vm10, %v2308_v53, %v2304_v15 }
 0x33d   :  { %v2385_v42 = vmul.f32 %v4948_v19, %v2384_v33  ;;  %v2004_v13 = vrot.slane %v2003_v2, 2  ;;  %v2008_v21 = vsel %vm1168_vm4, %v5077_v18, 0.0  ;;  %v2843_v26 = vpack.c.bf16 %v4782_v7, %v4782_v7 }
 0x33e   :  { %v2693_v49 = vrot.slane %v4913_v60, 4  ;;  %3511 = vrcp.f32 %v5083_v52  ;;  %v2667_v47 = vrot.slane %v4791_v25, 2  ;;  %v5574_v19 = vrot.slane %v4871_v17, 4 }
 0x33f   :  { %v2595_v0 = vmul.f32 %v5575_v59, %v4974_v8  ;;  %v5103_v48 = vmul.f32 %v4735_v34, %v2385_v42  ;;  %v2844_v29 = vpack.c.bf16 %v4788_v50, %v4788_v50  ;;  %v2310_v7 = vmul.f32 %v4785_v44, %v2309_v12 }
 0x340   :  { %v2687_v23 = vadd.f32 %v5574_v19, %v4871_v17  ;;  %v2005_v56 = vadd.f32 %v2004_v13, %v2003_v2  ;;  %v2009_v1 = vrot.slane %v2008_v21, 4  ;;  %v5576_v54 = vpack.c.bf16 %v4740_v31, %v4740_v31 }
 0x341   :  { %v5577_v17 = vrot.slane %v4774_v62, 1  ;;  %v2596_v34 = vmul.f32 %v4524_v4, %v5023_v16  ;;  %v2597_v8 = vmul.f32 %v4536_v32, %v2295_v51  ;;  %v5121_v50 = vunpack.c.l.b16 %v2842_v10 }
 0x342   :  { %v5111_v63 = vunpack.c.l.b16 %v5576_v54  ;;  %v2694_v44 = vadd.f32 %v2693_v49, %v4913_v60  ;;  %v2006_v24 = vrot.slane %v2005_v56, 1  ;;  %v2010_v38 = vadd.f32 %v2009_v1, %v2008_v21 }
 0x343   :  { %v5116_v36 = vadd.f32 %v5577_v17, %v4774_v62  ;;  %v5124_v43 = vunpack.c.l.b16 %v2843_v26  ;;  %v2668_v31 = vadd.f32 %v2667_v47, %v4791_v25  ;;  %v2688_v57 = vrot.slane %v2687_v23, 2  ;;  %v1509_v39 = vpop.f32.mrf.mxu3 }
 0x344   :  { %v2699_v9 = vsel %vm1168_vm4, %v2595_v0, 0.0  ;;  %v3512_v62 = vpop.eup %3511  ;;  %v5128_v37 = vunpack.c.l.b16 %v2844_v29  ;;  %v2598_v4 = vmul.f32 %v4540_v46, %v2310_v7  ;;  %v5131_v16 = vadd.f32 %v2006_v24, %v2005_v56  ;;  %v5579_v24 = vld [vmem:[#allocation14_spill] sm:$0xff] }
 0x345   :  { %v2011_v32 = vrot.slane %v2010_v38, 2  ;;  %v2845_v60 = vpack.c.bf16 %v5116_v36, %v5116_v36  ;;  %v2706_v40 = vsel %vm1168_vm4, %v2596_v34, 0.0  ;;  %v2713_v3 = vsel %vm1168_vm4, %v2597_v8, 0.0  ;;  %v5578_v8 = vld [vmem:[#allocation11_spill] sm:$0xff] }
 0x346   :  { %v2387_v25 = vmul.f32 %v3512_v62, %v5083_v52  ;;  %v2695_v35 = vrot.slane %v2694_v44, 2  ;;  %v2700_v20 = vrot.slane %v2699_v9, 4  ;;  %3513 = vrcp.f32 %v5131_v16 }
 0x347   :  { %v5140_v41 = vadd.f32 %v4662_v5, %v1507_v58  ;;  %v5142_v46 = vadd.f32 %v2688_v57, %v2687_v23  ;;  %v2012_v15 = vadd.f32 %v2011_v32, %v2010_v38  ;;  %v2669_v45 = vrot.slane %v2668_v31, 1 }
 0x348   :  { %v2388_v22 = vsub.f32 1.0, %v2387_v25  ;;  %v2707_v6 = vrot.slane %v2706_v40, 4  ;;  %v2714_v53 = vrot.slane %v2713_v3, 4  ;;  %v2720_v14 = vsel %vm1168_vm4, %v2598_v4, 0.0 }
 0x349   :  { %v2397_v2 = vand.u32 2147483648, %v5083_v52  ;;  %vm2392_vm6 = vweird.f32 %v3512_v62  ;;  %v2395_v33 = vand.u32 2147483647, %v5083_v52  ;;  %v2013_v12 = vrot.slane %v2012_v15, 1 }
 0x34a   :  { %v2389_v51 = vmul.f32 %v3512_v62, %v2388_v22  ;;  %v5147_v42 = vadd.f32 %v2695_v35, %v2694_v44  ;;  %v5149_v13 = vadd.f32 %v2700_v20, %v2699_v9  ;;  %v1695_v21 = vsel %vm1168_vm4, %v5140_v41, -inf }
 0x34b   :  { %v5154_v58 = vadd.f32 %v4662_v5, %v1509_v39  ;;  %vm2391_vm7 = vweird.f32 %v5083_v52  ;;  %v5157_v26 = vadd.f32 %v2013_v12, %v2012_v15  ;;  %v2670_v49 = vadd.f32 %v2669_v45, %v2668_v31 }
 0x34c   :  { %v2390_v10 = vadd.f32 %v3512_v62, %v2389_v51  ;;  %v3514_v47 = vpop.eup %3513  ;;  %v2708_v19 = vadd.f32 %v2707_v6, %v2706_v40  ;;  %v5159_v23 = vadd.f32 %v2714_v53, %v2713_v3  ;;  %v2721_v59 = vrot.slane %v2720_v14, 4  ;;  %vm2393_vm8 = vmor %vm2391_vm7, %vm2392_vm6  ;;  %v5580_v51 = vld [vmem:[#allocation15_spill] sm:$0xff] }
 0x34d   :  { %v2398_v0 = vor.u32 1.1754944e-38, %v2397_v2  ;;  %vm2396_vm9 = vcmp.eq.f32.partialorder %v2395_v33, 8.507059e+37  ;;  %v2402_v7 = vmul.f32 %v3514_v47, %v5131_v16  ;;  %vm2943_vm10 = vcmask 1042434  }
 0x34e   :  { %v2394_v29 = vsel %vm2393_vm8, %v3512_v62, %v2390_v10  ;;  %3515 = vrcp.f32 %v5157_v26  ;;  %v1696_v52 = vrot.slane %v1695_v21, 4  ;;  %v1702_v56 = vsel %vm1168_vm4, %v5154_v58, -inf }
 0x34f   :  { %v2399_v5 = vsel %vm2396_vm9, %v2398_v0, %v2394_v29  ;;  %v2403_v54 = vsub.f32 1.0, %v2402_v7  ;;  %v2846_v17 = vpack.c.bf16 %v2670_v49, %v2670_v49  ;;  %vm2945_vm11 = vcmask 1043459  }
 0x350   :  { %v2400_v1 = vmul.f32 %v5008_v30, %v2399_v5  ;;  %v2410_v36 = vand.u32 2147483647, %v5131_v16  ;;  %v2412_v34 = vand.u32 2147483648, %v5131_v16  ;;  %v2944_v44 = vsel %vm2943_vm10, %v5111_v63, %v5578_v8 }
 0x351   :  { %vm2947_vm12 = vcmask 1044484   ;;  %v2404_v31 = vmul.f32 %v3514_v47, %v2403_v54  ;;  %vm2407_vm13 = vweird.f32 %v3514_v47  ;;  %vm2949_vm14 = vcmask 1045509  }
 0x352   :  { %v5173_v38 = vmul.f32 %v5579_v24, %v2400_v1  ;;  %v2722_v57 = vadd.f32 %v2721_v59, %v2720_v14  ;;  %v1703_v30 = vrot.slane %v1702_v56, 4  ;;  %v2915_v9 = vunpack.c.l.b16 %v2845_v60 }
 0x353   :  { %v2946_v62 = vsel %vm2945_vm11, %v5121_v50, %v2944_v44  ;;  %v2405_v4 = vadd.f32 %v3514_v47, %v2404_v31  ;;  %vm2406_vm15 = vweird.f32 %v5131_v16  ;;  %vm2951_vm3 = vcmask 1046534  }
 0x354   :  { %v2948_v32 = vsel %vm2947_vm12, %v5124_v43, %v2946_v62  ;;  %v3516_v63 = vpop.eup %3515  ;;  %vm2408_vm0 = vmor %vm2406_vm15, %vm2407_vm13  ;;  %v2413_v40 = vor.u32 1.1754944e-38, %v2412_v34  ;;  %v1697_v3 = vmax.f32 %v1695_v21, %v1696_v52  ;;  %v2916_v25 = vunpack.c.l.b16 %v2846_v17 }
 0x355   :  { %v2950_v35 = vsel %vm2949_vm14, %v5128_v37, %v2948_v32  ;;  %v2702_v60 = vrot.slane %v5149_v13, 2  ;;  %v2409_v20 = vsel %vm2408_vm0, %v3514_v47, %v2405_v4  ;;  %vm2411_vm2 = vcmp.eq.f32.partialorder %v2410_v36, 8.507059e+37 }
 0x356   :  { %v2417_v50 = vmul.f32 %v3516_v63, %v5157_v26  ;;  %v2709_v22 = vrot.slane %v2708_v19, 2  ;;  %v2716_v16 = vrot.slane %v5159_v23, 2  ;;  %v2414_v15 = vsel %vm2411_vm2, %v2413_v40, %v2409_v20 }
 0x357   :  { %v2952_v43 = vsel %vm2951_vm3, %v2915_v9, %v2950_v35  ;;  %v2415_v39 = vmul.f32 %v5059_v11, %v2414_v15  ;;  %v1704_v6 = vmax.f32 %v1702_v56, %v1703_v30  ;;  %vm2953_vm5 = vcmask 1047559   ;;  %v3552_v11 = vld [vmem:[%s5501_s5 + $0x58] sm:$0xff]  }
 0x358   :  { %v2418_v45 = vsub.f32 1.0, %v2417_v50  ;;  %v2723_v53 = vrot.slane %v2722_v57, 2  ;;  %v2427_v37 = vand.u32 2147483648, %v5157_v26  ;;  %v1698_v14 = vrot.slane %v1697_v3, 2 }
 0x359   :  { %v5189_v2 = vsel %vm2953_vm5, %v2916_v25, %v2952_v43  ;;  %v5192_v33 = vmul.f32 %v5580_v51, %v2415_v39  ;;  %vm2422_vm6 = vweird.f32 %v3516_v63  ;;  %v2425_v21 = vand.u32 2147483647, %v5157_v26 }
 0x35a   :  { %v2419_v12 = vmul.f32 %v3516_v63, %v2418_v45  ;;  %v3341_v10 = vunpack.c.h.bf16 %v3552_v11  ;;  %v2703_v49 = vadd.f32 %v2702_v60, %v5149_v13  ;;  %v2710_v47 = vadd.f32 %v2709_v22, %v2708_v19  ;;  %v5581_v13 = vld [vmem:[#allocation2_spill] sm:$0xff]  ;;  %v5582_v45 = vld [vmem:[#allocation13_spill] sm:$0xff] }
 0x35b   :  { %vm2421_vm7 = vweird.f32 %v5157_v26  ;;  %v1705_v0 = vrot.slane %v1704_v6, 2  ;;  %v2690_v29 = vrot.slane %v5142_v46, 1  ;;  %v2697_v7 = vrot.slane %v5147_v42, 1 }
 0x35c   :  { %v2420_v59 = vadd.f32 %v3516_v63, %v2419_v12  ;;  %v2717_v5 = vadd.f32 %v2716_v16, %v5159_v23  ;;  %vm2423_vm8 = vmor %vm2421_vm7, %vm2422_vm6  ;;  %v2428_v52 = vor.u32 1.1754944e-38, %v2427_v37  ;;  %v2724_v56 = vadd.f32 %v2723_v53, %v2722_v57  ;;  %v1512_v53 = vpop.f32.mrf.mxu3  ;;  %v5217_v12 = vld [vmem:[%s5500_s15] ss:$0 sm:$0xff] }
 0x35d   :  { %vm2426_vm9 = vcmp.eq.f32.partialorder %v2425_v21, 8.507059e+37  ;;  %v1699_v54 = vmax.f32 %v1697_v3, %v1698_v14  ;;  %v2704_v17 = vrot.slane %v2703_v49, 1  ;;  %v2574_v19 = vadd.f32 %v3341_v10, %v5581_v13 }
 0x35e   :  { %v2424_v1 = vsel %vm2423_vm8, %v3516_v63, %v2420_v59  ;;  %v2711_v34 = vrot.slane %v2710_v47, 1  ;;  %v1706_v8 = vmax.f32 %v1704_v6, %v1705_v0  ;;  %v2691_v44 = vadd.f32 %v2690_v29, %v5142_v46 }
 0x35f   :  { %v2429_v36 = vsel %vm2426_vm9, %v2428_v52, %v2424_v1  ;;  %v2718_v24 = vrot.slane %v2717_v5, 1  ;;  %v2698_v31 = vadd.f32 %v2697_v7, %v5147_v42  ;;  %v2725_v23 = vrot.slane %v2724_v56, 1 }
 0x360   :  { %v2430_v26 = vmul.f32 %v5077_v18, %v2429_v36  ;;  %v1700_v57 = vrot.slane %v1699_v54, 1  ;;  %v2705_v9 = vadd.f32 %v2704_v17, %v2703_v49  ;;  %v2712_v62 = vadd.f32 %v2711_v34, %v2710_v47 }
 0x361   :  { %v1707_v4 = vrot.slane %v1706_v8, 1  ;;  %v2849_v32 = vpack.c.bf16 %v2691_v44, %v2691_v44  ;;  %v2719_v63 = vadd.f32 %v2718_v24, %v2717_v5  ;;  %v2850_v40 = vpack.c.bf16 %v2698_v31, %v2698_v31 }
 0x362   :  { %v5207_v30 = vmul.f32 %v2574_v19, %v2430_v26  ;;  %v1701_v3 = vmax.f32 %v1699_v54, %v1700_v57  ;;  %v2726_v25 = vadd.f32 %v2725_v23, %v2724_v56  ;;  %v2851_v35 = vpack.c.bf16 %v2705_v9, %v2705_v9 }
 0x363   :  { %v2852_v18 = vpack.c.bf16 %v2712_v62, %v2712_v62  ;;  %v1708_v60 = vmax.f32 %v1706_v8, %v1707_v4  ;;  %v2919_v20 = vunpack.c.l.b16 %v2849_v32  ;;  %v2853_v46 = vpack.c.bf16 %v2719_v63, %v2719_v63 }
 0x364   :  { %v2920_v50 = vunpack.c.l.b16 %v2850_v40  ;;  %v1775_v42 = vsub.f32 %v5140_v41, %v1701_v3  ;;  %v2854_v22 = vpack.c.bf16 %v2726_v25, %v2726_v25  ;;  %v2921_v16 = vunpack.c.l.b16 %v2851_v35 }
 0x365   :  { %v2922_v15 = vunpack.c.l.b16 %v2852_v18  ;;  %v1776_v43 = vsub.f32 %v5154_v58, %v1708_v60  ;;  %v2923_v39 = vunpack.c.l.b16 %v2853_v46  ;;  %v2956_v6 = vsel %vm2943_vm10, %v2919_v20, %v5582_v45 }
 0x366   :  { %v1831_v37 = vmul.f32 1.442695, %v1775_v42  ;;  %v2924_v14 = vunpack.c.l.b16 %v2854_v22  ;;  %v2957_v51 = vsel %vm2945_vm11, %v2920_v50, %v2956_v6  ;;  %v1513_v41 = vadd.f32 %v5217_v12, %v1512_v53 }
 0x367   :  { %v2958_v21 = vsel %vm2947_vm12, %v2921_v16, %v2957_v51  ;;  %v1833_v11 = vmul.f32 1.442695, %v1776_v43  ;;  %v2734_v44 = vsel %vm1168_vm4, %v4996_v27, 0.0  ;;  %v2727_v23 = vsel %vm1168_vm4, %v4958_v61, 0.0 }
 0x368   :  { %v2959_v58 = vsel %vm2949_vm14, %v2922_v15, %v2958_v21  ;;  %v1709_v49 = vsel %vm1168_vm4, %v1513_v41, -inf  ;;  %3517 = vpow2.f32 %v1831_v37  ;;  %v2735_v9 = vrot.slane %v2734_v44, 4 }
 0x369   :  { %v2960_v10 = vsel %vm2951_vm3, %v2923_v39, %v2959_v58  ;;  %v1710_v59 = vrot.slane %v1709_v49, 4  ;;  %3519 = vpow2.f32 %v1833_v11  ;;  %v2728_v63 = vrot.slane %v2727_v23, 4 }
 0x36a   :  { %v2961_v47 = vsel %vm2953_vm5, %v2924_v14, %v2960_v10  ;;  %v2741_v40 = vsel %vm1168_vm4, %v5045_v55, 0.0  ;;  %v2736_v25 = vadd.f32 %v2735_v9, %v2734_v44  ;;  %v2748_v43 = vsel %vm1168_vm4, %v5081_v28, 0.0  ;;  %v1514_v14 = vpop.f32.mrf.mxu3 }
 0x36b   :  { %v2976_v0 = vpack.c.b16 %v2961_v47, %v5189_v2  ;;  %v1711_v29 = vmax.f32 %v1709_v49, %v1710_v59  ;;  %v2729_v18 = vadd.f32 %v2728_v63, %v2727_v23  ;;  %v2742_v60 = vrot.slane %v2741_v40, 4 }
 0x36c   :  { %v2737_v46 = vrot.slane %v2736_v25, 2  ;;  %v2749_v6 = vrot.slane %v2748_v43, 4  ;;  %v1515_v21 = vadd.f32 %v5217_v12, %v1514_v14 }
 0x36d   :  { %3138 = vmatmul.msk.bf16.vlgmr.msrb.gmra.mxu0 %vm1168_vm4, %v2976_v0  ;;  %v1712_v7 = vrot.slane %v1711_v29, 2  ;;  %v2730_v42 = vrot.slane %v2729_v18, 2  ;;  %v2743_v22 = vadd.f32 %v2742_v60, %v2741_v40 }
 0x36e   :  { %v5227_v5 = vpop.eup %3517  ;;  %v2738_v15 = vadd.f32 %v2737_v46, %v2736_v25  ;;  %v2750_v58 = vadd.f32 %v2749_v6, %v2748_v43  ;;  %v1716_v49 = vsel %vm1168_vm4, %v1515_v21, -inf }
 0x36f   :  { %v1713_v52 = vmax.f32 %v1711_v29, %v1712_v7  ;;  %v5229_v56 = vpop.eup %3519  ;;  %v2015_v54 = vsel %vm1168_vm4, %v5227_v5, 0.0  ;;  %v2731_v39 = vadd.f32 %v2730_v42, %v2729_v18  ;;  %v2744_v45 = vrot.slane %v2743_v22, 2 }
 0x370   :  { %v2022_v36 = vsel %vm1168_vm4, %v5229_v56, 0.0  ;;  %v2016_v13 = vrot.slane %v2015_v54, 4  ;;  %v2739_v53 = vrot.slane %v2738_v15, 1  ;;  %v1717_v59 = vrot.slane %v1716_v49, 4 }
 0x371   :  { %v1714_v1 = vrot.slane %v1713_v52, 1  ;;  %v2023_v19 = vrot.slane %v2022_v36, 4  ;;  %v2732_v51 = vrot.slane %v2731_v39, 1 }
 0x372   :  { %v2017_v26 = vadd.f32 %v2016_v13, %v2015_v54  ;;  %v2740_v10 = vadd.f32 %v2739_v53, %v2738_v15  ;;  %v1718_v54 = vmax.f32 %v1716_v49, %v1717_v59 }
 0x373   :  { %v1715_v17 = vmax.f32 %v1713_v52, %v1714_v1  ;;  %v2024_v8 = vadd.f32 %v2023_v19, %v2022_v36  ;;  %v2733_v0 = vadd.f32 %v2732_v51, %v2731_v39  ;;  %v2751_v52 = vrot.slane %v2750_v58, 2 }
 0x374   :  { %v2018_v24 = vrot.slane %v2017_v26, 2  ;;  %v2755_v1 = vsel %vm1168_vm4, %v5103_v48, 0.0  ;;  %v1719_v13 = vrot.slane %v1718_v54, 2 }
 0x375   :  { %v1777_v2 = vsub.f32 %v1513_v41, %v1715_v17  ;;  %v2025_v57 = vrot.slane %v2024_v8, 2  ;;  %v2745_v41 = vadd.f32 %v2744_v45, %v2743_v22  ;;  %v2856_v17 = vpack.c.bf16 %v2740_v10, %v2740_v10 }
 0x376   :  { %v2019_v4 = vadd.f32 %v2018_v24, %v2017_v26  ;;  %v1720_v44 = vmax.f32 %v1718_v54, %v1719_v13 }
 0x377   :  { %v1835_v34 = vmul.f32 1.442695, %v1777_v2  ;;  %v2026_v3 = vadd.f32 %v2025_v57, %v2024_v8  ;;  %v2746_v29 = vrot.slane %v2745_v41, 1  ;;  %v2855_v2 = vpack.c.bf16 %v2733_v0, %v2733_v0 }
 0x378   :  { %v2020_v35 = vrot.slane %v2019_v4, 1  ;;  %v2752_v8 = vadd.f32 %v2751_v52, %v2750_v58  ;;  %v2926_v24 = vunpack.c.l.b16 %v2856_v17  ;;  %v1721_v57 = vrot.slane %v1720_v44, 1 }
 0x379   :  { %3521 = vpow2.f32 %v1835_v34  ;;  %v2027_v20 = vrot.slane %v2026_v3, 1  ;;  %v2747_v19 = vadd.f32 %v2746_v29, %v2745_v41  ;;  %v2756_v34 = vrot.slane %v2755_v1, 4 }
 0x37a   :  { %v5245_v50 = vadd.f32 %v2020_v35, %v2019_v4  ;;  %v2925_v48 = vunpack.c.l.b16 %v2855_v2  ;;  %v2753_v63 = vrot.slane %v2752_v8, 1  ;;  %v1722_v40 = vmax.f32 %v1720_v44, %v1721_v57 }
 0x37b   :  { %v5247_v16 = vadd.f32 %v2027_v20, %v2026_v3  ;;  %v2757_v4 = vadd.f32 %v2756_v34, %v2755_v1  ;;  %v2762_v3 = vsel %vm1168_vm4, %v5173_v38, 0.0  ;;  %v3409_v38 = vld [vmem:[%s5501_s5 + $0x60] sm:$0xff]   ;;  %v5587_v1 = vld [vmem:[#allocation3_spill] sm:$0xff]  ;;  %v2769_v2 = vsel %vm1168_vm4, %v5192_v33, 0.0  ;;  %v5588_v33 = vld [vmem:[#allocation4_spill] sm:$0xff] }
 0x37c   :  { %3523 = vrcp.f32 %v5245_v50  ;;  %v1778_v18 = vsub.f32 %v1515_v21, %v1722_v40  ;;  %v2763_v42 = vrot.slane %v2762_v3, 4  ;;  %v2442_v22 = vand.u32 2147483648, %v5245_v50 }
 0x37d   :  { %3525 = vrcp.f32 %v5247_v16  ;;  %v2758_v20 = vrot.slane %v2757_v4, 2  ;;  %vm2436_vm15 = vweird.f32 %v5245_v50  ;;  %v2440_v43 = vand.u32 2147483647, %v5245_v50 }
 0x37e   :  { %v1837_v15 = vmul.f32 1.442695, %v1778_v18  ;;  %v2457_v45 = vand.u32 2147483648, %v5247_v16  ;;  %vm2451_vm6 = vweird.f32 %v5247_v16  ;;  %v3344_v14 = vunpack.c.l.bf16 %v3409_v38 }
 0x37f   :  { %v5237_v31 = vpop.eup %3521  ;;  %v2759_v53 = vadd.f32 %v2758_v20, %v2757_v4  ;;  %v2443_v41 = vor.u32 1.1754944e-38, %v2442_v22  ;;  %v2764_v58 = vadd.f32 %v2763_v42, %v2762_v3  ;;  %vm2441_vm8 = vcmp.eq.f32.partialorder %v2440_v43, 8.507059e+37 }
 0x380   :  { %v2029_v62 = vsel %vm1168_vm4, %v5237_v31, 0.0  ;;  %v2458_v59 = vor.u32 1.1754944e-38, %v2457_v45  ;;  %v2575_v54 = vadd.f32 %v3344_v14, %v5587_v1  ;;  %v2770_v40 = vrot.slane %v2769_v2, 4 }
 0x381   :  { %v2030_v32 = vrot.slane %v2029_v62, 4  ;;  %v2760_v29 = vrot.slane %v2759_v53, 1 }
 0x382   :  { %v5254_v11 = vpop.eup %3523  ;;  %v2771_v43 = vadd.f32 %v2770_v40, %v2769_v2 }
 0x383   :  { %v2031_v27 = vadd.f32 %v2030_v32, %v2029_v62  ;;  %v5259_v47 = vpop.eup %3525  ;;  %v2432_v7 = vmul.f32 %v5254_v11, %v5245_v50  ;;  %v2857_v62 = vpack.c.bf16 %v2747_v19, %v2747_v19  ;;  %vm2437_vm13 = vweird.f32 %v5254_v11 }
 0x384   :  { %v2447_v36 = vmul.f32 %v5259_v47, %v5247_v16  ;;  %vm2452_vm0 = vweird.f32 %v5259_v47  ;;  %vm5287_vm2 = vmor %vm2436_vm15, %vm2437_vm13  ;;  %v2455_v50 = vand.u32 2147483647, %v5247_v16  ;;  %v3345_v16 = vunpack.c.h.bf16 %v3409_v38 }
 0x385   :  { %v2032_v61 = vrot.slane %v2031_v27, 2  ;;  %v2433_v26 = vsub.f32 1.0, %v2432_v7  ;;  %v2927_v60 = vunpack.c.l.b16 %v2857_v62  ;;  %vm5297_vm7 = vmor %vm2451_vm6, %vm2452_vm0  ;;  %v1517_v7 = vpop.f32.mrf.mxu3 }
 0x386   :  { %v2448_v23 = vsub.f32 1.0, %v2447_v36  ;;  %vm2456_vm9 = vcmp.eq.f32.partialorder %v2455_v50, 8.507059e+37  ;;  %v5310_v13 = vadd.f32 %v5217_v12, %v1517_v7  ;;  %v2576_v62 = vadd.f32 %v3345_v16, %v5588_v33 }
 0x387   :  { %v2033_v55 = vadd.f32 %v2032_v61, %v2031_v27  ;;  %v2434_v32 = vmul.f32 %v5254_v11, %v2433_v26  ;;  %v2962_v27 = vsel %vm2941_vm1, %v2926_v24, %v2925_v48  ;;  %v2754_v61 = vadd.f32 %v2753_v63, %v2752_v8 }
 0x388   :  { %v2449_v25 = vmul.f32 %v5259_v47, %v2448_v23  ;;  %v2963_v49 = vsel %vm2943_vm10, %v2927_v60, %v2962_v27  ;;  %v1723_v44 = vsel %vm1168_vm4, %v5310_v13, -inf  ;;  %v2761_v24 = vadd.f32 %v2760_v29, %v2759_v53 }
 0x389   :  { %v2034_v37 = vrot.slane %v2033_v55, 1  ;;  %v2435_v46 = vadd.f32 %v5254_v11, %v2434_v32  ;;  %v2858_v51 = vpack.c.bf16 %v2754_v61, %v2754_v61  ;;  %v1724_v48 = vrot.slane %v1723_v44, 4  ;;  %v5329_v32 = vld [vmem:[%s5501_s5 + $0x68] sm:$0xff]  }
 0x38a   :  { %v2859_v18 = vpack.c.bf16 %v2761_v24, %v2761_v24  ;;  %v3348_v42 = vunpack.c.l.bf16 %v5329_v32  ;;  %v3349_v33 = vunpack.c.h.bf16 %v5329_v32 }
 0x38b   :  { %v5256_v28 = vadd.f32 %v2034_v37, %v2033_v55  ;;  %v2450_v55 = vadd.f32 %v5259_v47, %v2449_v25  ;;  %v2439_v37 = vsel %vm5287_vm2, %v5254_v11, %v2435_v46  ;;  %v2928_v17 = vunpack.c.l.b16 %v2858_v51 }
 0x38c   :  { %v2444_v11 = vsel %vm2441_vm8, %v2443_v41, %v2439_v37  ;;  %v2929_v51 = vunpack.c.l.b16 %v2859_v18  ;;  %v5591_v41 = vld [vmem:[#allocation5_spill] sm:$0xff] }
 0x38d   :  { %3527 = vrcp.f32 %v5256_v28  ;;  %v2454_v10 = vsel %vm5297_vm7, %v5259_v47, %v2450_v55  ;;  %v2765_v47 = vrot.slane %v2764_v58, 2  ;;  %v2445_v19 = vmul.f32 %v5227_v5, %v2444_v11  ;;  %v1519_v61 = vpop.f32.mrf.mxu3 }
 0x38e   :  { %3529 = vpow2.f32 %v1837_v15  ;;  %v2459_v36 = vsel %vm2456_vm9, %v2458_v59, %v2454_v10  ;;  %v2472_v57 = vand.u32 2147483648, %v5256_v28  ;;  %vm2466_vm15 = vweird.f32 %v5256_v28 }
 0x38f   :  { %v2460_v23 = vmul.f32 %v5229_v56, %v2459_v36  ;;  %v2470_v5 = vand.u32 2147483647, %v5256_v28  ;;  %v2766_v63 = vadd.f32 %v2765_v47, %v2764_v58  ;;  %v1725_v56 = vmax.f32 %v1723_v44, %v1724_v48 }
 0x390   :  { %v2964_v25 = vsel %vm2945_vm11, %v2928_v17, %v2963_v49  ;;  %v2607_v27 = vmul.f32 %v2575_v54, %v2445_v19  ;;  %v2473_v20 = vor.u32 1.1754944e-38, %v2472_v57  ;;  %v5341_v15 = vadd.f32 %v5217_v12, %v1519_v61 }
 0x391   :  { %v2608_v60 = vmul.f32 %v2576_v62, %v2460_v23  ;;  %v1726_v46 = vrot.slane %v1725_v56, 2  ;;  %vm2471_vm2 = vcmp.eq.f32.partialorder %v2470_v5, 8.507059e+37  ;;  %v2767_v38 = vrot.slane %v2766_v63, 1 }
 0x392   :  { %v2783_v45 = vsel %vm1168_vm4, %v2607_v27, 0.0  ;;  %v1730_v53 = vsel %vm1168_vm4, %v5341_v15, -inf  ;;  %v2577_v21 = vadd.f32 %v3348_v42, %v5591_v41  ;;  %v2965_v59 = vsel %vm2947_vm12, %v2929_v51, %v2964_v25 }
 0x393   :  { %v5268_v9 = vpop.eup %3527  ;;  %v1727_v39 = vmax.f32 %v1725_v56, %v1726_v46  ;;  %v2790_v37 = vsel %vm1168_vm4, %v2608_v60, 0.0  ;;  %v1731_v14 = vrot.slane %v1730_v53, 4  ;;  %v2784_v16 = vrot.slane %v2783_v45, 4 }
 0x394   :  { %v2462_v35 = vmul.f32 %v5268_v9, %v5256_v28  ;;  %v5306_v52 = vpop.eup %3529  ;;  %vm2467_vm13 = vweird.f32 %v5268_v9  ;;  %v2791_v29 = vrot.slane %v2790_v37, 4  ;;  %v2768_v17 = vadd.f32 %v2767_v38, %v2766_v63 }
 0x395   :  { %v2036_v34 = vsel %vm1168_vm4, %v5306_v52, 0.0  ;;  %vm5331_vm0 = vmor %vm2466_vm15, %vm2467_vm13  ;;  %v1728_v50 = vrot.slane %v1727_v39, 1  ;;  %v1522_v54 = vpop.f32.mrf.mxu3 }
 0x396   :  { %v2463_v6 = vsub.f32 1.0, %v2462_v35  ;;  %v2037_v8 = vrot.slane %v2036_v34, 4  ;;  %v2792_v44 = vadd.f32 %v2791_v29, %v2790_v37 }
 0x397   :  { %v1729_v11 = vmax.f32 %v1727_v39, %v1728_v50 }
 0x398   :  { %v2464_v0 = vmul.f32 %v5268_v9, %v2463_v6  ;;  %v2038_v4 = vadd.f32 %v2037_v8, %v2036_v34  ;;  %v2860_v34 = vpack.c.bf16 %v2768_v17, %v2768_v17  ;;  %v5359_v8 = vadd.f32 %v2784_v16, %v2783_v45 }
 0x399   :  { %v1779_v7 = vsub.f32 %v5310_v13, %v1729_v11  ;;  %v2793_v56 = vrot.slane %v2792_v44, 2 }
 0x39a   :  { %v2465_v26 = vadd.f32 %v5268_v9, %v2464_v0  ;;  %v2039_v35 = vrot.slane %v2038_v4, 2  ;;  %v2772_v0 = vrot.slane %v2771_v43, 2  ;;  %v2930_v57 = vunpack.c.l.b16 %v2860_v34 }
 0x39b   :  { %v1839_v2 = vmul.f32 1.442695, %v1779_v7  ;;  %v2786_v3 = vrot.slane %v5359_v8, 2  ;;  %v2794_v7 = vadd.f32 %v2793_v56, %v2792_v44 }
 0x39c   :  { %v2469_v28 = vsel %vm5331_vm0, %v5268_v9, %v2465_v26  ;;  %v2040_v22 = vadd.f32 %v2039_v35, %v2038_v4  ;;  %v2776_v9 = vsel %vm1168_vm4, %v5207_v30, 0.0  ;;  %v1732_v30 = vmax.f32 %v1730_v53, %v1731_v14 }
 0x39d   :  { %v2474_v55 = vsel %vm2471_vm2, %v2473_v20, %v2469_v28  ;;  %v2777_v49 = vrot.slane %v2776_v9, 4  ;;  %v2773_v26 = vadd.f32 %v2772_v0, %v2771_v43  ;;  %v2966_v27 = vsel %vm2949_vm14, %v2930_v57, %v2965_v59  ;;  %v1524_v20 = vpop.f32.mrf.mxu3 }
 0x39e   :  { %v2041_v6 = vrot.slane %v2040_v22, 1  ;;  %v2475_v58 = vmul.f32 %v5237_v31, %v2474_v55  ;;  %v1733_v1 = vrot.slane %v1732_v30, 2  ;;  %v5357_v31 = vadd.f32 %v5217_v12, %v1522_v54 }
 0x39f   :  { %v2778_v47 = vadd.f32 %v2777_v49, %v2776_v9  ;;  %v2774_v25 = vrot.slane %v2773_v26, 1  ;;  %v5372_v61 = vadd.f32 %v5217_v12, %v1524_v20  ;;  %v2787_v34 = vadd.f32 %v2786_v3, %v5359_v8 }
 0x3a0   :  { %v5351_v10 = vadd.f32 %v2041_v6, %v2040_v22  ;;  %v2609_v36 = vmul.f32 %v2577_v21, %v2475_v58  ;;  %v1734_v19 = vmax.f32 %v1732_v30, %v1733_v1  ;;  %v1737_v24 = vsel %vm1168_vm4, %v5357_v31, -inf  ;;  %v5592_v30 = vld [vmem:[#allocation6_spill] sm:$0xff] }
 0x3a1   :  { %v1738_v23 = vrot.slane %v1737_v24, 4  ;;  %v2779_v5 = vrot.slane %v2778_v47, 2  ;;  %v2775_v42 = vadd.f32 %v2774_v25, %v2773_v26  ;;  %v1744_v39 = vsel %vm1168_vm4, %v5372_v61, -inf }
 0x3a2   :  { %3531 = vrcp.f32 %v5351_v10  ;;  %v1735_v13 = vrot.slane %v1734_v19, 1  ;;  %v2797_v62 = vsel %vm1168_vm4, %v2609_v36, 0.0  ;;  %v2485_v32 = vand.u32 2147483647, %v5351_v10 }
 0x3a3   :  { %3533 = vpow2.f32 %v1839_v2  ;;  %v1739_v40 = vmax.f32 %v1737_v24, %v1738_v23  ;;  %v2798_v28 = vrot.slane %v2797_v62, 4  ;;  %v2487_v46 = vand.u32 2147483648, %v5351_v10 }
 0x3a4   :  { %v1736_v63 = vmax.f32 %v1734_v19, %v1735_v13  ;;  %vm2481_vm7 = vweird.f32 %v5351_v10  ;;  %v2861_v9 = vpack.c.bf16 %v2775_v42, %v2775_v42  ;;  %v1745_v37 = vrot.slane %v1744_v39, 4 }
 0x3a5   :  { %v1740_v60 = vrot.slane %v1739_v40, 2  ;;  %v2488_v53 = vor.u32 1.1754944e-38, %v2487_v46  ;;  %v2780_v50 = vadd.f32 %v2779_v5, %v2778_v47  ;;  %vm2486_vm9 = vcmp.eq.f32.partialorder %v2485_v32, 8.507059e+37 }
 0x3a6   :  { %v1780_v18 = vsub.f32 %v5341_v15, %v1736_v63  ;;  %v2931_v14 = vunpack.c.l.b16 %v2861_v9  ;;  %v2578_v59 = vadd.f32 %v3349_v33, %v5592_v30  ;;  %v2799_v36 = vadd.f32 %v2798_v28, %v2797_v62 }
 0x3a7   :  { %v1741_v55 = vmax.f32 %v1739_v40, %v1740_v60  ;;  %v2781_v49 = vrot.slane %v2780_v50, 1  ;;  %v2795_v33 = vrot.slane %v2794_v7, 1  ;;  %v2788_v40 = vrot.slane %v2787_v34, 1 }
 0x3a8   :  { %v3532_v48 = vpop.eup %3531  ;;  %v1841_v43 = vmul.f32 1.442695, %v1780_v18  ;;  %v2967_v11 = vsel %vm2951_vm3, %v2931_v14, %v2966_v27  ;;  %v2800_v62 = vrot.slane %v2799_v36, 2 }
 0x3a9   :  { %v2477_v4 = vmul.f32 %v3532_v48, %v5351_v10  ;;  %v5374_v22 = vpop.eup %3533  ;;  %vm2482_vm6 = vweird.f32 %v3532_v48  ;;  %v1742_v12 = vrot.slane %v1741_v55, 1  ;;  %v1746_v10 = vmax.f32 %v1744_v39, %v1745_v37 }
 0x3aa   :  { %v2043_v15 = vsel %vm1168_vm4, %v5374_v22, 0.0  ;;  %3535 = vpow2.f32 %v1841_v43  ;;  %vm2483_vm8 = vmor %vm2481_vm7, %vm2482_vm6  ;;  %v2782_v54 = vadd.f32 %v2781_v49, %v2780_v50  ;;  %v2796_v28 = vadd.f32 %v2795_v33, %v2794_v7 }
 0x3ab   :  { %v2478_v35 = vsub.f32 1.0, %v2477_v4  ;;  %v2044_v6 = vrot.slane %v2043_v15, 4  ;;  %v1743_v21 = vmax.f32 %v1741_v55, %v1742_v12  ;;  %v1747_v1 = vrot.slane %v1746_v10, 2  ;;  %v5402_v12 = vld [vmem:[%s5501_s5 + $0x70] sm:$0xff]  }
 0x3ac   :  { %v2862_v13 = vpack.c.bf16 %v2782_v54, %v2782_v54  ;;  %v2789_v32 = vadd.f32 %v2788_v40, %v2787_v34  ;;  %v2864_v55 = vpack.c.bf16 %v2796_v28, %v2796_v28  ;;  %v3352_v49 = vunpack.c.l.bf16 %v5402_v12  ;;  %v5423_v40 = vld [vmem:[%s5504_s7] sm:$0xff]  }
 0x3ad   :  { %v2479_v38 = vmul.f32 %v3532_v48, %v2478_v35  ;;  %v2045_v41 = vadd.f32 %v2044_v6, %v2043_v15  ;;  %v1781_v29 = vsub.f32 %v5357_v31, %v1743_v21  ;;  %v1748_v24 = vmax.f32 %v1746_v10, %v1747_v1 }
 0x3ae   :  { %v2801_v35 = vadd.f32 %v2800_v62, %v2799_v36  ;;  %v2934_v50 = vunpack.c.l.b16 %v2864_v55 }
 0x3af   :  { %v2480_v45 = vadd.f32 %v3532_v48, %v2479_v38  ;;  %v2046_v16 = vrot.slane %v2045_v41, 2  ;;  %v1843_v19 = vmul.f32 1.442695, %v1781_v29  ;;  %v1749_v57 = vrot.slane %v1748_v24, 1 }
 0x3b0   :  { %v5385_v17 = vpop.eup %3535  ;;  %v2802_v15 = vrot.slane %v2801_v35, 1 }
 0x3b1   :  { %v2484_v51 = vsel %vm2483_vm8, %v3532_v48, %v2480_v45  ;;  %v2047_v2 = vadd.f32 %v2046_v16, %v2045_v41  ;;  %v2050_v26 = vsel %vm1168_vm4, %v5385_v17, 0.0  ;;  %3537 = vpow2.f32 %v1843_v19 }
 0x3b2   :  { %v2489_v58 = vsel %vm2486_vm9, %v2488_v53, %v2484_v51  ;;  %v2051_v31 = vrot.slane %v2050_v26, 4  ;;  %v2932_v48 = vunpack.c.l.b16 %v2862_v13  ;;  %v1750_v63 = vmax.f32 %v1748_v24, %v1749_v57  ;;  %v5593_v24 = vld [vmem:[#allocation7_spill] sm:$0xff] }
 0x3b3   :  { %v2490_v0 = vmul.f32 %v5306_v52, %v2489_v58  ;;  %v2048_v23 = vrot.slane %v2047_v2, 1  ;;  %v2863_v45 = vpack.c.bf16 %v2789_v32, %v2789_v32  ;;  %v2803_v14 = vadd.f32 %v2802_v15, %v2801_v35 }
 0x3b4   :  { %v2052_v4 = vadd.f32 %v2051_v31, %v2050_v26  ;;  %v5392_v8 = vsel %vm2953_vm5, %v2932_v48, %v2967_v11  ;;  %v1782_v25 = vsub.f32 %v5372_v61, %v1750_v63  ;;  %v2579_v13 = vadd.f32 %v3352_v49, %v5593_v24  ;;  %v5418_v63 = vld [vmem:[%s5503_s17] ss:$0 sm:$0xff] }
 0x3b5   :  { %v2610_v47 = vmul.f32 %v2578_v59, %v2490_v0  ;;  %v2049_v5 = vadd.f32 %v2048_v23, %v2047_v2  ;;  %v2933_v11 = vunpack.c.l.b16 %v2863_v45  ;;  %v2865_v7 = vpack.c.bf16 %v2803_v14, %v2803_v14 }
 0x3b6   :  { %v2053_v56 = vrot.slane %v2052_v4, 2  ;;  %v1845_v20 = vmul.f32 1.442695, %v1782_v25  ;;  %vm3025_vm9 = vcmask 257024  }
 0x3b7   :  { %v2804_v52 = vsel %vm1168_vm4, %v2610_v47, 0.0  ;;  %3539 = vrcp.f32 %v2049_v5  ;;  %v5395_v27 = vpop.eup %3537  ;;  %v2502_v51 = vand.u32 2147483648, %v2049_v5  ;;  %v2500_v10 = vand.u32 2147483647, %v2049_v5 }
 0x3b8   :  { %v2805_v44 = vrot.slane %v2804_v52, 4  ;;  %v2054_v18 = vadd.f32 %v2053_v56, %v2052_v4  ;;  %v2057_v60 = vsel %vm1168_vm4, %v5395_v27, 0.0  ;;  %3541 = vpow2.f32 %v1845_v20 }
 0x3b9   :  { %v2058_v46 = vrot.slane %v2057_v60, 4  ;;  %vm2496_vm15 = vweird.f32 %v2049_v5  ;;  %v2503_v1 = vor.u32 1.1754944e-38, %v2502_v51  ;;  %v2969_v36 = vsel %vm2941_vm1, %v2934_v50, %v2933_v11 }
 0x3ba   :  { %v2806_v3 = vadd.f32 %v2805_v44, %v2804_v52  ;;  %v2055_v38 = vrot.slane %v2054_v18, 1  ;;  %vm2501_vm2 = vcmp.eq.f32.partialorder %v2500_v10, 8.507059e+37  ;;  %v2935_v31 = vunpack.c.l.b16 %v2865_v7 }
 0x3bb   :  { %v2059_v39 = vadd.f32 %v2058_v46, %v2057_v60 }
 0x3bc   :  { %v2807_v42 = vrot.slane %v2806_v3, 2  ;;  %v2056_v61 = vadd.f32 %v2055_v38, %v2054_v18  ;;  %v2970_v60 = vsel %vm2943_vm10, %v2935_v31, %v2969_v36 }
 0x3bd   :  { %v3540_v43 = vpop.eup %3539  ;;  %v2060_v6 = vrot.slane %v2059_v39, 2 }
 0x3be   :  { %v2492_v9 = vmul.f32 %v3540_v43, %v2049_v5  ;;  %v2808_v53 = vadd.f32 %v2807_v42, %v2806_v3  ;;  %3543 = vrcp.f32 %v2056_v61  ;;  %v5404_v21 = vpop.eup %3541  ;;  %vm2497_vm13 = vweird.f32 %v3540_v43 }
 0x3bf   :  { %v2061_v41 = vadd.f32 %v2060_v6, %v2059_v39  ;;  %v2064_v59 = vsel %vm1168_vm4, %v5404_v21, 0.0  ;;  %vm2498_vm0 = vmor %vm2496_vm15, %vm2497_vm13  ;;  %v2515_v33 = vand.u32 2147483647, %v2056_v61  ;;  %v2517_v62 = vand.u32 2147483648, %v2056_v61  ;;  %v5594_v39 = vld [vmem:[#allocation8_spill] sm:$0xff] }
 0x3c0   :  { %v2493_v37 = vsub.f32 1.0, %v2492_v9  ;;  %v2809_v0 = vrot.slane %v2808_v53, 1  ;;  %v2065_v29 = vrot.slane %v2064_v59, 4  ;;  %vm2511_vm6 = vweird.f32 %v2056_v61 }
 0x3c1   :  { %v2062_v30 = vrot.slane %v2061_v41, 1  ;;  %vm2516_vm8 = vcmp.eq.f32.partialorder %v2515_v33, 8.507059e+37  ;;  %v2518_v20 = vor.u32 1.1754944e-38, %v2517_v62  ;;  %v3360_v42 = vunpack.c.l.bf16 %v5423_v40 }
 0x3c2   :  { %v2494_v58 = vmul.f32 %v3540_v43, %v2493_v37  ;;  %v2066_v19 = vadd.f32 %v2065_v29, %v2064_v59  ;;  %v2810_v52 = vadd.f32 %v2809_v0, %v2808_v53 }
 0x3c3   :  { %v5409_v54 = vadd.f32 %v2062_v30, %v2061_v41 }
 0x3c4   :  { %v2495_v16 = vadd.f32 %v3540_v43, %v2494_v58  ;;  %v3544_v47 = vpop.eup %3543  ;;  %v2067_v57 = vrot.slane %v2066_v19, 2  ;;  %v2866_v3 = vpack.c.bf16 %v2810_v52, %v2810_v52 }
 0x3c5   :  { %v2507_v26 = vmul.f32 %v3544_v47, %v2056_v61  ;;  %3545 = vrcp.f32 %v5409_v54  ;;  %vm2512_vm1 = vweird.f32 %v3544_v47  ;;  %v2532_v50 = vand.u32 2147483648, %v5409_v54 }
 0x3c6   :  { %v2499_v2 = vsel %vm2498_vm0, %v3540_v43, %v2495_v16  ;;  %v2068_v4 = vadd.f32 %v2067_v57, %v2066_v19  ;;  %vm2513_vm7 = vmor %vm2511_vm6, %vm2512_vm1  ;;  %v2936_v61 = vunpack.c.l.b16 %v2866_v3  ;;  %v2530_v51 = vand.u32 2147483647, %v5409_v54 }
 0x3c7   :  { %v2504_v34 = vsel %vm2501_vm2, %v2503_v1, %v2499_v2  ;;  %v2508_v44 = vsub.f32 1.0, %v2507_v26  ;;  %vm2526_vm13 = vweird.f32 %v5409_v54  ;;  %v2533_v0 = vor.u32 1.1754944e-38, %v2532_v50 }
 0x3c8   :  { %v2505_v23 = vmul.f32 %v5374_v22, %v2504_v34  ;;  %v3353_v22 = vunpack.c.h.bf16 %v5402_v12  ;;  %v2069_v18 = vrot.slane %v2068_v4, 1  ;;  %v5437_v12 = vld [vmem:[%s5501_s5 + $0x78] sm:$0xff]   ;;  %v2971_v16 = vsel %vm2945_vm11, %v2936_v61, %v2970_v60 }
 0x3c9   :  { %v2509_v5 = vmul.f32 %v3544_v47, %v2508_v44  ;;  %v3356_v49 = vunpack.c.l.bf16 %v5437_v12  ;;  %vm2531_vm0 = vcmp.eq.f32.partialorder %v2530_v51, 8.507059e+37  ;;  %v3361_v44 = vunpack.c.h.bf16 %v5423_v40 }
 0x3ca   :  { %v2611_v48 = vmul.f32 %v2579_v13, %v2505_v23  ;;  %v5430_v55 = vadd.f32 %v2069_v18, %v2068_v4  ;;  %v2580_v9 = vadd.f32 %v3353_v22, %v5594_v39 }
 0x3cb   :  { %v3546_v25 = vpop.eup %3545  ;;  %v2510_v35 = vadd.f32 %v3544_v47, %v2509_v5 }
 0x3cc   :  { %v2811_v56 = vsel %vm1168_vm4, %v2611_v48, 0.0  ;;  %v2522_v32 = vmul.f32 %v3546_v25, %v5409_v54  ;;  %3547 = vrcp.f32 %v5430_v55  ;;  %vm2527_vm10 = vweird.f32 %v3546_v25  ;;  %v5595_v54 = vld [vmem:[#allocation9_spill] sm:$0xff] }
 0x3cd   :  { %v2812_v28 = vrot.slane %v2811_v56, 4  ;;  %v2514_v43 = vsel %vm2513_vm7, %v3544_v47, %v2510_v35  ;;  %vm2528_vm15 = vmor %vm2526_vm13, %vm2527_vm10  ;;  %v2581_v2 = vadd.f32 %v3356_v49, %v5595_v54  ;;  %v2545_v57 = vand.u32 2147483647, %v5430_v55 }
 0x3ce   :  { %v2519_v45 = vsel %vm2516_vm8, %v2518_v20, %v2514_v43  ;;  %v2523_v6 = vsub.f32 1.0, %v2522_v32  ;;  %v2547_v48 = vand.u32 2147483648, %v5430_v55  ;;  %vm2541_vm2 = vweird.f32 %v5430_v55 }
 0x3cf   :  { %v2813_v38 = vadd.f32 %v2812_v28, %v2811_v56  ;;  %v2520_v37 = vmul.f32 %v5385_v17, %v2519_v45  ;;  %vm2546_vm6 = vcmp.eq.f32.partialorder %v2545_v57, 8.507059e+37 }
 0x3d0   :  { %v2524_v14 = vmul.f32 %v3546_v25, %v2523_v6  ;;  %v2548_v18 = vor.u32 1.1754944e-38, %v2547_v48 }
 0x3d1   :  { %v2814_v53 = vrot.slane %v2813_v38, 2  ;;  %v2612_v10 = vmul.f32 %v2580_v9, %v2520_v37 }
 0x3d2   :  { %v2525_v11 = vadd.f32 %v3546_v25, %v2524_v14  ;;  %v3548_v1 = vpop.eup %3547 }
 0x3d3   :  { %v2815_v58 = vadd.f32 %v2814_v53, %v2813_v38  ;;  %v2818_v17 = vsel %vm1168_vm4, %v2612_v10, 0.0  ;;  %v2537_v26 = vmul.f32 %v3548_v1, %v5430_v55  ;;  %vm2542_vm11 = vweird.f32 %v3548_v1  ;;  %v5596_v38 = vld [vmem:[#allocation10_spill] sm:$0xff] }
 0x3d4   :  { %v2819_v29 = vrot.slane %v2818_v17, 4  ;;  %v2529_v7 = vsel %vm2528_vm15, %v3546_v25, %v2525_v11  ;;  %v3357_v25 = vunpack.c.h.bf16 %v5437_v12  ;;  %vm2543_vm1 = vmor %vm2541_vm2, %vm2542_vm11 }
 0x3d5   :  { %v2816_v59 = vrot.slane %v2815_v58, 1  ;;  %v2534_v47 = vsel %vm2531_vm0, %v2533_v0, %v2529_v7  ;;  %v2538_v23 = vsub.f32 1.0, %v2537_v26  ;;  %v3413_v0 = vld [vmem:[%s5504_s7 + $0x8] sm:$0xff]  }
 0x3d6   :  { %v2820_v19 = vadd.f32 %v2819_v29, %v2818_v17  ;;  %v2535_v34 = vmul.f32 %v5395_v27, %v2534_v47  ;;  %v2582_v43 = vadd.f32 %v3357_v25, %v5596_v38  ;;  %v3365_v47 = vunpack.c.h.bf16 %v3413_v0 }
 0x3d7   :  { %v2817_v36 = vadd.f32 %v2816_v59, %v2815_v58  ;;  %v2539_v27 = vmul.f32 %v3548_v1, %v2538_v23 }
 0x3d8   :  { %v2821_v13 = vrot.slane %v2820_v19, 2  ;;  %v2613_v52 = vmul.f32 %v2581_v2, %v2535_v34 }
 0x3d9   :  { %v2867_v24 = vpack.c.bf16 %v2817_v36, %v2817_v36  ;;  %v2540_v40 = vadd.f32 %v3548_v1, %v2539_v27 }
 0x3da   :  { %v2822_v5 = vadd.f32 %v2821_v13, %v2820_v19  ;;  %v2825_v4 = vsel %vm1168_vm4, %v2613_v52, 0.0 }
 0x3db   :  { %v2937_v33 = vunpack.c.l.b16 %v2867_v24  ;;  %v2826_v22 = vrot.slane %v2825_v4, 4  ;;  %v2544_v20 = vsel %vm2543_vm1, %v3548_v1, %v2540_v40 }
 0x3dc   :  { %v2823_v28 = vrot.slane %v2822_v5, 1 }
 0x3dd   :  { %v2972_v3 = vsel %vm2947_vm12, %v2937_v33, %v2971_v16  ;;  %v2827_v35 = vadd.f32 %v2826_v22, %v2825_v4  ;;  %v3364_v16 = vunpack.c.l.bf16 %v3413_v0 }
 0x3de   :  { %v2824_v32 = vadd.f32 %v2823_v28, %v2822_v5 }
 0x3e0   :  { %v2868_v39 = vpack.c.bf16 %v2824_v32, %v2824_v32 }
 0x3e2   :  { %v2938_v61 = vunpack.c.l.b16 %v2868_v39 }
 0x3e4   :  { %v2973_v12 = vsel %vm2949_vm14, %v2938_v61, %v2972_v3 }
 0x3ea   :  { %v2999_v46 = vpop.f32.mrf.mxu0 }
 0x3eb   :  { %v3000_v15 = vadd.f32 %v5418_v63, %v2999_v46  ;;  %v2828_v46 = vrot.slane %v2827_v35, 2 }
 0x3ed   :  { %v3017_v41 = vadd.f32 %v3360_v42, %v3000_v15  ;;  %v2549_v42 = vsel %vm2546_vm6, %v2548_v18, %v2544_v20  ;;  %v2829_v55 = vadd.f32 %v2828_v46, %v2827_v35 }
 0x3ee   :  { %v2550_v15 = vmul.f32 %v5404_v21, %v2549_v42 }
 0x3ef   :  { %v3021_v30 = vpack.c.bf16 %v3017_v41, %v3017_v41  ;;  %v2830_v45 = vrot.slane %v2829_v55, 1 }
 0x3f0   :  { %v2614_v9 = vmul.f32 %v2582_v43, %v2550_v15 }
 0x3f1   :  { %3026 = vst.msk [vmem:[%s5505_s18] sm:$0xf] %vm3025_vm9, %v3021_v30  ;;  %v2831_v37 = vadd.f32 %v2830_v45, %v2829_v55 }
 0x3f2   :  { %v3001_v31 = vpop.f32.mrf.mxu0  ;;  %v2832_v6 = vsel %vm1168_vm4, %v2614_v9, 0.0 }
 0x3f3   :  { %v3002_v62 = vadd.f32 %v5418_v63, %v3001_v31  ;;  %v2833_v53 = vrot.slane %v2832_v6, 4  ;;  %v2869_v14 = vpack.c.bf16 %v2831_v37, %v2831_v37 }
 0x3f5   :  { %v3018_v56 = vadd.f32 %v3361_v44, %v3002_v62  ;;  %v2834_v50 = vadd.f32 %v2833_v53, %v2832_v6  ;;  %v2939_v41 = vunpack.c.l.b16 %v2869_v14 }
 0x3f7   :  { %v3022_v60 = vpack.c.bf16 %v3018_v56, %v3018_v56  ;;  %v2835_v51 = vrot.slane %v2834_v50, 2  ;;  %v2974_v10 = vsel %vm2951_vm3, %v2939_v41, %v2973_v12 }
 0x3f9   :  { %3027 = vst.msk [vmem:[%s5505_s18 + $0x4] sm:$0xf] %vm3025_vm9, %v3022_v60  ;;  %v2836_v58 = vadd.f32 %v2835_v51, %v2834_v50 }
 0x3fb   :  { %v2837_v49 = vrot.slane %v2836_v58, 1 }
 0x3fd   :  { %v2838_v21 = vadd.f32 %v2837_v49, %v2836_v58 }
 0x3ff   :  { %v2870_v11 = vpack.c.bf16 %v2838_v21, %v2838_v21 }
 0x401   :  { %v2940_v30 = vunpack.c.l.b16 %v2870_v11 }
 0x403   :  { %v2975_v59 = vsel %vm2953_vm5, %v2940_v30, %v2974_v10 }
 0x404   :  { %v2977_v17 = vpack.c.b16 %v2975_v59, %v5392_v8 }
 0x406   :  { %3139 = vmatmul.msk.bf16.gmra.mxu0 %vm1168_vm4, %v2977_v17 }
 0x483   :  { %v3004_v29 = vpop.f32.mrf.mxu0 }
 0x484   :  { %v3005_v7 = vadd.f32 %v5418_v63, %v3004_v29 }
 0x486   :  { %v3019_v1 = vadd.f32 %v3364_v16, %v3005_v7 }
 0x488   :  { %v3023_v36 = vpack.c.bf16 %v3019_v1, %v3019_v1 }
 0x48a   :  { %3028 = vst.msk [vmem:[%s5505_s18 + $0x8] sm:$0xf] %vm3025_vm9, %v3023_v36 }
 0x48b   :  { %v3006_v54 = vpop.f32.mrf.mxu0 }
 0x48c   :  { %v3007_v8 = vadd.f32 %v5418_v63, %v3006_v54 }
 0x48e   :  { %v3020_v2 = vadd.f32 %v3365_v47, %v3007_v8 }
 0x490   :  { %v3024_v19 = vpack.c.bf16 %v3020_v2, %v3020_v2 }
 0x492   :  { %3029 = vst.msk [vmem:[%s5505_s18 + $0xc] sm:$0xf] %vm3025_vm9, %v3024_v19 }

</bundles_post_ra>
